<compile_context>
chip_gen: v6e
topology: v6e:2x2x1
jax: 0.10.0
libtpu: 0.0.40
codegen_flags: <defaults>
</compile_context>

<pallas_src>
import jax
import jax.numpy as jnp
from jax import lax
from jax.experimental import pallas as pl
from jax.experimental.pallas import tpu as pltpu


# ----------------------------- Pallas kernel ------------------------------ #

def _lstm_from_gates(gates, c, H):
    """PyTorch LSTMCell gate order: i, f, g, o.  All math in f32."""
    i_g = jax.nn.sigmoid(gates[:, 0:H])
    f_g = jax.nn.sigmoid(gates[:, H:2 * H])
    g_g = jnp.tanh(gates[:, 2 * H:3 * H])
    o_g = jax.nn.sigmoid(gates[:, 3 * H:4 * H])
    c_new = f_g * c + i_g * g_g
    h_new = o_g * jnp.tanh(c_new)
    return h_new, c_new


def seq2seq_auto_kernel(x_start_ref, x_rest_ref,
                        we_ih_ref, we_hh_ref, be_ref,            # x_rnn (encoder LSTM)
                        wd_ih_h_ref, wd_ih_y_ref, bd_ref,        # d_rnn (decoder LSTM)
                        bfold_ref, wstack_ref,                   # folded/stacked gate weights
                        w1_ref, b1_ref, w2_ref, b2_ref,          # d_mlp (tanh MLP)
                        w3_ref, b3_ref,                          # d_out (linear)
                        out_ref,                                 # (S-1, B, NXp) decoded frames
                        gx_ref):                                 # VMEM scratch (S-1, B, 4H)
    Sm1, B, NX = x_rest_ref.shape
    H = we_hh_ref.shape[0]
    bf16 = jnp.bfloat16
    unroll = B <= 32          # bound vreg pressure when the batch tile is enlarged

    # ---------------- encoder: input projection -----------------------------
    if Sm1 * B <= 256:
        # One batched matmul with M=(S-1)*B instead of S-1 tiny-M matmuls.
        x2 = x_rest_ref[...].reshape(Sm1 * B, NX).astype(bf16)
        gx = jnp.dot(x2, we_ih_ref[...],
                     preferred_element_type=jnp.float32) + be_ref[...]
        gx_ref[...] = gx.reshape(Sm1, B, 4 * H)
    else:
        # Large batch tile: per-step projection (M=B is already MXU-friendly) avoids
        # materializing a multi-MB f32 temporary in vregs.
        def proj_body(t, _):
            gx_ref[t] = (jnp.dot(x_rest_ref[t].astype(bf16), we_ih_ref[...],
                                 preferred_element_type=jnp.float32) + be_ref[...])
            return 0
        lax.fori_loop(0, Sm1, proj_body, 0, unroll=False)

    # ---------------- encoder: recurrence ------------------------------------
    def enc_body(t, carry):
        h, c = carry
        gates = gx_ref[t] + jnp.dot(h.astype(bf16), we_hh_ref[...],
                                    preferred_element_type=jnp.float32)
        return _lstm_from_gates(gates, c, H)

    h0 = jnp.zeros((B, H), jnp.float32)
    c0 = jnp.zeros((B, H), jnp.float32)
    h_y, _ = lax.fori_loop(0, Sm1, enc_body, (h0, c0), unroll=unroll)   # latent (B, H)

    # ---------------- decoder ------------------------------------------------
    x_start = x_start_ref[...]                                   # (B, NXp) f32, pad lanes 0
    h_yb = h_y.astype(bf16)
    # Loop-invariant gate pre-activation (h_y and bias), computed once.
    gates_base0 = jnp.dot(h_yb, wd_ih_h_ref[...],
                          preferred_element_type=jnp.float32) + bd_ref[...]
    gates_base = gates_base0 + bfold_ref[...]                    # + b3 @ wd_ih_y (steps >= 1)

    def mlp_head(hd):
        # Activation math in f32 (v5e-safe); operands cast to bf16 only for the MXU.
        h1 = jnp.tanh(jnp.dot(hd.astype(bf16), w1_ref[...],
                              preferred_element_type=jnp.float32) + b1_ref[...])
        h2 = jnp.tanh(jnp.dot(h1.astype(bf16), w2_ref[...],
                              preferred_element_type=jnp.float32) + b2_ref[...])
        h2b = h2.astype(bf16)
        y_rel = jnp.dot(h2b, w3_ref[...],
                        preferred_element_type=jnp.float32) + b3_ref[...]
        return h2b, y_rel

    # --- step 0 (peeled): feedback is x_start, decoder state is zero ---------
    gates0 = gates_base0 + jnp.dot(x_start.astype(bf16), wd_ih_y_ref[...],
                                   preferred_element_type=jnp.float32)
    cd0 = jnp.zeros((B, H), jnp.float32)
    hd, cd = _lstm_from_gates(gates0, cd0, H)
    h2b, y_rel = mlp_head(hd)
    y_cum = x_start + y_rel                    # rc_recurrent: y[0] += x_start
    out_ref[0] = y_cum                         # lane-dense 128-wide store

    # --- steps 1 .. S-2: folded feedback (h2 instead of y_rel @ wd_ih_y) -----
    def dec_body(i, carry):
        hd, cd, h2b, y_cum = carry
        fb = jnp.concatenate([h2b, hd.astype(bf16)], axis=-1)    # (B, NH2p + H)
        gates = gates_base + jnp.dot(fb, wstack_ref[...],
                                     preferred_element_type=jnp.float32)
        hd, cd = _lstm_from_gates(gates, cd, H)
        h2b, y_rel = mlp_head(hd)
        y_cum = y_cum + y_rel                  # rc_recurrent: y[i] += y[i-1]
        out_ref[i] = y_cum
        return (hd, cd, h2b, y_cum)

    lax.fori_loop(1, Sm1, dec_body, (hd, cd, h2b, y_cum), unroll=unroll)


# ----------------------------- pallas_call wrapper ------------------------- #

def _round_up(n, m):
    return ((n + m - 1) // m) * m


def _pick_tile_b(B):
    """Largest multiple-of-8 divisor of B that is <=128 and leaves >=2 grid steps
    (keeps both v7x TensorCores busy).  Small / awkward B falls back to a single tile."""
    if B < 16:
        return B
    best = None
    for t in range(8, min(128, B // 2) + 1, 8):
        if B % t == 0:
            best = t
    return best if best is not None else B


def seq2seq_auto_pallas(x_start_pad, x_rest, pparams):
    """x_start_pad: (B, NXp) f32 lane-padded first frame.
       x_rest: (S-1, B, NX) f32 unpadded frames 1..S-1.
       pparams: prepared (padded / folded / bf16) weights."""
    B, NXp = x_start_pad.shape
    Sm1, _, NX = x_rest.shape
    H = pparams[1].shape[0]                      # we_hh: (H, 4H)
    tile_b = _pick_tile_b(B)
    grid = (B // tile_b,)

    xs_spec = pl.BlockSpec((tile_b, NXp), lambda i: (i, 0))
    xr_spec = pl.BlockSpec((Sm1, tile_b, NX), lambda i: (0, i, 0))
    out_spec = pl.BlockSpec((Sm1, tile_b, NXp), lambda i: (0, i, 0))
    w_spec = pl.BlockSpec(memory_space=pltpu.MemorySpace.VMEM)   # whole weight in VMEM

    return pl.pallas_call(
        seq2seq_auto_kernel,
        out_shape=jax.ShapeDtypeStruct((Sm1, B, NXp), jnp.float32),
        grid=grid,
        in_specs=[xs_spec, xr_spec] + [w_spec] * len(pparams),
        out_specs=out_spec,
        scratch_shapes=[pltpu.VMEM((Sm1, tile_b, 4 * H), jnp.float32)],
        compiler_params=pltpu.CompilerParams(
            dimension_semantics=("parallel",),        # B-tiles independent (2 TCs on v7x)
            vmem_limit_bytes=32 * 1024 * 1024,        # actual use ~2-6 MB; fits v7x 64 MiB
        ),
    )(x_start_pad, x_rest, *pparams)


# ----------------------------- parameter prep ------------------------------ #

def init_params(key, nx, H=128, nh_mlp=(300, 200)):
    """Raw f32 parameters (PyTorch-style uniform(-1/sqrt(fan), 1/sqrt(fan)))."""
    def u(k, shape, bound):
        return jax.random.uniform(k, shape, jnp.float32, -bound, bound)

    ks = jax.random.split(key, 16)
    kr = 1.0 / (H ** 0.5)
    we_ih = u(ks[0], (nx, 4 * H), kr)
    we_hh = u(ks[1], (H, 4 * H), kr)
    be = u(ks[2], (1, 4 * H), kr) + u(ks[3], (1, 4 * H), kr)       # b_ih + b_hh
    wd_ih_h = u(ks[4], (H, 4 * H), kr)
    wd_ih_y = u(ks[5], (nx, 4 * H), kr)
    wd_hh = u(ks[6], (H, 4 * H), kr)
    bd = u(ks[7], (1, 4 * H), kr) + u(ks[8], (1, 4 * H), kr)
    k1 = 1.0 / (H ** 0.5)
    w1 = u(ks[9], (H, nh_mlp[0]), k1); b1 = u(ks[10], (1, nh_mlp[0]), k1)
    k2 = 1.0 / (nh_mlp[0] ** 0.5)
    w2 = u(ks[11], (nh_mlp[0], nh_mlp[1]), k2); b2 = u(ks[12], (1, nh_mlp[1]), k2)
    k3 = 1.0 / (nh_mlp[1] ** 0.5)
    w3 = u(ks[13], (nh_mlp[1], nx), k3); b3 = u(ks[14], (1, nx), k3)
    return (we_ih, we_hh, be, wd_ih_h, wd_ih_y, wd_hh, bd,
            w1, b1, w2, b2, w3, b3)


def prepare_params(params, nx, lane=128):
    """Zero-pad to lane multiples, fold wd_ih_y through the output head (f32 math, then
    bf16 cast), and stack the recurrent decoder gate weights into one matrix.
    Biases stay f32 (added to f32 MXU accumulators)."""
    (we_ih, we_hh, be, wd_ih_h, wd_ih_y, wd_hh, bd,
     w1, b1, w2, b2, w3, b3) = params
    H = we_hh.shape[0]
    nh1, nh2 = w1.shape[1], w2.shape[1]
    NXp = _round_up(nx, lane)
    NH1p = _round_up(nh1, lane)
    NH2p = _round_up(nh2, lane)

    def pad_to(a, shape):
        return jnp.pad(a, [(0, t - s) for s, t in zip(a.shape, shape)])

    # Fold the feedback projection through the output head (compute in f32, then cast).
    w_y2g = jnp.dot(w3, wd_ih_y, preferred_element_type=jnp.float32)    # (nh2, 4H)
    b_fold = jnp.dot(b3, wd_ih_y, preferred_element_type=jnp.float32)   # (1, 4H)
    # Stack [W_y2g ; wd_hh] so the per-step gate projection is a single K=NH2p+H matmul.
    w_stack = jnp.concatenate([pad_to(w_y2g, (NH2p, 4 * H)), wd_hh], axis=0)

    bf = jnp.bfloat16
    f32 = jnp.float32
    return (
        we_ih.astype(bf),                            # (nx, 4H) — encoder input, unpadded K
        we_hh.astype(bf),
        be.astype(f32),
        wd_ih_h.astype(bf),
        pad_to(wd_ih_y, (NXp, 4 * H)).astype(bf),    # only used for the peeled step 0
        bd.astype(f32),
        b_fold.astype(f32),
        w_stack.astype(bf),                          # (NH2p + H, 4H)
        pad_to(w1, (H, NH1p)).astype(bf),
        pad_to(b1, (1, NH1p)).astype(f32),
        pad_to(w2, (NH1p, NH2p)).astype(bf),         # pad rows/cols zero -> tanh(0)=0 harmless
        pad_to(b2, (1, NH2p)).astype(f32),
        pad_to(w3, (NH2p, NXp)).astype(bf),          # pad cols zero -> y_rel pad lanes stay 0
        pad_to(b3, (1, NXp)).astype(f32),
    )


# ----------------------------- JAX-side forward ---------------------------- #

@jax.jit
def seq2seq_auto_forward(x, y, pparams):
    """Matches Seq2Seq_Auto.forward(x, y): y is unused. x: (b, s, p, l, f)."""
    del y
    b, s, p, l, f = x.shape
    nx = l * f
    NXp = pparams[4].shape[0]                    # wd_ih_y_pad: (NXp, 4H)
    # 'b s p l f -> s (b p) (l f)'
    x_sbn = jnp.transpose(x, (1, 0, 2, 3, 4)).reshape(s, b * p, nx).astype(jnp.float32)
    x_start_pad = jnp.pad(x_sbn[0], ((0, 0), (0, NXp - nx)))     # only frame 0 lane-padded
    x_rest = x_sbn[1:]                                           # frames 1..S-1, unpadded
    y_dec = seq2seq_auto_pallas(x_start_pad, x_rest, pparams)    # (s-1, B, NXp)
    y_full = jnp.concatenate([x_sbn[0][None], y_dec[:, :, :nx]], axis=0)
    # 's (b p) (n f) -> b s p n f'
    return jnp.transpose(y_full.reshape(s, b, p, l, f), (1, 0, 2, 3, 4))


# ----------------------------- references ---------------------------------- #

def _matched_reference(x, pparams):
    """Plain-JAX replica of the kernel math (folded weights, bf16 matmul operands)."""
    (we_ih, we_hh, be, wd_ih_h, wd_ih_y, bd, b_fold, w_stack,
     w1, b1, w2, b2, w3, b3) = pparams
    b, s, p, l, f = x.shape
    nx = l * f
    NXp = wd_ih_y.shape[0]
    H = we_hh.shape[0]
    B = b * p
    bf = jnp.bfloat16
    xs = jnp.transpose(x, (1, 0, 2, 3, 4)).reshape(s, B, nx).astype(jnp.float32)
    x_start = jnp.pad(xs[0], ((0, 0), (0, NXp - nx)))

    def dot(a, w):
        return jnp.dot(a.astype(bf), w, preferred_element_type=jnp.float32)

    def cell(gates, c):
        i_g = jax.nn.sigmoid(gates[:, :H]); f_g = jax.nn.sigmoid(gates[:, H:2 * H])
        g_g = jnp.tanh(gates[:, 2 * H:3 * H]); o_g = jax.nn.sigmoid(gates[:, 3 * H:])
        c2 = f_g * c + i_g * g_g
        return o_g * jnp.tanh(c2), c2

    h = jnp.zeros((B, H), jnp.float32); c = jnp.zeros((B, H), jnp.float32)
    for t in range(1, s):
        h, c = cell(dot(xs[t], we_ih) + dot(h, we_hh) + be, c)
    h_y = h

    gates_base0 = dot(h_y, wd_ih_h) + bd
    gates_base = gates_base0 + b_fold

    def mlp(hd):
        h1 = jnp.tanh(dot(hd, w1) + b1)
        h2 = jnp.tanh(dot(h1, w2) + b2)
        h2b = h2.astype(bf)
        y_rel = jnp.dot(h2b, w3, preferred_element_type=jnp.float32) + b3
        return h2b, y_rel

    cd = jnp.zeros((B, H), jnp.float32)
    hd, cd = cell(gates_base0 + dot(x_start, wd_ih_y), cd)
    h2b, y_rel = mlp(hd)
    y_cum = x_start + y_rel
    outs = [xs[0], y_cum[:, :nx]]
    for _ in range(1, s - 1):
        fb = jnp.concatenate([h2b, hd.astype(bf)], axis=-1)
        gates = gates_base + jnp.dot(fb, w_stack, preferred_element_type=jnp.float32)
        hd, cd = cell(gates, cd)
        h2b, y_rel = mlp(hd)
        y_cum = y_cum + y_rel
        outs.append(y_cum[:, :nx])
    y_r = jnp.stack(outs, axis=0)
    return jnp.transpose(y_r.reshape(s, b, p, l, f), (1, 0, 2, 3, 4))


def _reference_forward_f32(x, params):
    """Module-faithful forward pass in plain f32 JAX (unfolded, unstacked weights)."""
    (we_ih, we_hh, be, wd_ih_h, wd_ih_y, wd_hh, bd,
     w1, b1, w2, b2, w3, b3) = params
    b, s, p, l, f = x.shape
    nx = l * f
    H = we_hh.shape[0]
    B = b * p
    xs = jnp.transpose(x, (1, 0, 2, 3, 4)).reshape(s, B, nx).astype(jnp.float32)

    def cell(gates, c):
        i_g = jax.nn.sigmoid(gates[:, :H]); f_g = jax.nn.sigmoid(gates[:, H:2 * H])
        g_g = jnp.tanh(gates[:, 2 * H:3 * H]); o_g = jax.nn.sigmoid(gates[:, 3 * H:])
        c2 = f_g * c + i_g * g_g
        return o_g * jnp.tanh(c2), c2

    h = jnp.zeros((B, H), jnp.float32); c = jnp.zeros((B, H), jnp.float32)
    for t in range(1, s):
        h, c = cell(xs[t] @ we_ih + h @ we_hh + be, c)
    h_y = h

    x_start = xs[0]
    hd = jnp.zeros((B, H), jnp.float32); cd = jnp.zeros((B, H), jnp.float32)
    y_prev, y_cum, outs = x_start, x_start, [x_start]
    for _ in range(s - 1):
        gates = h_y @ wd_ih_h + y_prev @ wd_ih_y + hd @ wd_hh + bd
        hd, cd = cell(gates, cd)
        h1 = jnp.tanh(hd @ w1 + b1)
        h2 = jnp.tanh(h1 @ w2 + b2)
        y_rel = h2 @ w3 + b3
        y_cum = y_cum + y_rel
        outs.append(y_cum)
        y_prev = y_rel                           # feedback is the RAW y_i (pre-residual)
    y_r = jnp.stack(outs, axis=0)
    return jnp.transpose(y_r.reshape(s, b, p, l, f), (1, 0, 2, 3, 4))


# ----------------------------- main ---------------------------------------- #

if __name__ == "__main__":
    key = jax.random.PRNGKey(0)
    kx, kp = jax.random.split(key)

    # Small shapes consistent with the module (autoencoder: obs_length == pred_length).
    b, p, l, f = 2, 4, 8, 2                  # batch, agents, landmarks, features
    s = 8                                    # pred_length frames consumed by forward
    nx = l * f                               # 16
    nh_rnn, nh_mlp = 128, (300, 200)

    x = jax.random.normal(kx, (b, s, p, l, f), jnp.float32)
    y_in = jnp.zeros_like(x)                 # unused by forward (matches PyTorch)

    raw_params = init_params(kp, nx, H=nh_rnn, nh_mlp=nh_mlp)
    pparams = prepare_params(raw_params, nx)

    out = seq2seq_auto_forward(x, y_in, pparams)
    out = jax.block_until_ready(out)
    assert out.shape == (b, s, p, l, f), out.shape

    # 1) Exact semantics check against a matched-precision (folded, bf16-operand) reference.
    ref_matched = _matched_reference(x, pparams)
    err_m = float(jnp.max(jnp.abs(out - ref_matched)))
    assert err_m < 2e-2, f"kernel vs matched-precision reference: max_err={err_m}"

    # 2) Sanity bound against the full-f32 module-faithful reference (bf16 operand drift).
    ref_f32 = _reference_forward_f32(x, raw_params)
    err_f = float(jnp.max(jnp.abs(out - ref_f32)))
    assert err_f < 3e-1, f"kernel vs f32 reference: max_err={err_f}"

    print("KERNEL_OK")
</pallas_src>

<mosaic_0001>
module attributes {stable_mosaic.version = 11 : i64} {
  func.func @seq2seq_auto_kernel(%arg0: i32, %arg1: memref<8x128xf32, #tpu.memory_space<vmem>>, %arg2: memref<7x8x16xf32, #tpu.memory_space<vmem>>, %arg3: memref<16x512xbf16, #tpu.memory_space<vmem>>, %arg4: memref<128x512xbf16, #tpu.memory_space<vmem>>, %arg5: memref<1x512xf32, #tpu.memory_space<vmem>>, %arg6: memref<128x512xbf16, #tpu.memory_space<vmem>>, %arg7: memref<128x512xbf16, #tpu.memory_space<vmem>>, %arg8: memref<1x512xf32, #tpu.memory_space<vmem>>, %arg9: memref<1x512xf32, #tpu.memory_space<vmem>>, %arg10: memref<384x512xbf16, #tpu.memory_space<vmem>>, %arg11: memref<128x384xbf16, #tpu.memory_space<vmem>>, %arg12: memref<1x384xf32, #tpu.memory_space<vmem>>, %arg13: memref<384x256xbf16, #tpu.memory_space<vmem>>, %arg14: memref<1x256xf32, #tpu.memory_space<vmem>>, %arg15: memref<256x128xbf16, #tpu.memory_space<vmem>>, %arg16: memref<1x128xf32, #tpu.memory_space<vmem>>, %arg17: memref<7x8x128xf32, #tpu.memory_space<vmem>>, %arg18: memref<7x8x512xf32, #tpu.memory_space<vmem>>) attributes {dimension_semantics = [#tpu.dimension_semantics<parallel>], iteration_bounds = array<i64: 1>, scalar_prefetch = 0 : i64, scratch_operands = 1 : i64, tpu.core_type = #tpu.core_type<tc>, window_params = [{transform_indices = @transform_0, window_bounds = array<i64: 8, 128>}, {transform_indices = @transform_1, window_bounds = array<i64: 7, 8, 16>}, {pipeline_mode = #tpu.pipeline_mode<synchronous>, transform_indices = @transform_2, window_bounds = array<i64: 16, 512>}, {pipeline_mode = #tpu.pipeline_mode<synchronous>, transform_indices = @transform_3, window_bounds = array<i64: 128, 512>}, {pipeline_mode = #tpu.pipeline_mode<synchronous>, transform_indices = @transform_4, window_bounds = array<i64: 1, 512>}, {pipeline_mode = #tpu.pipeline_mode<synchronous>, transform_indices = @transform_5, window_bounds = array<i64: 128, 512>}, {pipeline_mode = #tpu.pipeline_mode<synchronous>, transform_indices = @transform_6, window_bounds = array<i64: 128, 512>}, {pipeline_mode = #tpu.pipeline_mode<synchronous>, transform_indices = @transform_7, window_bounds = array<i64: 1, 512>}, {pipeline_mode = #tpu.pipeline_mode<synchronous>, transform_indices = @transform_8, window_bounds = array<i64: 1, 512>}, {pipeline_mode = #tpu.pipeline_mode<synchronous>, transform_indices = @transform_9, window_bounds = array<i64: 384, 512>}, {pipeline_mode = #tpu.pipeline_mode<synchronous>, transform_indices = @transform_10, window_bounds = array<i64: 128, 384>}, {pipeline_mode = #tpu.pipeline_mode<synchronous>, transform_indices = @transform_11, window_bounds = array<i64: 1, 384>}, {pipeline_mode = #tpu.pipeline_mode<synchronous>, transform_indices = @transform_12, window_bounds = array<i64: 384, 256>}, {pipeline_mode = #tpu.pipeline_mode<synchronous>, transform_indices = @transform_13, window_bounds = array<i64: 1, 256>}, {pipeline_mode = #tpu.pipeline_mode<synchronous>, transform_indices = @transform_14, window_bounds = array<i64: 256, 128>}, {pipeline_mode = #tpu.pipeline_mode<synchronous>, transform_indices = @transform_15, window_bounds = array<i64: 1, 128>}, {transform_indices = @transform_16, window_bounds = array<i64: 7, 8, 128>}]} {
    %c0 = arith.constant 0 : index
    %c0_0 = arith.constant 0 : index
    %c0_1 = arith.constant 0 : index
    %0 = vector.load %arg2[%c0, %c0_0, %c0_1] : memref<7x8x16xf32, #tpu.memory_space<vmem>>, vector<7x8x16xf32>
    %1 = vector.shape_cast %0 : vector<7x8x16xf32> to vector<56x16xf32>
    %2 = arith.truncf %1 : vector<56x16xf32> to vector<56x16xbf16>
    %c0_2 = arith.constant 0 : index
    %c0_3 = arith.constant 0 : index
    %3 = vector.load %arg3[%c0_2, %c0_3] : memref<16x512xbf16, #tpu.memory_space<vmem>>, vector<16x512xbf16>
    %cst = arith.constant dense<0.000000e+00> : vector<56x512xf32>
    %4 = tpu.matmul %2, %3, %cst {dimension_numbers = #tpu.dot_dimension_numbers<[1], [0], [0], [1], [0, 0, 1, 1], [], []>} : vector<56x16xbf16>, vector<16x512xbf16>, vector<56x512xf32> -> vector<56x512xf32>
    %c0_4 = arith.constant 0 : index
    %c0_5 = arith.constant 0 : index
    %5 = vector.load %arg5[%c0_4, %c0_5] : memref<1x512xf32, #tpu.memory_space<vmem>>, vector<1x512xf32>
    %6 = vector.broadcast %5 : vector<1x512xf32> to vector<56x512xf32>
    %7 = arith.addf %4, %6 : vector<56x512xf32>
    %8 = vector.shape_cast %7 : vector<56x512xf32> to vector<7x8x512xf32>
    %c0_6 = arith.constant 0 : index
    %c0_7 = arith.constant 0 : index
    %c0_8 = arith.constant 0 : index
    %9 = vector.load %arg18[%c0_6, %c0_7, %c0_8] : memref<7x8x512xf32, #tpu.memory_space<vmem>>, vector<7x8x512xf32>
    tpu.vector_store %arg18[%c0_6, %c0_7, %c0_8], %8 {strides = array<i32>} : memref<7x8x512xf32, #tpu.memory_space<vmem>>, vector<7x8x512xf32>,
    %cst_9 = arith.constant 0.000000e+00 : f32
    %10 = vector.broadcast %cst_9 : f32 to vector<8x128xf32>
    %cst_10 = arith.constant 0.000000e+00 : f32
    %11 = vector.broadcast %cst_10 : f32 to vector<8x128xf32>
    %c0_i32 = arith.constant 0 : i32
    %12 = arith.index_cast %c0_i32 : i32 to index
    %c0_11 = arith.constant 0 : index
    %c0_12 = arith.constant 0 : index
    %13 = vector.load %arg18[%12, %c0_11, %c0_12] : memref<7x8x512xf32, #tpu.memory_space<vmem>>, vector<1x8x512xf32>
    %14 = vector.shape_cast %13 : vector<1x8x512xf32> to vector<8x512xf32>
    %15 = arith.truncf %10 : vector<8x128xf32> to vector<8x128xbf16>
    %c0_13 = arith.constant 0 : index
    %c0_14 = arith.constant 0 : index
    %16 = vector.load %arg4[%c0_13, %c0_14] : memref<128x512xbf16, #tpu.memory_space<vmem>>, vector<128x512xbf16>
    %cst_15 = arith.constant dense<0.000000e+00> : vector<8x512xf32>
    %17 = tpu.matmul %15, %16, %cst_15 {dimension_numbers = #tpu.dot_dimension_numbers<[1], [0], [0], [1], [0, 0, 1, 1], [], []>} : vector<8x128xbf16>, vector<128x512xbf16>, vector<8x512xf32> -> vector<8x512xf32>
    %18 = arith.addf %14, %17 : vector<8x512xf32>
    %19 = vector.extract_strided_slice %18 {offsets = [0, 0], sizes = [8, 128], strides = [1, 1]} : vector<8x512xf32> to vector<8x128xf32>
    %20 = arith.negf %19 : vector<8x128xf32>
    %21 = math.exp %20 : vector<8x128xf32>
    %cst_16 = arith.constant 1.000000e+00 : f32
    %22 = vector.broadcast %cst_16 : f32 to vector<8x128xf32>
    %23 = arith.addf %22, %21 : vector<8x128xf32>
    %24 = arith.divf %22, %23 : vector<8x128xf32>
    %25 = vector.extract_strided_slice %18 {offsets = [0, 128], sizes = [8, 128], strides = [1, 1]} : vector<8x512xf32> to vector<8x128xf32>
    %26 = arith.negf %25 : vector<8x128xf32>
    %27 = math.exp %26 : vector<8x128xf32>
    %cst_17 = arith.constant 1.000000e+00 : f32
    %28 = vector.broadcast %cst_17 : f32 to vector<8x128xf32>
    %29 = arith.addf %28, %27 : vector<8x128xf32>
    %30 = arith.divf %28, %29 : vector<8x128xf32>
    %31 = vector.extract_strided_slice %18 {offsets = [0, 256], sizes = [8, 128], strides = [1, 1]} : vector<8x512xf32> to vector<8x128xf32>
    %32 = math.tanh %31 : vector<8x128xf32>
    %33 = vector.extract_strided_slice %18 {offsets = [0, 384], sizes = [8, 128], strides = [1, 1]} : vector<8x512xf32> to vector<8x128xf32>
    %34 = arith.negf %33 : vector<8x128xf32>
    %35 = math.exp %34 : vector<8x128xf32>
    %cst_18 = arith.constant 1.000000e+00 : f32
    %36 = vector.broadcast %cst_18 : f32 to vector<8x128xf32>
    %37 = arith.addf %36, %35 : vector<8x128xf32>
    %38 = arith.divf %36, %37 : vector<8x128xf32>
    %39 = arith.mulf %30, %11 : vector<8x128xf32>
    %40 = arith.mulf %24, %32 : vector<8x128xf32>
    %41 = arith.addf %39, %40 : vector<8x128xf32>
    %42 = math.tanh %41 : vector<8x128xf32>
    %43 = arith.mulf %38, %42 : vector<8x128xf32>
    %c1_i32 = arith.constant 1 : i32
    %44 = arith.index_cast %c1_i32 : i32 to index
    %c0_19 = arith.constant 0 : index
    %c0_20 = arith.constant 0 : index
    %45 = vector.load %arg18[%44, %c0_19, %c0_20] : memref<7x8x512xf32, #tpu.memory_space<vmem>>, vector<1x8x512xf32>
    %46 = vector.shape_cast %45 : vector<1x8x512xf32> to vector<8x512xf32>
    %47 = arith.truncf %43 : vector<8x128xf32> to vector<8x128xbf16>
    %c0_21 = arith.constant 0 : index
    %c0_22 = arith.constant 0 : index
    %48 = vector.load %arg4[%c0_21, %c0_22] : memref<128x512xbf16, #tpu.memory_space<vmem>>, vector<128x512xbf16>
    %cst_23 = arith.constant dense<0.000000e+00> : vector<8x512xf32>
    %49 = tpu.matmul %47, %48, %cst_23 {dimension_numbers = #tpu.dot_dimension_numbers<[1], [0], [0], [1], [0, 0, 1, 1], [], []>} : vector<8x128xbf16>, vector<128x512xbf16>, vector<8x512xf32> -> vector<8x512xf32>
    %50 = arith.addf %46, %49 : vector<8x512xf32>
    %51 = vector.extract_strided_slice %50 {offsets = [0, 0], sizes = [8, 128], strides = [1, 1]} : vector<8x512xf32> to vector<8x128xf32>
    %52 = arith.negf %51 : vector<8x128xf32>
    %53 = math.exp %52 : vector<8x128xf32>
    %cst_24 = arith.constant 1.000000e+00 : f32
    %54 = vector.broadcast %cst_24 : f32 to vector<8x128xf32>
    %55 = arith.addf %54, %53 : vector<8x128xf32>
    %56 = arith.divf %54, %55 : vector<8x128xf32>
    %57 = vector.extract_strided_slice %50 {offsets = [0, 128], sizes = [8, 128], strides = [1, 1]} : vector<8x512xf32> to vector<8x128xf32>
    %58 = arith.negf %57 : vector<8x128xf32>
    %59 = math.exp %58 : vector<8x128xf32>
    %cst_25 = arith.constant 1.000000e+00 : f32
    %60 = vector.broadcast %cst_25 : f32 to vector<8x128xf32>
    %61 = arith.addf %60, %59 : vector<8x128xf32>
    %62 = arith.divf %60, %61 : vector<8x128xf32>
    %63 = vector.extract_strided_slice %50 {offsets = [0, 256], sizes = [8, 128], strides = [1, 1]} : vector<8x512xf32> to vector<8x128xf32>
    %64 = math.tanh %63 : vector<8x128xf32>
    %65 = vector.extract_strided_slice %50 {offsets = [0, 384], sizes = [8, 128], strides = [1, 1]} : vector<8x512xf32> to vector<8x128xf32>
    %66 = arith.negf %65 : vector<8x128xf32>
    %67 = math.exp %66 : vector<8x128xf32>
    %cst_26 = arith.constant 1.000000e+00 : f32
    %68 = vector.broadcast %cst_26 : f32 to vector<8x128xf32>
    %69 = arith.addf %68, %67 : vector<8x128xf32>
    %70 = arith.divf %68, %69 : vector<8x128xf32>
    %71 = arith.mulf %62, %41 : vector<8x128xf32>
    %72 = arith.mulf %56, %64 : vector<8x128xf32>
    %73 = arith.addf %71, %72 : vector<8x128xf32>
    %74 = math.tanh %73 : vector<8x128xf32>
    %75 = arith.mulf %70, %74 : vector<8x128xf32>
    %c2_i32 = arith.constant 2 : i32
    %76 = arith.index_cast %c2_i32 : i32 to index
    %c0_27 = arith.constant 0 : index
    %c0_28 = arith.constant 0 : index
    %77 = vector.load %arg18[%76, %c0_27, %c0_28] : memref<7x8x512xf32, #tpu.memory_space<vmem>>, vector<1x8x512xf32>
    %78 = vector.shape_cast %77 : vector<1x8x512xf32> to vector<8x512xf32>
    %79 = arith.truncf %75 : vector<8x128xf32> to vector<8x128xbf16>
    %c0_29 = arith.constant 0 : index
    %c0_30 = arith.constant 0 : index
    %80 = vector.load %arg4[%c0_29, %c0_30] : memref<128x512xbf16, #tpu.memory_space<vmem>>, vector<128x512xbf16>
    %cst_31 = arith.constant dense<0.000000e+00> : vector<8x512xf32>
    %81 = tpu.matmul %79, %80, %cst_31 {dimension_numbers = #tpu.dot_dimension_numbers<[1], [0], [0], [1], [0, 0, 1, 1], [], []>} : vector<8x128xbf16>, vector<128x512xbf16>, vector<8x512xf32> -> vector<8x512xf32>
    %82 = arith.addf %78, %81 : vector<8x512xf32>
    %83 = vector.extract_strided_slice %82 {offsets = [0, 0], sizes = [8, 128], strides = [1, 1]} : vector<8x512xf32> to vector<8x128xf32>
    %84 = arith.negf %83 : vector<8x128xf32>
    %85 = math.exp %84 : vector<8x128xf32>
    %cst_32 = arith.constant 1.000000e+00 : f32
    %86 = vector.broadcast %cst_32 : f32 to vector<8x128xf32>
    %87 = arith.addf %86, %85 : vector<8x128xf32>
    %88 = arith.divf %86, %87 : vector<8x128xf32>
    %89 = vector.extract_strided_slice %82 {offsets = [0, 128], sizes = [8, 128], strides = [1, 1]} : vector<8x512xf32> to vector<8x128xf32>
    %90 = arith.negf %89 : vector<8x128xf32>
    %91 = math.exp %90 : vector<8x128xf32>
    %cst_33 = arith.constant 1.000000e+00 : f32
    %92 = vector.broadcast %cst_33 : f32 to vector<8x128xf32>
    %93 = arith.addf %92, %91 : vector<8x128xf32>
    %94 = arith.divf %92, %93 : vector<8x128xf32>
    %95 = vector.extract_strided_slice %82 {offsets = [0, 256], sizes = [8, 128], strides = [1, 1]} : vector<8x512xf32> to vector<8x128xf32>
    %96 = math.tanh %95 : vector<8x128xf32>
    %97 = vector.extract_strided_slice %82 {offsets = [0, 384], sizes = [8, 128], strides = [1, 1]} : vector<8x512xf32> to vector<8x128xf32>
    %98 = arith.negf %97 : vector<8x128xf32>
    %99 = math.exp %98 : vector<8x128xf32>
    %cst_34 = arith.constant 1.000000e+00 : f32
    %100 = vector.broadcast %cst_34 : f32 to vector<8x128xf32>
    %101 = arith.addf %100, %99 : vector<8x128xf32>
    %102 = arith.divf %100, %101 : vector<8x128xf32>
    %103 = arith.mulf %94, %73 : vector<8x128xf32>
    %104 = arith.mulf %88, %96 : vector<8x128xf32>
    %105 = arith.addf %103, %104 : vector<8x128xf32>
    %106 = math.tanh %105 : vector<8x128xf32>
    %107 = arith.mulf %102, %106 : vector<8x128xf32>
    %c3_i32 = arith.constant 3 : i32
    %108 = arith.index_cast %c3_i32 : i32 to index
    %c0_35 = arith.constant 0 : index
    %c0_36 = arith.constant 0 : index
    %109 = vector.load %arg18[%108, %c0_35, %c0_36] : memref<7x8x512xf32, #tpu.memory_space<vmem>>, vector<1x8x512xf32>
    %110 = vector.shape_cast %109 : vector<1x8x512xf32> to vector<8x512xf32>
    %111 = arith.truncf %107 : vector<8x128xf32> to vector<8x128xbf16>
    %c0_37 = arith.constant 0 : index
    %c0_38 = arith.constant 0 : index
    %112 = vector.load %arg4[%c0_37, %c0_38] : memref<128x512xbf16, #tpu.memory_space<vmem>>, vector<128x512xbf16>
    %cst_39 = arith.constant dense<0.000000e+00> : vector<8x512xf32>
    %113 = tpu.matmul %111, %112, %cst_39 {dimension_numbers = #tpu.dot_dimension_numbers<[1], [0], [0], [1], [0, 0, 1, 1], [], []>} : vector<8x128xbf16>, vector<128x512xbf16>, vector<8x512xf32> -> vector<8x512xf32>
    %114 = arith.addf %110, %113 : vector<8x512xf32>
    %115 = vector.extract_strided_slice %114 {offsets = [0, 0], sizes = [8, 128], strides = [1, 1]} : vector<8x512xf32> to vector<8x128xf32>
    %116 = arith.negf %115 : vector<8x128xf32>
    %117 = math.exp %116 : vector<8x128xf32>
    %cst_40 = arith.constant 1.000000e+00 : f32
    %118 = vector.broadcast %cst_40 : f32 to vector<8x128xf32>
    %119 = arith.addf %118, %117 : vector<8x128xf32>
    %120 = arith.divf %118, %119 : vector<8x128xf32>
    %121 = vector.extract_strided_slice %114 {offsets = [0, 128], sizes = [8, 128], strides = [1, 1]} : vector<8x512xf32> to vector<8x128xf32>
    %122 = arith.negf %121 : vector<8x128xf32>
    %123 = math.exp %122 : vector<8x128xf32>
    %cst_41 = arith.constant 1.000000e+00 : f32
    %124 = vector.broadcast %cst_41 : f32 to vector<8x128xf32>
    %125 = arith.addf %124, %123 : vector<8x128xf32>
    %126 = arith.divf %124, %125 : vector<8x128xf32>
    %127 = vector.extract_strided_slice %114 {offsets = [0, 256], sizes = [8, 128], strides = [1, 1]} : vector<8x512xf32> to vector<8x128xf32>
    %128 = math.tanh %127 : vector<8x128xf32>
    %129 = vector.extract_strided_slice %114 {offsets = [0, 384], sizes = [8, 128], strides = [1, 1]} : vector<8x512xf32> to vector<8x128xf32>
    %130 = arith.negf %129 : vector<8x128xf32>
    %131 = math.exp %130 : vector<8x128xf32>
    %cst_42 = arith.constant 1.000000e+00 : f32
    %132 = vector.broadcast %cst_42 : f32 to vector<8x128xf32>
    %133 = arith.addf %132, %131 : vector<8x128xf32>
    %134 = arith.divf %132, %133 : vector<8x128xf32>
    %135 = arith.mulf %126, %105 : vector<8x128xf32>
    %136 = arith.mulf %120, %128 : vector<8x128xf32>
    %137 = arith.addf %135, %136 : vector<8x128xf32>
    %138 = math.tanh %137 : vector<8x128xf32>
    %139 = arith.mulf %134, %138 : vector<8x128xf32>
    %c4_i32 = arith.constant 4 : i32
    %140 = arith.index_cast %c4_i32 : i32 to index
    %c0_43 = arith.constant 0 : index
    %c0_44 = arith.constant 0 : index
    %141 = vector.load %arg18[%140, %c0_43, %c0_44] : memref<7x8x512xf32, #tpu.memory_space<vmem>>, vector<1x8x512xf32>
    %142 = vector.shape_cast %141 : vector<1x8x512xf32> to vector<8x512xf32>
    %143 = arith.truncf %139 : vector<8x128xf32> to vector<8x128xbf16>
    %c0_45 = arith.constant 0 : index
    %c0_46 = arith.constant 0 : index
    %144 = vector.load %arg4[%c0_45, %c0_46] : memref<128x512xbf16, #tpu.memory_space<vmem>>, vector<128x512xbf16>
    %cst_47 = arith.constant dense<0.000000e+00> : vector<8x512xf32>
    %145 = tpu.matmul %143, %144, %cst_47 {dimension_numbers = #tpu.dot_dimension_numbers<[1], [0], [0], [1], [0, 0, 1, 1], [], []>} : vector<8x128xbf16>, vector<128x512xbf16>, vector<8x512xf32> -> vector<8x512xf32>
    %146 = arith.addf %142, %145 : vector<8x512xf32>
    %147 = vector.extract_strided_slice %146 {offsets = [0, 0], sizes = [8, 128], strides = [1, 1]} : vector<8x512xf32> to vector<8x128xf32>
    %148 = arith.negf %147 : vector<8x128xf32>
    %149 = math.exp %148 : vector<8x128xf32>
    %cst_48 = arith.constant 1.000000e+00 : f32
    %150 = vector.broadcast %cst_48 : f32 to vector<8x128xf32>
    %151 = arith.addf %150, %149 : vector<8x128xf32>
    %152 = arith.divf %150, %151 : vector<8x128xf32>
    %153 = vector.extract_strided_slice %146 {offsets = [0, 128], sizes = [8, 128], strides = [1, 1]} : vector<8x512xf32> to vector<8x128xf32>
    %154 = arith.negf %153 : vector<8x128xf32>
    %155 = math.exp %154 : vector<8x128xf32>
    %cst_49 = arith.constant 1.000000e+00 : f32
    %156 = vector.broadcast %cst_49 : f32 to vector<8x128xf32>
    %157 = arith.addf %156, %155 : vector<8x128xf32>
    %158 = arith.divf %156, %157 : vector<8x128xf32>
    %159 = vector.extract_strided_slice %146 {offsets = [0, 256], sizes = [8, 128], strides = [1, 1]} : vector<8x512xf32> to vector<8x128xf32>
    %160 = math.tanh %159 : vector<8x128xf32>
    %161 = vector.extract_strided_slice %146 {offsets = [0, 384], sizes = [8, 128], strides = [1, 1]} : vector<8x512xf32> to vector<8x128xf32>
    %162 = arith.negf %161 : vector<8x128xf32>
    %163 = math.exp %162 : vector<8x128xf32>
    %cst_50 = arith.constant 1.000000e+00 : f32
    %164 = vector.broadcast %cst_50 : f32 to vector<8x128xf32>
    %165 = arith.addf %164, %163 : vector<8x128xf32>
    %166 = arith.divf %164, %165 : vector<8x128xf32>
    %167 = arith.mulf %158, %137 : vector<8x128xf32>
    %168 = arith.mulf %152, %160 : vector<8x128xf32>
    %169 = arith.addf %167, %168 : vector<8x128xf32>
    %170 = math.tanh %169 : vector<8x128xf32>
    %171 = arith.mulf %166, %170 : vector<8x128xf32>
    %c5_i32 = arith.constant 5 : i32
    %172 = arith.index_cast %c5_i32 : i32 to index
    %c0_51 = arith.constant 0 : index
    %c0_52 = arith.constant 0 : index
    %173 = vector.load %arg18[%172, %c0_51, %c0_52] : memref<7x8x512xf32, #tpu.memory_space<vmem>>, vector<1x8x512xf32>
    %174 = vector.shape_cast %173 : vector<1x8x512xf32> to vector<8x512xf32>
    %175 = arith.truncf %171 : vector<8x128xf32> to vector<8x128xbf16>
    %c0_53 = arith.constant 0 : index
    %c0_54 = arith.constant 0 : index
    %176 = vector.load %arg4[%c0_53, %c0_54] : memref<128x512xbf16, #tpu.memory_space<vmem>>, vector<128x512xbf16>
    %cst_55 = arith.constant dense<0.000000e+00> : vector<8x512xf32>
    %177 = tpu.matmul %175, %176, %cst_55 {dimension_numbers = #tpu.dot_dimension_numbers<[1], [0], [0], [1], [0, 0, 1, 1], [], []>} : vector<8x128xbf16>, vector<128x512xbf16>, vector<8x512xf32> -> vector<8x512xf32>
    %178 = arith.addf %174, %177 : vector<8x512xf32>
    %179 = vector.extract_strided_slice %178 {offsets = [0, 0], sizes = [8, 128], strides = [1, 1]} : vector<8x512xf32> to vector<8x128xf32>
    %180 = arith.negf %179 : vector<8x128xf32>
    %181 = math.exp %180 : vector<8x128xf32>
    %cst_56 = arith.constant 1.000000e+00 : f32
    %182 = vector.broadcast %cst_56 : f32 to vector<8x128xf32>
    %183 = arith.addf %182, %181 : vector<8x128xf32>
    %184 = arith.divf %182, %183 : vector<8x128xf32>
    %185 = vector.extract_strided_slice %178 {offsets = [0, 128], sizes = [8, 128], strides = [1, 1]} : vector<8x512xf32> to vector<8x128xf32>
    %186 = arith.negf %185 : vector<8x128xf32>
    %187 = math.exp %186 : vector<8x128xf32>
    %cst_57 = arith.constant 1.000000e+00 : f32
    %188 = vector.broadcast %cst_57 : f32 to vector<8x128xf32>
    %189 = arith.addf %188, %187 : vector<8x128xf32>
    %190 = arith.divf %188, %189 : vector<8x128xf32>
    %191 = vector.extract_strided_slice %178 {offsets = [0, 256], sizes = [8, 128], strides = [1, 1]} : vector<8x512xf32> to vector<8x128xf32>
    %192 = math.tanh %191 : vector<8x128xf32>
    %193 = vector.extract_strided_slice %178 {offsets = [0, 384], sizes = [8, 128], strides = [1, 1]} : vector<8x512xf32> to vector<8x128xf32>
    %194 = arith.negf %193 : vector<8x128xf32>
    %195 = math.exp %194 : vector<8x128xf32>
    %cst_58 = arith.constant 1.000000e+00 : f32
    %196 = vector.broadcast %cst_58 : f32 to vector<8x128xf32>
    %197 = arith.addf %196, %195 : vector<8x128xf32>
    %198 = arith.divf %196, %197 : vector<8x128xf32>
    %199 = arith.mulf %190, %169 : vector<8x128xf32>
    %200 = arith.mulf %184, %192 : vector<8x128xf32>
    %201 = arith.addf %199, %200 : vector<8x128xf32>
    %202 = math.tanh %201 : vector<8x128xf32>
    %203 = arith.mulf %198, %202 : vector<8x128xf32>
    %c6_i32 = arith.constant 6 : i32
    %204 = arith.index_cast %c6_i32 : i32 to index
    %c0_59 = arith.constant 0 : index
    %c0_60 = arith.constant 0 : index
    %205 = vector.load %arg18[%204, %c0_59, %c0_60] : memref<7x8x512xf32, #tpu.memory_space<vmem>>, vector<1x8x512xf32>
    %206 = vector.shape_cast %205 : vector<1x8x512xf32> to vector<8x512xf32>
    %207 = arith.truncf %203 : vector<8x128xf32> to vector<8x128xbf16>
    %c0_61 = arith.constant 0 : index
    %c0_62 = arith.constant 0 : index
    %208 = vector.load %arg4[%c0_61, %c0_62] : memref<128x512xbf16, #tpu.memory_space<vmem>>, vector<128x512xbf16>
    %cst_63 = arith.constant dense<0.000000e+00> : vector<8x512xf32>
    %209 = tpu.matmul %207, %208, %cst_63 {dimension_numbers = #tpu.dot_dimension_numbers<[1], [0], [0], [1], [0, 0, 1, 1], [], []>} : vector<8x128xbf16>, vector<128x512xbf16>, vector<8x512xf32> -> vector<8x512xf32>
    %210 = arith.addf %206, %209 : vector<8x512xf32>
    %211 = vector.extract_strided_slice %210 {offsets = [0, 0], sizes = [8, 128], strides = [1, 1]} : vector<8x512xf32> to vector<8x128xf32>
    %212 = arith.negf %211 : vector<8x128xf32>
    %213 = math.exp %212 : vector<8x128xf32>
    %cst_64 = arith.constant 1.000000e+00 : f32
    %214 = vector.broadcast %cst_64 : f32 to vector<8x128xf32>
    %215 = arith.addf %214, %213 : vector<8x128xf32>
    %216 = arith.divf %214, %215 : vector<8x128xf32>
    %217 = vector.extract_strided_slice %210 {offsets = [0, 128], sizes = [8, 128], strides = [1, 1]} : vector<8x512xf32> to vector<8x128xf32>
    %218 = arith.negf %217 : vector<8x128xf32>
    %219 = math.exp %218 : vector<8x128xf32>
    %cst_65 = arith.constant 1.000000e+00 : f32
    %220 = vector.broadcast %cst_65 : f32 to vector<8x128xf32>
    %221 = arith.addf %220, %219 : vector<8x128xf32>
    %222 = arith.divf %220, %221 : vector<8x128xf32>
    %223 = vector.extract_strided_slice %210 {offsets = [0, 256], sizes = [8, 128], strides = [1, 1]} : vector<8x512xf32> to vector<8x128xf32>
    %224 = math.tanh %223 : vector<8x128xf32>
    %225 = vector.extract_strided_slice %210 {offsets = [0, 384], sizes = [8, 128], strides = [1, 1]} : vector<8x512xf32> to vector<8x128xf32>
    %226 = arith.negf %225 : vector<8x128xf32>
    %227 = math.exp %226 : vector<8x128xf32>
    %cst_66 = arith.constant 1.000000e+00 : f32
    %228 = vector.broadcast %cst_66 : f32 to vector<8x128xf32>
    %229 = arith.addf %228, %227 : vector<8x128xf32>
    %230 = arith.divf %228, %229 : vector<8x128xf32>
    %231 = arith.mulf %222, %201 : vector<8x128xf32>
    %232 = arith.mulf %216, %224 : vector<8x128xf32>
    %233 = arith.addf %231, %232 : vector<8x128xf32>
    %234 = math.tanh %233 : vector<8x128xf32>
    %235 = arith.mulf %230, %234 : vector<8x128xf32>
    %c7_i32 = arith.constant 7 : i32
    %c0_67 = arith.constant 0 : index
    %c0_68 = arith.constant 0 : index
    %236 = vector.load %arg1[%c0_67, %c0_68] : memref<8x128xf32, #tpu.memory_space<vmem>>, vector<8x128xf32>
    %237 = arith.truncf %235 : vector<8x128xf32> to vector<8x128xbf16>
    %c0_69 = arith.constant 0 : index
    %c0_70 = arith.constant 0 : index
    %238 = vector.load %arg6[%c0_69, %c0_70] : memref<128x512xbf16, #tpu.memory_space<vmem>>, vector<128x512xbf16>
    %cst_71 = arith.constant dense<0.000000e+00> : vector<8x512xf32>
    %239 = tpu.matmul %237, %238, %cst_71 {dimension_numbers = #tpu.dot_dimension_numbers<[1], [0], [0], [1], [0, 0, 1, 1], [], []>} : vector<8x128xbf16>, vector<128x512xbf16>, vector<8x512xf32> -> vector<8x512xf32>
    %c0_72 = arith.constant 0 : index
    %c0_73 = arith.constant 0 : index
    %240 = vector.load %arg8[%c0_72, %c0_73] : memref<1x512xf32, #tpu.memory_space<vmem>>, vector<1x512xf32>
    %241 = vector.broadcast %240 : vector<1x512xf32> to vector<8x512xf32>
    %242 = arith.addf %239, %241 : vector<8x512xf32>
    %c0_74 = arith.constant 0 : index
    %c0_75 = arith.constant 0 : index
    %243 = vector.load %arg9[%c0_74, %c0_75] : memref<1x512xf32, #tpu.memory_space<vmem>>, vector<1x512xf32>
    %244 = vector.broadcast %243 : vector<1x512xf32> to vector<8x512xf32>
    %245 = arith.addf %242, %244 : vector<8x512xf32>
    %246 = arith.truncf %236 : vector<8x128xf32> to vector<8x128xbf16>
    %c0_76 = arith.constant 0 : index
    %c0_77 = arith.constant 0 : index
    %247 = vector.load %arg7[%c0_76, %c0_77] : memref<128x512xbf16, #tpu.memory_space<vmem>>, vector<128x512xbf16>
    %cst_78 = arith.constant dense<0.000000e+00> : vector<8x512xf32>
    %248 = tpu.matmul %246, %247, %cst_78 {dimension_numbers = #tpu.dot_dimension_numbers<[1], [0], [0], [1], [0, 0, 1, 1], [], []>} : vector<8x128xbf16>, vector<128x512xbf16>, vector<8x512xf32> -> vector<8x512xf32>
    %249 = arith.addf %242, %248 : vector<8x512xf32>
    %cst_79 = arith.constant 0.000000e+00 : f32
    %250 = vector.broadcast %cst_79 : f32 to vector<8x128xf32>
    %251 = vector.extract_strided_slice %249 {offsets = [0, 0], sizes = [8, 128], strides = [1, 1]} : vector<8x512xf32> to vector<8x128xf32>
    %252 = arith.negf %251 : vector<8x128xf32>
    %253 = math.exp %252 : vector<8x128xf32>
    %cst_80 = arith.constant 1.000000e+00 : f32
    %254 = vector.broadcast %cst_80 : f32 to vector<8x128xf32>
    %255 = arith.addf %254, %253 : vector<8x128xf32>
    %256 = arith.divf %254, %255 : vector<8x128xf32>
    %257 = vector.extract_strided_slice %249 {offsets = [0, 128], sizes = [8, 128], strides = [1, 1]} : vector<8x512xf32> to vector<8x128xf32>
    %258 = arith.negf %257 : vector<8x128xf32>
    %259 = math.exp %258 : vector<8x128xf32>
    %cst_81 = arith.constant 1.000000e+00 : f32
    %260 = vector.broadcast %cst_81 : f32 to vector<8x128xf32>
    %261 = arith.addf %260, %259 : vector<8x128xf32>
    %262 = arith.divf %260, %261 : vector<8x128xf32>
    %263 = vector.extract_strided_slice %249 {offsets = [0, 256], sizes = [8, 128], strides = [1, 1]} : vector<8x512xf32> to vector<8x128xf32>
    %264 = math.tanh %263 : vector<8x128xf32>
    %265 = vector.extract_strided_slice %249 {offsets = [0, 384], sizes = [8, 128], strides = [1, 1]} : vector<8x512xf32> to vector<8x128xf32>
    %266 = arith.negf %265 : vector<8x128xf32>
    %267 = math.exp %266 : vector<8x128xf32>
    %cst_82 = arith.constant 1.000000e+00 : f32
    %268 = vector.broadcast %cst_82 : f32 to vector<8x128xf32>
    %269 = arith.addf %268, %267 : vector<8x128xf32>
    %270 = arith.divf %268, %269 : vector<8x128xf32>
    %271 = arith.mulf %262, %250 : vector<8x128xf32>
    %272 = arith.mulf %256, %264 : vector<8x128xf32>
    %273 = arith.addf %271, %272 : vector<8x128xf32>
    %274 = math.tanh %273 : vector<8x128xf32>
    %275 = arith.mulf %270, %274 : vector<8x128xf32>
    %276 = arith.truncf %275 : vector<8x128xf32> to vector<8x128xbf16>
    %c0_83 = arith.constant 0 : index
    %c0_84 = arith.constant 0 : index
    %277 = vector.load %arg11[%c0_83, %c0_84] : memref<128x384xbf16, #tpu.memory_space<vmem>>, vector<128x384xbf16>
    %cst_85 = arith.constant dense<0.000000e+00> : vector<8x384xf32>
    %278 = tpu.matmul %276, %277, %cst_85 {dimension_numbers = #tpu.dot_dimension_numbers<[1], [0], [0], [1], [0, 0, 1, 1], [], []>} : vector<8x128xbf16>, vector<128x384xbf16>, vector<8x384xf32> -> vector<8x384xf32>
    %c0_86 = arith.constant 0 : index
    %c0_87 = arith.constant 0 : index
    %279 = vector.load %arg12[%c0_86, %c0_87] : memref<1x384xf32, #tpu.memory_space<vmem>>, vector<1x384xf32>
    %280 = vector.broadcast %279 : vector<1x384xf32> to vector<8x384xf32>
    %281 = arith.addf %278, %280 : vector<8x384xf32>
    %282 = math.tanh %281 : vector<8x384xf32>
    %283 = arith.truncf %282 : vector<8x384xf32> to vector<8x384xbf16>
    %c0_88 = arith.constant 0 : index
    %c0_89 = arith.constant 0 : index
    %284 = vector.load %arg13[%c0_88, %c0_89] : memref<384x256xbf16, #tpu.memory_space<vmem>>, vector<384x256xbf16>
    %cst_90 = arith.constant dense<0.000000e+00> : vector<8x256xf32>
    %285 = tpu.matmul %283, %284, %cst_90 {dimension_numbers = #tpu.dot_dimension_numbers<[1], [0], [0], [1], [0, 0, 1, 1], [], []>} : vector<8x384xbf16>, vector<384x256xbf16>, vector<8x256xf32> -> vector<8x256xf32>
    %c0_91 = arith.constant 0 : index
    %c0_92 = arith.constant 0 : index
    %286 = vector.load %arg14[%c0_91, %c0_92] : memref<1x256xf32, #tpu.memory_space<vmem>>, vector<1x256xf32>
    %287 = vector.broadcast %286 : vector<1x256xf32> to vector<8x256xf32>
    %288 = arith.addf %285, %287 : vector<8x256xf32>
    %289 = math.tanh %288 : vector<8x256xf32>
    %290 = arith.truncf %289 : vector<8x256xf32> to vector<8x256xbf16>
    %c0_93 = arith.constant 0 : index
    %c0_94 = arith.constant 0 : index
    %291 = vector.load %arg15[%c0_93, %c0_94] : memref<256x128xbf16, #tpu.memory_space<vmem>>, vector<256x128xbf16>
    %cst_95 = arith.constant dense<0.000000e+00> : vector<8x128xf32>
    %292 = tpu.matmul %290, %291, %cst_95 {dimension_numbers = #tpu.dot_dimension_numbers<[1], [0], [0], [1], [0, 0, 1, 1], [], []>} : vector<8x256xbf16>, vector<256x128xbf16>, vector<8x128xf32> -> vector<8x128xf32>
    %c0_96 = arith.constant 0 : index
    %c0_97 = arith.constant 0 : index
    %293 = vector.load %arg16[%c0_96, %c0_97] : memref<1x128xf32, #tpu.memory_space<vmem>>, vector<1x128xf32>
    %294 = vector.broadcast %293 : vector<1x128xf32> to vector<8x128xf32>
    %295 = arith.addf %292, %294 : vector<8x128xf32>
    %296 = arith.addf %236, %295 : vector<8x128xf32>
    %c0_98 = arith.constant 0 : index
    %c0_99 = arith.constant 0 : index
    %c0_100 = arith.constant 0 : index
    %297 = vector.load %arg17[%c0_98, %c0_99, %c0_100] : memref<7x8x128xf32, #tpu.memory_space<vmem>>, vector<1x8x128xf32>
    %298 = vector.shape_cast %297 : vector<1x8x128xf32> to vector<8x128xf32>
    %299 = vector.shape_cast %296 : vector<8x128xf32> to vector<1x8x128xf32>
    tpu.vector_store %arg17[%c0_98, %c0_99, %c0_100], %299 {strides = array<i32>} : memref<7x8x128xf32, #tpu.memory_space<vmem>>, vector<1x8x128xf32>,
    %c1_i32_101 = arith.constant 1 : i32
    %300 = arith.truncf %275 : vector<8x128xf32> to vector<8x128xbf16>
    %301 = tpu.concatenate %290, %300 in 1 : vector<8x256xbf16>, vector<8x128xbf16> -> vector<8x384xbf16>
    %c0_102 = arith.constant 0 : index
    %c0_103 = arith.constant 0 : index
    %302 = vector.load %arg10[%c0_102, %c0_103] : memref<384x512xbf16, #tpu.memory_space<vmem>>, vector<384x512xbf16>
    %cst_104 = arith.constant dense<0.000000e+00> : vector<8x512xf32>
    %303 = tpu.matmul %301, %302, %cst_104 {dimension_numbers = #tpu.dot_dimension_numbers<[1], [0], [0], [1], [0, 0, 1, 1], [], []>} : vector<8x384xbf16>, vector<384x512xbf16>, vector<8x512xf32> -> vector<8x512xf32>
    %304 = arith.addf %245, %303 : vector<8x512xf32>
    %305 = vector.extract_strided_slice %304 {offsets = [0, 0], sizes = [8, 128], strides = [1, 1]} : vector<8x512xf32> to vector<8x128xf32>
    %306 = arith.negf %305 : vector<8x128xf32>
    %307 = math.exp %306 : vector<8x128xf32>
    %cst_105 = arith.constant 1.000000e+00 : f32
    %308 = vector.broadcast %cst_105 : f32 to vector<8x128xf32>
    %309 = arith.addf %308, %307 : vector<8x128xf32>
    %310 = arith.divf %308, %309 : vector<8x128xf32>
    %311 = vector.extract_strided_slice %304 {offsets = [0, 128], sizes = [8, 128], strides = [1, 1]} : vector<8x512xf32> to vector<8x128xf32>
    %312 = arith.negf %311 : vector<8x128xf32>
    %313 = math.exp %312 : vector<8x128xf32>
    %cst_106 = arith.constant 1.000000e+00 : f32
    %314 = vector.broadcast %cst_106 : f32 to vector<8x128xf32>
    %315 = arith.addf %314, %313 : vector<8x128xf32>
    %316 = arith.divf %314, %315 : vector<8x128xf32>
    %317 = vector.extract_strided_slice %304 {offsets = [0, 256], sizes = [8, 128], strides = [1, 1]} : vector<8x512xf32> to vector<8x128xf32>
    %318 = math.tanh %317 : vector<8x128xf32>
    %319 = vector.extract_strided_slice %304 {offsets = [0, 384], sizes = [8, 128], strides = [1, 1]} : vector<8x512xf32> to vector<8x128xf32>
    %320 = arith.negf %319 : vector<8x128xf32>
    %321 = math.exp %320 : vector<8x128xf32>
    %cst_107 = arith.constant 1.000000e+00 : f32
    %322 = vector.broadcast %cst_107 : f32 to vector<8x128xf32>
    %323 = arith.addf %322, %321 : vector<8x128xf32>
    %324 = arith.divf %322, %323 : vector<8x128xf32>
    %325 = arith.mulf %316, %273 : vector<8x128xf32>
    %326 = arith.mulf %310, %318 : vector<8x128xf32>
    %327 = arith.addf %325, %326 : vector<8x128xf32>
    %328 = math.tanh %327 : vector<8x128xf32>
    %329 = arith.mulf %324, %328 : vector<8x128xf32>
    %330 = arith.truncf %329 : vector<8x128xf32> to vector<8x128xbf16>
    %c0_108 = arith.constant 0 : index
    %c0_109 = arith.constant 0 : index
    %331 = vector.load %arg11[%c0_108, %c0_109] : memref<128x384xbf16, #tpu.memory_space<vmem>>, vector<128x384xbf16>
    %cst_110 = arith.constant dense<0.000000e+00> : vector<8x384xf32>
    %332 = tpu.matmul %330, %331, %cst_110 {dimension_numbers = #tpu.dot_dimension_numbers<[1], [0], [0], [1], [0, 0, 1, 1], [], []>} : vector<8x128xbf16>, vector<128x384xbf16>, vector<8x384xf32> -> vector<8x384xf32>
    %c0_111 = arith.constant 0 : index
    %c0_112 = arith.constant 0 : index
    %333 = vector.load %arg12[%c0_111, %c0_112] : memref<1x384xf32, #tpu.memory_space<vmem>>, vector<1x384xf32>
    %334 = vector.broadcast %333 : vector<1x384xf32> to vector<8x384xf32>
    %335 = arith.addf %332, %334 : vector<8x384xf32>
    %336 = math.tanh %335 : vector<8x384xf32>
    %337 = arith.truncf %336 : vector<8x384xf32> to vector<8x384xbf16>
    %c0_113 = arith.constant 0 : index
    %c0_114 = arith.constant 0 : index
    %338 = vector.load %arg13[%c0_113, %c0_114] : memref<384x256xbf16, #tpu.memory_space<vmem>>, vector<384x256xbf16>
    %cst_115 = arith.constant dense<0.000000e+00> : vector<8x256xf32>
    %339 = tpu.matmul %337, %338, %cst_115 {dimension_numbers = #tpu.dot_dimension_numbers<[1], [0], [0], [1], [0, 0, 1, 1], [], []>} : vector<8x384xbf16>, vector<384x256xbf16>, vector<8x256xf32> -> vector<8x256xf32>
    %c0_116 = arith.constant 0 : index
    %c0_117 = arith.constant 0 : index
    %340 = vector.load %arg14[%c0_116, %c0_117] : memref<1x256xf32, #tpu.memory_space<vmem>>, vector<1x256xf32>
    %341 = vector.broadcast %340 : vector<1x256xf32> to vector<8x256xf32>
    %342 = arith.addf %339, %341 : vector<8x256xf32>
    %343 = math.tanh %342 : vector<8x256xf32>
    %344 = arith.truncf %343 : vector<8x256xf32> to vector<8x256xbf16>
    %c0_118 = arith.constant 0 : index
    %c0_119 = arith.constant 0 : index
    %345 = vector.load %arg15[%c0_118, %c0_119] : memref<256x128xbf16, #tpu.memory_space<vmem>>, vector<256x128xbf16>
    %cst_120 = arith.constant dense<0.000000e+00> : vector<8x128xf32>
    %346 = tpu.matmul %344, %345, %cst_120 {dimension_numbers = #tpu.dot_dimension_numbers<[1], [0], [0], [1], [0, 0, 1, 1], [], []>} : vector<8x256xbf16>, vector<256x128xbf16>, vector<8x128xf32> -> vector<8x128xf32>
    %c0_121 = arith.constant 0 : index
    %c0_122 = arith.constant 0 : index
    %347 = vector.load %arg16[%c0_121, %c0_122] : memref<1x128xf32, #tpu.memory_space<vmem>>, vector<1x128xf32>
    %348 = vector.broadcast %347 : vector<1x128xf32> to vector<8x128xf32>
    %349 = arith.addf %346, %348 : vector<8x128xf32>
    %350 = arith.addf %296, %349 : vector<8x128xf32>
    %351 = arith.index_cast %c1_i32_101 : i32 to index
    %c0_123 = arith.constant 0 : index
    %c0_124 = arith.constant 0 : index
    %352 = vector.load %arg17[%351, %c0_123, %c0_124] : memref<7x8x128xf32, #tpu.memory_space<vmem>>, vector<1x8x128xf32>
    %353 = vector.shape_cast %352 : vector<1x8x128xf32> to vector<8x128xf32>
    %354 = vector.shape_cast %350 : vector<8x128xf32> to vector<1x8x128xf32>
    tpu.vector_store %arg17[%351, %c0_123, %c0_124], %354 {strides = array<i32>} : memref<7x8x128xf32, #tpu.memory_space<vmem>>, vector<1x8x128xf32>,
    %c2_i32_125 = arith.constant 2 : i32
    %355 = arith.truncf %329 : vector<8x128xf32> to vector<8x128xbf16>
    %356 = tpu.concatenate %344, %355 in 1 : vector<8x256xbf16>, vector<8x128xbf16> -> vector<8x384xbf16>
    %c0_126 = arith.constant 0 : index
    %c0_127 = arith.constant 0 : index
    %357 = vector.load %arg10[%c0_126, %c0_127] : memref<384x512xbf16, #tpu.memory_space<vmem>>, vector<384x512xbf16>
    %cst_128 = arith.constant dense<0.000000e+00> : vector<8x512xf32>
    %358 = tpu.matmul %356, %357, %cst_128 {dimension_numbers = #tpu.dot_dimension_numbers<[1], [0], [0], [1], [0, 0, 1, 1], [], []>} : vector<8x384xbf16>, vector<384x512xbf16>, vector<8x512xf32> -> vector<8x512xf32>
    %359 = arith.addf %245, %358 : vector<8x512xf32>
    %360 = vector.extract_strided_slice %359 {offsets = [0, 0], sizes = [8, 128], strides = [1, 1]} : vector<8x512xf32> to vector<8x128xf32>
    %361 = arith.negf %360 : vector<8x128xf32>
    %362 = math.exp %361 : vector<8x128xf32>
    %cst_129 = arith.constant 1.000000e+00 : f32
    %363 = vector.broadcast %cst_129 : f32 to vector<8x128xf32>
    %364 = arith.addf %363, %362 : vector<8x128xf32>
    %365 = arith.divf %363, %364 : vector<8x128xf32>
    %366 = vector.extract_strided_slice %359 {offsets = [0, 128], sizes = [8, 128], strides = [1, 1]} : vector<8x512xf32> to vector<8x128xf32>
    %367 = arith.negf %366 : vector<8x128xf32>
    %368 = math.exp %367 : vector<8x128xf32>
    %cst_130 = arith.constant 1.000000e+00 : f32
    %369 = vector.broadcast %cst_130 : f32 to vector<8x128xf32>
    %370 = arith.addf %369, %368 : vector<8x128xf32>
    %371 = arith.divf %369, %370 : vector<8x128xf32>
    %372 = vector.extract_strided_slice %359 {offsets = [0, 256], sizes = [8, 128], strides = [1, 1]} : vector<8x512xf32> to vector<8x128xf32>
    %373 = math.tanh %372 : vector<8x128xf32>
    %374 = vector.extract_strided_slice %359 {offsets = [0, 384], sizes = [8, 128], strides = [1, 1]} : vector<8x512xf32> to vector<8x128xf32>
    %375 = arith.negf %374 : vector<8x128xf32>
    %376 = math.exp %375 : vector<8x128xf32>
    %cst_131 = arith.constant 1.000000e+00 : f32
    %377 = vector.broadcast %cst_131 : f32 to vector<8x128xf32>
    %378 = arith.addf %377, %376 : vector<8x128xf32>
    %379 = arith.divf %377, %378 : vector<8x128xf32>
    %380 = arith.mulf %371, %327 : vector<8x128xf32>
    %381 = arith.mulf %365, %373 : vector<8x128xf32>
    %382 = arith.addf %380, %381 : vector<8x128xf32>
    %383 = math.tanh %382 : vector<8x128xf32>
    %384 = arith.mulf %379, %383 : vector<8x128xf32>
    %385 = arith.truncf %384 : vector<8x128xf32> to vector<8x128xbf16>
    %c0_132 = arith.constant 0 : index
    %c0_133 = arith.constant 0 : index
    %386 = vector.load %arg11[%c0_132, %c0_133] : memref<128x384xbf16, #tpu.memory_space<vmem>>, vector<128x384xbf16>
    %cst_134 = arith.constant dense<0.000000e+00> : vector<8x384xf32>
    %387 = tpu.matmul %385, %386, %cst_134 {dimension_numbers = #tpu.dot_dimension_numbers<[1], [0], [0], [1], [0, 0, 1, 1], [], []>} : vector<8x128xbf16>, vector<128x384xbf16>, vector<8x384xf32> -> vector<8x384xf32>
    %c0_135 = arith.constant 0 : index
    %c0_136 = arith.constant 0 : index
    %388 = vector.load %arg12[%c0_135, %c0_136] : memref<1x384xf32, #tpu.memory_space<vmem>>, vector<1x384xf32>
    %389 = vector.broadcast %388 : vector<1x384xf32> to vector<8x384xf32>
    %390 = arith.addf %387, %389 : vector<8x384xf32>
    %391 = math.tanh %390 : vector<8x384xf32>
    %392 = arith.truncf %391 : vector<8x384xf32> to vector<8x384xbf16>
    %c0_137 = arith.constant 0 : index
    %c0_138 = arith.constant 0 : index
    %393 = vector.load %arg13[%c0_137, %c0_138] : memref<384x256xbf16, #tpu.memory_space<vmem>>, vector<384x256xbf16>
    %cst_139 = arith.constant dense<0.000000e+00> : vector<8x256xf32>
    %394 = tpu.matmul %392, %393, %cst_139 {dimension_numbers = #tpu.dot_dimension_numbers<[1], [0], [0], [1], [0, 0, 1, 1], [], []>} : vector<8x384xbf16>, vector<384x256xbf16>, vector<8x256xf32> -> vector<8x256xf32>
    %c0_140 = arith.constant 0 : index
    %c0_141 = arith.constant 0 : index
    %395 = vector.load %arg14[%c0_140, %c0_141] : memref<1x256xf32, #tpu.memory_space<vmem>>, vector<1x256xf32>
    %396 = vector.broadcast %395 : vector<1x256xf32> to vector<8x256xf32>
    %397 = arith.addf %394, %396 : vector<8x256xf32>
    %398 = math.tanh %397 : vector<8x256xf32>
    %399 = arith.truncf %398 : vector<8x256xf32> to vector<8x256xbf16>
    %c0_142 = arith.constant 0 : index
    %c0_143 = arith.constant 0 : index
    %400 = vector.load %arg15[%c0_142, %c0_143] : memref<256x128xbf16, #tpu.memory_space<vmem>>, vector<256x128xbf16>
    %cst_144 = arith.constant dense<0.000000e+00> : vector<8x128xf32>
    %401 = tpu.matmul %399, %400, %cst_144 {dimension_numbers = #tpu.dot_dimension_numbers<[1], [0], [0], [1], [0, 0, 1, 1], [], []>} : vector<8x256xbf16>, vector<256x128xbf16>, vector<8x128xf32> -> vector<8x128xf32>
    %c0_145 = arith.constant 0 : index
    %c0_146 = arith.constant 0 : index
    %402 = vector.load %arg16[%c0_145, %c0_146] : memref<1x128xf32, #tpu.memory_space<vmem>>, vector<1x128xf32>
    %403 = vector.broadcast %402 : vector<1x128xf32> to vector<8x128xf32>
    %404 = arith.addf %401, %403 : vector<8x128xf32>
    %405 = arith.addf %350, %404 : vector<8x128xf32>
    %406 = arith.index_cast %c2_i32_125 : i32 to index
    %c0_147 = arith.constant 0 : index
    %c0_148 = arith.constant 0 : index
    %407 = vector.load %arg17[%406, %c0_147, %c0_148] : memref<7x8x128xf32, #tpu.memory_space<vmem>>, vector<1x8x128xf32>
    %408 = vector.shape_cast %407 : vector<1x8x128xf32> to vector<8x128xf32>
    %409 = vector.shape_cast %405 : vector<8x128xf32> to vector<1x8x128xf32>
    tpu.vector_store %arg17[%406, %c0_147, %c0_148], %409 {strides = array<i32>} : memref<7x8x128xf32, #tpu.memory_space<vmem>>, vector<1x8x128xf32>,
    %c3_i32_149 = arith.constant 3 : i32
    %410 = arith.truncf %384 : vector<8x128xf32> to vector<8x128xbf16>
    %411 = tpu.concatenate %399, %410 in 1 : vector<8x256xbf16>, vector<8x128xbf16> -> vector<8x384xbf16>
    %c0_150 = arith.constant 0 : index
    %c0_151 = arith.constant 0 : index
    %412 = vector.load %arg10[%c0_150, %c0_151] : memref<384x512xbf16, #tpu.memory_space<vmem>>, vector<384x512xbf16>
    %cst_152 = arith.constant dense<0.000000e+00> : vector<8x512xf32>
    %413 = tpu.matmul %411, %412, %cst_152 {dimension_numbers = #tpu.dot_dimension_numbers<[1], [0], [0], [1], [0, 0, 1, 1], [], []>} : vector<8x384xbf16>, vector<384x512xbf16>, vector<8x512xf32> -> vector<8x512xf32>
    %414 = arith.addf %245, %413 : vector<8x512xf32>
    %415 = vector.extract_strided_slice %414 {offsets = [0, 0], sizes = [8, 128], strides = [1, 1]} : vector<8x512xf32> to vector<8x128xf32>
    %416 = arith.negf %415 : vector<8x128xf32>
    %417 = math.exp %416 : vector<8x128xf32>
    %cst_153 = arith.constant 1.000000e+00 : f32
    %418 = vector.broadcast %cst_153 : f32 to vector<8x128xf32>
    %419 = arith.addf %418, %417 : vector<8x128xf32>
    %420 = arith.divf %418, %419 : vector<8x128xf32>
    %421 = vector.extract_strided_slice %414 {offsets = [0, 128], sizes = [8, 128], strides = [1, 1]} : vector<8x512xf32> to vector<8x128xf32>
    %422 = arith.negf %421 : vector<8x128xf32>
    %423 = math.exp %422 : vector<8x128xf32>
    %cst_154 = arith.constant 1.000000e+00 : f32
    %424 = vector.broadcast %cst_154 : f32 to vector<8x128xf32>
    %425 = arith.addf %424, %423 : vector<8x128xf32>
    %426 = arith.divf %424, %425 : vector<8x128xf32>
    %427 = vector.extract_strided_slice %414 {offsets = [0, 256], sizes = [8, 128], strides = [1, 1]} : vector<8x512xf32> to vector<8x128xf32>
    %428 = math.tanh %427 : vector<8x128xf32>
    %429 = vector.extract_strided_slice %414 {offsets = [0, 384], sizes = [8, 128], strides = [1, 1]} : vector<8x512xf32> to vector<8x128xf32>
    %430 = arith.negf %429 : vector<8x128xf32>
    %431 = math.exp %430 : vector<8x128xf32>
    %cst_155 = arith.constant 1.000000e+00 : f32
    %432 = vector.broadcast %cst_155 : f32 to vector<8x128xf32>
    %433 = arith.addf %432, %431 : vector<8x128xf32>
    %434 = arith.divf %432, %433 : vector<8x128xf32>
    %435 = arith.mulf %426, %382 : vector<8x128xf32>
    %436 = arith.mulf %420, %428 : vector<8x128xf32>
    %437 = arith.addf %435, %436 : vector<8x128xf32>
    %438 = math.tanh %437 : vector<8x128xf32>
    %439 = arith.mulf %434, %438 : vector<8x128xf32>
    %440 = arith.truncf %439 : vector<8x128xf32> to vector<8x128xbf16>
    %c0_156 = arith.constant 0 : index
    %c0_157 = arith.constant 0 : index
    %441 = vector.load %arg11[%c0_156, %c0_157] : memref<128x384xbf16, #tpu.memory_space<vmem>>, vector<128x384xbf16>
    %cst_158 = arith.constant dense<0.000000e+00> : vector<8x384xf32>
    %442 = tpu.matmul %440, %441, %cst_158 {dimension_numbers = #tpu.dot_dimension_numbers<[1], [0], [0], [1], [0, 0, 1, 1], [], []>} : vector<8x128xbf16>, vector<128x384xbf16>, vector<8x384xf32> -> vector<8x384xf32>
    %c0_159 = arith.constant 0 : index
    %c0_160 = arith.constant 0 : index
    %443 = vector.load %arg12[%c0_159, %c0_160] : memref<1x384xf32, #tpu.memory_space<vmem>>, vector<1x384xf32>
    %444 = vector.broadcast %443 : vector<1x384xf32> to vector<8x384xf32>
    %445 = arith.addf %442, %444 : vector<8x384xf32>
    %446 = math.tanh %445 : vector<8x384xf32>
    %447 = arith.truncf %446 : vector<8x384xf32> to vector<8x384xbf16>
    %c0_161 = arith.constant 0 : index
    %c0_162 = arith.constant 0 : index
    %448 = vector.load %arg13[%c0_161, %c0_162] : memref<384x256xbf16, #tpu.memory_space<vmem>>, vector<384x256xbf16>
    %cst_163 = arith.constant dense<0.000000e+00> : vector<8x256xf32>
    %449 = tpu.matmul %447, %448, %cst_163 {dimension_numbers = #tpu.dot_dimension_numbers<[1], [0], [0], [1], [0, 0, 1, 1], [], []>} : vector<8x384xbf16>, vector<384x256xbf16>, vector<8x256xf32> -> vector<8x256xf32>
    %c0_164 = arith.constant 0 : index
    %c0_165 = arith.constant 0 : index
    %450 = vector.load %arg14[%c0_164, %c0_165] : memref<1x256xf32, #tpu.memory_space<vmem>>, vector<1x256xf32>
    %451 = vector.broadcast %450 : vector<1x256xf32> to vector<8x256xf32>
    %452 = arith.addf %449, %451 : vector<8x256xf32>
    %453 = math.tanh %452 : vector<8x256xf32>
    %454 = arith.truncf %453 : vector<8x256xf32> to vector<8x256xbf16>
    %c0_166 = arith.constant 0 : index
    %c0_167 = arith.constant 0 : index
    %455 = vector.load %arg15[%c0_166, %c0_167] : memref<256x128xbf16, #tpu.memory_space<vmem>>, vector<256x128xbf16>
    %cst_168 = arith.constant dense<0.000000e+00> : vector<8x128xf32>
    %456 = tpu.matmul %454, %455, %cst_168 {dimension_numbers = #tpu.dot_dimension_numbers<[1], [0], [0], [1], [0, 0, 1, 1], [], []>} : vector<8x256xbf16>, vector<256x128xbf16>, vector<8x128xf32> -> vector<8x128xf32>
    %c0_169 = arith.constant 0 : index
    %c0_170 = arith.constant 0 : index
    %457 = vector.load %arg16[%c0_169, %c0_170] : memref<1x128xf32, #tpu.memory_space<vmem>>, vector<1x128xf32>
    %458 = vector.broadcast %457 : vector<1x128xf32> to vector<8x128xf32>
    %459 = arith.addf %456, %458 : vector<8x128xf32>
    %460 = arith.addf %405, %459 : vector<8x128xf32>
    %461 = arith.index_cast %c3_i32_149 : i32 to index
    %c0_171 = arith.constant 0 : index
    %c0_172 = arith.constant 0 : index
    %462 = vector.load %arg17[%461, %c0_171, %c0_172] : memref<7x8x128xf32, #tpu.memory_space<vmem>>, vector<1x8x128xf32>
    %463 = vector.shape_cast %462 : vector<1x8x128xf32> to vector<8x128xf32>
    %464 = vector.shape_cast %460 : vector<8x128xf32> to vector<1x8x128xf32>
    tpu.vector_store %arg17[%461, %c0_171, %c0_172], %464 {strides = array<i32>} : memref<7x8x128xf32, #tpu.memory_space<vmem>>, vector<1x8x128xf32>,
    %c4_i32_173 = arith.constant 4 : i32
    %465 = arith.truncf %439 : vector<8x128xf32> to vector<8x128xbf16>
    %466 = tpu.concatenate %454, %465 in 1 : vector<8x256xbf16>, vector<8x128xbf16> -> vector<8x384xbf16>
    %c0_174 = arith.constant 0 : index
    %c0_175 = arith.constant 0 : index
    %467 = vector.load %arg10[%c0_174, %c0_175] : memref<384x512xbf16, #tpu.memory_space<vmem>>, vector<384x512xbf16>
    %cst_176 = arith.constant dense<0.000000e+00> : vector<8x512xf32>
    %468 = tpu.matmul %466, %467, %cst_176 {dimension_numbers = #tpu.dot_dimension_numbers<[1], [0], [0], [1], [0, 0, 1, 1], [], []>} : vector<8x384xbf16>, vector<384x512xbf16>, vector<8x512xf32> -> vector<8x512xf32>
    %469 = arith.addf %245, %468 : vector<8x512xf32>
    %470 = vector.extract_strided_slice %469 {offsets = [0, 0], sizes = [8, 128], strides = [1, 1]} : vector<8x512xf32> to vector<8x128xf32>
    %471 = arith.negf %470 : vector<8x128xf32>
    %472 = math.exp %471 : vector<8x128xf32>
    %cst_177 = arith.constant 1.000000e+00 : f32
    %473 = vector.broadcast %cst_177 : f32 to vector<8x128xf32>
    %474 = arith.addf %473, %472 : vector<8x128xf32>
    %475 = arith.divf %473, %474 : vector<8x128xf32>
    %476 = vector.extract_strided_slice %469 {offsets = [0, 128], sizes = [8, 128], strides = [1, 1]} : vector<8x512xf32> to vector<8x128xf32>
    %477 = arith.negf %476 : vector<8x128xf32>
    %478 = math.exp %477 : vector<8x128xf32>
    %cst_178 = arith.constant 1.000000e+00 : f32
    %479 = vector.broadcast %cst_178 : f32 to vector<8x128xf32>
    %480 = arith.addf %479, %478 : vector<8x128xf32>
    %481 = arith.divf %479, %480 : vector<8x128xf32>
    %482 = vector.extract_strided_slice %469 {offsets = [0, 256], sizes = [8, 128], strides = [1, 1]} : vector<8x512xf32> to vector<8x128xf32>
    %483 = math.tanh %482 : vector<8x128xf32>
    %484 = vector.extract_strided_slice %469 {offsets = [0, 384], sizes = [8, 128], strides = [1, 1]} : vector<8x512xf32> to vector<8x128xf32>
    %485 = arith.negf %484 : vector<8x128xf32>
    %486 = math.exp %485 : vector<8x128xf32>
    %cst_179 = arith.constant 1.000000e+00 : f32
    %487 = vector.broadcast %cst_179 : f32 to vector<8x128xf32>
    %488 = arith.addf %487, %486 : vector<8x128xf32>
    %489 = arith.divf %487, %488 : vector<8x128xf32>
    %490 = arith.mulf %481, %437 : vector<8x128xf32>
    %491 = arith.mulf %475, %483 : vector<8x128xf32>
    %492 = arith.addf %490, %491 : vector<8x128xf32>
    %493 = math.tanh %492 : vector<8x128xf32>
    %494 = arith.mulf %489, %493 : vector<8x128xf32>
    %495 = arith.truncf %494 : vector<8x128xf32> to vector<8x128xbf16>
    %c0_180 = arith.constant 0 : index
    %c0_181 = arith.constant 0 : index
    %496 = vector.load %arg11[%c0_180, %c0_181] : memref<128x384xbf16, #tpu.memory_space<vmem>>, vector<128x384xbf16>
    %cst_182 = arith.constant dense<0.000000e+00> : vector<8x384xf32>
    %497 = tpu.matmul %495, %496, %cst_182 {dimension_numbers = #tpu.dot_dimension_numbers<[1], [0], [0], [1], [0, 0, 1, 1], [], []>} : vector<8x128xbf16>, vector<128x384xbf16>, vector<8x384xf32> -> vector<8x384xf32>
    %c0_183 = arith.constant 0 : index
    %c0_184 = arith.constant 0 : index
    %498 = vector.load %arg12[%c0_183, %c0_184] : memref<1x384xf32, #tpu.memory_space<vmem>>, vector<1x384xf32>
    %499 = vector.broadcast %498 : vector<1x384xf32> to vector<8x384xf32>
    %500 = arith.addf %497, %499 : vector<8x384xf32>
    %501 = math.tanh %500 : vector<8x384xf32>
    %502 = arith.truncf %501 : vector<8x384xf32> to vector<8x384xbf16>
    %c0_185 = arith.constant 0 : index
    %c0_186 = arith.constant 0 : index
    %503 = vector.load %arg13[%c0_185, %c0_186] : memref<384x256xbf16, #tpu.memory_space<vmem>>, vector<384x256xbf16>
    %cst_187 = arith.constant dense<0.000000e+00> : vector<8x256xf32>
    %504 = tpu.matmul %502, %503, %cst_187 {dimension_numbers = #tpu.dot_dimension_numbers<[1], [0], [0], [1], [0, 0, 1, 1], [], []>} : vector<8x384xbf16>, vector<384x256xbf16>, vector<8x256xf32> -> vector<8x256xf32>
    %c0_188 = arith.constant 0 : index
    %c0_189 = arith.constant 0 : index
    %505 = vector.load %arg14[%c0_188, %c0_189] : memref<1x256xf32, #tpu.memory_space<vmem>>, vector<1x256xf32>
    %506 = vector.broadcast %505 : vector<1x256xf32> to vector<8x256xf32>
    %507 = arith.addf %504, %506 : vector<8x256xf32>
    %508 = math.tanh %507 : vector<8x256xf32>
    %509 = arith.truncf %508 : vector<8x256xf32> to vector<8x256xbf16>
    %c0_190 = arith.constant 0 : index
    %c0_191 = arith.constant 0 : index
    %510 = vector.load %arg15[%c0_190, %c0_191] : memref<256x128xbf16, #tpu.memory_space<vmem>>, vector<256x128xbf16>
    %cst_192 = arith.constant dense<0.000000e+00> : vector<8x128xf32>
    %511 = tpu.matmul %509, %510, %cst_192 {dimension_numbers = #tpu.dot_dimension_numbers<[1], [0], [0], [1], [0, 0, 1, 1], [], []>} : vector<8x256xbf16>, vector<256x128xbf16>, vector<8x128xf32> -> vector<8x128xf32>
    %c0_193 = arith.constant 0 : index
    %c0_194 = arith.constant 0 : index
    %512 = vector.load %arg16[%c0_193, %c0_194] : memref<1x128xf32, #tpu.memory_space<vmem>>, vector<1x128xf32>
    %513 = vector.broadcast %512 : vector<1x128xf32> to vector<8x128xf32>
    %514 = arith.addf %511, %513 : vector<8x128xf32>
    %515 = arith.addf %460, %514 : vector<8x128xf32>
    %516 = arith.index_cast %c4_i32_173 : i32 to index
    %c0_195 = arith.constant 0 : index
    %c0_196 = arith.constant 0 : index
    %517 = vector.load %arg17[%516, %c0_195, %c0_196] : memref<7x8x128xf32, #tpu.memory_space<vmem>>, vector<1x8x128xf32>
    %518 = vector.shape_cast %517 : vector<1x8x128xf32> to vector<8x128xf32>
    %519 = vector.shape_cast %515 : vector<8x128xf32> to vector<1x8x128xf32>
    tpu.vector_store %arg17[%516, %c0_195, %c0_196], %519 {strides = array<i32>} : memref<7x8x128xf32, #tpu.memory_space<vmem>>, vector<1x8x128xf32>,
    %c5_i32_197 = arith.constant 5 : i32
    %520 = arith.truncf %494 : vector<8x128xf32> to vector<8x128xbf16>
    %521 = tpu.concatenate %509, %520 in 1 : vector<8x256xbf16>, vector<8x128xbf16> -> vector<8x384xbf16>
    %c0_198 = arith.constant 0 : index
    %c0_199 = arith.constant 0 : index
    %522 = vector.load %arg10[%c0_198, %c0_199] : memref<384x512xbf16, #tpu.memory_space<vmem>>, vector<384x512xbf16>
    %cst_200 = arith.constant dense<0.000000e+00> : vector<8x512xf32>
    %523 = tpu.matmul %521, %522, %cst_200 {dimension_numbers = #tpu.dot_dimension_numbers<[1], [0], [0], [1], [0, 0, 1, 1], [], []>} : vector<8x384xbf16>, vector<384x512xbf16>, vector<8x512xf32> -> vector<8x512xf32>
    %524 = arith.addf %245, %523 : vector<8x512xf32>
    %525 = vector.extract_strided_slice %524 {offsets = [0, 0], sizes = [8, 128], strides = [1, 1]} : vector<8x512xf32> to vector<8x128xf32>
    %526 = arith.negf %525 : vector<8x128xf32>
    %527 = math.exp %526 : vector<8x128xf32>
    %cst_201 = arith.constant 1.000000e+00 : f32
    %528 = vector.broadcast %cst_201 : f32 to vector<8x128xf32>
    %529 = arith.addf %528, %527 : vector<8x128xf32>
    %530 = arith.divf %528, %529 : vector<8x128xf32>
    %531 = vector.extract_strided_slice %524 {offsets = [0, 128], sizes = [8, 128], strides = [1, 1]} : vector<8x512xf32> to vector<8x128xf32>
    %532 = arith.negf %531 : vector<8x128xf32>
    %533 = math.exp %532 : vector<8x128xf32>
    %cst_202 = arith.constant 1.000000e+00 : f32
    %534 = vector.broadcast %cst_202 : f32 to vector<8x128xf32>
    %535 = arith.addf %534, %533 : vector<8x128xf32>
    %536 = arith.divf %534, %535 : vector<8x128xf32>
    %537 = vector.extract_strided_slice %524 {offsets = [0, 256], sizes = [8, 128], strides = [1, 1]} : vector<8x512xf32> to vector<8x128xf32>
    %538 = math.tanh %537 : vector<8x128xf32>
    %539 = vector.extract_strided_slice %524 {offsets = [0, 384], sizes = [8, 128], strides = [1, 1]} : vector<8x512xf32> to vector<8x128xf32>
    %540 = arith.negf %539 : vector<8x128xf32>
    %541 = math.exp %540 : vector<8x128xf32>
    %cst_203 = arith.constant 1.000000e+00 : f32
    %542 = vector.broadcast %cst_203 : f32 to vector<8x128xf32>
    %543 = arith.addf %542, %541 : vector<8x128xf32>
    %544 = arith.divf %542, %543 : vector<8x128xf32>
    %545 = arith.mulf %536, %492 : vector<8x128xf32>
    %546 = arith.mulf %530, %538 : vector<8x128xf32>
    %547 = arith.addf %545, %546 : vector<8x128xf32>
    %548 = math.tanh %547 : vector<8x128xf32>
    %549 = arith.mulf %544, %548 : vector<8x128xf32>
    %550 = arith.truncf %549 : vector<8x128xf32> to vector<8x128xbf16>
    %c0_204 = arith.constant 0 : index
    %c0_205 = arith.constant 0 : index
    %551 = vector.load %arg11[%c0_204, %c0_205] : memref<128x384xbf16, #tpu.memory_space<vmem>>, vector<128x384xbf16>
    %cst_206 = arith.constant dense<0.000000e+00> : vector<8x384xf32>
    %552 = tpu.matmul %550, %551, %cst_206 {dimension_numbers = #tpu.dot_dimension_numbers<[1], [0], [0], [1], [0, 0, 1, 1], [], []>} : vector<8x128xbf16>, vector<128x384xbf16>, vector<8x384xf32> -> vector<8x384xf32>
    %c0_207 = arith.constant 0 : index
    %c0_208 = arith.constant 0 : index
    %553 = vector.load %arg12[%c0_207, %c0_208] : memref<1x384xf32, #tpu.memory_space<vmem>>, vector<1x384xf32>
    %554 = vector.broadcast %553 : vector<1x384xf32> to vector<8x384xf32>
    %555 = arith.addf %552, %554 : vector<8x384xf32>
    %556 = math.tanh %555 : vector<8x384xf32>
    %557 = arith.truncf %556 : vector<8x384xf32> to vector<8x384xbf16>
    %c0_209 = arith.constant 0 : index
    %c0_210 = arith.constant 0 : index
    %558 = vector.load %arg13[%c0_209, %c0_210] : memref<384x256xbf16, #tpu.memory_space<vmem>>, vector<384x256xbf16>
    %cst_211 = arith.constant dense<0.000000e+00> : vector<8x256xf32>
    %559 = tpu.matmul %557, %558, %cst_211 {dimension_numbers = #tpu.dot_dimension_numbers<[1], [0], [0], [1], [0, 0, 1, 1], [], []>} : vector<8x384xbf16>, vector<384x256xbf16>, vector<8x256xf32> -> vector<8x256xf32>
    %c0_212 = arith.constant 0 : index
    %c0_213 = arith.constant 0 : index
    %560 = vector.load %arg14[%c0_212, %c0_213] : memref<1x256xf32, #tpu.memory_space<vmem>>, vector<1x256xf32>
    %561 = vector.broadcast %560 : vector<1x256xf32> to vector<8x256xf32>
    %562 = arith.addf %559, %561 : vector<8x256xf32>
    %563 = math.tanh %562 : vector<8x256xf32>
    %564 = arith.truncf %563 : vector<8x256xf32> to vector<8x256xbf16>
    %c0_214 = arith.constant 0 : index
    %c0_215 = arith.constant 0 : index
    %565 = vector.load %arg15[%c0_214, %c0_215] : memref<256x128xbf16, #tpu.memory_space<vmem>>, vector<256x128xbf16>
    %cst_216 = arith.constant dense<0.000000e+00> : vector<8x128xf32>
    %566 = tpu.matmul %564, %565, %cst_216 {dimension_numbers = #tpu.dot_dimension_numbers<[1], [0], [0], [1], [0, 0, 1, 1], [], []>} : vector<8x256xbf16>, vector<256x128xbf16>, vector<8x128xf32> -> vector<8x128xf32>
    %c0_217 = arith.constant 0 : index
    %c0_218 = arith.constant 0 : index
    %567 = vector.load %arg16[%c0_217, %c0_218] : memref<1x128xf32, #tpu.memory_space<vmem>>, vector<1x128xf32>
    %568 = vector.broadcast %567 : vector<1x128xf32> to vector<8x128xf32>
    %569 = arith.addf %566, %568 : vector<8x128xf32>
    %570 = arith.addf %515, %569 : vector<8x128xf32>
    %571 = arith.index_cast %c5_i32_197 : i32 to index
    %c0_219 = arith.constant 0 : index
    %c0_220 = arith.constant 0 : index
    %572 = vector.load %arg17[%571, %c0_219, %c0_220] : memref<7x8x128xf32, #tpu.memory_space<vmem>>, vector<1x8x128xf32>
    %573 = vector.shape_cast %572 : vector<1x8x128xf32> to vector<8x128xf32>
    %574 = vector.shape_cast %570 : vector<8x128xf32> to vector<1x8x128xf32>
    tpu.vector_store %arg17[%571, %c0_219, %c0_220], %574 {strides = array<i32>} : memref<7x8x128xf32, #tpu.memory_space<vmem>>, vector<1x8x128xf32>,
    %c6_i32_221 = arith.constant 6 : i32
    %575 = arith.truncf %549 : vector<8x128xf32> to vector<8x128xbf16>
    %576 = tpu.concatenate %564, %575 in 1 : vector<8x256xbf16>, vector<8x128xbf16> -> vector<8x384xbf16>
    %c0_222 = arith.constant 0 : index
    %c0_223 = arith.constant 0 : index
    %577 = vector.load %arg10[%c0_222, %c0_223] : memref<384x512xbf16, #tpu.memory_space<vmem>>, vector<384x512xbf16>
    %cst_224 = arith.constant dense<0.000000e+00> : vector<8x512xf32>
    %578 = tpu.matmul %576, %577, %cst_224 {dimension_numbers = #tpu.dot_dimension_numbers<[1], [0], [0], [1], [0, 0, 1, 1], [], []>} : vector<8x384xbf16>, vector<384x512xbf16>, vector<8x512xf32> -> vector<8x512xf32>
    %579 = arith.addf %245, %578 : vector<8x512xf32>
    %580 = vector.extract_strided_slice %579 {offsets = [0, 0], sizes = [8, 128], strides = [1, 1]} : vector<8x512xf32> to vector<8x128xf32>
    %581 = arith.negf %580 : vector<8x128xf32>
    %582 = math.exp %581 : vector<8x128xf32>
    %cst_225 = arith.constant 1.000000e+00 : f32
    %583 = vector.broadcast %cst_225 : f32 to vector<8x128xf32>
    %584 = arith.addf %583, %582 : vector<8x128xf32>
    %585 = arith.divf %583, %584 : vector<8x128xf32>
    %586 = vector.extract_strided_slice %579 {offsets = [0, 128], sizes = [8, 128], strides = [1, 1]} : vector<8x512xf32> to vector<8x128xf32>
    %587 = arith.negf %586 : vector<8x128xf32>
    %588 = math.exp %587 : vector<8x128xf32>
    %cst_226 = arith.constant 1.000000e+00 : f32
    %589 = vector.broadcast %cst_226 : f32 to vector<8x128xf32>
    %590 = arith.addf %589, %588 : vector<8x128xf32>
    %591 = arith.divf %589, %590 : vector<8x128xf32>
    %592 = vector.extract_strided_slice %579 {offsets = [0, 256], sizes = [8, 128], strides = [1, 1]} : vector<8x512xf32> to vector<8x128xf32>
    %593 = math.tanh %592 : vector<8x128xf32>
    %594 = vector.extract_strided_slice %579 {offsets = [0, 384], sizes = [8, 128], strides = [1, 1]} : vector<8x512xf32> to vector<8x128xf32>
    %595 = arith.negf %594 : vector<8x128xf32>
    %596 = math.exp %595 : vector<8x128xf32>
    %cst_227 = arith.constant 1.000000e+00 : f32
    %597 = vector.broadcast %cst_227 : f32 to vector<8x128xf32>
    %598 = arith.addf %597, %596 : vector<8x128xf32>
    %599 = arith.divf %597, %598 : vector<8x128xf32>
    %600 = arith.mulf %591, %547 : vector<8x128xf32>
    %601 = arith.mulf %585, %593 : vector<8x128xf32>
    %602 = arith.addf %600, %601 : vector<8x128xf32>
    %603 = math.tanh %602 : vector<8x128xf32>
    %604 = arith.mulf %599, %603 : vector<8x128xf32>
    %605 = arith.truncf %604 : vector<8x128xf32> to vector<8x128xbf16>
    %c0_228 = arith.constant 0 : index
    %c0_229 = arith.constant 0 : index
    %606 = vector.load %arg11[%c0_228, %c0_229] : memref<128x384xbf16, #tpu.memory_space<vmem>>, vector<128x384xbf16>
    %cst_230 = arith.constant dense<0.000000e+00> : vector<8x384xf32>
    %607 = tpu.matmul %605, %606, %cst_230 {dimension_numbers = #tpu.dot_dimension_numbers<[1], [0], [0], [1], [0, 0, 1, 1], [], []>} : vector<8x128xbf16>, vector<128x384xbf16>, vector<8x384xf32> -> vector<8x384xf32>
    %c0_231 = arith.constant 0 : index
    %c0_232 = arith.constant 0 : index
    %608 = vector.load %arg12[%c0_231, %c0_232] : memref<1x384xf32, #tpu.memory_space<vmem>>, vector<1x384xf32>
    %609 = vector.broadcast %608 : vector<1x384xf32> to vector<8x384xf32>
    %610 = arith.addf %607, %609 : vector<8x384xf32>
    %611 = math.tanh %610 : vector<8x384xf32>
    %612 = arith.truncf %611 : vector<8x384xf32> to vector<8x384xbf16>
    %c0_233 = arith.constant 0 : index
    %c0_234 = arith.constant 0 : index
    %613 = vector.load %arg13[%c0_233, %c0_234] : memref<384x256xbf16, #tpu.memory_space<vmem>>, vector<384x256xbf16>
    %cst_235 = arith.constant dense<0.000000e+00> : vector<8x256xf32>
    %614 = tpu.matmul %612, %613, %cst_235 {dimension_numbers = #tpu.dot_dimension_numbers<[1], [0], [0], [1], [0, 0, 1, 1], [], []>} : vector<8x384xbf16>, vector<384x256xbf16>, vector<8x256xf32> -> vector<8x256xf32>
    %c0_236 = arith.constant 0 : index
    %c0_237 = arith.constant 0 : index
    %615 = vector.load %arg14[%c0_236, %c0_237] : memref<1x256xf32, #tpu.memory_space<vmem>>, vector<1x256xf32>
    %616 = vector.broadcast %615 : vector<1x256xf32> to vector<8x256xf32>
    %617 = arith.addf %614, %616 : vector<8x256xf32>
    %618 = math.tanh %617 : vector<8x256xf32>
    %619 = arith.truncf %618 : vector<8x256xf32> to vector<8x256xbf16>
    %c0_238 = arith.constant 0 : index
    %c0_239 = arith.constant 0 : index
    %620 = vector.load %arg15[%c0_238, %c0_239] : memref<256x128xbf16, #tpu.memory_space<vmem>>, vector<256x128xbf16>
    %cst_240 = arith.constant dense<0.000000e+00> : vector<8x128xf32>
    %621 = tpu.matmul %619, %620, %cst_240 {dimension_numbers = #tpu.dot_dimension_numbers<[1], [0], [0], [1], [0, 0, 1, 1], [], []>} : vector<8x256xbf16>, vector<256x128xbf16>, vector<8x128xf32> -> vector<8x128xf32>
    %c0_241 = arith.constant 0 : index
    %c0_242 = arith.constant 0 : index
    %622 = vector.load %arg16[%c0_241, %c0_242] : memref<1x128xf32, #tpu.memory_space<vmem>>, vector<1x128xf32>
    %623 = vector.broadcast %622 : vector<1x128xf32> to vector<8x128xf32>
    %624 = arith.addf %621, %623 : vector<8x128xf32>
    %625 = arith.addf %570, %624 : vector<8x128xf32>
    %626 = arith.index_cast %c6_i32_221 : i32 to index
    %c0_243 = arith.constant 0 : index
    %c0_244 = arith.constant 0 : index
    %627 = vector.load %arg17[%626, %c0_243, %c0_244] : memref<7x8x128xf32, #tpu.memory_space<vmem>>, vector<1x8x128xf32>
    %628 = vector.shape_cast %627 : vector<1x8x128xf32> to vector<8x128xf32>
    %629 = vector.shape_cast %625 : vector<8x128xf32> to vector<1x8x128xf32>
    tpu.vector_store %arg17[%626, %c0_243, %c0_244], %629 {strides = array<i32>} : memref<7x8x128xf32, #tpu.memory_space<vmem>>, vector<1x8x128xf32>,
    %c6_i32_245 = arith.constant 6 : i32
    return
  }
  func.func @transform_0(%arg0: i32) -> (i32, i32) {
    %c0_i32 = arith.constant 0 : i32
    %c0_i32_0 = arith.constant 0 : i32
    return %arg0, %c0_i32 : i32, i32
  }
  func.func @transform_1(%arg0: i32) -> (i32, i32, i32) {
    %c0_i32 = arith.constant 0 : i32
    %c0_i32_0 = arith.constant 0 : i32
    %c0_i32_1 = arith.constant 0 : i32
    return %c0_i32, %arg0, %c0_i32_0 : i32, i32, i32
  }
  func.func @transform_2(%arg0: i32) -> (i32, i32) {
    %c0_i32 = arith.constant 0 : i32
    %c0_i32_0 = arith.constant 0 : i32
    %c0_i32_1 = arith.constant 0 : i32
    return %c0_i32, %c0_i32_0 : i32, i32
  }
  func.func @transform_3(%arg0: i32) -> (i32, i32) {
    %c0_i32 = arith.constant 0 : i32
    %c0_i32_0 = arith.constant 0 : i32
    %c0_i32_1 = arith.constant 0 : i32
    return %c0_i32, %c0_i32_0 : i32, i32
  }
  func.func @transform_4(%arg0: i32) -> (i32, i32) {
    %c0_i32 = arith.constant 0 : i32
    %c0_i32_0 = arith.constant 0 : i32
    %c0_i32_1 = arith.constant 0 : i32
    return %c0_i32, %c0_i32_0 : i32, i32
  }
  func.func @transform_5(%arg0: i32) -> (i32, i32) {
    %c0_i32 = arith.constant 0 : i32
    %c0_i32_0 = arith.constant 0 : i32
    %c0_i32_1 = arith.constant 0 : i32
    return %c0_i32, %c0_i32_0 : i32, i32
  }
  func.func @transform_6(%arg0: i32) -> (i32, i32) {
    %c0_i32 = arith.constant 0 : i32
    %c0_i32_0 = arith.constant 0 : i32
    %c0_i32_1 = arith.constant 0 : i32
    return %c0_i32, %c0_i32_0 : i32, i32
  }
  func.func @transform_7(%arg0: i32) -> (i32, i32) {
    %c0_i32 = arith.constant 0 : i32
    %c0_i32_0 = arith.constant 0 : i32
    %c0_i32_1 = arith.constant 0 : i32
    return %c0_i32, %c0_i32_0 : i32, i32
  }
  func.func @transform_8(%arg0: i32) -> (i32, i32) {
    %c0_i32 = arith.constant 0 : i32
    %c0_i32_0 = arith.constant 0 : i32
    %c0_i32_1 = arith.constant 0 : i32
    return %c0_i32, %c0_i32_0 : i32, i32
  }
  func.func @transform_9(%arg0: i32) -> (i32, i32) {
    %c0_i32 = arith.constant 0 : i32
    %c0_i32_0 = arith.constant 0 : i32
    %c0_i32_1 = arith.constant 0 : i32
    return %c0_i32, %c0_i32_0 : i32, i32
  }
  func.func @transform_10(%arg0: i32) -> (i32, i32) {
    %c0_i32 = arith.constant 0 : i32
    %c0_i32_0 = arith.constant 0 : i32
    %c0_i32_1 = arith.constant 0 : i32
    return %c0_i32, %c0_i32_0 : i32, i32
  }
  func.func @transform_11(%arg0: i32) -> (i32, i32) {
    %c0_i32 = arith.constant 0 : i32
    %c0_i32_0 = arith.constant 0 : i32
    %c0_i32_1 = arith.constant 0 : i32
    return %c0_i32, %c0_i32_0 : i32, i32
  }
  func.func @transform_12(%arg0: i32) -> (i32, i32) {
    %c0_i32 = arith.constant 0 : i32
    %c0_i32_0 = arith.constant 0 : i32
    %c0_i32_1 = arith.constant 0 : i32
    return %c0_i32, %c0_i32_0 : i32, i32
  }
  func.func @transform_13(%arg0: i32) -> (i32, i32) {
    %c0_i32 = arith.constant 0 : i32
    %c0_i32_0 = arith.constant 0 : i32
    %c0_i32_1 = arith.constant 0 : i32
    return %c0_i32, %c0_i32_0 : i32, i32
  }
  func.func @transform_14(%arg0: i32) -> (i32, i32) {
    %c0_i32 = arith.constant 0 : i32
    %c0_i32_0 = arith.constant 0 : i32
    %c0_i32_1 = arith.constant 0 : i32
    return %c0_i32, %c0_i32_0 : i32, i32
  }
  func.func @transform_15(%arg0: i32) -> (i32, i32) {
    %c0_i32 = arith.constant 0 : i32
    %c0_i32_0 = arith.constant 0 : i32
    %c0_i32_1 = arith.constant 0 : i32
    return %c0_i32, %c0_i32_0 : i32, i32
  }
  func.func @transform_16(%arg0: i32) -> (i32, i32, i32) {
    %c0_i32 = arith.constant 0 : i32
    %c0_i32_0 = arith.constant 0 : i32
    %c0_i32_1 = arith.constant 0 : i32
    return %c0_i32, %arg0, %c0_i32_0 : i32, i32, i32
  }
}

</mosaic_0001>

<bundles_post_ra>
// kernel: seq2seq_auto_forward.1
= control target key start
LH: loop header
LB: loop body
LE: loop exit
PB: predicated region body
PF: predicated region fallthrough
CT: control target
= control target key end

     0   :  { %s19492_s0 = inlined_call_operand.vmem [shape: f32[8,128], index: 0, kind: input, shape index: {}]   ;;  %s19493_s1 = inlined_call_operand.vmem [shape: f32[7,8,16], index: 1, kind: input, shape index: {}]   ;;  %s19494_s2 = inlined_call_operand.vmem [shape: bf16[16,512], index: 2, kind: input, shape index: {}]   ;;  %s19495_s3 = inlined_call_operand.vmem [shape: bf16[128,512], index: 3, kind: input, shape index: {}]   ;;  %s19496_s4 = inlined_call_operand.vmem [shape: f32[1,512], index: 4, kind: input, shape index: {}]   ;;  %s19497_s5 = inlined_call_operand.hbm [shape: bf16[128,512], index: 5, kind: input, shape index: {}]   ;;  %s19498_s6 = inlined_call_operand.hbm [shape: bf16[128,512], index: 6, kind: input, shape index: {}]   ;;  %s19499_s7 = inlined_call_operand.vmem [shape: f32[1,512], index: 7, kind: input, shape index: {}]   ;;  %s19500_s8 = inlined_call_operand.vmem [shape: f32[1,512], index: 8, kind: input, shape index: {}]   ;;  %s19501_s9 = inlined_call_operand.vmem [shape: bf16[384,512], index: 9, kind: input, shape index: {}]   ;;  %s19502_s10 = inlined_call_operand.hbm [shape: bf16[128,384], index: 10, kind: input, shape index: {}]   ;;  %s19503_s11 = inlined_call_operand.vmem [shape: f32[1,384], index: 11, kind: input, shape index: {}]   ;;  %s19504_s12 = inlined_call_operand.hbm [shape: bf16[384,256], index: 12, kind: input, shape index: {}]   ;;  %s19505_s13 = inlined_call_operand.vmem [shape: f32[1,256], index: 13, kind: input, shape index: {}]   ;;  %s19506_s14 = inlined_call_operand.hbm [shape: bf16[256,128], index: 14, kind: input, shape index: {}]   ;;  %s19507_s15 = inlined_call_operand.vmem [shape: f32[1,128], index: 15, kind: input, shape index: {}]   ;;  %s19508_s16 = inlined_call_operand.vmem [shape: f32[7,8,128], index: 16, kind: output, shape index: {}]  }
   0x1   :  { %19520 = sst [smem:[#allocation26_spill]] %s19492_s0 }
   0x2   :  { %21 = vsyncpa [#allocation4], 0 }
   0x3   :  { %22 = vsyncpa [#allocation6], 0 }
   0x4   :  { %23 = vsyncpa [#allocation9], 0  ;;  %s16455_s21 = smov [#allocation5]   ;;  %s16456_s23 = smov [#allocation8]  }
   0x5   :  { %s51_s22 = sshll.u32 %s16455_s21, 4  ;;  %s83_s24 = sshll.u32 %s16456_s23, 4  ;;  %s52_s22 = int_to_ptr.vmem [resolvable:$true] %s51_s22  ;;  %s84_s24 = int_to_ptr.vmem [resolvable:$true] %s83_s24 }
   0x6   :  { %s16357_s25 = scalar_lea.vmem %s52_s22, 4096  ;;  %p16362_p1 = scmp.lt.s32.totalorder %s52_s22, %s52_s22 }
   0x7   :  { %p16358_p0 = scmp.ne.s32.totalorder %s52_s22, %s16357_s25  ;;  %p16363_p2 = scmp.lt.s32.totalorder %s16357_s25, %s16357_s25 }
   0x9   :  { %p16364_p3 = por %p16363_p2, %p16362_p1 }
   0xb   :  { %p16365_p4 = pnand %p16364_p3, %p16358_p0 }
   0xd   :  { %16368 = shalt.err (!%p16365_p4)
}
   0xe   :  { %s16457_s26 = smov 256   ;;  %s16458_s27 = smov 16  }
   0xf   :  { %57 = dma.hbm_to_vmem [thread:$0]  %s19498_s6, 4096, %s52_s22, [#allocation6], %s16457_s26, %s16457_s26, %s16458_s27  }
  0x10   :  { %s16377_s30 = scalar_lea.vmem %s84_s24, 6144  ;;  %p16382_p6 = scmp.lt.s32.totalorder %s84_s24, %s84_s24 }
  0x11   :  { %p16378_p5 = scmp.ne.s32.totalorder %s84_s24, %s16377_s30  ;;  %p16383_p7 = scmp.lt.s32.totalorder %s16377_s30, %s16377_s30 }
  0x13   :  { %p16384_p8 = por %p16383_p7, %p16382_p6 }
  0x15   :  { %p16385_p9 = pnand %p16384_p8, %p16378_p5 }
  0x17   :  { %16388 = shalt.err (!%p16385_p9)
}
  0x18   :  { %s16459_s0 = smov 128   ;;  %s16460_s17 = smov 8  }
  0x19   :  { %89 = dma.hbm_to_vmem [thread:$0]  %s19504_s12, 6144, %s84_s24, [#allocation9], %s16459_s0, %s16459_s0, %s16460_s17  }
  0x1a   :  { %s16461_s20 = smov [#allocation3]   ;;  %s16462_s23 = smov [#allocation7]  }
  0x1b   :  { %s39_s21 = sshll.u32 %s16461_s20, 4  ;;  %s69_s25 = sshll.u32 %s16462_s23, 4  ;;  %s40_s21 = int_to_ptr.vmem [resolvable:$true] %s39_s21  ;;  %s70_s25 = int_to_ptr.vmem [resolvable:$true] %s69_s25 }
  0x1c   :  { %s16397_s6 = scalar_lea.vmem %s40_s21, 4096  ;;  %p16402_p11 = scmp.lt.s32.totalorder %s40_s21, %s40_s21 }
  0x1d   :  { %p16398_p10 = scmp.ne.s32.totalorder %s40_s21, %s16397_s6  ;;  %p16403_p12 = scmp.lt.s32.totalorder %s16397_s6, %s16397_s6 }
  0x1f   :  { %p16404_p13 = por %p16403_p12, %p16402_p11 }
  0x21   :  { %p16405_p0 = pnand %p16404_p13, %p16398_p10 }
  0x23   :  { %16408 = shalt.err (!%p16405_p0)
}
  0x24   :  { %45 = dma.hbm_to_vmem [thread:$0]  %s19497_s5, 4096, %s40_s21, [#allocation4], %s16457_s26, %s16457_s26, %s16458_s27  }
  0x25   :  { %s16417_s29 = scalar_lea.vmem %s70_s25, 3072  ;;  %p16422_p2 = scmp.lt.s32.totalorder %s70_s25, %s70_s25 }
  0x26   :  { %p16418_p1 = scmp.ne.s32.totalorder %s70_s25, %s16417_s29  ;;  %p16423_p3 = scmp.lt.s32.totalorder %s16417_s29, %s16417_s29 }
  0x28   :  { %p16424_p4 = por %p16423_p3, %p16422_p2 }
  0x2a   :  { %p16425_p5 = pnand %p16424_p4, %p16418_p1 }
  0x2c   :  { %16428 = shalt.err (!%p16425_p5)
}
  0x2d   :  { %s16463_s12 = smov 192   ;;  %s16464_s24 = smov 12  }
  0x2e   :  { %75 = dma.hbm_to_vmem [thread:$0]  %s19502_s10, 3072, %s70_s25, [#allocation6], %s16463_s12, %s16463_s12, %s16464_s24  }
  0x2f   :  { %s16465_s17 = smov [#allocation10]  }
  0x30   :  { %s97_s18 = sshll.u32 %s16465_s17, 4  ;;  %s98_s18 = int_to_ptr.vmem [resolvable:$true] %s97_s18 }
  0x31   :  { %s16437_s19 = scalar_lea.vmem %s98_s18, 2048  ;;  %p16442_p7 = scmp.lt.s32.totalorder %s98_s18, %s98_s18 }
  0x32   :  { %p16438_p6 = scmp.ne.s32.totalorder %s98_s18, %s16437_s19  ;;  %p16443_p8 = scmp.lt.s32.totalorder %s16437_s19, %s16437_s19 }
  0x34   :  { %p16444_p9 = por %p16443_p8, %p16442_p7 }
  0x36   :  { %p16445_p10 = pnand %p16444_p9, %p16438_p6 }
  0x38   :  { %16448 = shalt.err (!%p16445_p10)
}
  0x39   :  { %s16466_s5 = smov 64   ;;  %s16467_s26 = smov 4  }
  0x3a   :  { %103 = dma.hbm_to_vmem [thread:$0]  %s19506_s14, 2048, %s98_s18, [#allocation9], %s16466_s5, %s16466_s5, %s16467_s26  }
  0x3b   :  { %16449 = dma.done.wait [#allocation4], 4096  }
  0x3c   :  { %16450 = vsyncadd [#allocation4], 4294963200 }
  0x3d   :  { %16451 = dma.done.wait [#allocation6], 7168  }
  0x3e   :  { %16452 = vsyncadd [#allocation6], 4294960128 }
  0x3f   :  { %16453 = dma.done.wait [#allocation9], 8192  }
  0x40   :  { %16454 = vsyncadd [#allocation9], 4294959104  ;;  %v19510_v0 = vmov 0   ;;  %v14136_v1 = vld [vmem:[%s19494_s2 + $0x4] ss:$16 sps:$4 sm:$0xff]   ;;  %v123_v6 = vld [vmem:[%s19493_s1 + $0x8] sm:$0xff]  ;;  %v139_v48 = vlaneseq }
  0x41   :  { %224 = vmatprep.mubr.bf16.mxu0 %v19510_v0  ;;  %295 = vmatprep.mubr.bf16.mxu1 %v19510_v0  ;;  %v14138_v2 = vld [vmem:[%s19494_s2 + $0xc] ss:$16 sps:$4 sm:$0xff]   ;;  %v14140_v3 = vld [vmem:[%s19494_s2] ss:$16 sps:$4 sm:$0xff]   ;;  %v14141_v4 = vld [vmem:[%s19494_s2 + $0x8] ss:$16 sps:$4 sm:$0xff]  }
  0x42   :  { %206 = vmatprep.subr.bf16.mxu0 %v14136_v1  ;;  %v122_v5 = vld [vmem:[%s19493_s1] sm:$0xff]  ;;  %277 = vmatprep.subr.bf16.mxu1 %v14138_v2  ;;  %vm179_vm0 = vcmask 130048   ;;  %v16599_v9 = vld [vmem:[%s19495_s3 + $0xec] ss:$16 sps:$4 sm:$0xff]   ;;  %v16609_v11 = vld [vmem:[%s19495_s3 + $0xe8] ss:$16 sps:$4 sm:$0xff]  }
  0x43   :  { %207 = vmatpush1.bf16.msra.mxu0 %v14140_v3  ;;  %278 = vmatpush1.bf16.msra.mxu1 %v14141_v4  ;;  %v129_v7 = vpack.c.bf16 %v123_v6, %v122_v5  ;;  %v16594_v8 = vld [vmem:[%s19495_s3 + $0xe4] ss:$16 sps:$4 sm:$0xff]   ;;  %v16604_v10 = vld [vmem:[%s19495_s3 + $0xe0] ss:$16 sps:$4 sm:$0xff]   ;;  %v16622_v13 = vld [vmem:[%s19495_s3 + $0xcc] ss:$16 sps:$4 sm:$0xff]  }
  0x44   :  { %558 = vmatprep.subr.bf16.mxu0 %v16594_v8  ;;  %v16615_v12 = vld [vmem:[%s19495_s3 + $0xc4] ss:$16 sps:$4 sm:$0xff]   ;;  %599 = vmatprep.subr.bf16.mxu1 %v16599_v9  ;;  %v16629_v14 = vld [vmem:[%s19495_s3 + $0xc0] ss:$16 sps:$4 sm:$0xff]   ;;  %v16634_v15 = vld [vmem:[%s19495_s3 + $0xc8] ss:$16 sps:$4 sm:$0xff]  }
  0x45   :  { %v124_v16 = vld [vmem:[%s19493_s1 + $0x10] sm:$0xff]  ;;  %v125_v17 = vld [vmem:[%s19493_s1 + $0x18] sm:$0xff]  ;;  %v126_v26 = vld [vmem:[%s19493_s1 + $0x20] sm:$0xff]  ;;  %v140_v49 = vshrl.u32 %v139_v48, 7  ;;  %s19542_s2 = sld [smem:[#allocation26_spill]]  ;;  %vm16470_vm1 = vmmov 0  }
  0x46   :  { %12412 = vmatmul.mubr.msk.bf16.vlgmr.msra.gmra.mxu0 %vm179_vm0, %v129_v7  ;;  %12416 = vmatmul.mubr.msk.bf16.vlgmr.msra.gmra.mxu1 %vm179_vm0, %v129_v7  ;;  %v16649_v18 = vld [vmem:[%s19495_s3 + $0xa4] ss:$16 sps:$4 sm:$0xff]   ;;  %v130_v19 = vpack.c.bf16 %v125_v17, %v124_v16  ;;  %v16655_v20 = vld [vmem:[%s19495_s3 + $0xac] ss:$16 sps:$4 sm:$0xff]   ;;  %v16660_v21 = vld [vmem:[%s19495_s3 + $0xa0] ss:$16 sps:$4 sm:$0xff]  }
  0x47   :  { %559 = vmatpush1.bf16.msra.mxu0 %v16604_v10  ;;  %600 = vmatpush1.bf16.msra.mxu1 %v16609_v11  ;;  %v16666_v22 = vld [vmem:[%s19495_s3 + $0xa8] ss:$16 sps:$4 sm:$0xff]   ;;  %v16673_v23 = vld [vmem:[%s19495_s3 + $0x84] ss:$16 sps:$4 sm:$0xff]   ;;  %v16679_v24 = vld [vmem:[%s19495_s3 + $0x8c] ss:$16 sps:$4 sm:$0xff]  }
  0x48   :  { %560 = vmatprep.subr.bf16.mxu0 %v16615_v12  ;;  %601 = vmatprep.subr.bf16.mxu1 %v16622_v13  ;;  %v16684_v25 = vld [vmem:[%s19495_s3 + $0x80] ss:$16 sps:$4 sm:$0xff]   ;;  %v127_v27 = vld [vmem:[%s19493_s1 + $0x28] sm:$0xff]  ;;  %v16706_v29 = vld [vmem:[%s19495_s3 + $0x64] ss:$16 sps:$4 sm:$0xff]   ;;  %v16796_v50 = vsub.s32 2, %v140_v49 }
  0x49   :  { %234 = vmatprep.mubr.bf16.mxu0 %v19510_v0  ;;  %305 = vmatprep.mubr.bf16.mxu1 %v19510_v0  ;;  %v16701_v28 = vld [vmem:[%s19495_s3 + $0x88] ss:$16 sps:$4 sm:$0xff]   ;;  %v16713_v30 = vld [vmem:[%s19495_s3 + $0x6c] ss:$16 sps:$4 sm:$0xff]   ;;  %v131_v31 = vpack.c.bf16 %v127_v27, %v126_v26  ;;  %v14170_v32 = vld [vmem:[%s19495_s3 + $0x60] ss:$16 sps:$4 sm:$0xff]  }
  0x4a   :  { %v14171_v33 = vld [vmem:[%s19495_s3 + $0x68] ss:$16 sps:$4 sm:$0xff]   ;;  %v14172_v34 = vld [vmem:[%s19495_s3 + $0x44] ss:$16 sps:$4 sm:$0xff]   ;;  %v14174_v35 = vld [vmem:[%s19495_s3 + $0x4c] ss:$16 sps:$4 sm:$0xff]  }
  0x4b   :  { %561 = vmatpush1.bf16.msra.mxu0 %v16629_v14  ;;  %602 = vmatpush1.bf16.msra.mxu1 %v16634_v15  ;;  %v14176_v36 = vld [vmem:[%s19495_s3 + $0x40] ss:$16 sps:$4 sm:$0xff]   ;;  %v14177_v38 = vld [vmem:[%s19495_s3 + $0x48] ss:$16 sps:$4 sm:$0xff]   ;;  %v14178_v39 = vld [vmem:[%s19495_s3 + $0x24] ss:$16 sps:$4 sm:$0xff]  }
  0x4c   :  { %562 = vmatprep.subr.bf16.mxu0 %v16649_v18  ;;  %603 = vmatprep.subr.bf16.mxu1 %v16655_v20  ;;  %v128_v37 = vld [vmem:[%s19493_s1 + $0x30] sm:$0xff]  ;;  %v14180_v40 = vld [vmem:[%s19495_s3 + $0x2c] ss:$16 sps:$4 sm:$0xff]   ;;  %v14183_v43 = vld [vmem:[%s19495_s3 + $0x28] ss:$16 sps:$4 sm:$0xff]   ;;  %19521 = vst [vmem:[#allocation14_spill] sm:$0xff] %v16796_v50 }
  0x4d   :  { %v14182_v41 = vld [vmem:[%s19495_s3 + $0x20] ss:$16 sps:$4 sm:$0xff]   ;;  %v132_v42 = vpack.c.bf16 %v128_v37, %v128_v37  ;;  %v14184_v44 = vld [vmem:[%s19495_s3 + $0x4] ss:$16 sps:$4 sm:$0xff]   ;;  %v14186_v45 = vld [vmem:[%s19495_s3 + $0xc] ss:$16 sps:$4 sm:$0xff]  }
  0x4e   :  { %12413 = vmatmul.mubr.msk.bf16.gmra.mxu0 %vm179_vm0, %v130_v19  ;;  %12417 = vmatmul.mubr.msk.bf16.gmra.mxu1 %vm179_vm0, %v130_v19  ;;  %v14188_v46 = vld [vmem:[%s19495_s3] ss:$16 sps:$4 sm:$0xff]   ;;  %v14189_v47 = vld [vmem:[%s19495_s3 + $0x8] ss:$16 sps:$4 sm:$0xff]   ;;  %v16801_v52 = vsub.s32 0, %v140_v49  ;;  %v16811_v61 = vsub.s32 1, %v140_v49 }
  0x4f   :  { %563 = vmatpush1.bf16.msra.mxu0 %v16660_v21  ;;  %244 = vmatprep.mubr.bf16.mxu0 %v19510_v0  ;;  %v137_v51 = vld [vmem:[%s19496_s4] sm:$0xf]  ;;  %v16813_v62 = vsub.s32 3, %v140_v49 }
  0x50   :  { %604 = vmatpush1.bf16.msra.mxu1 %v16666_v22  ;;  %564 = vmatprep.subr.bf16.mxu0 %v16673_v23  ;;  %19522 = vst [vmem:[#allocation15_spill] sm:$0xff] %v16801_v52  ;;  %v16806_v55 = vrot.slane %v137_v51, %v16796_v50  ;;  %v142_v58 = vrot.slane %v137_v51, %v16801_v52  ;;  %19523 = vst [vmem:[#allocation16_spill] sm:$0xff] %v16811_v61 }
  0x51   :  { %605 = vmatprep.subr.bf16.mxu1 %v16679_v24  ;;  %315 = vmatprep.mubr.bf16.mxu1 %v19510_v0  ;;  %19524 = vst [vmem:[#allocation17_spill] sm:$0xff] %v16813_v62  ;;  %v16825_v6 = vrot.slane %v137_v51, %v16811_v61  ;;  %v16828_v7 = vrot.slane %v137_v51, %v16813_v62 }
  0x53   :  { %565 = vmatpush1.bf16.msra.mxu0 %v16684_v25 }
  0x54   :  { %606 = vmatpush1.bf16.msra.mxu1 %v16701_v28  ;;  %566 = vmatprep.subr.bf16.mxu0 %v16706_v29 }
  0x55   :  { %607 = vmatprep.subr.bf16.mxu1 %v16713_v30 }
  0x56   :  { %12414 = vmatmul.mubr.msk.bf16.gmra.mxu0 %vm179_vm0, %v131_v31  ;;  %12418 = vmatmul.mubr.msk.bf16.gmra.mxu1 %vm179_vm0, %v131_v31 }
  0x57   :  { %567 = vmatpush1.bf16.msra.mxu0 %v14170_v32  ;;  %254 = vmatprep.mubr.bf16.mxu0 %v19510_v0 }
  0x58   :  { %608 = vmatpush1.bf16.msra.mxu1 %v14171_v33  ;;  %568 = vmatprep.subr.bf16.mxu0 %v14172_v34 }
  0x59   :  { %609 = vmatprep.subr.bf16.mxu1 %v14174_v35  ;;  %325 = vmatprep.mubr.bf16.mxu1 %v19510_v0 }
  0x5b   :  { %569 = vmatpush1.bf16.msra.mxu0 %v14176_v36 }
  0x5c   :  { %610 = vmatpush1.bf16.msra.mxu1 %v14177_v38  ;;  %570 = vmatprep.subr.bf16.mxu0 %v14178_v39 }
  0x5d   :  { %611 = vmatprep.subr.bf16.mxu1 %v14180_v40 }
  0x5e   :  { %12415 = vmatmul.mubr.msk.bf16.gmra.mxu0 %vm179_vm0, %v132_v42  ;;  %12419 = vmatmul.mubr.msk.bf16.gmra.mxu1 %vm179_vm0, %v132_v42 }
  0x5f   :  { %571 = vmatpush1.bf16.msra.mxu0 %v14182_v41  ;;  %590 = vmatprep.mubr.bf16.mxu0 %v19510_v0 }
  0x60   :  { %612 = vmatpush1.bf16.msra.mxu1 %v14183_v43  ;;  %572 = vmatprep.subr.bf16.mxu0 %v14184_v44 }
  0x61   :  { %613 = vmatprep.subr.bf16.mxu1 %v14186_v45  ;;  %631 = vmatprep.mubr.bf16.mxu1 %v19510_v0 }
  0x63   :  { %573 = vmatpush1.bf16.msra.mxu0 %v14188_v46 }
  0x64   :  { %614 = vmatpush1.bf16.msra.mxu1 %v14189_v47  ;;  %674 = vmatprep.subr.bf16.mxu0 %v16594_v8 }
  0x65   :  { %715 = vmatprep.subr.bf16.mxu1 %v16599_v9 }
  0x66   :  { %591 = vmatmul.mubr.bf16.vlgmr.msra.gmra.mxu0 %v19510_v0 }
  0x67   :  { %632 = vmatmul.mubr.bf16.vlgmr.msra.gmra.mxu1 %v19510_v0  ;;  %675 = vmatpush1.bf16.msra.mxu0 %v16604_v10 }
  0x68   :  { %716 = vmatpush1.bf16.msra.mxu1 %v16609_v11  ;;  %676 = vmatprep.subr.bf16.mxu0 %v16615_v12 }
  0x69   :  { %717 = vmatprep.subr.bf16.mxu1 %v16622_v13  ;;  %706 = vmatprep.mubr.bf16.mxu0 %v19510_v0 }
  0x6a   :  { %747 = vmatprep.mubr.bf16.mxu1 %v19510_v0 }
  0x6b   :  { %677 = vmatpush1.bf16.msra.mxu0 %v16629_v14 }
  0x6c   :  { %718 = vmatpush1.bf16.msra.mxu1 %v16634_v15  ;;  %678 = vmatprep.subr.bf16.mxu0 %v16649_v18 }
  0x6d   :  { %719 = vmatprep.subr.bf16.mxu1 %v16655_v20 }
  0x6f   :  { %679 = vmatpush1.bf16.msra.mxu0 %v16660_v21 }
  0x70   :  { %720 = vmatpush1.bf16.msra.mxu1 %v16666_v22  ;;  %680 = vmatprep.subr.bf16.mxu0 %v16673_v23 }
  0x71   :  { %721 = vmatprep.subr.bf16.mxu1 %v16679_v24 }
  0x73   :  { %681 = vmatpush1.bf16.msra.mxu0 %v16684_v25 }
  0x74   :  { %722 = vmatpush1.bf16.msra.mxu1 %v16701_v28  ;;  %682 = vmatprep.subr.bf16.mxu0 %v16706_v29 }
  0x75   :  { %723 = vmatprep.subr.bf16.mxu1 %v16713_v30 }
  0x77   :  { %683 = vmatpush1.bf16.msra.mxu0 %v14170_v32 }
  0x78   :  { %724 = vmatpush1.bf16.msra.mxu1 %v14171_v33  ;;  %684 = vmatprep.subr.bf16.mxu0 %v14172_v34 }
  0x79   :  { %725 = vmatprep.subr.bf16.mxu1 %v14174_v35 }
  0x7b   :  { %685 = vmatpush1.bf16.msra.mxu0 %v14176_v36 }
  0x7c   :  { %726 = vmatpush1.bf16.msra.mxu1 %v14177_v38  ;;  %686 = vmatprep.subr.bf16.mxu0 %v14178_v39 }
  0x7d   :  { %727 = vmatprep.subr.bf16.mxu1 %v14180_v40 }
  0x7f   :  { %687 = vmatpush1.bf16.msra.mxu0 %v14182_v41 }
  0x80   :  { %728 = vmatpush1.bf16.msra.mxu1 %v14183_v43  ;;  %688 = vmatprep.subr.bf16.mxu0 %v14184_v44 }
  0x81   :  { %729 = vmatprep.subr.bf16.mxu1 %v14186_v45 }
  0x83   :  { %689 = vmatpush1.bf16.msra.mxu0 %v14188_v46 }
  0x84   :  { %730 = vmatpush1.bf16.msra.mxu1 %v14189_v47  ;;  %790 = vmatprep.subr.bf16.mxu0 %v16594_v8 }
  0x85   :  { %831 = vmatprep.subr.bf16.mxu1 %v16599_v9 }
 0x106   :  { %v226_v53 = vpop.f32.mrf.mxu0  ;;  %v16803_v54 = vpop.f32.mrf.mxu1 }
 0x107   :  { %v227_v46 = vadd.f32 %v226_v53, %v142_v58 }
 0x108   :  { %v228_v56 = vpop.f32.mrf.mxu0  ;;  %v16808_v57 = vpop.f32.mrf.mxu1 }
 0x109   :  { %v229_v48 = vadd.f32 %v228_v56, %v16825_v6  ;;  %v298_v56 = vadd.f32 %v16803_v54, %v16806_v55 }
 0x10a   :  { %v230_v59 = vpop.f32.mrf.mxu0  ;;  %v301_v60 = vpop.f32.mrf.mxu1 }
 0x10b   :  { %v16815_v63 = vadd.f32 %v230_v59, %v142_v58  ;;  %v16818_v1 = vadd.f32 %v301_v60, %v16806_v55 }
 0x10c   :  { %v16820_v2 = vpop.f32.mrf.mxu0  ;;  %v16822_v3 = vpop.f32.mrf.mxu1 }
 0x10e   :  { %v236_v4 = vpop.f32.mrf.mxu0  ;;  %v307_v5 = vpop.f32.mrf.mxu1 }
 0x10f   :  { %v16830_v8 = vadd.f32 %v236_v4, %v142_v58  ;;  %v16833_v9 = vadd.f32 %v307_v5, %v16806_v55 }
 0x110   :  { %v238_v10 = vpop.f32.mrf.mxu0  ;;  %v309_v11 = vpop.f32.mrf.mxu1 }
 0x111   :  { %v16836_v12 = vadd.f32 %v238_v10, %v16825_v6  ;;  %v16839_v13 = vadd.f32 %v309_v11, %v16828_v7 }
 0x112   :  { %v240_v14 = vpop.f32.mrf.mxu0  ;;  %v311_v15 = vpop.f32.mrf.mxu1 }
 0x113   :  { %v16841_v16 = vadd.f32 %v240_v14, %v142_v58  ;;  %v16844_v17 = vadd.f32 %v311_v15, %v16806_v55 }
 0x114   :  { %v16846_v18 = vpop.f32.mrf.mxu0  ;;  %v16848_v19 = vpop.f32.mrf.mxu1 }
 0x116   :  { %v246_v20 = vpop.f32.mrf.mxu0  ;;  %v317_v21 = vpop.f32.mrf.mxu1 }
 0x117   :  { %v16850_v22 = vadd.f32 %v246_v20, %v142_v58  ;;  %v16853_v23 = vadd.f32 %v317_v21, %v16806_v55  ;;  %v300_v21 = vadd.f32 %v16808_v57, %v16828_v7 }
 0x118   :  { %v248_v24 = vpop.f32.mrf.mxu0  ;;  %v319_v25 = vpop.f32.mrf.mxu1 }
 0x119   :  { %v16856_v26 = vadd.f32 %v248_v24, %v16825_v6  ;;  %v16859_v27 = vadd.f32 %v319_v25, %v16828_v7 }
 0x11a   :  { %v250_v28 = vpop.f32.mrf.mxu0  ;;  %v321_v29 = vpop.f32.mrf.mxu1 }
 0x11b   :  { %v16861_v30 = vadd.f32 %v250_v28, %v142_v58  ;;  %v16864_v31 = vadd.f32 %v321_v29, %v16806_v55 }
 0x11c   :  { %v16866_v32 = vpop.f32.mrf.mxu0  ;;  %v16868_v33 = vpop.f32.mrf.mxu1 }
 0x11d   :  { %19525 = vst [vmem:[#allocation18_spill] sm:$0xff] %v16861_v30  ;;  %19526 = vst [vmem:[#allocation19_spill] sm:$0xff] %v16864_v31 }
 0x11e   :  { %19527 = vst [vmem:[#allocation20_spill] sm:$0xff] %v16866_v32  ;;  %19528 = vst [vmem:[#allocation21_spill] sm:$0xff] %v16868_v33  ;;  %v256_v34 = vpop.f32.mrf.mxu0  ;;  %v327_v35 = vpop.f32.mrf.mxu1 }
 0x11f   :  { %v16870_v36 = vadd.f32 %v256_v34, %v142_v58  ;;  %v16873_v37 = vadd.f32 %v327_v35, %v16806_v55 }
 0x120   :  { %v258_v38 = vpop.f32.mrf.mxu0  ;;  %v329_v39 = vpop.f32.mrf.mxu1 }
 0x121   :  { %19529 = vst [vmem:[#allocation22_spill] sm:$0xff] %v16870_v36  ;;  %19530 = vst [vmem:[#allocation23_spill] sm:$0xff] %v16873_v37  ;;  %v16876_v40 = vadd.f32 %v258_v38, %v16825_v6  ;;  %v16879_v41 = vadd.f32 %v329_v39, %v16828_v7 }
 0x122   :  { %v260_v42 = vpop.f32.mrf.mxu0  ;;  %v331_v43 = vpop.f32.mrf.mxu1 }
 0x123   :  { %19531 = vst [vmem:[#allocation24_spill] sm:$0xff] %v16876_v40  ;;  %19532 = vst [vmem:[#allocation25_spill] sm:$0xff] %v16879_v41 }
 0x124   :  { %v261_v44 = vpop.f32.mrf.mxu0  ;;  %v332_v45 = vpop.f32.mrf.mxu1 }
 0x126   :  { %v592_v47 = vpop.f32.mrf.mxu0 }
 0x127   :  { %v640_v49 = vadd.f32 %v592_v47, %v227_v46  ;;  %v633_v51 = vpop.f32.mrf.mxu1 }
 0x128   :  { %v594_v59 = vpop.f32.mrf.mxu0  ;;  %v642_v25 = vadd.f32 %v633_v51, %v298_v56  ;;  %v16286_v51 = vld [vmem:[%s19495_s3 + $0xc4] ss:$16 sps:$4 sm:$0xff]  }
 0x129   :  { %v12452_v60 = vmul.f32 -1.442695, %v640_v49  ;;  %v641_v4 = vadd.f32 %v594_v59, %v229_v48  ;;  %v635_v5 = vpop.f32.mrf.mxu1  ;;  %v16284_v48 = vld [vmem:[%s19495_s3 + $0xe0] ss:$16 sps:$4 sm:$0xff]   ;;  %v16285_v49 = vld [vmem:[%s19495_s3 + $0xe8] ss:$16 sps:$4 sm:$0xff]  }
 0x12a   :  { %v596_v10 = vpop.f32.mrf.mxu0  ;;  %v643_v53 = vadd.f32 %v635_v5, %v300_v21  ;;  %v16287_v59 = vld [vmem:[%s19495_s3 + $0xcc] ss:$16 sps:$4 sm:$0xff]   ;;  %v16290_v5 = vld [vmem:[%s19495_s3 + $0xa4] ss:$16 sps:$4 sm:$0xff]   ;;  %v16296_v21 = vld [vmem:[%s19495_s3 + $0x80] ss:$16 sps:$4 sm:$0xff]  }
 0x12b   :  { %15990 = vpow2.f32 %v12452_v60  ;;  %v12453_v11 = vmul.f32 -1.442695, %v641_v4  ;;  %v637_v14 = vpop.f32.mrf.mxu1  ;;  %v16288_v60 = vld [vmem:[%s19495_s3 + $0xc0] ss:$16 sps:$4 sm:$0xff]   ;;  %v16289_v4 = vld [vmem:[%s19495_s3 + $0xc8] ss:$16 sps:$4 sm:$0xff]  }
 0x12c   :  { %v597_v15 = vpop.f32.mrf.mxu0  ;;  %v12454_v58 = vmul.f32 -1.442695, %v643_v53  ;;  %v16291_v10 = vld [vmem:[%s19495_s3 + $0xac] ss:$16 sps:$4 sm:$0xff]   ;;  %v16293_v14 = vld [vmem:[%s19495_s3 + $0xa8] ss:$16 sps:$4 sm:$0xff]  }
 0x12d   :  { %15992 = vpow2.f32 %v12453_v11  ;;  %v638_v20 = vpop.f32.mrf.mxu1  ;;  %v16292_v11 = vld [vmem:[%s19495_s3 + $0xa0] ss:$16 sps:$4 sm:$0xff]   ;;  %v16294_v15 = vld [vmem:[%s19495_s3 + $0x84] ss:$16 sps:$4 sm:$0xff]   ;;  %v16297_v53 = vld [vmem:[%s19495_s3 + $0x88] ss:$16 sps:$4 sm:$0xff]  }
 0x12e   :  { %15994 = vpow2.f32 %v12454_v58  ;;  %v16295_v20 = vld [vmem:[%s19495_s3 + $0x8c] ss:$16 sps:$4 sm:$0xff]   ;;  %v16298_v56 = vld [vmem:[%s19495_s3 + $0x64] ss:$16 sps:$4 sm:$0xff]  }
 0x12f   :  { %v16299_v58 = vld [vmem:[%s19495_s3 + $0x6c] ss:$16 sps:$4 sm:$0xff]  }
 0x138   :  { %v15991_v24 = vpop.eup %15990 }
 0x139   :  { %v647_v28 = vadd.f32 1.0, %v15991_v24  ;;  %v16300_v24 = vld [vmem:[%s19495_s3 + $0x60] ss:$16 sps:$4 sm:$0xff]  }
 0x13a   :  { %v15993_v29 = vpop.eup %15992 }
 0x13b   :  { %15996 = vrcp.f32 %v647_v28  ;;  %v653_v34 = vadd.f32 1.0, %v15993_v29  ;;  %v15995_v35 = vpop.eup %15994  ;;  %v16302_v28 = vld [vmem:[%s19495_s3 + $0x44] ss:$16 sps:$4 sm:$0xff]   ;;  %v16303_v29 = vld [vmem:[%s19495_s3 + $0x4c] ss:$16 sps:$4 sm:$0xff]  }
 0x13c   :  { %15998 = vtanh.f32 %v642_v25  ;;  %v660_v43 = vadd.f32 1.0, %v15995_v35  ;;  %v16301_v25 = vld [vmem:[%s19495_s3 + $0x68] ss:$16 sps:$4 sm:$0xff]  }
 0x13d   :  { %16000 = vrcp.f32 %v653_v34  ;;  %v16304_v34 = vld [vmem:[%s19495_s3 + $0x40] ss:$16 sps:$4 sm:$0xff]   ;;  %v16305_v35 = vld [vmem:[%s19495_s3 + $0x48] ss:$16 sps:$4 sm:$0xff]  }
 0x13e   :  { %16002 = vrcp.f32 %v660_v43  ;;  %v16309_v43 = vld [vmem:[%s19495_s3 + $0x28] ss:$16 sps:$4 sm:$0xff]  }
 0x148   :  { %v15997_v38 = vpop.eup %15996 }
 0x149   :  { %v15999_v39 = vpop.eup %15998 }
 0x14a   :  { %v16001_v42 = vpop.eup %16000  ;;  %v664_v44 = vmul.f32 %v15999_v39, %v15997_v38  ;;  %v16306_v38 = vld [vmem:[%s19495_s3 + $0x24] ss:$16 sps:$4 sm:$0xff]   ;;  %v16307_v39 = vld [vmem:[%s19495_s3 + $0x2c] ss:$16 sps:$4 sm:$0xff]  }
 0x14b   :  { %v663_v57 = vmul.f32 0.0, %v16001_v42  ;;  %v16003_v54 = vpop.eup %16002  ;;  %v16308_v42 = vld [vmem:[%s19495_s3 + $0x20] ss:$16 sps:$4 sm:$0xff]  }
 0x14d   :  { %v16886_v45 = vadd.f32 %v664_v44, %v663_v57  ;;  %v16310_v57 = vld [vmem:[%s19495_s3 + $0x4] ss:$16 sps:$4 sm:$0xff]   ;;  %v16311_v44 = vld [vmem:[%s19495_s3 + $0xc] ss:$16 sps:$4 sm:$0xff]  }
 0x14f   :  { %16004 = vtanh.f32 %v16886_v45 }
 0x15c   :  { %v16005_v55 = vpop.eup %16004 }
 0x15d   :  { %v667_v46 = vmul.f32 %v16005_v55, %v16003_v54  ;;  %v16312_v54 = vld [vmem:[%s19495_s3] ss:$16 sps:$4 sm:$0xff]   ;;  %v16313_v55 = vld [vmem:[%s19495_s3 + $0x8] ss:$16 sps:$4 sm:$0xff]  }
 0x15f   :  { %v673_v47 = vpack.c.bf16 %v667_v46, %v667_v46  ;;  %v16314_v46 = vld [vmem:[%s19495_s3 + $0xe4] ss:$16 sps:$4 sm:$0xff]  }
 0x161   :  { %707 = vmatmul.mubr.bf16.vlgmr.msra.gmra.mxu0 %v673_v47  ;;  %748 = vmatmul.mubr.bf16.vlgmr.msra.gmra.mxu1 %v673_v47  ;;  %v16315_v47 = vld [vmem:[%s19495_s3 + $0xec] ss:$16 sps:$4 sm:$0xff]  }
 0x162   :  { %791 = vmatpush1.bf16.msra.mxu0 %v16284_v48  ;;  %832 = vmatpush1.bf16.msra.mxu1 %v16285_v49 }
 0x163   :  { %792 = vmatprep.subr.bf16.mxu0 %v16286_v51  ;;  %833 = vmatprep.subr.bf16.mxu1 %v16287_v59  ;;  %v233_v51 = vadd.f32 %v16820_v2, %v16825_v6 }
 0x164   :  { %822 = vmatprep.mubr.bf16.mxu0 %v19510_v0  ;;  %863 = vmatprep.mubr.bf16.mxu1 %v19510_v0 }
 0x166   :  { %793 = vmatpush1.bf16.msra.mxu0 %v16288_v60  ;;  %834 = vmatpush1.bf16.msra.mxu1 %v16289_v4  ;;  %v304_v60 = vadd.f32 %v16822_v3, %v16828_v7 }
 0x167   :  { %794 = vmatprep.subr.bf16.mxu0 %v16290_v5  ;;  %835 = vmatprep.subr.bf16.mxu1 %v16291_v10 }
 0x16a   :  { %795 = vmatpush1.bf16.msra.mxu0 %v16292_v11  ;;  %836 = vmatpush1.bf16.msra.mxu1 %v16293_v14 }
 0x16b   :  { %796 = vmatprep.subr.bf16.mxu0 %v16294_v15  ;;  %837 = vmatprep.subr.bf16.mxu1 %v16295_v20 }
 0x16e   :  { %797 = vmatpush1.bf16.msra.mxu0 %v16296_v21  ;;  %838 = vmatpush1.bf16.msra.mxu1 %v16297_v53 }
 0x16f   :  { %798 = vmatprep.subr.bf16.mxu0 %v16298_v56  ;;  %839 = vmatprep.subr.bf16.mxu1 %v16299_v58 }
 0x172   :  { %799 = vmatpush1.bf16.msra.mxu0 %v16300_v24  ;;  %840 = vmatpush1.bf16.msra.mxu1 %v16301_v25 }
 0x173   :  { %800 = vmatprep.subr.bf16.mxu0 %v16302_v28  ;;  %841 = vmatprep.subr.bf16.mxu1 %v16303_v29 }
 0x176   :  { %801 = vmatpush1.bf16.msra.mxu0 %v16304_v34  ;;  %842 = vmatpush1.bf16.msra.mxu1 %v16305_v35 }
 0x177   :  { %802 = vmatprep.subr.bf16.mxu0 %v16306_v38  ;;  %843 = vmatprep.subr.bf16.mxu1 %v16307_v39 }
 0x17a   :  { %803 = vmatpush1.bf16.msra.mxu0 %v16308_v42  ;;  %844 = vmatpush1.bf16.msra.mxu1 %v16309_v43 }
 0x17b   :  { %804 = vmatprep.subr.bf16.mxu0 %v16310_v57  ;;  %845 = vmatprep.subr.bf16.mxu1 %v16311_v44 }
 0x17e   :  { %805 = vmatpush1.bf16.msra.mxu0 %v16312_v54  ;;  %846 = vmatpush1.bf16.msra.mxu1 %v16313_v55  ;;  %v17000_v55 = vld [vmem:[%s19495_s3 + $0xe0] ss:$16 sps:$4 sm:$0xff]  }
 0x17f   :  { %906 = vmatprep.subr.bf16.mxu0 %v16314_v46  ;;  %947 = vmatprep.subr.bf16.mxu1 %v16315_v47  ;;  %v17012_v46 = vld [vmem:[%s19495_s3 + $0xc4] ss:$16 sps:$4 sm:$0xff]   ;;  %v17018_v47 = vld [vmem:[%s19495_s3 + $0xcc] ss:$16 sps:$4 sm:$0xff]  }
 0x221   :  { %v708_v48 = vpop.f32.mrf.mxu0  ;;  %v749_v49 = vpop.f32.mrf.mxu1 }
 0x222   :  { %v756_v59 = vadd.f32 %v708_v48, %v16815_v63  ;;  %v758_v2 = vadd.f32 %v749_v49, %v16818_v1  ;;  %v17026_v48 = vld [vmem:[%s19495_s3 + $0xc0] ss:$16 sps:$4 sm:$0xff]   ;;  %v17032_v49 = vld [vmem:[%s19495_s3 + $0xc8] ss:$16 sps:$4 sm:$0xff]  }
 0x223   :  { %v710_v4 = vpop.f32.mrf.mxu0  ;;  %v751_v5 = vpop.f32.mrf.mxu1 }
 0x224   :  { %v12455_v10 = vmul.f32 -1.442695, %v756_v59  ;;  %v757_v11 = vadd.f32 %v710_v4, %v233_v51  ;;  %v759_v14 = vadd.f32 %v751_v5, %v304_v60  ;;  %v17038_v51 = vld [vmem:[%s19495_s3 + $0xa4] ss:$16 sps:$4 sm:$0xff]   ;;  %v17044_v59 = vld [vmem:[%s19495_s3 + $0xac] ss:$16 sps:$4 sm:$0xff]  }
 0x225   :  { %v712_v15 = vpop.f32.mrf.mxu0  ;;  %v753_v20 = vpop.f32.mrf.mxu1  ;;  %v17050_v60 = vld [vmem:[%s19495_s3 + $0xa0] ss:$16 sps:$4 sm:$0xff]   ;;  %v17056_v4 = vld [vmem:[%s19495_s3 + $0xa8] ss:$16 sps:$4 sm:$0xff]   ;;  %v17062_v5 = vld [vmem:[%s19495_s3 + $0x84] ss:$16 sps:$4 sm:$0xff]  }
 0x226   :  { %16006 = vpow2.f32 %v12455_v10  ;;  %v12456_v21 = vmul.f32 -1.442695, %v757_v11  ;;  %v12457_v58 = vmul.f32 -1.442695, %v759_v14  ;;  %v17068_v10 = vld [vmem:[%s19495_s3 + $0x8c] ss:$16 sps:$4 sm:$0xff]  }
 0x227   :  { %v713_v53 = vpop.f32.mrf.mxu0  ;;  %v754_v56 = vpop.f32.mrf.mxu1  ;;  %v17074_v11 = vld [vmem:[%s19495_s3 + $0x80] ss:$16 sps:$4 sm:$0xff]   ;;  %v17080_v14 = vld [vmem:[%s19495_s3 + $0x88] ss:$16 sps:$4 sm:$0xff]   ;;  %v17086_v15 = vld [vmem:[%s19495_s3 + $0x64] ss:$16 sps:$4 sm:$0xff]  }
 0x228   :  { %16008 = vpow2.f32 %v12456_v21  ;;  %v17092_v20 = vld [vmem:[%s19495_s3 + $0x6c] ss:$16 sps:$4 sm:$0xff]   ;;  %v17098_v21 = vld [vmem:[%s19495_s3 + $0x60] ss:$16 sps:$4 sm:$0xff]   ;;  %v17104_v53 = vld [vmem:[%s19495_s3 + $0x68] ss:$16 sps:$4 sm:$0xff]  }
 0x229   :  { %16010 = vtanh.f32 %v758_v2  ;;  %v17110_v56 = vld [vmem:[%s19495_s3 + $0x44] ss:$16 sps:$4 sm:$0xff]   ;;  %v17122_v2 = vld [vmem:[%s19495_s3 + $0x40] ss:$16 sps:$4 sm:$0xff]  }
 0x22a   :  { %16012 = vpow2.f32 %v12457_v58  ;;  %v17116_v58 = vld [vmem:[%s19495_s3 + $0x4c] ss:$16 sps:$4 sm:$0xff]  }
 0x233   :  { %v16007_v24 = vpop.eup %16006 }
 0x234   :  { %v763_v63 = vadd.f32 1.0, %v16007_v24  ;;  %v17128_v24 = vld [vmem:[%s19495_s3 + $0x48] ss:$16 sps:$4 sm:$0xff]  }
 0x235   :  { %v16009_v25 = vpop.eup %16008 }
 0x236   :  { %16014 = vrcp.f32 %v763_v63  ;;  %v769_v3 = vadd.f32 1.0, %v16009_v25  ;;  %v16011_v28 = vpop.eup %16010  ;;  %v17134_v63 = vld [vmem:[%s19495_s3 + $0x24] ss:$16 sps:$4 sm:$0xff]   ;;  %v17140_v25 = vld [vmem:[%s19495_s3 + $0x2c] ss:$16 sps:$4 sm:$0xff]  }
 0x237   :  { %v16013_v29 = vpop.eup %16012 }
 0x238   :  { %16016 = vrcp.f32 %v769_v3  ;;  %v776_v39 = vadd.f32 1.0, %v16013_v29  ;;  %v17146_v3 = vld [vmem:[%s19495_s3 + $0x20] ss:$16 sps:$4 sm:$0xff]   ;;  %v17158_v29 = vld [vmem:[%s19495_s3 + $0x4] ss:$16 sps:$4 sm:$0xff]  }
 0x23a   :  { %16018 = vrcp.f32 %v776_v39  ;;  %v17182_v39 = vld [vmem:[%s19495_s3 + $0xe4] ss:$16 sps:$4 sm:$0xff]  }
 0x243   :  { %v16015_v34 = vpop.eup %16014 }
 0x244   :  { %v780_v35 = vmul.f32 %v16015_v34, %v16011_v28  ;;  %v17152_v28 = vld [vmem:[%s19495_s3 + $0x28] ss:$16 sps:$4 sm:$0xff]   ;;  %v17164_v34 = vld [vmem:[%s19495_s3 + $0xc] ss:$16 sps:$4 sm:$0xff]  }
 0x245   :  { %v16017_v38 = vpop.eup %16016 }
 0x246   :  { %v779_v42 = vmul.f32 %v16017_v38, %v16886_v45  ;;  %v17006_v45 = vld [vmem:[%s19495_s3 + $0xe8] ss:$16 sps:$4 sm:$0xff]  }
 0x247   :  { %v16019_v1 = vpop.eup %16018  ;;  %v17176_v38 = vld [vmem:[%s19495_s3 + $0x8] ss:$16 sps:$4 sm:$0xff]  }
 0x248   :  { %v16994_v43 = vadd.f32 %v780_v35, %v779_v42  ;;  %v17170_v35 = vld [vmem:[%s19495_s3] ss:$16 sps:$4 sm:$0xff]   ;;  %v17188_v42 = vld [vmem:[%s19495_s3 + $0xec] ss:$16 sps:$4 sm:$0xff]  }
 0x24a   :  { %16020 = vtanh.f32 %v16994_v43 }
 0x257   :  { %v16021_v57 = vpop.eup %16020 }
 0x258   :  { %v783_v44 = vmul.f32 %v16021_v57, %v16019_v1 }
 0x25a   :  { %v789_v54 = vpack.c.bf16 %v783_v44, %v783_v44 }
 0x25c   :  { %823 = vmatmul.mubr.bf16.vlgmr.msra.gmra.mxu0 %v789_v54  ;;  %864 = vmatmul.mubr.bf16.vlgmr.msra.gmra.mxu1 %v789_v54 }
 0x25d   :  { %907 = vmatpush1.bf16.msra.mxu0 %v17000_v55  ;;  %948 = vmatpush1.bf16.msra.mxu1 %v17006_v45 }
 0x25e   :  { %908 = vmatprep.subr.bf16.mxu0 %v17012_v46  ;;  %949 = vmatprep.subr.bf16.mxu1 %v17018_v47 }
 0x25f   :  { %938 = vmatprep.mubr.bf16.mxu0 %v19510_v0  ;;  %979 = vmatprep.mubr.bf16.mxu1 %v19510_v0 }
 0x261   :  { %909 = vmatpush1.bf16.msra.mxu0 %v17026_v48  ;;  %950 = vmatpush1.bf16.msra.mxu1 %v17032_v49 }
 0x262   :  { %910 = vmatprep.subr.bf16.mxu0 %v17038_v51  ;;  %951 = vmatprep.subr.bf16.mxu1 %v17044_v59 }
 0x265   :  { %911 = vmatpush1.bf16.msra.mxu0 %v17050_v60  ;;  %952 = vmatpush1.bf16.msra.mxu1 %v17056_v4 }
 0x266   :  { %912 = vmatprep.subr.bf16.mxu0 %v17062_v5  ;;  %953 = vmatprep.subr.bf16.mxu1 %v17068_v10 }
 0x269   :  { %913 = vmatpush1.bf16.msra.mxu0 %v17074_v11  ;;  %954 = vmatpush1.bf16.msra.mxu1 %v17080_v14 }
 0x26a   :  { %914 = vmatprep.subr.bf16.mxu0 %v17086_v15  ;;  %955 = vmatprep.subr.bf16.mxu1 %v17092_v20 }
 0x26d   :  { %915 = vmatpush1.bf16.msra.mxu0 %v17098_v21  ;;  %956 = vmatpush1.bf16.msra.mxu1 %v17104_v53 }
 0x26e   :  { %916 = vmatprep.subr.bf16.mxu0 %v17110_v56  ;;  %957 = vmatprep.subr.bf16.mxu1 %v17116_v58 }
 0x271   :  { %917 = vmatpush1.bf16.msra.mxu0 %v17122_v2  ;;  %958 = vmatpush1.bf16.msra.mxu1 %v17128_v24 }
 0x272   :  { %918 = vmatprep.subr.bf16.mxu0 %v17134_v63  ;;  %959 = vmatprep.subr.bf16.mxu1 %v17140_v25 }
 0x275   :  { %919 = vmatpush1.bf16.msra.mxu0 %v17146_v3  ;;  %960 = vmatpush1.bf16.msra.mxu1 %v17152_v28 }
 0x276   :  { %920 = vmatprep.subr.bf16.mxu0 %v17158_v29  ;;  %961 = vmatprep.subr.bf16.mxu1 %v17164_v34 }
 0x279   :  { %921 = vmatpush1.bf16.msra.mxu0 %v17170_v35  ;;  %962 = vmatpush1.bf16.msra.mxu1 %v17176_v38 }
 0x27a   :  { %1022 = vmatprep.subr.bf16.mxu0 %v17182_v39  ;;  %1063 = vmatprep.subr.bf16.mxu1 %v17188_v42 }
 0x31c   :  { %v824_v1 = vpop.f32.mrf.mxu0  ;;  %v865_v57 = vpop.f32.mrf.mxu1 }
 0x31d   :  { %v872_v44 = vadd.f32 %v824_v1, %v16830_v8  ;;  %v874_v31 = vadd.f32 %v865_v57, %v16833_v9 }
 0x31e   :  { %v826_v54 = vpop.f32.mrf.mxu0  ;;  %v867_v0 = vpop.f32.mrf.mxu1 }
 0x31f   :  { %v12458_v50 = vmul.f32 -1.442695, %v872_v44  ;;  %v873_v62 = vadd.f32 %v826_v54, %v16836_v12  ;;  %v875_v36 = vadd.f32 %v867_v0, %v16839_v13 }
 0x320   :  { %v828_v61 = vpop.f32.mrf.mxu0  ;;  %v869_v52 = vpop.f32.mrf.mxu1 }
 0x321   :  { %16022 = vpow2.f32 %v12458_v50  ;;  %v12459_v37 = vmul.f32 -1.442695, %v873_v62  ;;  %v12460_v33 = vmul.f32 -1.442695, %v875_v36 }
 0x322   :  { %v829_v41 = vpop.f32.mrf.mxu0  ;;  %v870_v40 = vpop.f32.mrf.mxu1 }
 0x323   :  { %16024 = vpow2.f32 %v12459_v37  ;;  %v243_v41 = vadd.f32 %v16846_v18, %v16825_v6 }
 0x324   :  { %16026 = vtanh.f32 %v874_v31 }
 0x325   :  { %16028 = vpow2.f32 %v12460_v33 }
 0x32e   :  { %v16023_v30 = vpop.eup %16022 }
 0x32f   :  { %v879_v32 = vadd.f32 1.0, %v16023_v30 }
 0x330   :  { %v16025_v8 = vpop.eup %16024 }
 0x331   :  { %16030 = vrcp.f32 %v879_v32  ;;  %v885_v1 = vadd.f32 1.0, %v16025_v8  ;;  %v16027_v61 = vpop.eup %16026  ;;  %v19533_v32 = vmov 0  }
 0x332   :  { %v16029_v52 = vpop.eup %16028 }
 0x333   :  { %16032 = vrcp.f32 %v885_v1  ;;  %v892_v40 = vadd.f32 1.0, %v16029_v52 }
 0x335   :  { %16034 = vrcp.f32 %v892_v40 }
 0x33e   :  { %v16031_v50 = vpop.eup %16030 }
 0x33f   :  { %v896_v62 = vmul.f32 %v16031_v50, %v16027_v61 }
 0x340   :  { %v16033_v12 = vpop.eup %16032 }
 0x341   :  { %v895_v37 = vmul.f32 %v16033_v12, %v16994_v43  ;;  %v314_v12 = vadd.f32 %v16848_v19, %v16828_v7 }
 0x342   :  { %v16035_v9 = vpop.eup %16034 }
 0x343   :  { %v17196_v0 = vadd.f32 %v896_v62, %v895_v37 }
 0x345   :  { %16036 = vtanh.f32 %v17196_v0 }
 0x352   :  { %v16037_v13 = vpop.eup %16036 }
 0x353   :  { %v899_v30 = vmul.f32 %v16037_v13, %v16035_v9 }
 0x355   :  { %v905_v31 = vpack.c.bf16 %v899_v30, %v899_v30 }
 0x357   :  { %939 = vmatmul.mubr.bf16.vlgmr.msra.gmra.mxu0 %v905_v31  ;;  %980 = vmatmul.mubr.bf16.vlgmr.msra.gmra.mxu1 %v905_v31 }
 0x358   :  { %1023 = vmatpush1.bf16.msra.mxu0 %v17000_v55  ;;  %1064 = vmatpush1.bf16.msra.mxu1 %v17006_v45 }
 0x359   :  { %1024 = vmatprep.subr.bf16.mxu0 %v17012_v46  ;;  %1065 = vmatprep.subr.bf16.mxu1 %v17018_v47 }
 0x35a   :  { %1054 = vmatprep.mubr.bf16.mxu0 %v19533_v32  ;;  %1095 = vmatprep.mubr.bf16.mxu1 %v19533_v32 }
 0x35c   :  { %1025 = vmatpush1.bf16.msra.mxu0 %v17026_v48  ;;  %1066 = vmatpush1.bf16.msra.mxu1 %v17032_v49 }
 0x35d   :  { %1026 = vmatprep.subr.bf16.mxu0 %v17038_v51  ;;  %1067 = vmatprep.subr.bf16.mxu1 %v17044_v59 }
 0x360   :  { %1027 = vmatpush1.bf16.msra.mxu0 %v17050_v60  ;;  %1068 = vmatpush1.bf16.msra.mxu1 %v17056_v4 }
 0x361   :  { %1028 = vmatprep.subr.bf16.mxu0 %v17062_v5  ;;  %1069 = vmatprep.subr.bf16.mxu1 %v17068_v10 }
 0x364   :  { %1029 = vmatpush1.bf16.msra.mxu0 %v17074_v11  ;;  %1070 = vmatpush1.bf16.msra.mxu1 %v17080_v14 }
 0x365   :  { %1030 = vmatprep.subr.bf16.mxu0 %v17086_v15  ;;  %1071 = vmatprep.subr.bf16.mxu1 %v17092_v20 }
 0x368   :  { %1031 = vmatpush1.bf16.msra.mxu0 %v17098_v21  ;;  %1072 = vmatpush1.bf16.msra.mxu1 %v17104_v53 }
 0x369   :  { %1032 = vmatprep.subr.bf16.mxu0 %v17110_v56  ;;  %1073 = vmatprep.subr.bf16.mxu1 %v17116_v58 }
 0x36c   :  { %1033 = vmatpush1.bf16.msra.mxu0 %v17122_v2  ;;  %1074 = vmatpush1.bf16.msra.mxu1 %v17128_v24 }
 0x36d   :  { %1034 = vmatprep.subr.bf16.mxu0 %v17134_v63  ;;  %1075 = vmatprep.subr.bf16.mxu1 %v17140_v25 }
 0x370   :  { %1035 = vmatpush1.bf16.msra.mxu0 %v17146_v3  ;;  %1076 = vmatpush1.bf16.msra.mxu1 %v17152_v28 }
 0x371   :  { %1036 = vmatprep.subr.bf16.mxu0 %v17158_v29  ;;  %1077 = vmatprep.subr.bf16.mxu1 %v17164_v34 }
 0x374   :  { %1037 = vmatpush1.bf16.msra.mxu0 %v17170_v35  ;;  %1078 = vmatpush1.bf16.msra.mxu1 %v17176_v38 }
 0x375   :  { %1138 = vmatprep.subr.bf16.mxu0 %v17182_v39  ;;  %1179 = vmatprep.subr.bf16.mxu1 %v17188_v42 }
 0x417   :  { %v940_v33 = vpop.f32.mrf.mxu0  ;;  %v981_v36 = vpop.f32.mrf.mxu1 }
 0x418   :  { %v988_v43 = vadd.f32 %v940_v33, %v16841_v16  ;;  %v990_v37 = vadd.f32 %v981_v36, %v16844_v17 }
 0x419   :  { %v942_v57 = vpop.f32.mrf.mxu0  ;;  %v983_v44 = vpop.f32.mrf.mxu1 }
 0x41a   :  { %v12461_v54 = vmul.f32 -1.442695, %v988_v43  ;;  %v989_v8 = vadd.f32 %v942_v57, %v243_v41  ;;  %v991_v40 = vadd.f32 %v983_v44, %v314_v12 }
 0x41b   :  { %v944_v1 = vpop.f32.mrf.mxu0  ;;  %v985_v61 = vpop.f32.mrf.mxu1 }
 0x41c   :  { %16038 = vpow2.f32 %v12461_v54  ;;  %v12462_v52 = vmul.f32 -1.442695, %v989_v8  ;;  %v12463_v18 = vmul.f32 -1.442695, %v991_v40 }
 0x41d   :  { %v945_v50 = vpop.f32.mrf.mxu0  ;;  %v986_v62 = vpop.f32.mrf.mxu1 }
 0x41e   :  { %16040 = vpow2.f32 %v12462_v52 }
 0x41f   :  { %16042 = vtanh.f32 %v990_v37 }
 0x420   :  { %16044 = vpow2.f32 %v12463_v18 }
 0x429   :  { %v16039_v9 = vpop.eup %16038 }
 0x42a   :  { %v995_v16 = vadd.f32 1.0, %v16039_v9 }
 0x42b   :  { %v16041_v13 = vpop.eup %16040 }
 0x42c   :  { %16046 = vrcp.f32 %v995_v16  ;;  %v1001_v30 = vadd.f32 1.0, %v16041_v13  ;;  %v16043_v31 = vpop.eup %16042 }
 0x42d   :  { %v16045_v33 = vpop.eup %16044 }
 0x42e   :  { %16048 = vrcp.f32 %v1001_v30  ;;  %v1008_v54 = vadd.f32 1.0, %v16045_v33 }
 0x430   :  { %16050 = vrcp.f32 %v1008_v54 }
 0x439   :  { %v16047_v41 = vpop.eup %16046 }
 0x43a   :  { %v1012_v43 = vmul.f32 %v16047_v41, %v16043_v31 }
 0x43b   :  { %v16049_v57 = vpop.eup %16048 }
 0x43c   :  { %v1011_v19 = vmul.f32 %v16049_v57, %v17196_v0 }
 0x43d   :  { %v16051_v17 = vpop.eup %16050 }
 0x43e   :  { %v17240_v44 = vadd.f32 %v1012_v43, %v1011_v19 }
 0x440   :  { %16052 = vtanh.f32 %v17240_v44 }
 0x44d   :  { %v16053_v36 = vpop.eup %16052 }
 0x44e   :  { %v1015_v8 = vmul.f32 %v16053_v36, %v16051_v17 }
 0x450   :  { %v1021_v1 = vpack.c.bf16 %v1015_v8, %v1015_v8 }
 0x452   :  { %1055 = vmatmul.mubr.bf16.vlgmr.msra.gmra.mxu0 %v1021_v1  ;;  %1096 = vmatmul.mubr.bf16.vlgmr.msra.gmra.mxu1 %v1021_v1 }
 0x453   :  { %1139 = vmatpush1.bf16.msra.mxu0 %v17000_v55  ;;  %1180 = vmatpush1.bf16.msra.mxu1 %v17006_v45 }
 0x454   :  { %1140 = vmatprep.subr.bf16.mxu0 %v17012_v46  ;;  %1181 = vmatprep.subr.bf16.mxu1 %v17018_v47 }
 0x455   :  { %1170 = vmatprep.mubr.bf16.mxu0 %v19533_v32  ;;  %1211 = vmatprep.mubr.bf16.mxu1 %v19533_v32 }
 0x457   :  { %1141 = vmatpush1.bf16.msra.mxu0 %v17026_v48  ;;  %1182 = vmatpush1.bf16.msra.mxu1 %v17032_v49 }
 0x458   :  { %1142 = vmatprep.subr.bf16.mxu0 %v17038_v51  ;;  %1183 = vmatprep.subr.bf16.mxu1 %v17044_v59 }
 0x45b   :  { %1143 = vmatpush1.bf16.msra.mxu0 %v17050_v60  ;;  %1184 = vmatpush1.bf16.msra.mxu1 %v17056_v4 }
 0x45c   :  { %1144 = vmatprep.subr.bf16.mxu0 %v17062_v5  ;;  %1185 = vmatprep.subr.bf16.mxu1 %v17068_v10 }
 0x45f   :  { %1145 = vmatpush1.bf16.msra.mxu0 %v17074_v11  ;;  %1186 = vmatpush1.bf16.msra.mxu1 %v17080_v14 }
 0x460   :  { %1146 = vmatprep.subr.bf16.mxu0 %v17086_v15  ;;  %1187 = vmatprep.subr.bf16.mxu1 %v17092_v20 }
 0x463   :  { %1147 = vmatpush1.bf16.msra.mxu0 %v17098_v21  ;;  %1188 = vmatpush1.bf16.msra.mxu1 %v17104_v53 }
 0x464   :  { %1148 = vmatprep.subr.bf16.mxu0 %v17110_v56  ;;  %1189 = vmatprep.subr.bf16.mxu1 %v17116_v58 }
 0x467   :  { %1149 = vmatpush1.bf16.msra.mxu0 %v17122_v2  ;;  %1190 = vmatpush1.bf16.msra.mxu1 %v17128_v24 }
 0x468   :  { %1150 = vmatprep.subr.bf16.mxu0 %v17134_v63  ;;  %1191 = vmatprep.subr.bf16.mxu1 %v17140_v25 }
 0x46b   :  { %1151 = vmatpush1.bf16.msra.mxu0 %v17146_v3  ;;  %1192 = vmatpush1.bf16.msra.mxu1 %v17152_v28 }
 0x46c   :  { %1152 = vmatprep.subr.bf16.mxu0 %v17158_v29  ;;  %1193 = vmatprep.subr.bf16.mxu1 %v17164_v34 }
 0x46f   :  { %1153 = vmatpush1.bf16.msra.mxu0 %v17170_v35  ;;  %1194 = vmatpush1.bf16.msra.mxu1 %v17176_v38 }
 0x470   :  { %1254 = vmatprep.subr.bf16.mxu0 %v17182_v39  ;;  %1295 = vmatprep.subr.bf16.mxu1 %v17188_v42 }
 0x512   :  { %v1056_v0 = vpop.f32.mrf.mxu0  ;;  %v1097_v61 = vpop.f32.mrf.mxu1 }
 0x513   :  { %v1104_v52 = vadd.f32 %v1056_v0, %v16850_v22  ;;  %v1106_v42 = vadd.f32 %v1097_v61, %v16853_v23 }
 0x514   :  { %v1058_v50 = vpop.f32.mrf.mxu0  ;;  %v1099_v62 = vpop.f32.mrf.mxu1 }
 0x515   :  { %v12464_v12 = vmul.f32 -1.442695, %v1104_v52  ;;  %v1105_v40 = vadd.f32 %v1058_v50, %v16856_v26  ;;  %v1107_v39 = vadd.f32 %v1099_v62, %v16859_v27 }
 0x516   :  { %v1060_v37 = vpop.f32.mrf.mxu0  ;;  %v1101_v18 = vpop.f32.mrf.mxu1 }
 0x517   :  { %16054 = vpow2.f32 %v12464_v12  ;;  %v12465_v9 = vmul.f32 -1.442695, %v1105_v40  ;;  %v12466_v30 = vmul.f32 -1.442695, %v1107_v39  ;;  %v14192_v12 = vld [vmem:[#allocation3 + $0xe4] ss:$16 sps:$4 sm:$0xff]  }
 0x518   :  { %v1061_v16 = vpop.f32.mrf.mxu0  ;;  %v1102_v13 = vpop.f32.mrf.mxu1  ;;  %v14195_v40 = vld [vmem:[#allocation3 + $0xec] ss:$16 sps:$4 sm:$0xff]   ;;  %v14190_v37 = vld [vmem:[#allocation3 + $0xe0] ss:$16 sps:$4 sm:$0xff]   ;;  %v14193_v18 = vld [vmem:[#allocation3 + $0xe8] ss:$16 sps:$4 sm:$0xff]  }
 0x519   :  { %16056 = vpow2.f32 %v12465_v9  ;;  %v14198_v9 = vld [vmem:[#allocation3 + $0xc4] ss:$16 sps:$4 sm:$0xff]   ;;  %v14201_v16 = vld [vmem:[#allocation3 + $0xcc] ss:$16 sps:$4 sm:$0xff]   ;;  %v14196_v13 = vld [vmem:[#allocation3 + $0xc0] ss:$16 sps:$4 sm:$0xff]  }
 0x51a   :  { %16058 = vtanh.f32 %v1106_v42  ;;  %v14199_v39 = vld [vmem:[#allocation3 + $0xc8] ss:$16 sps:$4 sm:$0xff]   ;;  %v14204_v42 = vld [vmem:[#allocation3 + $0xa4] ss:$16 sps:$4 sm:$0xff]  }
 0x51b   :  { %16060 = vpow2.f32 %v12466_v30  ;;  %v14207_v30 = vld [vmem:[#allocation3 + $0xac] ss:$16 sps:$4 sm:$0xff]  }
 0x524   :  { %v16055_v31 = vpop.eup %16054 }
 0x525   :  { %v1111_v33 = vadd.f32 1.0, %v16055_v31  ;;  %v14202_v31 = vld [vmem:[#allocation3 + $0xa0] ss:$16 sps:$4 sm:$0xff]  }
 0x526   :  { %v16057_v22 = vpop.eup %16056 }
 0x527   :  { %16062 = vrcp.f32 %v1111_v33  ;;  %v1117_v41 = vadd.f32 1.0, %v16057_v22  ;;  %v16059_v26 = vpop.eup %16058  ;;  %v14205_v33 = vld [vmem:[#allocation3 + $0xa8] ss:$16 sps:$4 sm:$0xff]   ;;  %v14210_v22 = vld [vmem:[#allocation3 + $0x84] ss:$16 sps:$4 sm:$0xff]  }
 0x528   :  { %v16061_v43 = vpop.eup %16060 }
 0x529   :  { %16064 = vrcp.f32 %v1117_v41  ;;  %v1124_v17 = vadd.f32 1.0, %v16061_v43  ;;  %v14213_v41 = vld [vmem:[#allocation3 + $0x8c] ss:$16 sps:$4 sm:$0xff]   ;;  %v14211_v43 = vld [vmem:[#allocation3 + $0x88] ss:$16 sps:$4 sm:$0xff]  }
 0x52b   :  { %16066 = vrcp.f32 %v1124_v17  ;;  %v14219_v17 = vld [vmem:[#allocation3 + $0x6c] ss:$16 sps:$4 sm:$0xff]  }
 0x534   :  { %v16063_v57 = vpop.eup %16062 }
 0x535   :  { %v1128_v54 = vmul.f32 %v16063_v57, %v16059_v26  ;;  %v14208_v26 = vld [vmem:[#allocation3 + $0x80] ss:$16 sps:$4 sm:$0xff]   ;;  %v14216_v57 = vld [vmem:[#allocation3 + $0x64] ss:$16 sps:$4 sm:$0xff]  }
 0x536   :  { %v16065_v19 = vpop.eup %16064 }
 0x537   :  { %v1127_v36 = vmul.f32 %v16065_v19, %v17240_v44  ;;  %v14217_v19 = vld [vmem:[#allocation3 + $0x68] ss:$16 sps:$4 sm:$0xff]  }
 0x538   :  { %v16067_v23 = vpop.eup %16066 }
 0x539   :  { %v17282_v27 = vadd.f32 %v1128_v54, %v1127_v36  ;;  %v14214_v54 = vld [vmem:[#allocation3 + $0x60] ss:$16 sps:$4 sm:$0xff]   ;;  %v14222_v36 = vld [vmem:[#allocation3 + $0x44] ss:$16 sps:$4 sm:$0xff]  }
 0x53b   :  { %16068 = vtanh.f32 %v17282_v27 }
 0x548   :  { %v16069_v8 = vpop.eup %16068 }
 0x549   :  { %v1131_v1 = vmul.f32 %v16069_v8, %v16067_v23  ;;  %v14220_v23 = vld [vmem:[#allocation3 + $0x40] ss:$16 sps:$4 sm:$0xff]   ;;  %v14223_v8 = vld [vmem:[#allocation3 + $0x48] ss:$16 sps:$4 sm:$0xff]  }
 0x54b   :  { %v1137_v0 = vpack.c.bf16 %v1131_v1, %v1131_v1  ;;  %v14228_v1 = vld [vmem:[#allocation3 + $0x24] ss:$16 sps:$4 sm:$0xff]  }
 0x54d   :  { %1171 = vmatmul.mubr.bf16.vlgmr.msra.gmra.mxu0 %v1137_v0  ;;  %1212 = vmatmul.mubr.bf16.vlgmr.msra.gmra.mxu1 %v1137_v0  ;;  %v14231_v0 = vld [vmem:[#allocation3 + $0x2c] ss:$16 sps:$4 sm:$0xff]  }
 0x54e   :  { %1255 = vmatpush1.bf16.msra.mxu0 %v17000_v55  ;;  %1296 = vmatpush1.bf16.msra.mxu1 %v17006_v45 }
 0x54f   :  { %1256 = vmatprep.subr.bf16.mxu0 %v17012_v46  ;;  %1297 = vmatprep.subr.bf16.mxu1 %v17018_v47  ;;  %v19534_v46 = vld [vmem:[#allocation20_spill] sm:$0xff] }
 0x550   :  { %1286 = vmatprep.mubr.bf16.mxu0 %v19533_v32  ;;  %1327 = vmatprep.mubr.bf16.mxu1 %v19533_v32  ;;  %v253_v47 = vadd.f32 %v19534_v46, %v16825_v6  ;;  %v14234_v46 = vld [vmem:[#allocation3 + $0x4] ss:$16 sps:$4 sm:$0xff]  }
 0x552   :  { %1257 = vmatpush1.bf16.msra.mxu0 %v17026_v48  ;;  %1298 = vmatpush1.bf16.msra.mxu1 %v17032_v49  ;;  %v19535_v48 = vld [vmem:[#allocation18_spill] sm:$0xff] }
 0x553   :  { %1258 = vmatprep.subr.bf16.mxu0 %v17038_v51  ;;  %1299 = vmatprep.subr.bf16.mxu1 %v17044_v59 }
 0x556   :  { %1259 = vmatpush1.bf16.msra.mxu0 %v17050_v60  ;;  %1300 = vmatpush1.bf16.msra.mxu1 %v17056_v4 }
 0x557   :  { %1260 = vmatprep.subr.bf16.mxu0 %v17062_v5  ;;  %1301 = vmatprep.subr.bf16.mxu1 %v17068_v10 }
 0x55a   :  { %1261 = vmatpush1.bf16.msra.mxu0 %v17074_v11  ;;  %1302 = vmatpush1.bf16.msra.mxu1 %v17080_v14 }
 0x55b   :  { %1262 = vmatprep.subr.bf16.mxu0 %v17086_v15  ;;  %1303 = vmatprep.subr.bf16.mxu1 %v17092_v20  ;;  %v19536_v20 = vld [vmem:[#allocation21_spill] sm:$0xff] }
 0x55e   :  { %1263 = vmatpush1.bf16.msra.mxu0 %v17098_v21  ;;  %1304 = vmatpush1.bf16.msra.mxu1 %v17104_v53  ;;  %v324_v21 = vadd.f32 %v19536_v20, %v16828_v7  ;;  %v19539_v20 = vld [vmem:[#allocation24_spill] sm:$0xff] }
 0x55f   :  { %1264 = vmatprep.subr.bf16.mxu0 %v17110_v56  ;;  %1305 = vmatprep.subr.bf16.mxu1 %v17116_v58  ;;  %v19537_v56 = vld [vmem:[#allocation19_spill] sm:$0xff] }
 0x562   :  { %1265 = vmatpush1.bf16.msra.mxu0 %v17122_v2  ;;  %1306 = vmatpush1.bf16.msra.mxu1 %v17128_v24 }
 0x563   :  { %1266 = vmatprep.subr.bf16.mxu0 %v17134_v63  ;;  %1307 = vmatprep.subr.bf16.mxu1 %v17140_v25 }
 0x566   :  { %1267 = vmatpush1.bf16.msra.mxu0 %v17146_v3  ;;  %1308 = vmatpush1.bf16.msra.mxu1 %v17152_v28 }
 0x567   :  { %1268 = vmatprep.subr.bf16.mxu0 %v17158_v29  ;;  %1309 = vmatprep.subr.bf16.mxu1 %v17164_v34 }
 0x56a   :  { %1269 = vmatpush1.bf16.msra.mxu0 %v17170_v35  ;;  %1310 = vmatpush1.bf16.msra.mxu1 %v17176_v38 }
 0x56b   :  { %1580 = vmatprep.subr.bf16.mxu0 %v14192_v12  ;;  %1621 = vmatprep.subr.bf16.mxu1 %v14195_v40 }
 0x60d   :  { %v1172_v55 = vpop.f32.mrf.mxu0  ;;  %v1213_v45 = vpop.f32.mrf.mxu1 }
 0x60e   :  { %v1220_v49 = vadd.f32 %v1172_v55, %v19535_v48  ;;  %v1222_v58 = vadd.f32 %v1213_v45, %v19537_v56  ;;  %v14226_v55 = vld [vmem:[#allocation3 + $0x20] ss:$16 sps:$4 sm:$0xff]   ;;  %v14229_v45 = vld [vmem:[#allocation3 + $0x28] ss:$16 sps:$4 sm:$0xff]  }
 0x60f   :  { %v1174_v51 = vpop.f32.mrf.mxu0  ;;  %v1215_v59 = vpop.f32.mrf.mxu1  ;;  %v14232_v48 = vld [vmem:[#allocation3] ss:$16 sps:$4 sm:$0xff]  }
 0x610   :  { %v12467_v60 = vmul.f32 -1.442695, %v1220_v49  ;;  %v1221_v4 = vadd.f32 %v1174_v51, %v253_v47  ;;  %v1223_v53 = vadd.f32 %v1215_v59, %v324_v21  ;;  %v14237_v47 = vld [vmem:[#allocation3 + $0xc] ss:$16 sps:$4 sm:$0xff]   ;;  %v14235_v49 = vld [vmem:[#allocation3 + $0x8] ss:$16 sps:$4 sm:$0xff]  }
 0x611   :  { %v1176_v5 = vpop.f32.mrf.mxu0  ;;  %v1217_v10 = vpop.f32.mrf.mxu1  ;;  %v14240_v51 = vld [vmem:[#allocation5 + $0xe4] ss:$16 sps:$4 sm:$0xff]   ;;  %v14243_v59 = vld [vmem:[#allocation5 + $0xec] ss:$16 sps:$4 sm:$0xff]  }
 0x612   :  { %16070 = vpow2.f32 %v12467_v60  ;;  %v12468_v11 = vmul.f32 -1.442695, %v1221_v4  ;;  %v12469_v6 = vmul.f32 -1.442695, %v1223_v53  ;;  %v19538_v5 = vld [vmem:[#allocation22_spill] sm:$0xff] }
 0x613   :  { %v1177_v14 = vpop.f32.mrf.mxu0  ;;  %v1218_v15 = vpop.f32.mrf.mxu1 }
 0x614   :  { %16072 = vpow2.f32 %v12468_v11 }
 0x615   :  { %16074 = vtanh.f32 %v1222_v58 }
 0x616   :  { %16076 = vpow2.f32 %v12469_v6 }
 0x61f   :  { %v16071_v2 = vpop.eup %16070 }
 0x620   :  { %v1227_v24 = vadd.f32 1.0, %v16071_v2 }
 0x621   :  { %v16073_v63 = vpop.eup %16072 }
 0x622   :  { %16078 = vrcp.f32 %v1227_v24  ;;  %v1233_v25 = vadd.f32 1.0, %v16073_v63  ;;  %v16075_v3 = vpop.eup %16074  ;;  %v19540_v24 = vld [vmem:[#allocation25_spill] sm:$0xff] }
 0x623   :  { %v16077_v28 = vpop.eup %16076 }
 0x624   :  { %16080 = vrcp.f32 %v1233_v25  ;;  %v1240_v38 = vadd.f32 1.0, %v16077_v28  ;;  %v19541_v25 = vld [vmem:[#allocation23_spill] sm:$0xff] }
 0x626   :  { %16082 = vrcp.f32 %v1240_v38 }
 0x62f   :  { %v16079_v29 = vpop.eup %16078 }
 0x630   :  { %v1244_v34 = vmul.f32 %v16079_v29, %v16075_v3 }
 0x631   :  { %v16081_v35 = vpop.eup %16080 }
 0x632   :  { %v1243_v7 = vmul.f32 %v16081_v35, %v17282_v27  ;;  %v14225_v27 = vld [vmem:[#allocation3 + $0x4c] ss:$16 sps:$4 sm:$0xff]  }
 0x633   :  { %v16083_v61 = vpop.eup %16082 }
 0x634   :  { %v17324_v44 = vadd.f32 %v1244_v34, %v1243_v7 }
 0x636   :  { %16084 = vtanh.f32 %v17324_v44 }
 0x643   :  { %v16085_v52 = vpop.eup %16084 }
 0x644   :  { %v1247_v50 = vmul.f32 %v16085_v52, %v16083_v61 }
 0x646   :  { %v1253_v62 = vpack.c.bf16 %v1247_v50, %v1247_v50 }
 0x648   :  { %1287 = vmatmul.mubr.bf16.vlgmr.msra.gmra.mxu0 %v1253_v62  ;;  %1328 = vmatmul.mubr.bf16.vlgmr.msra.gmra.mxu1 %v1253_v62 }
 0x649   :  { %1612 = vmatprep.mubr.bf16.mxu0 %v19533_v32  ;;  %1653 = vmatprep.mubr.bf16.mxu1 %v19533_v32 }
 0x64a   :  { %1581 = vmatpush1.bf16.msra.mxu0 %v14190_v37  ;;  %1622 = vmatpush1.bf16.msra.mxu1 %v14193_v18 }
 0x64b   :  { %1582 = vmatprep.subr.bf16.mxu0 %v14198_v9  ;;  %1623 = vmatprep.subr.bf16.mxu1 %v14201_v16 }
 0x64e   :  { %1583 = vmatpush1.bf16.msra.mxu0 %v14196_v13  ;;  %1624 = vmatpush1.bf16.msra.mxu1 %v14199_v39  ;;  %v14238_v13 = vld [vmem:[#allocation5 + $0xe0] ss:$16 sps:$4 sm:$0xff]   ;;  %v14241_v39 = vld [vmem:[#allocation5 + $0xe8] ss:$16 sps:$4 sm:$0xff]  }
 0x64f   :  { %1584 = vmatprep.subr.bf16.mxu0 %v14204_v42  ;;  %1625 = vmatprep.subr.bf16.mxu1 %v14207_v30  ;;  %v14246_v30 = vld [vmem:[#allocation5 + $0xc4] ss:$16 sps:$4 sm:$0xff]  }
 0x652   :  { %1585 = vmatpush1.bf16.msra.mxu0 %v14202_v31  ;;  %1626 = vmatpush1.bf16.msra.mxu1 %v14205_v33  ;;  %v14249_v31 = vld [vmem:[#allocation5 + $0xcc] ss:$16 sps:$4 sm:$0xff]   ;;  %v14244_v33 = vld [vmem:[#allocation5 + $0xc0] ss:$16 sps:$4 sm:$0xff]  }
 0x653   :  { %1586 = vmatprep.subr.bf16.mxu0 %v14210_v22  ;;  %1627 = vmatprep.subr.bf16.mxu1 %v14213_v41  ;;  %v14247_v22 = vld [vmem:[#allocation5 + $0xc8] ss:$16 sps:$4 sm:$0xff]   ;;  %v14255_v41 = vld [vmem:[#allocation5 + $0xac] ss:$16 sps:$4 sm:$0xff]  }
 0x656   :  { %1587 = vmatpush1.bf16.msra.mxu0 %v14208_v26  ;;  %1628 = vmatpush1.bf16.msra.mxu1 %v14211_v43  ;;  %v14250_v26 = vld [vmem:[#allocation5 + $0xa0] ss:$16 sps:$4 sm:$0xff]   ;;  %v14253_v43 = vld [vmem:[#allocation5 + $0xa8] ss:$16 sps:$4 sm:$0xff]  }
 0x657   :  { %1588 = vmatprep.subr.bf16.mxu0 %v14216_v57  ;;  %1629 = vmatprep.subr.bf16.mxu1 %v14219_v17  ;;  %v14258_v57 = vld [vmem:[#allocation5 + $0x84] ss:$16 sps:$4 sm:$0xff]   ;;  %v14259_v17 = vld [vmem:[#allocation5 + $0x88] ss:$16 sps:$4 sm:$0xff]  }
 0x65a   :  { %1589 = vmatpush1.bf16.msra.mxu0 %v14214_v54  ;;  %1630 = vmatpush1.bf16.msra.mxu1 %v14217_v19  ;;  %v14261_v54 = vld [vmem:[#allocation5 + $0x8c] ss:$16 sps:$4 sm:$0xff]   ;;  %v14256_v19 = vld [vmem:[#allocation5 + $0x80] ss:$16 sps:$4 sm:$0xff]  }
 0x65b   :  { %1590 = vmatprep.subr.bf16.mxu0 %v14222_v36  ;;  %1631 = vmatprep.subr.bf16.mxu1 %v14225_v27  ;;  %v14264_v36 = vld [vmem:[#allocation5 + $0x64] ss:$16 sps:$4 sm:$0xff]   ;;  %v14267_v27 = vld [vmem:[#allocation5 + $0x6c] ss:$16 sps:$4 sm:$0xff]  }
 0x65e   :  { %1591 = vmatpush1.bf16.msra.mxu0 %v14220_v23  ;;  %1632 = vmatpush1.bf16.msra.mxu1 %v14223_v8  ;;  %v14262_v23 = vld [vmem:[#allocation5 + $0x60] ss:$16 sps:$4 sm:$0xff]   ;;  %v14265_v8 = vld [vmem:[#allocation5 + $0x68] ss:$16 sps:$4 sm:$0xff]  }
 0x65f   :  { %1592 = vmatprep.subr.bf16.mxu0 %v14228_v1  ;;  %1633 = vmatprep.subr.bf16.mxu1 %v14231_v0  ;;  %v14270_v1 = vld [vmem:[#allocation5 + $0x44] ss:$16 sps:$4 sm:$0xff]   ;;  %v14273_v0 = vld [vmem:[#allocation5 + $0x4c] ss:$16 sps:$4 sm:$0xff]  }
 0x662   :  { %1593 = vmatpush1.bf16.msra.mxu0 %v14226_v55  ;;  %1634 = vmatpush1.bf16.msra.mxu1 %v14229_v45  ;;  %v14268_v55 = vld [vmem:[#allocation5 + $0x40] ss:$16 sps:$4 sm:$0xff]   ;;  %v14271_v45 = vld [vmem:[#allocation5 + $0x48] ss:$16 sps:$4 sm:$0xff]  }
 0x663   :  { %1594 = vmatprep.subr.bf16.mxu0 %v14234_v46  ;;  %1635 = vmatprep.subr.bf16.mxu1 %v14237_v47  ;;  %v14276_v46 = vld [vmem:[#allocation5 + $0x24] ss:$16 sps:$4 sm:$0xff]   ;;  %v14279_v47 = vld [vmem:[#allocation5 + $0x2c] ss:$16 sps:$4 sm:$0xff]  }
 0x666   :  { %1595 = vmatpush1.bf16.msra.mxu0 %v14232_v48  ;;  %1636 = vmatpush1.bf16.msra.mxu1 %v14235_v49  ;;  %v14274_v48 = vld [vmem:[#allocation5 + $0x20] ss:$16 sps:$4 sm:$0xff]   ;;  %v14277_v49 = vld [vmem:[#allocation5 + $0x28] ss:$16 sps:$4 sm:$0xff]  }
 0x667   :  { %1881 = vmatprep.subr.bf16.mxu0 %v14240_v51  ;;  %1922 = vmatprep.subr.bf16.mxu1 %v14243_v59  ;;  %v14282_v51 = vld [vmem:[#allocation5 + $0x4] ss:$16 sps:$4 sm:$0xff]   ;;  %v14285_v59 = vld [vmem:[#allocation5 + $0xc] ss:$16 sps:$4 sm:$0xff]  }
 0x708   :  { %v1288_v60 = vpop.f32.mrf.mxu0  ;;  %v1329_v4 = vpop.f32.mrf.mxu1 }
 0x709   :  { %v1336_v10 = vadd.f32 %v1288_v60, %v19538_v5  ;;  %v1338_v3 = vadd.f32 %v1329_v4, %v19541_v25  ;;  %v14280_v60 = vld [vmem:[#allocation5] ss:$16 sps:$4 sm:$0xff]   ;;  %v14283_v4 = vld [vmem:[#allocation5 + $0x8] ss:$16 sps:$4 sm:$0xff]  }
 0x70a   :  { %v1290_v11 = vpop.f32.mrf.mxu0  ;;  %v1331_v14 = vpop.f32.mrf.mxu1  ;;  %v1364_v5 = vld [vmem:[%s19542_s2] sm:$0xff]  ;;  %v14301_v25 = vld [vmem:[#allocation7 + $0x68] ss:$12 sps:$4 sm:$0xff]  }
 0x70b   :  { %v12470_v15 = vmul.f32 -1.442695, %v1336_v10  ;;  %v1337_v21 = vadd.f32 %v1290_v11, %v19539_v20  ;;  %v1339_v63 = vadd.f32 %v1331_v14, %v19540_v24  ;;  %v1688_v10 = vpack.c.bf16 %v1364_v5, %v1364_v5  ;;  %v14288_v11 = vld [vmem:[#allocation7 + $0xac] ss:$12 sps:$4 sm:$0xff]   ;;  %v14286_v14 = vld [vmem:[#allocation7 + $0xa8] ss:$12 sps:$4 sm:$0xff]  }
 0x70c   :  { %v1292_v53 = vpop.f32.mrf.mxu0  ;;  %v1333_v56 = vpop.f32.mrf.mxu1  ;;  %v16469_v20 = vmov 0.0   ;;  %v14300_v24 = vld [vmem:[#allocation7 + $0x64] ss:$12 sps:$4 sm:$0xff]  }
 0x70d   :  { %16086 = vpow2.f32 %v12470_v15  ;;  %v12471_v58 = vmul.f32 -1.442695, %v1337_v21  ;;  %v12472_v28 = vmul.f32 -1.442695, %v1339_v63  ;;  %v14289_v15 = vld [vmem:[#allocation7 + $0xb0] ss:$12 sps:$4 sm:$0xff]  }
 0x70e   :  { %v1293_v6 = vpop.f32.mrf.mxu0  ;;  %v1334_v2 = vpop.f32.mrf.mxu1  ;;  %v14292_v21 = vld [vmem:[#allocation7 + $0x94] ss:$12 sps:$4 sm:$0xff]   ;;  %v14290_v53 = vld [vmem:[#allocation7 + $0x90] ss:$12 sps:$4 sm:$0xff]   ;;  %v14293_v56 = vld [vmem:[#allocation7 + $0x98] ss:$12 sps:$4 sm:$0xff]  }
 0x70f   :  { %16088 = vpow2.f32 %v12471_v58  ;;  %v14296_v58 = vld [vmem:[#allocation7 + $0x7c] ss:$12 sps:$4 sm:$0xff]   ;;  %v14294_v6 = vld [vmem:[#allocation7 + $0x78] ss:$12 sps:$4 sm:$0xff]   ;;  %v14297_v2 = vld [vmem:[#allocation7 + $0x80] ss:$12 sps:$4 sm:$0xff]  }
 0x710   :  { %16090 = vtanh.f32 %v1338_v3  ;;  %v14298_v63 = vld [vmem:[#allocation7 + $0x60] ss:$12 sps:$4 sm:$0xff]   ;;  %v14302_v3 = vld [vmem:[#allocation7 + $0x48] ss:$12 sps:$4 sm:$0xff]  }
 0x711   :  { %16092 = vpow2.f32 %v12472_v28  ;;  %v14304_v28 = vld [vmem:[#allocation7 + $0x4c] ss:$12 sps:$4 sm:$0xff]  }
 0x71a   :  { %v16087_v29 = vpop.eup %16086 }
 0x71b   :  { %v1343_v34 = vadd.f32 1.0, %v16087_v29  ;;  %v14305_v29 = vld [vmem:[#allocation7 + $0x50] ss:$12 sps:$4 sm:$0xff]  }
 0x71c   :  { %v16089_v35 = vpop.eup %16088 }
 0x71d   :  { %16094 = vrcp.f32 %v1343_v34  ;;  %v1349_v38 = vadd.f32 1.0, %v16089_v35  ;;  %v16091_v7 = vpop.eup %16090  ;;  %v14308_v34 = vld [vmem:[#allocation7 + $0x34] ss:$12 sps:$4 sm:$0xff]   ;;  %v14306_v35 = vld [vmem:[#allocation7 + $0x30] ss:$12 sps:$4 sm:$0xff]  }
 0x71e   :  { %v16093_v61 = vpop.eup %16092 }
 0x71f   :  { %16096 = vrcp.f32 %v1349_v38  ;;  %v1356_v12 = vadd.f32 1.0, %v16093_v61  ;;  %v14309_v38 = vld [vmem:[#allocation7 + $0x38] ss:$12 sps:$4 sm:$0xff]  }
 0x720   :  { %v14310_v61 = vld [vmem:[#allocation7 + $0x18] ss:$12 sps:$4 sm:$0xff]  }
 0x721   :  { %16098 = vrcp.f32 %v1356_v12  ;;  %v14317_v12 = vld [vmem:[#allocation7 + $0x8] ss:$12 sps:$4 sm:$0xff]  }
 0x72a   :  { %v16095_v52 = vpop.eup %16094 }
 0x72b   :  { %v1360_v50 = vmul.f32 %v16095_v52, %v16091_v7  ;;  %v14312_v7 = vld [vmem:[#allocation7 + $0x1c] ss:$12 sps:$4 sm:$0xff]   ;;  %v14313_v52 = vld [vmem:[#allocation7 + $0x20] ss:$12 sps:$4 sm:$0xff]  }
 0x72c   :  { %v16097_v62 = vpop.eup %16096 }
 0x72d   :  { %v1359_v40 = vmul.f32 %v16097_v62, %v17324_v44  ;;  %v14252_v44 = vld [vmem:[#allocation5 + $0xa4] ss:$16 sps:$4 sm:$0xff]   ;;  %v14314_v62 = vld [vmem:[#allocation7] ss:$12 sps:$4 sm:$0xff]  }
 0x72e   :  { %v16099_v18 = vpop.eup %16098 }
 0x72f   :  { %v1361_v37 = vadd.f32 %v1360_v50, %v1359_v40  ;;  %v14316_v50 = vld [vmem:[#allocation7 + $0x4] ss:$12 sps:$4 sm:$0xff]   ;;  %v14320_v40 = vld [vmem:[#allocation8 + $0x74] ss:$8 sps:$4 sm:$0xff]  }
 0x731   :  { %16100 = vtanh.f32 %v1361_v37  ;;  %v14344_v37 = vld [vmem:[#allocation8 + $0x174] ss:$8 sps:$4 sm:$0xff]  }
 0x73e   :  { %v16101_v9 = vpop.eup %16100 }
 0x73f   :  { %v1363_v16 = vmul.f32 %v16101_v9, %v16099_v18 }
 0x741   :  { %v1365_v42 = vpack.c.bf16 %v1363_v16, %v1363_v16 }
 0x743   :  { %1613 = vmatmul.mubr.bf16.vlgmr.msra.gmra.mxu0 %v1365_v42  ;;  %1654 = vmatmul.mubr.bf16.vlgmr.msra.gmra.mxu1 %v1365_v42 }
 0x744   :  { %1882 = vmatpush1.bf16.msra.mxu0 %v14238_v13  ;;  %1923 = vmatpush1.bf16.msra.mxu1 %v14241_v39 }
 0x745   :  { %1883 = vmatprep.subr.bf16.mxu0 %v14246_v30  ;;  %1924 = vmatprep.subr.bf16.mxu1 %v14249_v31 }
 0x746   :  { %1913 = vmatprep.mubr.bf16.mxu0 %v19533_v32  ;;  %1954 = vmatprep.mubr.bf16.mxu1 %v19533_v32 }
 0x748   :  { %1884 = vmatpush1.bf16.msra.mxu0 %v14244_v33  ;;  %1925 = vmatpush1.bf16.msra.mxu1 %v14247_v22  ;;  %v1398_v33 = vld [vmem:[%s19499_s7] sm:$0xf]  ;;  %v19543_v22 = vld [vmem:[#allocation15_spill] sm:$0xff] }
 0x749   :  { %1885 = vmatprep.subr.bf16.mxu0 %v14252_v44  ;;  %1926 = vmatprep.subr.bf16.mxu1 %v14255_v41  ;;  %v1403_v44 = vrot.slane %v1398_v33, %v19543_v22  ;;  %v19544_v41 = vld [vmem:[#allocation16_spill] sm:$0xff] }
 0x74c   :  { %1886 = vmatpush1.bf16.msra.mxu0 %v14250_v26  ;;  %1927 = vmatpush1.bf16.msra.mxu1 %v14253_v43  ;;  %v1407_v26 = vrot.slane %v1398_v33, %v19544_v41 }
 0x74d   :  { %1887 = vmatprep.subr.bf16.mxu0 %v14258_v57  ;;  %1928 = vmatprep.subr.bf16.mxu1 %v14261_v54 }
 0x750   :  { %1888 = vmatpush1.bf16.msra.mxu0 %v14256_v19  ;;  %1929 = vmatpush1.bf16.msra.mxu1 %v14259_v17 }
 0x751   :  { %1889 = vmatprep.subr.bf16.mxu0 %v14264_v36  ;;  %1930 = vmatprep.subr.bf16.mxu1 %v14267_v27 }
 0x754   :  { %1890 = vmatpush1.bf16.msra.mxu0 %v14262_v23  ;;  %1931 = vmatpush1.bf16.msra.mxu1 %v14265_v8 }
 0x755   :  { %1891 = vmatprep.subr.bf16.mxu0 %v14270_v1  ;;  %1932 = vmatprep.subr.bf16.mxu1 %v14273_v0 }
 0x758   :  { %1892 = vmatpush1.bf16.msra.mxu0 %v14268_v55  ;;  %1933 = vmatpush1.bf16.msra.mxu1 %v14271_v45  ;;  %v19545_v45 = vld [vmem:[#allocation17_spill] sm:$0xff] }
 0x759   :  { %1893 = vmatprep.subr.bf16.mxu0 %v14276_v46  ;;  %1934 = vmatprep.subr.bf16.mxu1 %v14279_v47  ;;  %v1415_v46 = vrot.slane %v1398_v33, %v19545_v45 }
 0x75c   :  { %1894 = vmatpush1.bf16.msra.mxu0 %v14274_v48  ;;  %1935 = vmatpush1.bf16.msra.mxu1 %v14277_v49 }
 0x75d   :  { %1895 = vmatprep.subr.bf16.mxu0 %v14282_v51  ;;  %1936 = vmatprep.subr.bf16.mxu1 %v14285_v59  ;;  %v19546_v51 = vld [vmem:[#allocation14_spill] sm:$0xff] }
 0x75e   :  { %v1411_v59 = vrot.slane %v1398_v33, %v19546_v51  ;;  %v14338_v33 = vld [vmem:[#allocation8 + $0x14] ss:$8 sps:$4 sm:$0xff]  }
 0x760   :  { %1896 = vmatpush1.bf16.msra.mxu0 %v14280_v60  ;;  %1937 = vmatpush1.bf16.msra.mxu1 %v14283_v4 }
 0x761   :  { %2169 = vmatprep.subr.bf16.mxu0 %v14288_v11  ;;  %13980 = vmatprep.subr.bf16.mxu1 %v16469_v20 }
 0x763   :  { %1914 = vmatmul.mubr.bf16.vlgmr.msra.gmra.mxu0 %v1688_v10  ;;  %1955 = vmatmul.mubr.bf16.vlgmr.msra.gmra.mxu1 %v1688_v10 }
 0x764   :  { %2201 = vmatprep.mubr.bf16.mxu0 %v19533_v32  ;;  %2170 = vmatpush1.bf16.msra.mxu0 %v14286_v14 }
 0x765   :  { %13981 = vmatpush3.bf16.msra.mxu1 %v14289_v15  ;;  %2171 = vmatprep.subr.bf16.mxu0 %v14292_v21 }
 0x766   :  { %13982 = vmatprep.subr.bf16.mxu1 %v16469_v20  ;;  %13996 = vmatprep.mubr.msk.bf16.mxu1 %vm16470_vm1, %v16469_v20 }
 0x768   :  { %2172 = vmatpush1.bf16.msra.mxu0 %v14290_v53 }
 0x769   :  { %13983 = vmatpush3.bf16.msra.mxu1 %v14293_v56  ;;  %2173 = vmatprep.subr.bf16.mxu0 %v14296_v58 }
 0x76a   :  { %13984 = vmatprep.subr.bf16.mxu1 %v16469_v20 }
 0x76c   :  { %2174 = vmatpush1.bf16.msra.mxu0 %v14294_v6 }
 0x76d   :  { %13985 = vmatpush3.bf16.msra.mxu1 %v14297_v2  ;;  %2175 = vmatprep.subr.bf16.mxu0 %v14300_v24 }
 0x76e   :  { %13986 = vmatprep.subr.bf16.mxu1 %v16469_v20 }
 0x770   :  { %2176 = vmatpush1.bf16.msra.mxu0 %v14298_v63 }
 0x771   :  { %13987 = vmatpush3.bf16.msra.mxu1 %v14301_v25  ;;  %2177 = vmatprep.subr.bf16.mxu0 %v14304_v28 }
 0x772   :  { %13988 = vmatprep.subr.bf16.mxu1 %v16469_v20 }
 0x774   :  { %2178 = vmatpush1.bf16.msra.mxu0 %v14302_v3 }
 0x775   :  { %13989 = vmatpush3.bf16.msra.mxu1 %v14305_v29  ;;  %2179 = vmatprep.subr.bf16.mxu0 %v14308_v34  ;;  %v14318_v34 = vld [vmem:[#allocation8 + $0x70] ss:$8 sps:$4 sm:$0xff]  }
 0x776   :  { %13990 = vmatprep.subr.bf16.mxu1 %v16469_v20 }
 0x778   :  { %2180 = vmatpush1.bf16.msra.mxu0 %v14306_v35  ;;  %v14342_v35 = vld [vmem:[#allocation8 + $0x170] ss:$8 sps:$4 sm:$0xff]  }
 0x779   :  { %13991 = vmatpush3.bf16.msra.mxu1 %v14309_v38  ;;  %2181 = vmatprep.subr.bf16.mxu0 %v14312_v7  ;;  %v14323_v7 = vld [vmem:[#allocation8 + $0x64] ss:$8 sps:$4 sm:$0xff]  }
 0x77a   :  { %13992 = vmatprep.subr.bf16.mxu1 %v16469_v20 }
 0x77c   :  { %2182 = vmatpush1.bf16.msra.mxu0 %v14310_v61  ;;  %v14350_v61 = vld [vmem:[#allocation8 + $0x164] ss:$8 sps:$4 sm:$0xff]  }
 0x77d   :  { %13993 = vmatpush3.bf16.msra.mxu1 %v14313_v52  ;;  %2183 = vmatprep.subr.bf16.mxu0 %v14316_v50  ;;  %v14321_v52 = vld [vmem:[#allocation8 + $0x60] ss:$8 sps:$4 sm:$0xff]  }
 0x77e   :  { %13994 = vmatprep.subr.bf16.mxu1 %v16469_v20  ;;  %v14348_v50 = vld [vmem:[#allocation8 + $0x160] ss:$8 sps:$4 sm:$0xff]  }
 0x780   :  { %2184 = vmatpush1.bf16.msra.mxu0 %v14314_v62  ;;  %v14326_v62 = vld [vmem:[#allocation8 + $0x54] ss:$8 sps:$4 sm:$0xff]  }
 0x781   :  { %13995 = vmatpush3.bf16.msra.mxu1 %v14317_v12  ;;  %2556 = vmatprep.subr.bf16.mxu0 %v14320_v40  ;;  %v14356_v12 = vld [vmem:[#allocation8 + $0x154] ss:$8 sps:$4 sm:$0xff]   ;;  %v14324_v40 = vld [vmem:[#allocation8 + $0x50] ss:$8 sps:$4 sm:$0xff]  }
 0x782   :  { %2597 = vmatprep.subr.bf16.mxu1 %v14344_v37  ;;  %v14354_v37 = vld [vmem:[#allocation8 + $0x150] ss:$8 sps:$4 sm:$0xff]  }
 0x803   :  { %v1614_v18 = vpop.f32.mrf.mxu0  ;;  %v1655_v9 = vpop.f32.mrf.mxu1 }
 0x804   :  { %v17355_v43 = vadd.f32 %v1614_v18, %v1403_v44  ;;  %v17366_v4 = vadd.f32 %v1655_v9, %v1411_v59  ;;  %v14329_v18 = vld [vmem:[#allocation8 + $0x44] ss:$8 sps:$4 sm:$0xff]   ;;  %v14336_v44 = vld [vmem:[#allocation8 + $0x10] ss:$8 sps:$4 sm:$0xff]  }
 0x805   :  { %v1616_v16 = vpop.f32.mrf.mxu0  ;;  %v1657_v13 = vpop.f32.mrf.mxu1  ;;  %v14362_v9 = vld [vmem:[#allocation8 + $0x144] ss:$8 sps:$4 sm:$0xff]  }
 0x806   :  { %v17357_v19 = vadd.f32 %v1616_v16, %v1407_v26  ;;  %v17362_v49 = vadd.f32 %v1657_v13, %v1415_v46  ;;  %v14327_v16 = vld [vmem:[#allocation8 + $0x40] ss:$8 sps:$4 sm:$0xff]   ;;  %v14341_v26 = vld [vmem:[#allocation8 + $0x4] ss:$8 sps:$4 sm:$0xff]   ;;  %v14366_v46 = vld [vmem:[#allocation8 + $0x130] ss:$8 sps:$4 sm:$0xff]  }
 0x807   :  { %v1618_v39 = vpop.f32.mrf.mxu0  ;;  %v1659_v42 = vpop.f32.mrf.mxu1  ;;  %v14360_v13 = vld [vmem:[#allocation8 + $0x140] ss:$8 sps:$4 sm:$0xff]   ;;  %v14374_v59 = vld [vmem:[#allocation8 + $0x124] ss:$8 sps:$4 sm:$0xff]  }
 0x808   :  { %v14332_v39 = vld [vmem:[#allocation8 + $0x34] ss:$8 sps:$4 sm:$0xff]   ;;  %v14330_v42 = vld [vmem:[#allocation8 + $0x30] ss:$8 sps:$4 sm:$0xff]  }
 0x809   :  { %v1619_v30 = vpop.f32.mrf.mxu0  ;;  %v1660_v31 = vpop.f32.mrf.mxu1 }
 0x80a   :  { %v14335_v30 = vld [vmem:[#allocation8 + $0x24] ss:$8 sps:$4 sm:$0xff]   ;;  %v14333_v31 = vld [vmem:[#allocation8 + $0x20] ss:$8 sps:$4 sm:$0xff]  }
 0x823   :  { %v1915_v57 = vpop.f32.mrf.mxu0  ;;  %v1956_v54 = vpop.f32.mrf.mxu1 }
 0x824   :  { %v1963_v17 = vadd.f32 %v1915_v57, %v17355_v43  ;;  %v1965_v11 = vadd.f32 %v1956_v54, %v17366_v4  ;;  %v14339_v57 = vld [vmem:[#allocation8] ss:$8 sps:$4 sm:$0xff]   ;;  %v14347_v54 = vld [vmem:[#allocation8 + $0xf4] ss:$8 sps:$4 sm:$0xff]  }
 0x825   :  { %v1917_v36 = vpop.f32.mrf.mxu0  ;;  %v1958_v27 = vpop.f32.mrf.mxu1 }
 0x826   :  { %v12537_v23 = vmul.f32 -1.442695, %v1963_v17  ;;  %v1964_v8 = vadd.f32 %v1917_v36, %v17357_v19  ;;  %v1966_v60 = vadd.f32 %v1958_v27, %v17362_v49  ;;  %v14345_v17 = vld [vmem:[#allocation8 + $0xf0] ss:$8 sps:$4 sm:$0xff]   ;;  %v14353_v36 = vld [vmem:[#allocation8 + $0xe4] ss:$8 sps:$4 sm:$0xff]  }
 0x827   :  { %v1919_v1 = vpop.f32.mrf.mxu0  ;;  %v1960_v0 = vpop.f32.mrf.mxu1  ;;  %v14351_v27 = vld [vmem:[#allocation8 + $0xe0] ss:$8 sps:$4 sm:$0xff]  }
 0x828   :  { %16102 = vpow2.f32 %v12537_v23  ;;  %v12538_v55 = vmul.f32 -1.442695, %v1964_v8  ;;  %v12539_v5 = vmul.f32 -1.442695, %v1966_v60  ;;  %v14359_v23 = vld [vmem:[#allocation8 + $0xd4] ss:$8 sps:$4 sm:$0xff]  }
 0x829   :  { %v1920_v47 = vpop.f32.mrf.mxu0  ;;  %v1961_v48 = vpop.f32.mrf.mxu1  ;;  %v14357_v8 = vld [vmem:[#allocation8 + $0xd0] ss:$8 sps:$4 sm:$0xff]   ;;  %v14365_v1 = vld [vmem:[#allocation8 + $0xc4] ss:$8 sps:$4 sm:$0xff]   ;;  %v14363_v0 = vld [vmem:[#allocation8 + $0xc0] ss:$8 sps:$4 sm:$0xff]  }
 0x82a   :  { %16104 = vpow2.f32 %v12538_v55  ;;  %v14368_v55 = vld [vmem:[#allocation8 + $0x134] ss:$8 sps:$4 sm:$0xff]   ;;  %v14369_v48 = vld [vmem:[#allocation8 + $0xb0] ss:$8 sps:$4 sm:$0xff]   ;;  %v14372_v60 = vld [vmem:[#allocation8 + $0x120] ss:$8 sps:$4 sm:$0xff]  }
 0x82b   :  { %16106 = vpow2.f32 %v12539_v5  ;;  %v14371_v47 = vld [vmem:[#allocation8 + $0xb4] ss:$8 sps:$4 sm:$0xff]   ;;  %v14377_v5 = vld [vmem:[#allocation8 + $0xa4] ss:$8 sps:$4 sm:$0xff]  }
 0x835   :  { %v16103_v10 = vpop.eup %16102 }
 0x836   :  { %v1970_v14 = vadd.f32 1.0, %v16103_v10  ;;  %v14375_v10 = vld [vmem:[#allocation8 + $0xa0] ss:$8 sps:$4 sm:$0xff]  }
 0x837   :  { %v16105_v15 = vpop.eup %16104 }
 0x838   :  { %16108 = vrcp.f32 %v1970_v14  ;;  %v1976_v21 = vadd.f32 1.0, %v16105_v15  ;;  %v16107_v53 = vpop.eup %16106  ;;  %v14378_v14 = vld [vmem:[#allocation8 + $0x110] ss:$8 sps:$4 sm:$0xff]   ;;  %v14383_v15 = vld [vmem:[#allocation8 + $0x94] ss:$8 sps:$4 sm:$0xff]  }
 0x839   :  { %16110 = vtanh.f32 %v1965_v11  ;;  %v1983_v2 = vadd.f32 1.0, %v16107_v53  ;;  %v14380_v11 = vld [vmem:[#allocation8 + $0x114] ss:$8 sps:$4 sm:$0xff]   ;;  %v14386_v53 = vld [vmem:[#allocation8 + $0x104] ss:$8 sps:$4 sm:$0xff]  }
 0x83a   :  { %16112 = vrcp.f32 %v1976_v21  ;;  %v14381_v21 = vld [vmem:[#allocation8 + $0x90] ss:$8 sps:$4 sm:$0xff]  }
 0x83b   :  { %16114 = vrcp.f32 %v1983_v2  ;;  %v14392_v2 = vld [vmem:[%s19501_s9 + $0xe4] ss:$16 sps:$4 sm:$0xff]  }
 0x845   :  { %v16109_v56 = vpop.eup %16108 }
 0x846   :  { %v16111_v58 = vpop.eup %16110 }
 0x847   :  { %v16113_v6 = vpop.eup %16112  ;;  %v1987_v63 = vmul.f32 %v16111_v58, %v16109_v56  ;;  %v14384_v56 = vld [vmem:[#allocation8 + $0x100] ss:$8 sps:$4 sm:$0xff]   ;;  %v14389_v58 = vld [vmem:[#allocation8 + $0x84] ss:$8 sps:$4 sm:$0xff]  }
 0x848   :  { %v1986_v24 = vmul.f32 0.0, %v16113_v6  ;;  %v16115_v3 = vpop.eup %16114  ;;  %v14387_v6 = vld [vmem:[#allocation8 + $0x80] ss:$8 sps:$4 sm:$0xff]  }
 0x84a   :  { %v17369_v25 = vadd.f32 %v1987_v63, %v1986_v24  ;;  %v14414_v24 = vld [vmem:[#allocation10 + $0x78] sm:$0xff]   ;;  %v2024_v63 = vld [vmem:[%s19503_s11] sm:$0x7] }
 0x84c   :  { %16116 = vtanh.f32 %v17369_v25 }
 0x859   :  { %v16117_v28 = vpop.eup %16116 }
 0x85a   :  { %v1990_v29 = vmul.f32 %v16117_v28, %v16115_v3  ;;  %v2029_v3 = vrot.slane %v2024_v63, %v19543_v22  ;;  %v2037_v28 = vrot.slane %v2024_v63, %v19546_v51 }
 0x85c   :  { %v17372_v38 = vpack.c.bf16 %v1990_v29, %v1990_v29  ;;  %v2033_v29 = vrot.slane %v2024_v63, %v19544_v41  ;;  %v14437_v63 = vld [vmem:[%s19501_s9 + $0x164] ss:$16 sps:$4 sm:$0xff]  }
 0x85e   :  { %2202 = vmatmul.mubr.bf16.vlgmr.msra.gmra.mxu0 %v17372_v38  ;;  %13997 = vmatmul.mubr.bf16.vlgmr.msra.gmra.mxu1 %v17372_v38 }
 0x85f   :  { %2557 = vmatpush1.bf16.msra.mxu0 %v14318_v34  ;;  %2598 = vmatpush1.bf16.msra.mxu1 %v14342_v35 }
 0x860   :  { %2558 = vmatprep.subr.bf16.mxu0 %v14323_v7  ;;  %2599 = vmatprep.subr.bf16.mxu1 %v14350_v61 }
 0x861   :  { %2629 = vmatprep.mubr.bf16.mxu1 %v19533_v32 }
 0x863   :  { %2559 = vmatpush1.bf16.msra.mxu0 %v14321_v52  ;;  %2600 = vmatpush1.bf16.msra.mxu1 %v14348_v50 }
 0x864   :  { %2560 = vmatprep.subr.bf16.mxu0 %v14326_v62  ;;  %2601 = vmatprep.subr.bf16.mxu1 %v14356_v12 }
 0x867   :  { %2561 = vmatpush1.bf16.msra.mxu0 %v14324_v40  ;;  %2602 = vmatpush1.bf16.msra.mxu1 %v14354_v37 }
 0x868   :  { %2562 = vmatprep.subr.bf16.mxu0 %v14329_v18  ;;  %2603 = vmatprep.subr.bf16.mxu1 %v14362_v9 }
 0x86b   :  { %2563 = vmatpush1.bf16.msra.mxu0 %v14327_v16  ;;  %2604 = vmatpush1.bf16.msra.mxu1 %v14360_v13  ;;  %v14418_v13 = vld [vmem:[#allocation10 + $0x38] sm:$0xff]  }
 0x86c   :  { %2564 = vmatprep.subr.bf16.mxu0 %v14332_v39  ;;  %2605 = vmatprep.subr.bf16.mxu1 %v14368_v55  ;;  %v14405_v55 = vld [vmem:[%s19501_s9 + $0x40] ss:$16 sps:$4 sm:$0xff]  }
 0x86f   :  { %2565 = vmatpush1.bf16.msra.mxu0 %v14330_v42  ;;  %2606 = vmatpush1.bf16.msra.mxu1 %v14366_v46  ;;  %v14410_v46 = vld [vmem:[%s19501_s9 + $0x24] ss:$16 sps:$4 sm:$0xff]  }
 0x870   :  { %2566 = vmatprep.subr.bf16.mxu0 %v14335_v30  ;;  %2607 = vmatprep.subr.bf16.mxu1 %v14374_v59  ;;  %v14419_v30 = vld [vmem:[#allocation10 + $0x70] sm:$0xff]  }
 0x871   :  { %v14411_v59 = vld [vmem:[%s19501_s9] ss:$16 sps:$4 sm:$0xff]  }
 0x873   :  { %2567 = vmatpush1.bf16.msra.mxu0 %v14333_v31  ;;  %2608 = vmatpush1.bf16.msra.mxu1 %v14372_v60  ;;  %v14417_v60 = vld [vmem:[%s19501_s9 + $0x1e4] ss:$16 sps:$4 sm:$0xff]  }
 0x874   :  { %2568 = vmatprep.subr.bf16.mxu0 %v14338_v33  ;;  %2609 = vmatprep.subr.bf16.mxu1 %v14380_v11  ;;  %v14390_v33 = vld [vmem:[%s19501_s9 + $0xe0] ss:$16 sps:$4 sm:$0xff]  }
 0x875   :  { %v14420_v11 = vld [vmem:[%s19501_s9 + $0x1c0] ss:$16 sps:$4 sm:$0xff]  }
 0x877   :  { %2569 = vmatpush1.bf16.msra.mxu0 %v14336_v44  ;;  %2610 = vmatpush1.bf16.msra.mxu1 %v14378_v14  ;;  %v14424_v14 = vld [vmem:[#allocation10 + $0x68] sm:$0xff]  }
 0x878   :  { %2570 = vmatprep.subr.bf16.mxu0 %v14341_v26  ;;  %2611 = vmatprep.subr.bf16.mxu1 %v14386_v53  ;;  %v14395_v26 = vld [vmem:[%s19501_s9 + $0xc4] ss:$16 sps:$4 sm:$0xff]   ;;  %v14428_v53 = vld [vmem:[#allocation10 + $0x28] sm:$0xff]  }
 0x87b   :  { %2571 = vmatpush1.bf16.msra.mxu0 %v14339_v57  ;;  %2612 = vmatpush1.bf16.msra.mxu1 %v14384_v56  ;;  %v14423_v57 = vld [vmem:[#allocation10 + $0x30] sm:$0xff]   ;;  %v14429_v56 = vld [vmem:[#allocation10 + $0x60] sm:$0xff]  }
 0x87c   :  { %2572 = vmatprep.subr.bf16.mxu0 %v14347_v54  ;;  %13772 = vmatprep.subr.bf16.mxu1 %v14414_v24  ;;  %v14393_v54 = vld [vmem:[%s19501_s9 + $0xc0] ss:$16 sps:$4 sm:$0xff]   ;;  %v14434_v24 = vld [vmem:[#allocation10 + $0x58] sm:$0xff]  }
 0x87f   :  { %2573 = vmatpush2.bf16.msra.mxu0 %v14345_v17  ;;  %v14398_v17 = vld [vmem:[%s19501_s9 + $0xa4] ss:$16 sps:$4 sm:$0xff]  }
 0x880   :  { %2574 = vmatprep.subr.bf16.mxu0 %v14353_v36  ;;  %v14396_v36 = vld [vmem:[%s19501_s9 + $0xa0] ss:$16 sps:$4 sm:$0xff]  }
 0x883   :  { %2575 = vmatpush2.bf16.msra.mxu0 %v14351_v27  ;;  %v14401_v27 = vld [vmem:[%s19501_s9 + $0x84] ss:$16 sps:$4 sm:$0xff]  }
 0x884   :  { %2576 = vmatprep.subr.bf16.mxu0 %v14359_v23  ;;  %v14399_v23 = vld [vmem:[%s19501_s9 + $0x80] ss:$16 sps:$4 sm:$0xff]  }
 0x887   :  { %2577 = vmatpush2.bf16.msra.mxu0 %v14357_v8  ;;  %v14404_v8 = vld [vmem:[%s19501_s9 + $0x64] ss:$16 sps:$4 sm:$0xff]  }
 0x888   :  { %2578 = vmatprep.subr.bf16.mxu0 %v14365_v1  ;;  %v14402_v1 = vld [vmem:[%s19501_s9 + $0x60] ss:$16 sps:$4 sm:$0xff]  }
 0x88b   :  { %2579 = vmatpush2.bf16.msra.mxu0 %v14363_v0  ;;  %v14407_v0 = vld [vmem:[%s19501_s9 + $0x44] ss:$16 sps:$4 sm:$0xff]  }
 0x88c   :  { %2580 = vmatprep.subr.bf16.mxu0 %v14371_v47  ;;  %v14408_v47 = vld [vmem:[%s19501_s9 + $0x20] ss:$16 sps:$4 sm:$0xff]  }
 0x88f   :  { %2581 = vmatpush2.bf16.msra.mxu0 %v14369_v48  ;;  %v14413_v48 = vld [vmem:[%s19501_s9 + $0x4] ss:$16 sps:$4 sm:$0xff]  }
 0x890   :  { %2582 = vmatprep.subr.bf16.mxu0 %v14377_v5  ;;  %v14415_v5 = vld [vmem:[%s19501_s9 + $0x1e0] ss:$16 sps:$4 sm:$0xff]  }
 0x893   :  { %2583 = vmatpush2.bf16.msra.mxu0 %v14375_v10  ;;  %v14422_v10 = vld [vmem:[%s19501_s9 + $0x1c4] ss:$16 sps:$4 sm:$0xff]  }
 0x894   :  { %2584 = vmatprep.subr.bf16.mxu0 %v14383_v15  ;;  %v14427_v15 = vld [vmem:[%s19501_s9 + $0x1a4] ss:$16 sps:$4 sm:$0xff]  }
 0x897   :  { %2585 = vmatpush2.bf16.msra.mxu0 %v14381_v21  ;;  %v14425_v21 = vld [vmem:[%s19501_s9 + $0x1a0] ss:$16 sps:$4 sm:$0xff]  }
 0x898   :  { %2586 = vmatprep.subr.bf16.mxu0 %v14389_v58  ;;  %v14432_v58 = vld [vmem:[%s19501_s9 + $0x184] ss:$16 sps:$4 sm:$0xff]  }
 0x89b   :  { %2587 = vmatpush2.bf16.msra.mxu0 %v14387_v6  ;;  %v14430_v6 = vld [vmem:[%s19501_s9 + $0x180] ss:$16 sps:$4 sm:$0xff]  }
 0x89c   :  { %3395 = vmatprep.subr.bf16.mxu0 %v14392_v2  ;;  %v14433_v2 = vld [vmem:[#allocation10 + $0x20] sm:$0xff]  }
 0x91e   :  { %v2203_v34 = vpop.f32.mrf.mxu0  ;;  %v2244_v35 = vpop.f32.mrf.mxu1 }
 0x91f   :  { %v2204_v7 = vadd.f32 %v2203_v34, %v2029_v3  ;;  %v2245_v61 = vadd.f32 %v2244_v35, %v2037_v28  ;;  %v14435_v3 = vld [vmem:[%s19501_s9 + $0x160] ss:$16 sps:$4 sm:$0xff]   ;;  %v14438_v28 = vld [vmem:[#allocation10 + $0x18] sm:$0xff]   ;;  %v14442_v34 = vld [vmem:[%s19501_s9 + $0x144] ss:$16 sps:$4 sm:$0xff]  }
 0x920   :  { %v2205_v52 = vpop.f32.mrf.mxu0  ;;  %v13998_v50 = vpop.f32.mrf.mxu1  ;;  %v14440_v35 = vld [vmem:[%s19501_s9 + $0x140] ss:$16 sps:$4 sm:$0xff]  }
 0x921   :  { %16118 = vtanh.f32 %v2204_v7  ;;  %v2206_v62 = vadd.f32 %v2205_v52, %v2033_v29  ;;  %v14439_v29 = vld [vmem:[#allocation10 + $0x50] sm:$0xff]  }
 0x922   :  { %16120 = vtanh.f32 %v2245_v61  ;;  %v2207_v12 = vpop.f32.mrf.mxu0  ;;  %v2247_v40 = vpop.f32.mrf.mxu1  ;;  %v14443_v7 = vld [vmem:[#allocation10 + $0x10] sm:$0xff]   ;;  %v14444_v61 = vld [vmem:[#allocation10 + $0x48] sm:$0xff]  }
 0x923   :  { %16122 = vtanh.f32 %v2206_v62  ;;  %v14447_v52 = vld [vmem:[%s19501_s9 + $0x124] ss:$16 sps:$4 sm:$0xff]   ;;  %v14445_v50 = vld [vmem:[%s19501_s9 + $0x120] ss:$16 sps:$4 sm:$0xff]   ;;  %v14448_v62 = vld [vmem:[#allocation10 + $0x8] sm:$0xff]  }
 0x924   :  { %v2208_v37 = vpop.f32.mrf.mxu0  ;;  %v13999_v18 = vpop.f32.mrf.mxu1  ;;  %v14449_v12 = vld [vmem:[#allocation10 + $0x40] sm:$0xff]  }
 0x925   :  { %v14452_v40 = vld [vmem:[%s19501_s9 + $0x104] ss:$16 sps:$4 sm:$0xff]   ;;  %v14450_v37 = vld [vmem:[%s19501_s9 + $0x100] ss:$16 sps:$4 sm:$0xff]  }
 0x926   :  { %v14453_v18 = vld [vmem:[#allocation10] sm:$0xff]  }
 0x92e   :  { %v16119_v9 = vpop.eup %16118 }
 0x92f   :  { %v16121_v16 = vpop.eup %16120  ;;  %v2253_v44 = vpack.c.bf16 %v16119_v9, %v16119_v9  ;;  %v14456_v9 = vld [vmem:[%s19501_s9 + $0x2e4] ss:$16 sps:$4 sm:$0xff]  }
 0x930   :  { %v16123_v39 = vpop.eup %16122  ;;  %v2255_v42 = vpack.c.bf16 %v16121_v16, %v16121_v16  ;;  %v14459_v16 = vld [vmem:[%s19501_s9 + $0x2ec] ss:$16 sps:$4 sm:$0xff]  }
 0x931   :  { %v2254_v31 = vpack.c.bf16 %v16123_v39, %v16123_v39 }
 0x932   :  { %2630 = vmatmul.mubr.bf16.vlgmr.msra.gmra.mxu1 %v2255_v42 }
 0x933   :  { %2588 = vmatprep.mubr.bf16.mxu0 %v2254_v31  ;;  %13773 = vmatpush3.bf16.msra.mxu1 %v14418_v13  ;;  %v2304_v13 = vld [vmem:[%s19505_s13] sm:$0x3] }
 0x934   :  { %2589 = vmatmul.mubr.bf16.vlgmr.msra.gmra.mxu0 %v2253_v44  ;;  %13774 = vmatprep.subr.bf16.mxu1 %v14419_v30  ;;  %v2309_v39 = vrot.slane %v2304_v13, %v19543_v22  ;;  %v2313_v30 = vrot.slane %v2304_v13, %v19544_v41  ;;  %v14505_v13 = vld [vmem:[%s19501_s9 + $0xc8] ss:$16 sps:$4 sm:$0xff]  }
 0x935   :  { %3396 = vmatpush1.bf16.msra.mxu0 %v14390_v33 }
 0x936   :  { %3397 = vmatprep.subr.bf16.mxu0 %v14395_v26 }
 0x937   :  { %13775 = vmatpush3.bf16.msra.mxu1 %v14423_v57 }
 0x938   :  { %13776 = vmatprep.subr.bf16.mxu1 %v14424_v14  ;;  %v14471_v14 = vld [vmem:[%s19501_s9 + $0x2ac] ss:$16 sps:$4 sm:$0xff]  }
 0x939   :  { %3398 = vmatpush1.bf16.msra.mxu0 %v14393_v54 }
 0x93a   :  { %3399 = vmatprep.subr.bf16.mxu0 %v14398_v17 }
 0x93b   :  { %13777 = vmatpush3.bf16.msra.mxu1 %v14428_v53  ;;  %v14474_v53 = vld [vmem:[%s19501_s9 + $0x284] ss:$16 sps:$4 sm:$0xff]  }
 0x93c   :  { %13778 = vmatprep.subr.bf16.mxu1 %v14429_v56  ;;  %v14477_v56 = vld [vmem:[%s19501_s9 + $0x28c] ss:$16 sps:$4 sm:$0xff]  }
 0x93d   :  { %3400 = vmatpush1.bf16.msra.mxu0 %v14396_v36 }
 0x93e   :  { %3401 = vmatprep.subr.bf16.mxu0 %v14401_v27 }
 0x93f   :  { %13779 = vmatpush3.bf16.msra.mxu1 %v14433_v2  ;;  %v14480_v2 = vld [vmem:[%s19501_s9 + $0x264] ss:$16 sps:$4 sm:$0xff]  }
 0x940   :  { %13780 = vmatprep.subr.bf16.mxu1 %v14434_v24  ;;  %v14483_v24 = vld [vmem:[%s19501_s9 + $0x26c] ss:$16 sps:$4 sm:$0xff]  }
 0x941   :  { %3402 = vmatpush1.bf16.msra.mxu0 %v14399_v23 }
 0x942   :  { %3403 = vmatprep.subr.bf16.mxu0 %v14404_v8 }
 0x943   :  { %13781 = vmatpush3.bf16.msra.mxu1 %v14438_v28  ;;  %v14486_v28 = vld [vmem:[%s19501_s9 + $0x244] ss:$16 sps:$4 sm:$0xff]  }
 0x944   :  { %13782 = vmatprep.subr.bf16.mxu1 %v14439_v29  ;;  %v14489_v29 = vld [vmem:[%s19501_s9 + $0x24c] ss:$16 sps:$4 sm:$0xff]  }
 0x945   :  { %3404 = vmatpush1.bf16.msra.mxu0 %v14402_v1 }
 0x946   :  { %3405 = vmatprep.subr.bf16.mxu0 %v14407_v0 }
 0x947   :  { %13783 = vmatpush3.bf16.msra.mxu1 %v14443_v7  ;;  %v14492_v7 = vld [vmem:[%s19501_s9 + $0x224] ss:$16 sps:$4 sm:$0xff]  }
 0x948   :  { %13784 = vmatprep.subr.bf16.mxu1 %v14444_v61  ;;  %v14495_v61 = vld [vmem:[%s19501_s9 + $0x22c] ss:$16 sps:$4 sm:$0xff]  }
 0x949   :  { %3406 = vmatpush1.bf16.msra.mxu0 %v14405_v55 }
 0x94a   :  { %3407 = vmatprep.subr.bf16.mxu0 %v14410_v46  ;;  %v14454_v46 = vld [vmem:[%s19501_s9 + $0x2e0] ss:$16 sps:$4 sm:$0xff]  }
 0x94b   :  { %13785 = vmatpush3.bf16.msra.mxu1 %v14448_v62  ;;  %v14498_v62 = vld [vmem:[%s19501_s9 + $0x204] ss:$16 sps:$4 sm:$0xff]  }
 0x94c   :  { %13786 = vmatprep.subr.bf16.mxu1 %v14449_v12  ;;  %v14501_v12 = vld [vmem:[%s19501_s9 + $0x20c] ss:$16 sps:$4 sm:$0xff]  }
 0x94d   :  { %3408 = vmatpush1.bf16.msra.mxu0 %v14408_v47  ;;  %v14457_v47 = vld [vmem:[%s19501_s9 + $0x2e8] ss:$16 sps:$4 sm:$0xff]  }
 0x94e   :  { %3409 = vmatprep.subr.bf16.mxu0 %v14413_v48 }
 0x94f   :  { %13787 = vmatpush3.bf16.msra.mxu1 %v14453_v18  ;;  %v14504_v18 = vld [vmem:[%s19501_s9 + $0xec] ss:$16 sps:$4 sm:$0xff]  }
 0x950   :  { %3436 = vmatprep.subr.bf16.mxu1 %v14456_v9  ;;  %v14502_v9 = vld [vmem:[%s19501_s9 + $0xe8] ss:$16 sps:$4 sm:$0xff]  }
 0x951   :  { %3410 = vmatpush1.bf16.msra.mxu0 %v14411_v59  ;;  %v14462_v59 = vld [vmem:[%s19501_s9 + $0x2c4] ss:$16 sps:$4 sm:$0xff]  }
 0x952   :  { %3411 = vmatprep.subr.bf16.mxu0 %v14417_v60  ;;  %v14465_v60 = vld [vmem:[%s19501_s9 + $0x2cc] ss:$16 sps:$4 sm:$0xff]  }
 0x955   :  { %3412 = vmatpush2.bf16.msra.mxu0 %v14415_v5  ;;  %v14460_v5 = vld [vmem:[%s19501_s9 + $0x2c0] ss:$16 sps:$4 sm:$0xff]  }
 0x956   :  { %3413 = vmatprep.subr.bf16.mxu0 %v14422_v10  ;;  %v14463_v10 = vld [vmem:[%s19501_s9 + $0x2c8] ss:$16 sps:$4 sm:$0xff]  }
 0x959   :  { %3414 = vmatpush2.bf16.msra.mxu0 %v14420_v11  ;;  %v14468_v11 = vld [vmem:[%s19501_s9 + $0x2a4] ss:$16 sps:$4 sm:$0xff]  }
 0x95a   :  { %3415 = vmatprep.subr.bf16.mxu0 %v14427_v15  ;;  %v14466_v15 = vld [vmem:[%s19501_s9 + $0x2a0] ss:$16 sps:$4 sm:$0xff]  }
 0x95d   :  { %3416 = vmatpush2.bf16.msra.mxu0 %v14425_v21  ;;  %v14469_v21 = vld [vmem:[%s19501_s9 + $0x2a8] ss:$16 sps:$4 sm:$0xff]  }
 0x95e   :  { %3417 = vmatprep.subr.bf16.mxu0 %v14432_v58  ;;  %v14472_v58 = vld [vmem:[%s19501_s9 + $0x280] ss:$16 sps:$4 sm:$0xff]  }
 0x961   :  { %3418 = vmatpush2.bf16.msra.mxu0 %v14430_v6  ;;  %v14475_v6 = vld [vmem:[%s19501_s9 + $0x288] ss:$16 sps:$4 sm:$0xff]  }
 0x962   :  { %3419 = vmatprep.subr.bf16.mxu0 %v14437_v63  ;;  %v14478_v63 = vld [vmem:[%s19501_s9 + $0x260] ss:$16 sps:$4 sm:$0xff]  }
 0x965   :  { %3420 = vmatpush2.bf16.msra.mxu0 %v14435_v3  ;;  %v14481_v3 = vld [vmem:[%s19501_s9 + $0x268] ss:$16 sps:$4 sm:$0xff]  }
 0x966   :  { %3421 = vmatprep.subr.bf16.mxu0 %v14442_v34  ;;  %v14484_v34 = vld [vmem:[%s19501_s9 + $0x240] ss:$16 sps:$4 sm:$0xff]  }
 0x969   :  { %3422 = vmatpush2.bf16.msra.mxu0 %v14440_v35  ;;  %v14487_v35 = vld [vmem:[%s19501_s9 + $0x248] ss:$16 sps:$4 sm:$0xff]  }
 0x96a   :  { %3423 = vmatprep.subr.bf16.mxu0 %v14447_v52  ;;  %v14490_v52 = vld [vmem:[%s19501_s9 + $0x220] ss:$16 sps:$4 sm:$0xff]  }
 0x96d   :  { %3424 = vmatpush2.bf16.msra.mxu0 %v14445_v50  ;;  %v14493_v50 = vld [vmem:[%s19501_s9 + $0x228] ss:$16 sps:$4 sm:$0xff]  }
 0x96e   :  { %3425 = vmatprep.subr.bf16.mxu0 %v14452_v40  ;;  %v14496_v40 = vld [vmem:[%s19501_s9 + $0x200] ss:$16 sps:$4 sm:$0xff]  }
 0x971   :  { %3426 = vmatpush2.bf16.msra.mxu0 %v14450_v37  ;;  %v14499_v37 = vld [vmem:[%s19501_s9 + $0x208] ss:$16 sps:$4 sm:$0xff]  }
 0x972   :  { %3518 = vmatprep.subr.bf16.mxu0 %v14459_v16  ;;  %v14507_v16 = vld [vmem:[%s19501_s9 + $0xcc] ss:$16 sps:$4 sm:$0xff]  }
 0x9f2   :  { %v2631_v42 = vpop.f32.mrf.mxu1 }
 0x9f4   :  { %v2633_v31 = vpop.f32.mrf.mxu1  ;;  %v2590_v33 = vpop.f32.mrf.mxu0 }
 0x9f5   :  { %v2591_v44 = vadd.f32 %v2590_v33, %v2309_v39  ;;  %v14510_v39 = vld [vmem:[%s19501_s9 + $0xac] ss:$16 sps:$4 sm:$0xff]   ;;  %v14514_v33 = vld [vmem:[%s19501_s9 + $0x68] ss:$16 sps:$4 sm:$0xff]  }
 0x9f6   :  { %v2635_v26 = vpop.f32.mrf.mxu1  ;;  %v2592_v57 = vpop.f32.mrf.mxu0 }
 0x9f7   :  { %v2632_v54 = vadd.f32 %v2631_v42, %v2591_v44  ;;  %v2593_v17 = vadd.f32 %v2592_v57, %v2313_v30  ;;  %v14508_v42 = vld [vmem:[%s19501_s9 + $0xa8] ss:$16 sps:$4 sm:$0xff]   ;;  %v14519_v44 = vld [vmem:[%s19501_s9 + $0x4c] ss:$16 sps:$4 sm:$0xff]  }
 0x9f8   :  { %v2636_v36 = vpop.f32.mrf.mxu1  ;;  %v2594_v27 = vpop.f32.mrf.mxu0  ;;  %v14511_v30 = vld [vmem:[%s19501_s9 + $0x88] ss:$16 sps:$4 sm:$0xff]   ;;  %v14522_v57 = vld [vmem:[%s19501_s9 + $0x2c] ss:$16 sps:$4 sm:$0xff]  }
 0x9f9   :  { %v2634_v23 = vadd.f32 %v2633_v31, %v2593_v17  ;;  %16124 = vtanh.f32 %v2632_v54  ;;  %v14516_v31 = vld [vmem:[%s19501_s9 + $0x6c] ss:$16 sps:$4 sm:$0xff]   ;;  %v14517_v26 = vld [vmem:[%s19501_s9 + $0x48] ss:$16 sps:$4 sm:$0xff]  }
 0x9fa   :  { %v2595_v8 = vpop.f32.mrf.mxu0  ;;  %v14520_v54 = vld [vmem:[%s19501_s9 + $0x28] ss:$16 sps:$4 sm:$0xff]   ;;  %v14525_v17 = vld [vmem:[%s19501_s9 + $0xc] ss:$16 sps:$4 sm:$0xff]  }
 0x9fb   :  { %16126 = vtanh.f32 %v2634_v23  ;;  %v14523_v36 = vld [vmem:[%s19501_s9 + $0x8] ss:$16 sps:$4 sm:$0xff]   ;;  %v14528_v27 = vld [vmem:[%s19501_s9 + $0x1ec] ss:$16 sps:$4 sm:$0xff]  }
 0x9fc   :  { %v14526_v23 = vld [vmem:[%s19501_s9 + $0x1e8] ss:$16 sps:$4 sm:$0xff]   ;;  %v14531_v8 = vld [vmem:[%s19501_s9 + $0x1cc] ss:$16 sps:$4 sm:$0xff]  }
 0xa06   :  { %v16125_v1 = vpop.eup %16124 }
 0xa07   :  { %v17498_v48 = vpack.c.bf16 %v16125_v1, %v16125_v1  ;;  %v14529_v1 = vld [vmem:[%s19501_s9 + $0x1c8] ss:$16 sps:$4 sm:$0xff]  }
 0xa08   :  { %v16127_v0 = vpop.eup %16126 }
 0xa09   :  { %v17490_v55 = vpack.c.bf16 %v16127_v0, %v16127_v0  ;;  %v14534_v0 = vld [vmem:[%s19501_s9 + $0x1ac] ss:$16 sps:$4 sm:$0xff]  }
 0xa0b   :  { %2809 = vmatprep.mubr.bf16.mxu1 %v17490_v55  ;;  %3427 = vmatprep.mubr.bf16.mxu0 %v17490_v55 }
 0xa0c   :  { %2810 = vmatmul.mubr.bf16.vlgmr.msra.gmra.mxu1 %v17498_v48  ;;  %3428 = vmatmul.mubr.bf16.vlgmr.msra.gmra.mxu0 %v17498_v48 }
 0xa0d   :  { %3437 = vmatpush1.bf16.msra.mxu1 %v14454_v46  ;;  %3519 = vmatpush1.bf16.msra.mxu0 %v14457_v47  ;;  %v14537_v46 = vld [vmem:[%s19501_s9 + $0x18c] ss:$16 sps:$4 sm:$0xff]   ;;  %v14535_v47 = vld [vmem:[%s19501_s9 + $0x188] ss:$16 sps:$4 sm:$0xff]  }
 0xa0e   :  { %3438 = vmatprep.subr.bf16.mxu1 %v14462_v59  ;;  %3520 = vmatprep.subr.bf16.mxu0 %v14465_v60  ;;  %v14540_v59 = vld [vmem:[%s19501_s9 + $0x16c] ss:$16 sps:$4 sm:$0xff]   ;;  %v14538_v60 = vld [vmem:[%s19501_s9 + $0x168] ss:$16 sps:$4 sm:$0xff]  }
 0xa0f   :  { %3468 = vmatprep.mubr.bf16.mxu1 %v19533_v32  ;;  %3550 = vmatprep.mubr.bf16.mxu0 %v19533_v32 }
 0xa11   :  { %3439 = vmatpush1.bf16.msra.mxu1 %v14460_v5  ;;  %3521 = vmatpush1.bf16.msra.mxu0 %v14463_v10  ;;  %v14543_v5 = vld [vmem:[%s19501_s9 + $0x14c] ss:$16 sps:$4 sm:$0xff]   ;;  %v14541_v10 = vld [vmem:[%s19501_s9 + $0x148] ss:$16 sps:$4 sm:$0xff]  }
 0xa12   :  { %3440 = vmatprep.subr.bf16.mxu1 %v14468_v11  ;;  %3522 = vmatprep.subr.bf16.mxu0 %v14471_v14  ;;  %v14546_v11 = vld [vmem:[%s19501_s9 + $0x12c] ss:$16 sps:$4 sm:$0xff]   ;;  %v14544_v14 = vld [vmem:[%s19501_s9 + $0x128] ss:$16 sps:$4 sm:$0xff]  }
 0xa15   :  { %3441 = vmatpush1.bf16.msra.mxu1 %v14466_v15  ;;  %3523 = vmatpush1.bf16.msra.mxu0 %v14469_v21  ;;  %v14549_v15 = vld [vmem:[%s19501_s9 + $0x10c] ss:$16 sps:$4 sm:$0xff]   ;;  %v14547_v21 = vld [vmem:[%s19501_s9 + $0x108] ss:$16 sps:$4 sm:$0xff]  }
 0xa16   :  { %3442 = vmatprep.subr.bf16.mxu1 %v14474_v53  ;;  %3524 = vmatprep.subr.bf16.mxu0 %v14477_v56  ;;  %v14552_v53 = vld [vmem:[#allocation7 + $0xac] ss:$12 sps:$4 sm:$0xff]   ;;  %v14550_v56 = vld [vmem:[#allocation7 + $0xa8] ss:$12 sps:$4 sm:$0xff]  }
 0xa19   :  { %3443 = vmatpush1.bf16.msra.mxu1 %v14472_v58  ;;  %3525 = vmatpush1.bf16.msra.mxu0 %v14475_v6  ;;  %v14553_v58 = vld [vmem:[#allocation7 + $0xb0] ss:$12 sps:$4 sm:$0xff]   ;;  %v14556_v6 = vld [vmem:[#allocation7 + $0x94] ss:$12 sps:$4 sm:$0xff]  }
 0xa1a   :  { %3444 = vmatprep.subr.bf16.mxu1 %v14480_v2  ;;  %3526 = vmatprep.subr.bf16.mxu0 %v14483_v24  ;;  %v14554_v2 = vld [vmem:[#allocation7 + $0x90] ss:$12 sps:$4 sm:$0xff]   ;;  %v14557_v24 = vld [vmem:[#allocation7 + $0x98] ss:$12 sps:$4 sm:$0xff]  }
 0xa1d   :  { %3445 = vmatpush1.bf16.msra.mxu1 %v14478_v63  ;;  %3527 = vmatpush1.bf16.msra.mxu0 %v14481_v3  ;;  %v14560_v63 = vld [vmem:[#allocation7 + $0x7c] ss:$12 sps:$4 sm:$0xff]   ;;  %v14561_v3 = vld [vmem:[#allocation7 + $0x80] ss:$12 sps:$4 sm:$0xff]  }
 0xa1e   :  { %3446 = vmatprep.subr.bf16.mxu1 %v14486_v28  ;;  %3528 = vmatprep.subr.bf16.mxu0 %v14489_v29  ;;  %v14564_v28 = vld [vmem:[#allocation7 + $0x64] ss:$12 sps:$4 sm:$0xff]   ;;  %v14562_v29 = vld [vmem:[#allocation7 + $0x60] ss:$12 sps:$4 sm:$0xff]  }
 0xa21   :  { %3447 = vmatpush1.bf16.msra.mxu1 %v14484_v34  ;;  %3529 = vmatpush1.bf16.msra.mxu0 %v14487_v35  ;;  %v14565_v34 = vld [vmem:[#allocation7 + $0x68] ss:$12 sps:$4 sm:$0xff]  }
 0xa22   :  { %3448 = vmatprep.subr.bf16.mxu1 %v14492_v7  ;;  %3530 = vmatprep.subr.bf16.mxu0 %v14495_v61  ;;  %v14566_v35 = vld [vmem:[#allocation7 + $0x48] ss:$12 sps:$4 sm:$0xff]   ;;  %v14568_v7 = vld [vmem:[#allocation7 + $0x4c] ss:$12 sps:$4 sm:$0xff]   ;;  %v14569_v61 = vld [vmem:[#allocation7 + $0x50] ss:$12 sps:$4 sm:$0xff]  }
 0xa25   :  { %3449 = vmatpush1.bf16.msra.mxu1 %v14490_v52  ;;  %3531 = vmatpush1.bf16.msra.mxu0 %v14493_v50  ;;  %v14572_v52 = vld [vmem:[#allocation7 + $0x34] ss:$12 sps:$4 sm:$0xff]   ;;  %v14570_v50 = vld [vmem:[#allocation7 + $0x30] ss:$12 sps:$4 sm:$0xff]  }
 0xa26   :  { %3450 = vmatprep.subr.bf16.mxu1 %v14498_v62  ;;  %3532 = vmatprep.subr.bf16.mxu0 %v14501_v12  ;;  %v14573_v62 = vld [vmem:[#allocation7 + $0x38] ss:$12 sps:$4 sm:$0xff]   ;;  %v14576_v12 = vld [vmem:[#allocation7 + $0x1c] ss:$12 sps:$4 sm:$0xff]  }
 0xa29   :  { %3451 = vmatpush1.bf16.msra.mxu1 %v14496_v40  ;;  %3533 = vmatpush1.bf16.msra.mxu0 %v14499_v37 }
 0xa2a   :  { %3477 = vmatprep.subr.bf16.mxu1 %v14504_v18  ;;  %3765 = vmatprep.subr.bf16.mxu0 %v14552_v53  ;;  %v14574_v18 = vld [vmem:[#allocation7 + $0x18] ss:$12 sps:$4 sm:$0xff]  }
 0xa2c   :  { %3469 = vmatmul.mubr.bf16.vlgmr.msra.gmra.mxu1 %v17372_v38  ;;  %3551 = vmatmul.mubr.bf16.vlgmr.msra.gmra.mxu0 %v17372_v38  ;;  %v14513_v38 = vld [vmem:[%s19501_s9 + $0x8c] ss:$16 sps:$4 sm:$0xff]  }
 0xa2d   :  { %3478 = vmatpush1.bf16.msra.mxu1 %v14502_v9  ;;  %3509 = vmatprep.mubr.bf16.mxu1 %v17490_v55  ;;  %v14532_v55 = vld [vmem:[%s19501_s9 + $0x1a8] ss:$16 sps:$4 sm:$0xff]   ;;  %v14577_v9 = vld [vmem:[#allocation7 + $0x20] ss:$12 sps:$4 sm:$0xff]  }
 0xa2e   :  { %3479 = vmatprep.subr.bf16.mxu1 %v14507_v16  ;;  %3797 = vmatprep.mubr.bf16.mxu0 %v19533_v32  ;;  %v14580_v16 = vld [vmem:[#allocation7 + $0x4] ss:$12 sps:$4 sm:$0xff]  }
 0xa2f   :  { %3766 = vmatpush1.bf16.msra.mxu0 %v14550_v56 }
 0xa30   :  { %3767 = vmatprep.subr.bf16.mxu0 %v14556_v6 }
 0xa31   :  { %3480 = vmatpush1.bf16.msra.mxu1 %v14505_v13  ;;  %v12612_v13 = vld [vmem:[%s19507_s15] ss:$0 sm:$0xff] }
 0xa32   :  { %3481 = vmatprep.subr.bf16.mxu1 %v14510_v39 }
 0xa33   :  { %3768 = vmatpush1.bf16.msra.mxu0 %v14554_v2 }
 0xa34   :  { %3769 = vmatprep.subr.bf16.mxu0 %v14560_v63 }
 0xa35   :  { %3482 = vmatpush1.bf16.msra.mxu1 %v14508_v42 }
 0xa36   :  { %3483 = vmatprep.subr.bf16.mxu1 %v14513_v38 }
 0xa39   :  { %3484 = vmatpush1.bf16.msra.mxu1 %v14511_v30 }
 0xa3a   :  { %3485 = vmatprep.subr.bf16.mxu1 %v14516_v31 }
 0xa3d   :  { %3486 = vmatpush1.bf16.msra.mxu1 %v14514_v33  ;;  %v14578_v33 = vld [vmem:[#allocation7] ss:$12 sps:$4 sm:$0xff]  }
 0xa3e   :  { %3487 = vmatprep.subr.bf16.mxu1 %v14519_v44  ;;  %v14581_v44 = vld [vmem:[#allocation7 + $0x8] ss:$12 sps:$4 sm:$0xff]  }
 0xa41   :  { %3488 = vmatpush1.bf16.msra.mxu1 %v14517_v26 }
 0xa42   :  { %3489 = vmatprep.subr.bf16.mxu1 %v14522_v57 }
 0xa45   :  { %3490 = vmatpush1.bf16.msra.mxu1 %v14520_v54 }
 0xa46   :  { %3491 = vmatprep.subr.bf16.mxu1 %v14525_v17  ;;  %v16348_v17 = vld [vmem:[%s19542_s2] sm:$0xff] }
 0xa49   :  { %3492 = vmatpush1.bf16.msra.mxu1 %v14523_v36 }
 0xa4a   :  { %3493 = vmatprep.subr.bf16.mxu1 %v14528_v27  ;;  %v14584_v27 = vld [vmem:[#allocation8 + $0x74] ss:$8 sps:$4 sm:$0xff]  }
 0xa4d   :  { %3494 = vmatpush2.bf16.msra.mxu1 %v14526_v23 }
 0xa4e   :  { %3495 = vmatprep.subr.bf16.mxu1 %v14531_v8 }
 0xa51   :  { %3496 = vmatpush2.bf16.msra.mxu1 %v14529_v1 }
 0xa52   :  { %3497 = vmatprep.subr.bf16.mxu1 %v14534_v0 }
 0xa55   :  { %3498 = vmatpush2.bf16.msra.mxu1 %v14532_v55 }
 0xa56   :  { %3499 = vmatprep.subr.bf16.mxu1 %v14537_v46 }
 0xa59   :  { %3500 = vmatpush2.bf16.msra.mxu1 %v14535_v47 }
 0xa5a   :  { %3501 = vmatprep.subr.bf16.mxu1 %v14540_v59 }
 0xa5d   :  { %3502 = vmatpush2.bf16.msra.mxu1 %v14538_v60  ;;  %v14608_v60 = vld [vmem:[#allocation8 + $0x174] ss:$8 sps:$4 sm:$0xff]  }
 0xa5e   :  { %3503 = vmatprep.subr.bf16.mxu1 %v14543_v5  ;;  %v1662_v5 = vld [vmem:[%s19500_s8] sm:$0xf] }
 0xa61   :  { %3504 = vmatpush2.bf16.msra.mxu1 %v14541_v10  ;;  %v1671_v10 = vrot.slane %v1662_v5, %v19544_v41 }
 0xa62   :  { %3505 = vmatprep.subr.bf16.mxu1 %v14546_v11  ;;  %v1667_v11 = vrot.slane %v1662_v5, %v19543_v22 }
 0xa64   :  { %v17722_v53 = vadd.f32 %v1667_v11, %v17355_v43  ;;  %v14605_v11 = vld [vmem:[#allocation8 + $0x4] ss:$8 sps:$4 sm:$0xff]  }
 0xa65   :  { %3506 = vmatpush2.bf16.msra.mxu1 %v14544_v14 }
 0xa66   :  { %3507 = vmatprep.subr.bf16.mxu1 %v14549_v15 }
 0xa69   :  { %3508 = vmatpush2.bf16.msra.mxu1 %v14547_v21  ;;  %v17719_v21 = vadd.f32 %v1671_v10, %v17357_v19  ;;  %v14600_v10 = vld [vmem:[#allocation8 + $0x10] ss:$8 sps:$4 sm:$0xff]  }
 0xa6a   :  { %14000 = vmatprep.subr.bf16.mxu1 %v16469_v20 }
 0xa6c   :  { %3510 = vmatmul.mubr.bf16.vlgmr.msra.gmra.mxu1 %v17498_v48  ;;  %v14558_v48 = vld [vmem:[#allocation7 + $0x78] ss:$12 sps:$4 sm:$0xff]  }
 0xa6d   :  { %14016 = vmatprep.mubr.msk.bf16.mxu1 %vm16470_vm1, %v16469_v20  ;;  %14001 = vmatpush3.bf16.msra.mxu1 %v14553_v58 }
 0xa6e   :  { %14002 = vmatprep.subr.bf16.mxu1 %v16469_v20  ;;  %3770 = vmatpush1.bf16.msra.mxu0 %v14558_v48  ;;  %v1675_v48 = vrot.slane %v1662_v5, %v19546_v51 }
 0xa6f   :  { %3771 = vmatprep.subr.bf16.mxu0 %v14564_v28 }
 0xa70   :  { %v17729_v43 = vadd.f32 %v1675_v48, %v17366_v4  ;;  %v14627_v48 = vld [vmem:[#allocation8 + $0xc0] ss:$8 sps:$4 sm:$0xff]  }
 0xa71   :  { %14003 = vmatpush3.bf16.msra.mxu1 %v14557_v24 }
 0xa72   :  { %14004 = vmatprep.subr.bf16.mxu1 %v16469_v20  ;;  %3772 = vmatpush1.bf16.msra.mxu0 %v14562_v29 }
 0xa73   :  { %3773 = vmatprep.subr.bf16.mxu0 %v14568_v7 }
 0xa75   :  { %14005 = vmatpush3.bf16.msra.mxu1 %v14561_v3  ;;  %v1679_v3 = vrot.slane %v1662_v5, %v19545_v45  ;;  %v14602_v5 = vld [vmem:[#allocation8 + $0x14] ss:$8 sps:$4 sm:$0xff]  }
 0xa76   :  { %14006 = vmatprep.subr.bf16.mxu1 %v16469_v20  ;;  %3774 = vmatpush1.bf16.msra.mxu0 %v14566_v35 }
 0xa77   :  { %3775 = vmatprep.subr.bf16.mxu0 %v14572_v52  ;;  %v17732_v7 = vadd.f32 %v1679_v3, %v17362_v49  ;;  %v14632_v3 = vld [vmem:[#allocation8 + $0x134] ss:$8 sps:$4 sm:$0xff]  }
 0xa79   :  { %14007 = vmatpush3.bf16.msra.mxu1 %v14565_v34 }
 0xa7a   :  { %14008 = vmatprep.subr.bf16.mxu1 %v16469_v20  ;;  %3776 = vmatpush1.bf16.msra.mxu0 %v14570_v50 }
 0xa7b   :  { %3777 = vmatprep.subr.bf16.mxu0 %v14576_v12 }
 0xa7d   :  { %14009 = vmatpush3.bf16.msra.mxu1 %v14569_v61 }
 0xa7e   :  { %14010 = vmatprep.subr.bf16.mxu1 %v16469_v20  ;;  %3778 = vmatpush1.bf16.msra.mxu0 %v14574_v18 }
 0xa7f   :  { %3779 = vmatprep.subr.bf16.mxu0 %v14580_v16 }
 0xa81   :  { %14011 = vmatpush3.bf16.msra.mxu1 %v14573_v62 }
 0xa82   :  { %14012 = vmatprep.subr.bf16.mxu1 %v16469_v20  ;;  %3780 = vmatpush1.bf16.msra.mxu0 %v14578_v33 }
 0xa83   :  { %4152 = vmatprep.subr.bf16.mxu0 %v14584_v27  ;;  %v14588_v27 = vld [vmem:[#allocation8 + $0x50] ss:$8 sps:$4 sm:$0xff]  }
 0xa85   :  { %14013 = vmatpush3.bf16.msra.mxu1 %v14577_v9 }
 0xa86   :  { %14014 = vmatprep.subr.bf16.mxu1 %v16469_v20 }
 0xa89   :  { %14015 = vmatpush3.bf16.msra.mxu1 %v14581_v44  ;;  %v14587_v44 = vld [vmem:[#allocation8 + $0x64] ss:$8 sps:$4 sm:$0xff]  }
 0xa8a   :  { %4193 = vmatprep.subr.bf16.mxu1 %v14608_v60  ;;  %v14597_v60 = vld [vmem:[#allocation8 + $0x20] ss:$8 sps:$4 sm:$0xff]  }
 0xacc   :  { %v13788_v40 = vpop.f32.mrf.mxu1  ;;  %v3429_v37 = vpop.f32.mrf.mxu0 }
 0xace   :  { %v13789_v39 = vpop.f32.mrf.mxu1  ;;  %v3431_v42 = vpop.f32.mrf.mxu0 }
 0xacf   :  { %v13790_v38 = vadd.f32 %v13789_v39, %v13788_v40 }
 0xad0   :  { %v13791_v30 = vpop.f32.mrf.mxu1  ;;  %v3433_v31 = vpop.f32.mrf.mxu0 }
 0xad1   :  { %v2812_v26 = vadd.f32 %v13790_v38, %v12612_v13  ;;  %v14582_v30 = vld [vmem:[#allocation8 + $0x70] ss:$8 sps:$4 sm:$0xff]  }
 0xad2   :  { %v13792_v57 = vpop.f32.mrf.mxu1  ;;  %v3434_v54 = vpop.f32.mrf.mxu0  ;;  %v14606_v31 = vld [vmem:[#allocation8 + $0x170] ss:$8 sps:$4 sm:$0xff]  }
 0xad3   :  { %v17707_v36 = vadd.f32 %v16348_v17, %v2812_v26  ;;  %v14614_v26 = vld [vmem:[#allocation8 + $0x164] ss:$8 sps:$4 sm:$0xff]   ;;  %v14612_v57 = vld [vmem:[#allocation8 + $0x160] ss:$8 sps:$4 sm:$0xff]   ;;  %v14590_v54 = vld [vmem:[#allocation8 + $0x54] ss:$8 sps:$4 sm:$0xff]  }
 0xad4   :  { %v14620_v17 = vld [vmem:[#allocation8 + $0x154] ss:$8 sps:$4 sm:$0xff]  }
 0xad5   :  { %2818 = vst [vmem:[%s19508_s16] sm:$0xff] %v17707_v36 }
 0xaec   :  { %v3470_v23 = vpop.f32.mrf.mxu1  ;;  %v3552_v8 = vpop.f32.mrf.mxu0 }
 0xaed   :  { %v3471_v15 = vadd.f32 %v3470_v23, %v3429_v37  ;;  %v14618_v23 = vld [vmem:[#allocation8 + $0x150] ss:$8 sps:$4 sm:$0xff]  }
 0xaee   :  { %v3472_v1 = vpop.f32.mrf.mxu1  ;;  %v3554_v0 = vpop.f32.mrf.mxu0 }
 0xaef   :  { %v3473_v14 = vadd.f32 %v3472_v1, %v3431_v42  ;;  %v3559_v58 = vadd.f32 %v3471_v15, %v17722_v53  ;;  %v14626_v1 = vld [vmem:[#allocation8 + $0x144] ss:$8 sps:$4 sm:$0xff]   ;;  %v14611_v15 = vld [vmem:[#allocation8 + $0xf4] ss:$8 sps:$4 sm:$0xff]  }
 0xaf0   :  { %v3474_v55 = vpop.f32.mrf.mxu1  ;;  %v3556_v46 = vpop.f32.mrf.mxu0 }
 0xaf1   :  { %v3560_v56 = vadd.f32 %v3473_v14, %v17719_v21  ;;  %v12725_v2 = vmul.f32 -1.442695, %v3559_v58  ;;  %v14624_v55 = vld [vmem:[#allocation8 + $0x140] ss:$8 sps:$4 sm:$0xff]   ;;  %v14596_v46 = vld [vmem:[#allocation8 + $0x34] ss:$8 sps:$4 sm:$0xff]  }
 0xaf2   :  { %v3475_v47 = vpop.f32.mrf.mxu1  ;;  %v3557_v59 = vpop.f32.mrf.mxu0  ;;  %v14603_v14 = vld [vmem:[#allocation8] ss:$8 sps:$4 sm:$0xff]   ;;  %v14617_v58 = vld [vmem:[#allocation8 + $0xe4] ss:$8 sps:$4 sm:$0xff]  }
 0xaf3   :  { %v12726_v6 = vmul.f32 -1.442695, %v3560_v56  ;;  %v14594_v47 = vld [vmem:[#allocation8 + $0x30] ss:$8 sps:$4 sm:$0xff]   ;;  %v14599_v59 = vld [vmem:[#allocation8 + $0x24] ss:$8 sps:$4 sm:$0xff]  }
 0xaf4   :  { %v14609_v56 = vld [vmem:[#allocation8 + $0xf0] ss:$8 sps:$4 sm:$0xff]  }
 0xaf5   :  { %16128 = vpow2.f32 %v12726_v6  ;;  %v14615_v6 = vld [vmem:[#allocation8 + $0xe0] ss:$8 sps:$4 sm:$0xff]  }
 0xaf6   :  { %16130 = vpow2.f32 %v12725_v2  ;;  %v14623_v2 = vld [vmem:[#allocation8 + $0xd4] ss:$8 sps:$4 sm:$0xff]  }
 0xb02   :  { %v16129_v24 = vpop.eup %16128 }
 0xb03   :  { %v16131_v63 = vpop.eup %16130  ;;  %v3572_v28 = vadd.f32 1.0, %v16129_v24  ;;  %v14621_v24 = vld [vmem:[#allocation8 + $0xd0] ss:$8 sps:$4 sm:$0xff]  }
 0xb04   :  { %v3566_v19 = vadd.f32 1.0, %v16131_v63  ;;  %v14629_v63 = vld [vmem:[#allocation8 + $0xc4] ss:$8 sps:$4 sm:$0xff]  }
 0xb05   :  { %16132 = vrcp.f32 %v3572_v28  ;;  %v14630_v28 = vld [vmem:[#allocation8 + $0x130] ss:$8 sps:$4 sm:$0xff]  }
 0xb06   :  { %16134 = vrcp.f32 %v3566_v19  ;;  %v14635_v19 = vld [vmem:[#allocation8 + $0xb4] ss:$8 sps:$4 sm:$0xff]  }
 0xb12   :  { %v16133_v40 = vpop.eup %16132 }
 0xb13   :  { %v16135_v4 = vpop.eup %16134  ;;  %v3582_v18 = vmul.f32 %v16133_v40, %v17369_v25  ;;  %v14585_v25 = vld [vmem:[#allocation8 + $0x60] ss:$8 sps:$4 sm:$0xff]   ;;  %v14650_v40 = vld [vmem:[#allocation8 + $0x104] ss:$8 sps:$4 sm:$0xff]  }
 0xb2c   :  { %v3511_v29 = vpop.f32.mrf.mxu1 }
 0xb2d   :  { %v3553_v34 = vadd.f32 %v3552_v8, %v3511_v29  ;;  %v14593_v8 = vld [vmem:[#allocation8 + $0x44] ss:$8 sps:$4 sm:$0xff]   ;;  %v14633_v29 = vld [vmem:[#allocation8 + $0xb0] ss:$8 sps:$4 sm:$0xff]  }
 0xb2e   :  { %v3513_v35 = vpop.f32.mrf.mxu1 }
 0xb2f   :  { %v3561_v61 = vadd.f32 %v3553_v34, %v17729_v43  ;;  %v3555_v52 = vadd.f32 %v3554_v0, %v3513_v35  ;;  %v14591_v0 = vld [vmem:[#allocation8 + $0x40] ss:$8 sps:$4 sm:$0xff]   ;;  %v14638_v34 = vld [vmem:[#allocation8 + $0x124] ss:$8 sps:$4 sm:$0xff]  }
 0xb30   :  { %v3515_v50 = vpop.f32.mrf.mxu1  ;;  %v14636_v35 = vld [vmem:[#allocation8 + $0x120] ss:$8 sps:$4 sm:$0xff]  }
 0xb31   :  { %16136 = vtanh.f32 %v3561_v61  ;;  %v3562_v45 = vadd.f32 %v3555_v52, %v17732_v7  ;;  %v14641_v61 = vld [vmem:[#allocation8 + $0xa4] ss:$8 sps:$4 sm:$0xff]   ;;  %v14639_v52 = vld [vmem:[#allocation8 + $0xa0] ss:$8 sps:$4 sm:$0xff]   ;;  %v14644_v50 = vld [vmem:[#allocation8 + $0x114] ss:$8 sps:$4 sm:$0xff]  }
 0xb32   :  { %v3516_v62 = vpop.f32.mrf.mxu1 }
 0xb33   :  { %v12727_v12 = vmul.f32 -1.442695, %v3562_v45  ;;  %v14642_v45 = vld [vmem:[#allocation8 + $0x110] ss:$8 sps:$4 sm:$0xff]   ;;  %v14647_v62 = vld [vmem:[#allocation8 + $0x94] ss:$8 sps:$4 sm:$0xff]  }
 0xb35   :  { %16138 = vpow2.f32 %v12727_v12  ;;  %v14645_v12 = vld [vmem:[#allocation8 + $0x90] ss:$8 sps:$4 sm:$0xff]  }
 0xb3e   :  { %v16137_v37 = vpop.eup %16136 }
 0xb3f   :  { %v3583_v9 = vmul.f32 %v16137_v37, %v16135_v4  ;;  %v14648_v4 = vld [vmem:[#allocation8 + $0x100] ss:$8 sps:$4 sm:$0xff]   ;;  %v14653_v37 = vld [vmem:[#allocation8 + $0x84] ss:$8 sps:$4 sm:$0xff]  }
 0xb41   :  { %v17737_v49 = vadd.f32 %v3583_v9, %v3582_v18  ;;  %v14651_v18 = vld [vmem:[#allocation8 + $0x80] ss:$8 sps:$4 sm:$0xff]   ;;  %v14656_v9 = vld [vmem:[%s19501_s9 + $0xe4] ss:$16 sps:$4 sm:$0xff]  }
 0xb42   :  { %v16139_v16 = vpop.eup %16138 }
 0xb43   :  { %v3579_v13 = vadd.f32 1.0, %v16139_v16  ;;  %16140 = vtanh.f32 %v17737_v49  ;;  %v14678_v16 = vld [vmem:[#allocation10 + $0x78] sm:$0xff]  }
 0xb45   :  { %16142 = vrcp.f32 %v3579_v13  ;;  %v3620_v13 = vld [vmem:[%s19503_s11] sm:$0x7] }
 0xb50   :  { %v16141_v39 = vpop.eup %16140 }
 0xb52   :  { %v16143_v42 = vpop.eup %16142 }
 0xb53   :  { %v3586_v38 = vmul.f32 %v16143_v42, %v16141_v39  ;;  %v3625_v39 = vrot.slane %v3620_v13, %v19543_v22  ;;  %v3633_v42 = vrot.slane %v3620_v13, %v19546_v51 }
 0xb55   :  { %v17740_v33 = vpack.c.bf16 %v3586_v38, %v3586_v38  ;;  %v3629_v38 = vrot.slane %v3620_v13, %v19544_v41  ;;  %v14701_v13 = vld [vmem:[%s19501_s9 + $0x164] ss:$16 sps:$4 sm:$0xff]  }
 0xb57   :  { %3798 = vmatmul.mubr.bf16.vlgmr.msra.gmra.mxu0 %v17740_v33  ;;  %14017 = vmatmul.mubr.bf16.vlgmr.msra.gmra.mxu1 %v17740_v33 }
 0xb58   :  { %4153 = vmatpush1.bf16.msra.mxu0 %v14582_v30  ;;  %4194 = vmatpush1.bf16.msra.mxu1 %v14606_v31 }
 0xb59   :  { %4154 = vmatprep.subr.bf16.mxu0 %v14587_v44  ;;  %4195 = vmatprep.subr.bf16.mxu1 %v14614_v26 }
 0xb5a   :  { %4225 = vmatprep.mubr.bf16.mxu1 %v19533_v32 }
 0xb5c   :  { %4155 = vmatpush1.bf16.msra.mxu0 %v14585_v25  ;;  %4196 = vmatpush1.bf16.msra.mxu1 %v14612_v57 }
 0xb5d   :  { %4156 = vmatprep.subr.bf16.mxu0 %v14590_v54  ;;  %4197 = vmatprep.subr.bf16.mxu1 %v14620_v17 }
 0xb60   :  { %4157 = vmatpush1.bf16.msra.mxu0 %v14588_v27  ;;  %4198 = vmatpush1.bf16.msra.mxu1 %v14618_v23 }
 0xb61   :  { %4158 = vmatprep.subr.bf16.mxu0 %v14593_v8  ;;  %4199 = vmatprep.subr.bf16.mxu1 %v14626_v1 }
 0xb64   :  { %4159 = vmatpush1.bf16.msra.mxu0 %v14591_v0  ;;  %4200 = vmatpush1.bf16.msra.mxu1 %v14624_v55  ;;  %v14682_v55 = vld [vmem:[#allocation10 + $0x38] sm:$0xff]  }
 0xb65   :  { %4160 = vmatprep.subr.bf16.mxu0 %v14596_v46  ;;  %4201 = vmatprep.subr.bf16.mxu1 %v14632_v3  ;;  %v14669_v3 = vld [vmem:[%s19501_s9 + $0x40] ss:$16 sps:$4 sm:$0xff]  }
 0xb68   :  { %4161 = vmatpush1.bf16.msra.mxu0 %v14594_v47  ;;  %4202 = vmatpush1.bf16.msra.mxu1 %v14630_v28  ;;  %v14674_v28 = vld [vmem:[%s19501_s9 + $0x24] ss:$16 sps:$4 sm:$0xff]  }
 0xb69   :  { %4162 = vmatprep.subr.bf16.mxu0 %v14599_v59  ;;  %4203 = vmatprep.subr.bf16.mxu1 %v14638_v34  ;;  %v14683_v59 = vld [vmem:[#allocation10 + $0x70] sm:$0xff]  }
 0xb6a   :  { %v14675_v34 = vld [vmem:[%s19501_s9] ss:$16 sps:$4 sm:$0xff]  }
 0xb6c   :  { %4163 = vmatpush1.bf16.msra.mxu0 %v14597_v60  ;;  %4204 = vmatpush1.bf16.msra.mxu1 %v14636_v35  ;;  %v14681_v35 = vld [vmem:[%s19501_s9 + $0x1e4] ss:$16 sps:$4 sm:$0xff]  }
 0xb6d   :  { %4164 = vmatprep.subr.bf16.mxu0 %v14602_v5  ;;  %4205 = vmatprep.subr.bf16.mxu1 %v14644_v50  ;;  %v14654_v5 = vld [vmem:[%s19501_s9 + $0xe0] ss:$16 sps:$4 sm:$0xff]  }
 0xb6e   :  { %v14684_v50 = vld [vmem:[%s19501_s9 + $0x1c0] ss:$16 sps:$4 sm:$0xff]  }
 0xb70   :  { %4165 = vmatpush1.bf16.msra.mxu0 %v14600_v10  ;;  %4206 = vmatpush1.bf16.msra.mxu1 %v14642_v45  ;;  %v14688_v45 = vld [vmem:[#allocation10 + $0x68] sm:$0xff]  }
 0xb71   :  { %4166 = vmatprep.subr.bf16.mxu0 %v14605_v11  ;;  %4207 = vmatprep.subr.bf16.mxu1 %v14650_v40  ;;  %v14659_v11 = vld [vmem:[%s19501_s9 + $0xc4] ss:$16 sps:$4 sm:$0xff]   ;;  %v14692_v40 = vld [vmem:[#allocation10 + $0x28] sm:$0xff]  }
 0xb74   :  { %4167 = vmatpush1.bf16.msra.mxu0 %v14603_v14  ;;  %4208 = vmatpush1.bf16.msra.mxu1 %v14648_v4  ;;  %v14687_v14 = vld [vmem:[#allocation10 + $0x30] sm:$0xff]   ;;  %v14693_v4 = vld [vmem:[#allocation10 + $0x60] sm:$0xff]  }
 0xb75   :  { %4168 = vmatprep.subr.bf16.mxu0 %v14611_v15  ;;  %13803 = vmatprep.subr.bf16.mxu1 %v14678_v16  ;;  %v14657_v15 = vld [vmem:[%s19501_s9 + $0xc0] ss:$16 sps:$4 sm:$0xff]   ;;  %v14698_v16 = vld [vmem:[#allocation10 + $0x58] sm:$0xff]  }
 0xb78   :  { %4169 = vmatpush2.bf16.msra.mxu0 %v14609_v56  ;;  %v14662_v56 = vld [vmem:[%s19501_s9 + $0xa4] ss:$16 sps:$4 sm:$0xff]  }
 0xb79   :  { %4170 = vmatprep.subr.bf16.mxu0 %v14617_v58  ;;  %v14660_v58 = vld [vmem:[%s19501_s9 + $0xa0] ss:$16 sps:$4 sm:$0xff]  }
 0xb7c   :  { %4171 = vmatpush2.bf16.msra.mxu0 %v14615_v6  ;;  %v14665_v6 = vld [vmem:[%s19501_s9 + $0x84] ss:$16 sps:$4 sm:$0xff]  }
 0xb7d   :  { %4172 = vmatprep.subr.bf16.mxu0 %v14623_v2  ;;  %v14663_v2 = vld [vmem:[%s19501_s9 + $0x80] ss:$16 sps:$4 sm:$0xff]  }
 0xb80   :  { %4173 = vmatpush2.bf16.msra.mxu0 %v14621_v24  ;;  %v14668_v24 = vld [vmem:[%s19501_s9 + $0x64] ss:$16 sps:$4 sm:$0xff]  }
 0xb81   :  { %4174 = vmatprep.subr.bf16.mxu0 %v14629_v63  ;;  %v14666_v63 = vld [vmem:[%s19501_s9 + $0x60] ss:$16 sps:$4 sm:$0xff]  }
 0xb84   :  { %4175 = vmatpush2.bf16.msra.mxu0 %v14627_v48  ;;  %v14671_v48 = vld [vmem:[%s19501_s9 + $0x44] ss:$16 sps:$4 sm:$0xff]  }
 0xb85   :  { %4176 = vmatprep.subr.bf16.mxu0 %v14635_v19  ;;  %v14672_v19 = vld [vmem:[%s19501_s9 + $0x20] ss:$16 sps:$4 sm:$0xff]  }
 0xb88   :  { %4177 = vmatpush2.bf16.msra.mxu0 %v14633_v29  ;;  %v14677_v29 = vld [vmem:[%s19501_s9 + $0x4] ss:$16 sps:$4 sm:$0xff]  }
 0xb89   :  { %4178 = vmatprep.subr.bf16.mxu0 %v14641_v61  ;;  %v14679_v61 = vld [vmem:[%s19501_s9 + $0x1e0] ss:$16 sps:$4 sm:$0xff]  }
 0xb8c   :  { %4179 = vmatpush2.bf16.msra.mxu0 %v14639_v52  ;;  %v14686_v52 = vld [vmem:[%s19501_s9 + $0x1c4] ss:$16 sps:$4 sm:$0xff]  }
 0xb8d   :  { %4180 = vmatprep.subr.bf16.mxu0 %v14647_v62  ;;  %v14691_v62 = vld [vmem:[%s19501_s9 + $0x1a4] ss:$16 sps:$4 sm:$0xff]  }
 0xb90   :  { %4181 = vmatpush2.bf16.msra.mxu0 %v14645_v12  ;;  %v14689_v12 = vld [vmem:[%s19501_s9 + $0x1a0] ss:$16 sps:$4 sm:$0xff]  }
 0xb91   :  { %4182 = vmatprep.subr.bf16.mxu0 %v14653_v37  ;;  %v14696_v37 = vld [vmem:[%s19501_s9 + $0x184] ss:$16 sps:$4 sm:$0xff]  }
 0xb94   :  { %4183 = vmatpush2.bf16.msra.mxu0 %v14651_v18  ;;  %v14694_v18 = vld [vmem:[%s19501_s9 + $0x180] ss:$16 sps:$4 sm:$0xff]  }
 0xb95   :  { %4992 = vmatprep.subr.bf16.mxu0 %v14656_v9  ;;  %v14697_v9 = vld [vmem:[#allocation10 + $0x20] sm:$0xff]  }
 0xc17   :  { %v3799_v30 = vpop.f32.mrf.mxu0  ;;  %v3840_v31 = vpop.f32.mrf.mxu1 }
 0xc18   :  { %v3800_v44 = vadd.f32 %v3799_v30, %v3625_v39  ;;  %v3841_v26 = vadd.f32 %v3840_v31, %v3633_v42  ;;  %v14699_v39 = vld [vmem:[%s19501_s9 + $0x160] ss:$16 sps:$4 sm:$0xff]   ;;  %v14702_v42 = vld [vmem:[#allocation10 + $0x18] sm:$0xff]   ;;  %v14706_v30 = vld [vmem:[%s19501_s9 + $0x144] ss:$16 sps:$4 sm:$0xff]  }
 0xc19   :  { %v3801_v25 = vpop.f32.mrf.mxu0  ;;  %v14018_v57 = vpop.f32.mrf.mxu1  ;;  %v14704_v31 = vld [vmem:[%s19501_s9 + $0x140] ss:$16 sps:$4 sm:$0xff]  }
 0xc1a   :  { %16144 = vtanh.f32 %v3800_v44  ;;  %v3802_v54 = vadd.f32 %v3801_v25, %v3629_v38  ;;  %v14703_v38 = vld [vmem:[#allocation10 + $0x50] sm:$0xff]  }
 0xc1b   :  { %16146 = vtanh.f32 %v3841_v26  ;;  %v3803_v17 = vpop.f32.mrf.mxu0  ;;  %v3843_v27 = vpop.f32.mrf.mxu1  ;;  %v14707_v44 = vld [vmem:[#allocation10 + $0x10] sm:$0xff]   ;;  %v14708_v26 = vld [vmem:[#allocation10 + $0x48] sm:$0xff]  }
 0xc1c   :  { %16148 = vtanh.f32 %v3802_v54  ;;  %v14711_v25 = vld [vmem:[%s19501_s9 + $0x124] ss:$16 sps:$4 sm:$0xff]   ;;  %v14709_v57 = vld [vmem:[%s19501_s9 + $0x120] ss:$16 sps:$4 sm:$0xff]   ;;  %v14712_v54 = vld [vmem:[#allocation10 + $0x8] sm:$0xff]  }
 0xc1d   :  { %v3804_v23 = vpop.f32.mrf.mxu0  ;;  %v14019_v8 = vpop.f32.mrf.mxu1  ;;  %v14713_v17 = vld [vmem:[#allocation10 + $0x40] sm:$0xff]  }
 0xc1e   :  { %v14716_v27 = vld [vmem:[%s19501_s9 + $0x104] ss:$16 sps:$4 sm:$0xff]   ;;  %v14714_v23 = vld [vmem:[%s19501_s9 + $0x100] ss:$16 sps:$4 sm:$0xff]  }
 0xc1f   :  { %v14717_v8 = vld [vmem:[#allocation10] sm:$0xff]  }
 0xc27   :  { %v16145_v1 = vpop.eup %16144 }
 0xc28   :  { %v16147_v0 = vpop.eup %16146  ;;  %v3849_v10 = vpack.c.bf16 %v16145_v1, %v16145_v1  ;;  %v14720_v1 = vld [vmem:[%s19501_s9 + $0x2e4] ss:$16 sps:$4 sm:$0xff]  }
 0xc29   :  { %v16149_v46 = vpop.eup %16148  ;;  %v3851_v47 = vpack.c.bf16 %v16147_v0, %v16147_v0  ;;  %v14723_v0 = vld [vmem:[%s19501_s9 + $0x2ec] ss:$16 sps:$4 sm:$0xff]  }
 0xc2a   :  { %v3850_v60 = vpack.c.bf16 %v16149_v46, %v16149_v46 }
 0xc2b   :  { %4226 = vmatmul.mubr.bf16.vlgmr.msra.gmra.mxu1 %v3851_v47 }
 0xc2c   :  { %4184 = vmatprep.mubr.bf16.mxu0 %v3850_v60  ;;  %13804 = vmatpush3.bf16.msra.mxu1 %v14682_v55  ;;  %v3900_v55 = vld [vmem:[%s19505_s13] sm:$0x3] }
 0xc2d   :  { %4185 = vmatmul.mubr.bf16.vlgmr.msra.gmra.mxu0 %v3849_v10  ;;  %13805 = vmatprep.subr.bf16.mxu1 %v14683_v59  ;;  %v3905_v46 = vrot.slane %v3900_v55, %v19543_v22  ;;  %v3909_v59 = vrot.slane %v3900_v55, %v19544_v41  ;;  %v14769_v55 = vld [vmem:[%s19501_s9 + $0xc8] ss:$16 sps:$4 sm:$0xff]  }
 0xc2e   :  { %4993 = vmatpush1.bf16.msra.mxu0 %v14654_v5 }
 0xc2f   :  { %4994 = vmatprep.subr.bf16.mxu0 %v14659_v11 }
 0xc30   :  { %13806 = vmatpush3.bf16.msra.mxu1 %v14687_v14 }
 0xc31   :  { %13807 = vmatprep.subr.bf16.mxu1 %v14688_v45  ;;  %v14735_v45 = vld [vmem:[%s19501_s9 + $0x2ac] ss:$16 sps:$4 sm:$0xff]  }
 0xc32   :  { %4995 = vmatpush1.bf16.msra.mxu0 %v14657_v15 }
 0xc33   :  { %4996 = vmatprep.subr.bf16.mxu0 %v14662_v56 }
 0xc34   :  { %13808 = vmatpush3.bf16.msra.mxu1 %v14692_v40  ;;  %v14738_v40 = vld [vmem:[%s19501_s9 + $0x284] ss:$16 sps:$4 sm:$0xff]  }
 0xc35   :  { %13809 = vmatprep.subr.bf16.mxu1 %v14693_v4  ;;  %v14741_v4 = vld [vmem:[%s19501_s9 + $0x28c] ss:$16 sps:$4 sm:$0xff]  }
 0xc36   :  { %4997 = vmatpush1.bf16.msra.mxu0 %v14660_v58 }
 0xc37   :  { %4998 = vmatprep.subr.bf16.mxu0 %v14665_v6 }
 0xc38   :  { %13810 = vmatpush3.bf16.msra.mxu1 %v14697_v9  ;;  %v14744_v9 = vld [vmem:[%s19501_s9 + $0x264] ss:$16 sps:$4 sm:$0xff]  }
 0xc39   :  { %13811 = vmatprep.subr.bf16.mxu1 %v14698_v16  ;;  %v14747_v16 = vld [vmem:[%s19501_s9 + $0x26c] ss:$16 sps:$4 sm:$0xff]  }
 0xc3a   :  { %4999 = vmatpush1.bf16.msra.mxu0 %v14663_v2 }
 0xc3b   :  { %5000 = vmatprep.subr.bf16.mxu0 %v14668_v24 }
 0xc3c   :  { %13812 = vmatpush3.bf16.msra.mxu1 %v14702_v42  ;;  %v14750_v42 = vld [vmem:[%s19501_s9 + $0x244] ss:$16 sps:$4 sm:$0xff]  }
 0xc3d   :  { %13813 = vmatprep.subr.bf16.mxu1 %v14703_v38  ;;  %v14753_v38 = vld [vmem:[%s19501_s9 + $0x24c] ss:$16 sps:$4 sm:$0xff]  }
 0xc3e   :  { %5001 = vmatpush1.bf16.msra.mxu0 %v14666_v63 }
 0xc3f   :  { %5002 = vmatprep.subr.bf16.mxu0 %v14671_v48 }
 0xc40   :  { %13814 = vmatpush3.bf16.msra.mxu1 %v14707_v44  ;;  %v14756_v44 = vld [vmem:[%s19501_s9 + $0x224] ss:$16 sps:$4 sm:$0xff]  }
 0xc41   :  { %13815 = vmatprep.subr.bf16.mxu1 %v14708_v26  ;;  %v14759_v26 = vld [vmem:[%s19501_s9 + $0x22c] ss:$16 sps:$4 sm:$0xff]  }
 0xc42   :  { %5003 = vmatpush1.bf16.msra.mxu0 %v14669_v3 }
 0xc43   :  { %5004 = vmatprep.subr.bf16.mxu0 %v14674_v28  ;;  %v14718_v28 = vld [vmem:[%s19501_s9 + $0x2e0] ss:$16 sps:$4 sm:$0xff]  }
 0xc44   :  { %13816 = vmatpush3.bf16.msra.mxu1 %v14712_v54  ;;  %v14762_v54 = vld [vmem:[%s19501_s9 + $0x204] ss:$16 sps:$4 sm:$0xff]  }
 0xc45   :  { %13817 = vmatprep.subr.bf16.mxu1 %v14713_v17  ;;  %v14765_v17 = vld [vmem:[%s19501_s9 + $0x20c] ss:$16 sps:$4 sm:$0xff]  }
 0xc46   :  { %5005 = vmatpush1.bf16.msra.mxu0 %v14672_v19  ;;  %v14721_v19 = vld [vmem:[%s19501_s9 + $0x2e8] ss:$16 sps:$4 sm:$0xff]  }
 0xc47   :  { %5006 = vmatprep.subr.bf16.mxu0 %v14677_v29 }
 0xc48   :  { %13818 = vmatpush3.bf16.msra.mxu1 %v14717_v8  ;;  %v14768_v8 = vld [vmem:[%s19501_s9 + $0xec] ss:$16 sps:$4 sm:$0xff]  }
 0xc49   :  { %5033 = vmatprep.subr.bf16.mxu1 %v14720_v1  ;;  %v14766_v1 = vld [vmem:[%s19501_s9 + $0xe8] ss:$16 sps:$4 sm:$0xff]  }
 0xc4a   :  { %5007 = vmatpush1.bf16.msra.mxu0 %v14675_v34  ;;  %v14726_v34 = vld [vmem:[%s19501_s9 + $0x2c4] ss:$16 sps:$4 sm:$0xff]  }
 0xc4b   :  { %5008 = vmatprep.subr.bf16.mxu0 %v14681_v35  ;;  %v14729_v35 = vld [vmem:[%s19501_s9 + $0x2cc] ss:$16 sps:$4 sm:$0xff]  }
 0xc4e   :  { %5009 = vmatpush2.bf16.msra.mxu0 %v14679_v61  ;;  %v14724_v61 = vld [vmem:[%s19501_s9 + $0x2c0] ss:$16 sps:$4 sm:$0xff]  }
 0xc4f   :  { %5010 = vmatprep.subr.bf16.mxu0 %v14686_v52  ;;  %v14727_v52 = vld [vmem:[%s19501_s9 + $0x2c8] ss:$16 sps:$4 sm:$0xff]  }
 0xc52   :  { %5011 = vmatpush2.bf16.msra.mxu0 %v14684_v50  ;;  %v14732_v50 = vld [vmem:[%s19501_s9 + $0x2a4] ss:$16 sps:$4 sm:$0xff]  }
 0xc53   :  { %5012 = vmatprep.subr.bf16.mxu0 %v14691_v62  ;;  %v14730_v62 = vld [vmem:[%s19501_s9 + $0x2a0] ss:$16 sps:$4 sm:$0xff]  }
 0xc56   :  { %5013 = vmatpush2.bf16.msra.mxu0 %v14689_v12  ;;  %v14733_v12 = vld [vmem:[%s19501_s9 + $0x2a8] ss:$16 sps:$4 sm:$0xff]  }
 0xc57   :  { %5014 = vmatprep.subr.bf16.mxu0 %v14696_v37  ;;  %v14736_v37 = vld [vmem:[%s19501_s9 + $0x280] ss:$16 sps:$4 sm:$0xff]  }
 0xc5a   :  { %5015 = vmatpush2.bf16.msra.mxu0 %v14694_v18  ;;  %v14739_v18 = vld [vmem:[%s19501_s9 + $0x288] ss:$16 sps:$4 sm:$0xff]  }
 0xc5b   :  { %5016 = vmatprep.subr.bf16.mxu0 %v14701_v13  ;;  %v14742_v13 = vld [vmem:[%s19501_s9 + $0x260] ss:$16 sps:$4 sm:$0xff]  }
 0xc5e   :  { %5017 = vmatpush2.bf16.msra.mxu0 %v14699_v39  ;;  %v14745_v39 = vld [vmem:[%s19501_s9 + $0x268] ss:$16 sps:$4 sm:$0xff]  }
 0xc5f   :  { %5018 = vmatprep.subr.bf16.mxu0 %v14706_v30  ;;  %v14748_v30 = vld [vmem:[%s19501_s9 + $0x240] ss:$16 sps:$4 sm:$0xff]  }
 0xc62   :  { %5019 = vmatpush2.bf16.msra.mxu0 %v14704_v31  ;;  %v14751_v31 = vld [vmem:[%s19501_s9 + $0x248] ss:$16 sps:$4 sm:$0xff]  }
 0xc63   :  { %5020 = vmatprep.subr.bf16.mxu0 %v14711_v25  ;;  %v14754_v25 = vld [vmem:[%s19501_s9 + $0x220] ss:$16 sps:$4 sm:$0xff]  }
 0xc66   :  { %5021 = vmatpush2.bf16.msra.mxu0 %v14709_v57  ;;  %v14757_v57 = vld [vmem:[%s19501_s9 + $0x228] ss:$16 sps:$4 sm:$0xff]  }
 0xc67   :  { %5022 = vmatprep.subr.bf16.mxu0 %v14716_v27  ;;  %v14760_v27 = vld [vmem:[%s19501_s9 + $0x200] ss:$16 sps:$4 sm:$0xff]  }
 0xc6a   :  { %5023 = vmatpush2.bf16.msra.mxu0 %v14714_v23  ;;  %v14763_v23 = vld [vmem:[%s19501_s9 + $0x208] ss:$16 sps:$4 sm:$0xff]  }
 0xc6b   :  { %5115 = vmatprep.subr.bf16.mxu0 %v14723_v0  ;;  %v14771_v0 = vld [vmem:[%s19501_s9 + $0xcc] ss:$16 sps:$4 sm:$0xff]  }
 0xceb   :  { %v4227_v47 = vpop.f32.mrf.mxu1 }
 0xced   :  { %v4229_v60 = vpop.f32.mrf.mxu1  ;;  %v4186_v5 = vpop.f32.mrf.mxu0 }
 0xcee   :  { %v4187_v10 = vadd.f32 %v4186_v5, %v3905_v46  ;;  %v14774_v46 = vld [vmem:[%s19501_s9 + $0xac] ss:$16 sps:$4 sm:$0xff]   ;;  %v14778_v5 = vld [vmem:[%s19501_s9 + $0x68] ss:$16 sps:$4 sm:$0xff]  }
 0xcef   :  { %v4231_v11 = vpop.f32.mrf.mxu1  ;;  %v4188_v14 = vpop.f32.mrf.mxu0 }
 0xcf0   :  { %v4228_v15 = vadd.f32 %v4227_v47, %v4187_v10  ;;  %v4189_v56 = vadd.f32 %v4188_v14, %v3909_v59  ;;  %v14772_v47 = vld [vmem:[%s19501_s9 + $0xa8] ss:$16 sps:$4 sm:$0xff]   ;;  %v14783_v10 = vld [vmem:[%s19501_s9 + $0x4c] ss:$16 sps:$4 sm:$0xff]  }
 0xcf1   :  { %v4232_v58 = vpop.f32.mrf.mxu1  ;;  %v4190_v6 = vpop.f32.mrf.mxu0  ;;  %v14775_v59 = vld [vmem:[%s19501_s9 + $0x88] ss:$16 sps:$4 sm:$0xff]   ;;  %v14786_v14 = vld [vmem:[%s19501_s9 + $0x2c] ss:$16 sps:$4 sm:$0xff]  }
 0xcf2   :  { %v4230_v2 = vadd.f32 %v4229_v60, %v4189_v56  ;;  %16150 = vtanh.f32 %v4228_v15  ;;  %v14780_v60 = vld [vmem:[%s19501_s9 + $0x6c] ss:$16 sps:$4 sm:$0xff]   ;;  %v14781_v11 = vld [vmem:[%s19501_s9 + $0x48] ss:$16 sps:$4 sm:$0xff]  }
 0xcf3   :  { %v4191_v24 = vpop.f32.mrf.mxu0  ;;  %v14784_v15 = vld [vmem:[%s19501_s9 + $0x28] ss:$16 sps:$4 sm:$0xff]   ;;  %v14789_v56 = vld [vmem:[%s19501_s9 + $0xc] ss:$16 sps:$4 sm:$0xff]  }
 0xcf4   :  { %16152 = vtanh.f32 %v4230_v2  ;;  %v14787_v58 = vld [vmem:[%s19501_s9 + $0x8] ss:$16 sps:$4 sm:$0xff]   ;;  %v14792_v6 = vld [vmem:[%s19501_s9 + $0x1ec] ss:$16 sps:$4 sm:$0xff]  }
 0xcf5   :  { %v14790_v2 = vld [vmem:[%s19501_s9 + $0x1e8] ss:$16 sps:$4 sm:$0xff]   ;;  %v14795_v24 = vld [vmem:[%s19501_s9 + $0x1cc] ss:$16 sps:$4 sm:$0xff]  }
 0xcff   :  { %v16151_v63 = vpop.eup %16150 }
 0xd00   :  { %v17866_v29 = vpack.c.bf16 %v16151_v63, %v16151_v63  ;;  %v14793_v63 = vld [vmem:[%s19501_s9 + $0x1c8] ss:$16 sps:$4 sm:$0xff]  }
 0xd01   :  { %v16153_v48 = vpop.eup %16152 }
 0xd02   :  { %v17858_v3 = vpack.c.bf16 %v16153_v48, %v16153_v48  ;;  %v14798_v48 = vld [vmem:[%s19501_s9 + $0x1ac] ss:$16 sps:$4 sm:$0xff]  }
 0xd04   :  { %4405 = vmatprep.mubr.bf16.mxu1 %v17858_v3  ;;  %5024 = vmatprep.mubr.bf16.mxu0 %v17858_v3 }
 0xd05   :  { %4406 = vmatmul.mubr.bf16.vlgmr.msra.gmra.mxu1 %v17866_v29  ;;  %5025 = vmatmul.mubr.bf16.vlgmr.msra.gmra.mxu0 %v17866_v29 }
 0xd06   :  { %5034 = vmatpush1.bf16.msra.mxu1 %v14718_v28  ;;  %5116 = vmatpush1.bf16.msra.mxu0 %v14721_v19  ;;  %v14801_v28 = vld [vmem:[%s19501_s9 + $0x18c] ss:$16 sps:$4 sm:$0xff]   ;;  %v14799_v19 = vld [vmem:[%s19501_s9 + $0x188] ss:$16 sps:$4 sm:$0xff]  }
 0xd07   :  { %5035 = vmatprep.subr.bf16.mxu1 %v14726_v34  ;;  %5117 = vmatprep.subr.bf16.mxu0 %v14729_v35  ;;  %v14804_v34 = vld [vmem:[%s19501_s9 + $0x16c] ss:$16 sps:$4 sm:$0xff]   ;;  %v14802_v35 = vld [vmem:[%s19501_s9 + $0x168] ss:$16 sps:$4 sm:$0xff]  }
 0xd08   :  { %5065 = vmatprep.mubr.bf16.mxu1 %v19533_v32  ;;  %5147 = vmatprep.mubr.bf16.mxu0 %v19533_v32 }
 0xd0a   :  { %5036 = vmatpush1.bf16.msra.mxu1 %v14724_v61  ;;  %5118 = vmatpush1.bf16.msra.mxu0 %v14727_v52  ;;  %v14807_v61 = vld [vmem:[%s19501_s9 + $0x14c] ss:$16 sps:$4 sm:$0xff]   ;;  %v14805_v52 = vld [vmem:[%s19501_s9 + $0x148] ss:$16 sps:$4 sm:$0xff]  }
 0xd0b   :  { %5037 = vmatprep.subr.bf16.mxu1 %v14732_v50  ;;  %5119 = vmatprep.subr.bf16.mxu0 %v14735_v45  ;;  %v14810_v50 = vld [vmem:[%s19501_s9 + $0x12c] ss:$16 sps:$4 sm:$0xff]   ;;  %v14808_v45 = vld [vmem:[%s19501_s9 + $0x128] ss:$16 sps:$4 sm:$0xff]  }
 0xd0e   :  { %5038 = vmatpush1.bf16.msra.mxu1 %v14730_v62  ;;  %5120 = vmatpush1.bf16.msra.mxu0 %v14733_v12  ;;  %v14813_v62 = vld [vmem:[%s19501_s9 + $0x10c] ss:$16 sps:$4 sm:$0xff]   ;;  %v14811_v12 = vld [vmem:[%s19501_s9 + $0x108] ss:$16 sps:$4 sm:$0xff]  }
 0xd0f   :  { %5039 = vmatprep.subr.bf16.mxu1 %v14738_v40  ;;  %5121 = vmatprep.subr.bf16.mxu0 %v14741_v4  ;;  %v14816_v40 = vld [vmem:[#allocation7 + $0xac] ss:$12 sps:$4 sm:$0xff]   ;;  %v14814_v4 = vld [vmem:[#allocation7 + $0xa8] ss:$12 sps:$4 sm:$0xff]  }
 0xd12   :  { %5040 = vmatpush1.bf16.msra.mxu1 %v14736_v37  ;;  %5122 = vmatpush1.bf16.msra.mxu0 %v14739_v18  ;;  %v14817_v37 = vld [vmem:[#allocation7 + $0xb0] ss:$12 sps:$4 sm:$0xff]   ;;  %v14820_v18 = vld [vmem:[#allocation7 + $0x94] ss:$12 sps:$4 sm:$0xff]  }
 0xd13   :  { %5041 = vmatprep.subr.bf16.mxu1 %v14744_v9  ;;  %5123 = vmatprep.subr.bf16.mxu0 %v14747_v16  ;;  %v14818_v9 = vld [vmem:[#allocation7 + $0x90] ss:$12 sps:$4 sm:$0xff]   ;;  %v14821_v16 = vld [vmem:[#allocation7 + $0x98] ss:$12 sps:$4 sm:$0xff]  }
 0xd16   :  { %5042 = vmatpush1.bf16.msra.mxu1 %v14742_v13  ;;  %5124 = vmatpush1.bf16.msra.mxu0 %v14745_v39  ;;  %v14824_v13 = vld [vmem:[#allocation7 + $0x7c] ss:$12 sps:$4 sm:$0xff]   ;;  %v14825_v39 = vld [vmem:[#allocation7 + $0x80] ss:$12 sps:$4 sm:$0xff]  }
 0xd17   :  { %5043 = vmatprep.subr.bf16.mxu1 %v14750_v42  ;;  %5125 = vmatprep.subr.bf16.mxu0 %v14753_v38  ;;  %v14828_v42 = vld [vmem:[#allocation7 + $0x64] ss:$12 sps:$4 sm:$0xff]   ;;  %v14826_v38 = vld [vmem:[#allocation7 + $0x60] ss:$12 sps:$4 sm:$0xff]  }
 0xd1a   :  { %5044 = vmatpush1.bf16.msra.mxu1 %v14748_v30  ;;  %5126 = vmatpush1.bf16.msra.mxu0 %v14751_v31  ;;  %v14829_v30 = vld [vmem:[#allocation7 + $0x68] ss:$12 sps:$4 sm:$0xff]  }
 0xd1b   :  { %5045 = vmatprep.subr.bf16.mxu1 %v14756_v44  ;;  %5127 = vmatprep.subr.bf16.mxu0 %v14759_v26  ;;  %v14830_v31 = vld [vmem:[#allocation7 + $0x48] ss:$12 sps:$4 sm:$0xff]   ;;  %v14832_v44 = vld [vmem:[#allocation7 + $0x4c] ss:$12 sps:$4 sm:$0xff]   ;;  %v14833_v26 = vld [vmem:[#allocation7 + $0x50] ss:$12 sps:$4 sm:$0xff]  }
 0xd1e   :  { %5046 = vmatpush1.bf16.msra.mxu1 %v14754_v25  ;;  %5128 = vmatpush1.bf16.msra.mxu0 %v14757_v57  ;;  %v14836_v25 = vld [vmem:[#allocation7 + $0x34] ss:$12 sps:$4 sm:$0xff]   ;;  %v14834_v57 = vld [vmem:[#allocation7 + $0x30] ss:$12 sps:$4 sm:$0xff]  }
 0xd1f   :  { %5047 = vmatprep.subr.bf16.mxu1 %v14762_v54  ;;  %5129 = vmatprep.subr.bf16.mxu0 %v14765_v17  ;;  %v14837_v54 = vld [vmem:[#allocation7 + $0x38] ss:$12 sps:$4 sm:$0xff]   ;;  %v14840_v17 = vld [vmem:[#allocation7 + $0x1c] ss:$12 sps:$4 sm:$0xff]  }
 0xd22   :  { %5048 = vmatpush1.bf16.msra.mxu1 %v14760_v27  ;;  %5130 = vmatpush1.bf16.msra.mxu0 %v14763_v23 }
 0xd23   :  { %5074 = vmatprep.subr.bf16.mxu1 %v14768_v8  ;;  %5362 = vmatprep.subr.bf16.mxu0 %v14816_v40  ;;  %v14838_v8 = vld [vmem:[#allocation7 + $0x18] ss:$12 sps:$4 sm:$0xff]  }
 0xd25   :  { %5066 = vmatmul.mubr.bf16.vlgmr.msra.gmra.mxu1 %v17740_v33  ;;  %5148 = vmatmul.mubr.bf16.vlgmr.msra.gmra.mxu0 %v17740_v33  ;;  %v14777_v33 = vld [vmem:[%s19501_s9 + $0x8c] ss:$16 sps:$4 sm:$0xff]  }
 0xd26   :  { %5075 = vmatpush1.bf16.msra.mxu1 %v14766_v1  ;;  %5106 = vmatprep.mubr.bf16.mxu1 %v17858_v3  ;;  %v14796_v3 = vld [vmem:[%s19501_s9 + $0x1a8] ss:$16 sps:$4 sm:$0xff]   ;;  %v14841_v1 = vld [vmem:[#allocation7 + $0x20] ss:$12 sps:$4 sm:$0xff]  }
 0xd27   :  { %5076 = vmatprep.subr.bf16.mxu1 %v14771_v0  ;;  %5394 = vmatprep.mubr.bf16.mxu0 %v19533_v32  ;;  %v14844_v0 = vld [vmem:[#allocation7 + $0x4] ss:$12 sps:$4 sm:$0xff]  }
 0xd28   :  { %5363 = vmatpush1.bf16.msra.mxu0 %v14814_v4 }
 0xd29   :  { %5364 = vmatprep.subr.bf16.mxu0 %v14820_v18 }
 0xd2a   :  { %5077 = vmatpush1.bf16.msra.mxu1 %v14769_v55  ;;  %v12800_v55 = vld [vmem:[%s19507_s15] ss:$0 sm:$0xff] }
 0xd2b   :  { %5078 = vmatprep.subr.bf16.mxu1 %v14774_v46 }
 0xd2c   :  { %5365 = vmatpush1.bf16.msra.mxu0 %v14818_v9 }
 0xd2d   :  { %5366 = vmatprep.subr.bf16.mxu0 %v14824_v13 }
 0xd2e   :  { %5079 = vmatpush1.bf16.msra.mxu1 %v14772_v47 }
 0xd2f   :  { %5080 = vmatprep.subr.bf16.mxu1 %v14777_v33 }
 0xd32   :  { %5081 = vmatpush1.bf16.msra.mxu1 %v14775_v59 }
 0xd33   :  { %5082 = vmatprep.subr.bf16.mxu1 %v14780_v60 }
 0xd36   :  { %5083 = vmatpush1.bf16.msra.mxu1 %v14778_v5  ;;  %v14842_v5 = vld [vmem:[#allocation7] ss:$12 sps:$4 sm:$0xff]  }
 0xd37   :  { %5084 = vmatprep.subr.bf16.mxu1 %v14783_v10  ;;  %v14845_v10 = vld [vmem:[#allocation7 + $0x8] ss:$12 sps:$4 sm:$0xff]  }
 0xd3a   :  { %5085 = vmatpush1.bf16.msra.mxu1 %v14781_v11 }
 0xd3b   :  { %5086 = vmatprep.subr.bf16.mxu1 %v14786_v14 }
 0xd3e   :  { %5087 = vmatpush1.bf16.msra.mxu1 %v14784_v15 }
 0xd3f   :  { %5088 = vmatprep.subr.bf16.mxu1 %v14789_v56 }
 0xd42   :  { %5089 = vmatpush1.bf16.msra.mxu1 %v14787_v58  ;;  %v14848_v58 = vld [vmem:[#allocation8 + $0x74] ss:$8 sps:$4 sm:$0xff]  }
 0xd43   :  { %5090 = vmatprep.subr.bf16.mxu1 %v14792_v6 }
 0xd46   :  { %5091 = vmatpush2.bf16.msra.mxu1 %v14790_v2 }
 0xd47   :  { %5092 = vmatprep.subr.bf16.mxu1 %v14795_v24 }
 0xd4a   :  { %5093 = vmatpush2.bf16.msra.mxu1 %v14793_v63 }
 0xd4b   :  { %5094 = vmatprep.subr.bf16.mxu1 %v14798_v48 }
 0xd4e   :  { %5095 = vmatpush2.bf16.msra.mxu1 %v14796_v3 }
 0xd4f   :  { %5096 = vmatprep.subr.bf16.mxu1 %v14801_v28 }
 0xd52   :  { %5097 = vmatpush2.bf16.msra.mxu1 %v14799_v19 }
 0xd53   :  { %5098 = vmatprep.subr.bf16.mxu1 %v14804_v34  ;;  %v14872_v34 = vld [vmem:[#allocation8 + $0x174] ss:$8 sps:$4 sm:$0xff]  }
 0xd56   :  { %5099 = vmatpush2.bf16.msra.mxu1 %v14802_v35 }
 0xd57   :  { %5100 = vmatprep.subr.bf16.mxu1 %v14807_v61 }
 0xd5a   :  { %5101 = vmatpush2.bf16.msra.mxu1 %v14805_v52 }
 0xd5b   :  { %5102 = vmatprep.subr.bf16.mxu1 %v14810_v50 }
 0xd5e   :  { %5103 = vmatpush2.bf16.msra.mxu1 %v14808_v45 }
 0xd5f   :  { %5104 = vmatprep.subr.bf16.mxu1 %v14813_v62 }
 0xd62   :  { %5105 = vmatpush2.bf16.msra.mxu1 %v14811_v12 }
 0xd63   :  { %14020 = vmatprep.subr.bf16.mxu1 %v16469_v20 }
 0xd65   :  { %5107 = vmatmul.mubr.bf16.vlgmr.msra.gmra.mxu1 %v17866_v29  ;;  %v14822_v29 = vld [vmem:[#allocation7 + $0x78] ss:$12 sps:$4 sm:$0xff]  }
 0xd66   :  { %14036 = vmatprep.mubr.msk.bf16.mxu1 %vm16470_vm1, %v16469_v20  ;;  %14021 = vmatpush3.bf16.msra.mxu1 %v14817_v37 }
 0xd67   :  { %14022 = vmatprep.subr.bf16.mxu1 %v16469_v20  ;;  %5367 = vmatpush1.bf16.msra.mxu0 %v14822_v29 }
 0xd68   :  { %5368 = vmatprep.subr.bf16.mxu0 %v14828_v42 }
 0xd6a   :  { %14023 = vmatpush3.bf16.msra.mxu1 %v14821_v16 }
 0xd6b   :  { %14024 = vmatprep.subr.bf16.mxu1 %v16469_v20  ;;  %5369 = vmatpush1.bf16.msra.mxu0 %v14826_v38 }
 0xd6c   :  { %5370 = vmatprep.subr.bf16.mxu0 %v14832_v44 }
 0xd6e   :  { %14025 = vmatpush3.bf16.msra.mxu1 %v14825_v39 }
 0xd6f   :  { %14026 = vmatprep.subr.bf16.mxu1 %v16469_v20  ;;  %5371 = vmatpush1.bf16.msra.mxu0 %v14830_v31 }
 0xd70   :  { %5372 = vmatprep.subr.bf16.mxu0 %v14836_v25 }
 0xd72   :  { %14027 = vmatpush3.bf16.msra.mxu1 %v14829_v30 }
 0xd73   :  { %14028 = vmatprep.subr.bf16.mxu1 %v16469_v20  ;;  %5373 = vmatpush1.bf16.msra.mxu0 %v14834_v57 }
 0xd74   :  { %5374 = vmatprep.subr.bf16.mxu0 %v14840_v17 }
 0xd76   :  { %14029 = vmatpush3.bf16.msra.mxu1 %v14833_v26 }
 0xd77   :  { %14030 = vmatprep.subr.bf16.mxu1 %v16469_v20  ;;  %5375 = vmatpush1.bf16.msra.mxu0 %v14838_v8 }
 0xd78   :  { %5376 = vmatprep.subr.bf16.mxu0 %v14844_v0  ;;  %v14870_v0 = vld [vmem:[#allocation8 + $0x170] ss:$8 sps:$4 sm:$0xff]  }
 0xd7a   :  { %14031 = vmatpush3.bf16.msra.mxu1 %v14837_v54 }
 0xd7b   :  { %14032 = vmatprep.subr.bf16.mxu1 %v16469_v20  ;;  %5377 = vmatpush1.bf16.msra.mxu0 %v14842_v5  ;;  %v14852_v5 = vld [vmem:[#allocation8 + $0x50] ss:$8 sps:$4 sm:$0xff]  }
 0xd7c   :  { %5749 = vmatprep.subr.bf16.mxu0 %v14848_v58  ;;  %v14888_v58 = vld [vmem:[#allocation8 + $0x140] ss:$8 sps:$4 sm:$0xff]  }
 0xd7e   :  { %14033 = vmatpush3.bf16.msra.mxu1 %v14841_v1  ;;  %v14846_v1 = vld [vmem:[#allocation8 + $0x70] ss:$8 sps:$4 sm:$0xff]  }
 0xd7f   :  { %14034 = vmatprep.subr.bf16.mxu1 %v16469_v20 }
 0xd82   :  { %14035 = vmatpush3.bf16.msra.mxu1 %v14845_v10  ;;  %v14882_v10 = vld [vmem:[#allocation8 + $0x150] ss:$8 sps:$4 sm:$0xff]  }
 0xd83   :  { %5790 = vmatprep.subr.bf16.mxu1 %v14872_v34  ;;  %v14875_v34 = vld [vmem:[#allocation8 + $0xf4] ss:$8 sps:$4 sm:$0xff]  }
 0xdc5   :  { %v13819_v27 = vpop.f32.mrf.mxu1  ;;  %v5026_v23 = vpop.f32.mrf.mxu0 }
 0xdc7   :  { %v13820_v46 = vpop.f32.mrf.mxu1  ;;  %v5028_v47 = vpop.f32.mrf.mxu0 }
 0xdc8   :  { %v13821_v33 = vadd.f32 %v13820_v46, %v13819_v27  ;;  %v14851_v46 = vld [vmem:[#allocation8 + $0x64] ss:$8 sps:$4 sm:$0xff]  }
 0xdc9   :  { %v13822_v59 = vpop.f32.mrf.mxu1  ;;  %v5030_v60 = vpop.f32.mrf.mxu0 }
 0xdca   :  { %v4408_v11 = vadd.f32 %v13821_v33, %v12800_v55  ;;  %v14876_v33 = vld [vmem:[#allocation8 + $0x160] ss:$8 sps:$4 sm:$0xff]   ;;  %v14854_v59 = vld [vmem:[#allocation8 + $0x54] ss:$8 sps:$4 sm:$0xff]  }
 0xdcb   :  { %v13823_v14 = vpop.f32.mrf.mxu1  ;;  %v5031_v15 = vpop.f32.mrf.mxu0  ;;  %v14884_v60 = vld [vmem:[#allocation8 + $0x154] ss:$8 sps:$4 sm:$0xff]  }
 0xdcc   :  { %v18073_v56 = vadd.f32 %v4408_v11, %v17707_v36  ;;  %v14857_v11 = vld [vmem:[#allocation8 + $0x44] ss:$8 sps:$4 sm:$0xff]   ;;  %v14855_v15 = vld [vmem:[#allocation8 + $0x40] ss:$8 sps:$4 sm:$0xff]  }
 0xdcd   :  { %v14890_v14 = vld [vmem:[#allocation8 + $0x144] ss:$8 sps:$4 sm:$0xff]  }
 0xdce   :  { %12817 = vst [vmem:[%s19508_s16 + $0x8] sm:$0xff] %v18073_v56 }
 0xde5   :  { %v5067_v6 = vpop.f32.mrf.mxu1  ;;  %v5149_v2 = vpop.f32.mrf.mxu0 }
 0xde6   :  { %v5068_v35 = vadd.f32 %v5067_v6, %v5026_v23  ;;  %v14860_v6 = vld [vmem:[#allocation8 + $0x34] ss:$8 sps:$4 sm:$0xff]  }
 0xde7   :  { %v5069_v24 = vpop.f32.mrf.mxu1  ;;  %v5151_v63 = vpop.f32.mrf.mxu0 }
 0xde8   :  { %v5070_v36 = vadd.f32 %v5069_v24, %v5028_v47  ;;  %v5156_v52 = vadd.f32 %v5068_v35, %v17722_v53  ;;  %v14878_v47 = vld [vmem:[#allocation8 + $0x164] ss:$8 sps:$4 sm:$0xff]  }
 0xde9   :  { %v5071_v48 = vpop.f32.mrf.mxu1  ;;  %v5153_v3 = vpop.f32.mrf.mxu0  ;;  %v14863_v24 = vld [vmem:[#allocation8 + $0x24] ss:$8 sps:$4 sm:$0xff]  }
 0xdea   :  { %v5157_v61 = vadd.f32 %v5070_v36, %v17719_v21  ;;  %v12914_v45 = vmul.f32 -1.442695, %v5156_v52  ;;  %v14866_v48 = vld [vmem:[#allocation8 + $0x14] ss:$8 sps:$4 sm:$0xff]   ;;  %v14864_v3 = vld [vmem:[#allocation8 + $0x10] ss:$8 sps:$4 sm:$0xff]  }
 0xdeb   :  { %v5072_v28 = vpop.f32.mrf.mxu1  ;;  %v5154_v19 = vpop.f32.mrf.mxu0  ;;  %v14873_v36 = vld [vmem:[#allocation8 + $0xf0] ss:$8 sps:$4 sm:$0xff]   ;;  %v14881_v35 = vld [vmem:[#allocation8 + $0xe4] ss:$8 sps:$4 sm:$0xff]   ;;  %v14887_v52 = vld [vmem:[#allocation8 + $0xd4] ss:$8 sps:$4 sm:$0xff]  }
 0xdec   :  { %v12915_v50 = vmul.f32 -1.442695, %v5157_v61  ;;  %v14869_v28 = vld [vmem:[#allocation8 + $0x4] ss:$8 sps:$4 sm:$0xff]   ;;  %v14867_v19 = vld [vmem:[#allocation8] ss:$8 sps:$4 sm:$0xff]  }
 0xded   :  { %v14879_v61 = vld [vmem:[#allocation8 + $0xe0] ss:$8 sps:$4 sm:$0xff]  }
 0xdee   :  { %16154 = vpow2.f32 %v12915_v50  ;;  %v14885_v50 = vld [vmem:[#allocation8 + $0xd0] ss:$8 sps:$4 sm:$0xff]  }
 0xdef   :  { %16156 = vpow2.f32 %v12914_v45  ;;  %v14893_v45 = vld [vmem:[#allocation8 + $0xc4] ss:$8 sps:$4 sm:$0xff]  }
 0xdfb   :  { %v16155_v62 = vpop.eup %16154 }
 0xdfc   :  { %v16157_v12 = vpop.eup %16156  ;;  %v5169_v40 = vadd.f32 1.0, %v16155_v62  ;;  %v14891_v62 = vld [vmem:[#allocation8 + $0xc0] ss:$8 sps:$4 sm:$0xff]  }
 0xdfd   :  { %v5163_v4 = vadd.f32 1.0, %v16157_v12  ;;  %v14896_v12 = vld [vmem:[#allocation8 + $0x134] ss:$8 sps:$4 sm:$0xff]  }
 0xdfe   :  { %16158 = vrcp.f32 %v5169_v40  ;;  %v14894_v40 = vld [vmem:[#allocation8 + $0x130] ss:$8 sps:$4 sm:$0xff]  }
 0xdff   :  { %16160 = vrcp.f32 %v5163_v4  ;;  %v14899_v4 = vld [vmem:[#allocation8 + $0xb4] ss:$8 sps:$4 sm:$0xff]  }
 0xe0b   :  { %v16159_v30 = vpop.eup %16158 }
 0xe0c   :  { %v16161_v31 = vpop.eup %16160  ;;  %v5179_v26 = vmul.f32 %v16159_v30, %v17737_v49  ;;  %v14849_v49 = vld [vmem:[#allocation8 + $0x60] ss:$8 sps:$4 sm:$0xff]   ;;  %v14914_v30 = vld [vmem:[#allocation8 + $0x104] ss:$8 sps:$4 sm:$0xff]  }
 0xe25   :  { %v5108_v37 = vpop.f32.mrf.mxu1 }
 0xe26   :  { %v5150_v18 = vadd.f32 %v5149_v2, %v5108_v37  ;;  %v14858_v2 = vld [vmem:[#allocation8 + $0x30] ss:$8 sps:$4 sm:$0xff]  }
 0xe27   :  { %v5110_v9 = vpop.f32.mrf.mxu1  ;;  %v14897_v37 = vld [vmem:[#allocation8 + $0xb0] ss:$8 sps:$4 sm:$0xff]  }
 0xe28   :  { %v5158_v16 = vadd.f32 %v5150_v18, %v17729_v43  ;;  %v5152_v13 = vadd.f32 %v5151_v63, %v5110_v9  ;;  %v14861_v63 = vld [vmem:[#allocation8 + $0x20] ss:$8 sps:$4 sm:$0xff]   ;;  %v14902_v18 = vld [vmem:[#allocation8 + $0x124] ss:$8 sps:$4 sm:$0xff]  }
 0xe29   :  { %v5112_v29 = vpop.f32.mrf.mxu1  ;;  %v14900_v9 = vld [vmem:[#allocation8 + $0x120] ss:$8 sps:$4 sm:$0xff]  }
 0xe2a   :  { %16162 = vtanh.f32 %v5158_v16  ;;  %v5159_v39 = vadd.f32 %v5152_v13, %v17732_v7  ;;  %v14905_v16 = vld [vmem:[#allocation8 + $0xa4] ss:$8 sps:$4 sm:$0xff]   ;;  %v14903_v13 = vld [vmem:[#allocation8 + $0xa0] ss:$8 sps:$4 sm:$0xff]   ;;  %v14908_v29 = vld [vmem:[#allocation8 + $0x114] ss:$8 sps:$4 sm:$0xff]  }
 0xe2b   :  { %v5113_v42 = vpop.f32.mrf.mxu1 }
 0xe2c   :  { %v12916_v38 = vmul.f32 -1.442695, %v5159_v39  ;;  %v14906_v39 = vld [vmem:[#allocation8 + $0x110] ss:$8 sps:$4 sm:$0xff]   ;;  %v14911_v42 = vld [vmem:[#allocation8 + $0x94] ss:$8 sps:$4 sm:$0xff]  }
 0xe2e   :  { %16164 = vpow2.f32 %v12916_v38  ;;  %v14909_v38 = vld [vmem:[#allocation8 + $0x90] ss:$8 sps:$4 sm:$0xff]  }
 0xe37   :  { %v16163_v44 = vpop.eup %16162 }
 0xe38   :  { %v5180_v25 = vmul.f32 %v16163_v44, %v16161_v31  ;;  %v14912_v31 = vld [vmem:[#allocation8 + $0x100] ss:$8 sps:$4 sm:$0xff]   ;;  %v14917_v44 = vld [vmem:[#allocation8 + $0x84] ss:$8 sps:$4 sm:$0xff]  }
 0xe3a   :  { %v18084_v57 = vadd.f32 %v5180_v25, %v5179_v26  ;;  %v14915_v26 = vld [vmem:[#allocation8 + $0x80] ss:$8 sps:$4 sm:$0xff]   ;;  %v14920_v25 = vld [vmem:[%s19501_s9 + $0xe4] ss:$16 sps:$4 sm:$0xff]  }
 0xe3b   :  { %v16165_v54 = vpop.eup %16164 }
 0xe3c   :  { %v5176_v17 = vadd.f32 1.0, %v16165_v54  ;;  %16166 = vtanh.f32 %v18084_v57  ;;  %v14942_v54 = vld [vmem:[#allocation10 + $0x78] sm:$0xff]  }
 0xe3e   :  { %16168 = vrcp.f32 %v5176_v17  ;;  %v5217_v17 = vld [vmem:[%s19503_s11] sm:$0x7] }
 0xe49   :  { %v16167_v27 = vpop.eup %16166 }
 0xe4b   :  { %v16169_v23 = vpop.eup %16168 }
 0xe4c   :  { %v5183_v8 = vmul.f32 %v16169_v23, %v16167_v27  ;;  %v5222_v27 = vrot.slane %v5217_v17, %v19543_v22  ;;  %v5230_v23 = vrot.slane %v5217_v17, %v19546_v51 }
 0xe4e   :  { %v18087_v55 = vpack.c.bf16 %v5183_v8, %v5183_v8  ;;  %v5226_v8 = vrot.slane %v5217_v17, %v19544_v41  ;;  %v14965_v17 = vld [vmem:[%s19501_s9 + $0x164] ss:$16 sps:$4 sm:$0xff]  }
 0xe50   :  { %5395 = vmatmul.mubr.bf16.vlgmr.msra.gmra.mxu0 %v18087_v55  ;;  %14037 = vmatmul.mubr.bf16.vlgmr.msra.gmra.mxu1 %v18087_v55 }
 0xe51   :  { %5750 = vmatpush1.bf16.msra.mxu0 %v14846_v1  ;;  %5791 = vmatpush1.bf16.msra.mxu1 %v14870_v0 }
 0xe52   :  { %5751 = vmatprep.subr.bf16.mxu0 %v14851_v46  ;;  %5792 = vmatprep.subr.bf16.mxu1 %v14878_v47 }
 0xe53   :  { %5822 = vmatprep.mubr.bf16.mxu1 %v19533_v32 }
 0xe55   :  { %5752 = vmatpush1.bf16.msra.mxu0 %v14849_v49  ;;  %5793 = vmatpush1.bf16.msra.mxu1 %v14876_v33 }
 0xe56   :  { %5753 = vmatprep.subr.bf16.mxu0 %v14854_v59  ;;  %5794 = vmatprep.subr.bf16.mxu1 %v14884_v60 }
 0xe59   :  { %5754 = vmatpush1.bf16.msra.mxu0 %v14852_v5  ;;  %5795 = vmatpush1.bf16.msra.mxu1 %v14882_v10 }
 0xe5a   :  { %5755 = vmatprep.subr.bf16.mxu0 %v14857_v11  ;;  %5796 = vmatprep.subr.bf16.mxu1 %v14890_v14 }
 0xe5d   :  { %5756 = vmatpush1.bf16.msra.mxu0 %v14855_v15  ;;  %5797 = vmatpush1.bf16.msra.mxu1 %v14888_v58  ;;  %v14946_v58 = vld [vmem:[#allocation10 + $0x38] sm:$0xff]  }
 0xe5e   :  { %5757 = vmatprep.subr.bf16.mxu0 %v14860_v6  ;;  %5798 = vmatprep.subr.bf16.mxu1 %v14896_v12  ;;  %v14933_v12 = vld [vmem:[%s19501_s9 + $0x40] ss:$16 sps:$4 sm:$0xff]  }
 0xe61   :  { %5758 = vmatpush1.bf16.msra.mxu0 %v14858_v2  ;;  %5799 = vmatpush1.bf16.msra.mxu1 %v14894_v40  ;;  %v14938_v40 = vld [vmem:[%s19501_s9 + $0x24] ss:$16 sps:$4 sm:$0xff]  }
 0xe62   :  { %5759 = vmatprep.subr.bf16.mxu0 %v14863_v24  ;;  %5800 = vmatprep.subr.bf16.mxu1 %v14902_v18  ;;  %v14947_v24 = vld [vmem:[#allocation10 + $0x70] sm:$0xff]  }
 0xe63   :  { %v14939_v18 = vld [vmem:[%s19501_s9] ss:$16 sps:$4 sm:$0xff]  }
 0xe65   :  { %5760 = vmatpush1.bf16.msra.mxu0 %v14861_v63  ;;  %5801 = vmatpush1.bf16.msra.mxu1 %v14900_v9  ;;  %v14945_v9 = vld [vmem:[%s19501_s9 + $0x1e4] ss:$16 sps:$4 sm:$0xff]  }
 0xe66   :  { %5761 = vmatprep.subr.bf16.mxu0 %v14866_v48  ;;  %5802 = vmatprep.subr.bf16.mxu1 %v14908_v29  ;;  %v14918_v48 = vld [vmem:[%s19501_s9 + $0xe0] ss:$16 sps:$4 sm:$0xff]  }
 0xe67   :  { %v14948_v29 = vld [vmem:[%s19501_s9 + $0x1c0] ss:$16 sps:$4 sm:$0xff]  }
 0xe69   :  { %5762 = vmatpush1.bf16.msra.mxu0 %v14864_v3  ;;  %5803 = vmatpush1.bf16.msra.mxu1 %v14906_v39  ;;  %v14952_v39 = vld [vmem:[#allocation10 + $0x68] sm:$0xff]  }
 0xe6a   :  { %5763 = vmatprep.subr.bf16.mxu0 %v14869_v28  ;;  %5804 = vmatprep.subr.bf16.mxu1 %v14914_v30  ;;  %v14923_v28 = vld [vmem:[%s19501_s9 + $0xc4] ss:$16 sps:$4 sm:$0xff]   ;;  %v14956_v30 = vld [vmem:[#allocation10 + $0x28] sm:$0xff]  }
 0xe6d   :  { %5764 = vmatpush1.bf16.msra.mxu0 %v14867_v19  ;;  %5805 = vmatpush1.bf16.msra.mxu1 %v14912_v31  ;;  %v14951_v19 = vld [vmem:[#allocation10 + $0x30] sm:$0xff]   ;;  %v14957_v31 = vld [vmem:[#allocation10 + $0x60] sm:$0xff]  }
 0xe6e   :  { %5765 = vmatprep.subr.bf16.mxu0 %v14875_v34  ;;  %13834 = vmatprep.subr.bf16.mxu1 %v14942_v54  ;;  %v14921_v34 = vld [vmem:[%s19501_s9 + $0xc0] ss:$16 sps:$4 sm:$0xff]   ;;  %v14962_v54 = vld [vmem:[#allocation10 + $0x58] sm:$0xff]  }
 0xe71   :  { %5766 = vmatpush2.bf16.msra.mxu0 %v14873_v36  ;;  %v14926_v36 = vld [vmem:[%s19501_s9 + $0xa4] ss:$16 sps:$4 sm:$0xff]  }
 0xe72   :  { %5767 = vmatprep.subr.bf16.mxu0 %v14881_v35  ;;  %v14924_v35 = vld [vmem:[%s19501_s9 + $0xa0] ss:$16 sps:$4 sm:$0xff]  }
 0xe75   :  { %5768 = vmatpush2.bf16.msra.mxu0 %v14879_v61  ;;  %v14929_v61 = vld [vmem:[%s19501_s9 + $0x84] ss:$16 sps:$4 sm:$0xff]  }
 0xe76   :  { %5769 = vmatprep.subr.bf16.mxu0 %v14887_v52  ;;  %v14927_v52 = vld [vmem:[%s19501_s9 + $0x80] ss:$16 sps:$4 sm:$0xff]  }
 0xe79   :  { %5770 = vmatpush2.bf16.msra.mxu0 %v14885_v50  ;;  %v14932_v50 = vld [vmem:[%s19501_s9 + $0x64] ss:$16 sps:$4 sm:$0xff]  }
 0xe7a   :  { %5771 = vmatprep.subr.bf16.mxu0 %v14893_v45  ;;  %v14930_v45 = vld [vmem:[%s19501_s9 + $0x60] ss:$16 sps:$4 sm:$0xff]  }
 0xe7d   :  { %5772 = vmatpush2.bf16.msra.mxu0 %v14891_v62  ;;  %v14935_v62 = vld [vmem:[%s19501_s9 + $0x44] ss:$16 sps:$4 sm:$0xff]  }
 0xe7e   :  { %5773 = vmatprep.subr.bf16.mxu0 %v14899_v4  ;;  %v14936_v4 = vld [vmem:[%s19501_s9 + $0x20] ss:$16 sps:$4 sm:$0xff]  }
 0xe81   :  { %5774 = vmatpush2.bf16.msra.mxu0 %v14897_v37  ;;  %v14941_v37 = vld [vmem:[%s19501_s9 + $0x4] ss:$16 sps:$4 sm:$0xff]  }
 0xe82   :  { %5775 = vmatprep.subr.bf16.mxu0 %v14905_v16  ;;  %v14943_v16 = vld [vmem:[%s19501_s9 + $0x1e0] ss:$16 sps:$4 sm:$0xff]  }
 0xe85   :  { %5776 = vmatpush2.bf16.msra.mxu0 %v14903_v13  ;;  %v14950_v13 = vld [vmem:[%s19501_s9 + $0x1c4] ss:$16 sps:$4 sm:$0xff]  }
 0xe86   :  { %5777 = vmatprep.subr.bf16.mxu0 %v14911_v42  ;;  %v14955_v42 = vld [vmem:[%s19501_s9 + $0x1a4] ss:$16 sps:$4 sm:$0xff]  }
 0xe89   :  { %5778 = vmatpush2.bf16.msra.mxu0 %v14909_v38  ;;  %v14953_v38 = vld [vmem:[%s19501_s9 + $0x1a0] ss:$16 sps:$4 sm:$0xff]  }
 0xe8a   :  { %5779 = vmatprep.subr.bf16.mxu0 %v14917_v44  ;;  %v14960_v44 = vld [vmem:[%s19501_s9 + $0x184] ss:$16 sps:$4 sm:$0xff]  }
 0xe8d   :  { %5780 = vmatpush2.bf16.msra.mxu0 %v14915_v26  ;;  %v14958_v26 = vld [vmem:[%s19501_s9 + $0x180] ss:$16 sps:$4 sm:$0xff]  }
 0xe8e   :  { %6589 = vmatprep.subr.bf16.mxu0 %v14920_v25  ;;  %v14961_v25 = vld [vmem:[#allocation10 + $0x20] sm:$0xff]  }
 0xf10   :  { %v5396_v1 = vpop.f32.mrf.mxu0  ;;  %v5437_v0 = vpop.f32.mrf.mxu1 }
 0xf11   :  { %v5397_v46 = vadd.f32 %v5396_v1, %v5222_v27  ;;  %v5438_v47 = vadd.f32 %v5437_v0, %v5230_v23  ;;  %v14963_v27 = vld [vmem:[%s19501_s9 + $0x160] ss:$16 sps:$4 sm:$0xff]   ;;  %v14966_v23 = vld [vmem:[#allocation10 + $0x18] sm:$0xff]   ;;  %v14970_v1 = vld [vmem:[%s19501_s9 + $0x144] ss:$16 sps:$4 sm:$0xff]  }
 0xf12   :  { %v5398_v49 = vpop.f32.mrf.mxu0  ;;  %v14038_v33 = vpop.f32.mrf.mxu1  ;;  %v14968_v0 = vld [vmem:[%s19501_s9 + $0x140] ss:$16 sps:$4 sm:$0xff]  }
 0xf13   :  { %16170 = vtanh.f32 %v5397_v46  ;;  %v5399_v59 = vadd.f32 %v5398_v49, %v5226_v8  ;;  %v14967_v8 = vld [vmem:[#allocation10 + $0x50] sm:$0xff]  }
 0xf14   :  { %16172 = vtanh.f32 %v5438_v47  ;;  %v5400_v60 = vpop.f32.mrf.mxu0  ;;  %v5440_v5 = vpop.f32.mrf.mxu1  ;;  %v14971_v46 = vld [vmem:[#allocation10 + $0x10] sm:$0xff]   ;;  %v14972_v47 = vld [vmem:[#allocation10 + $0x48] sm:$0xff]  }
 0xf15   :  { %16174 = vtanh.f32 %v5399_v59  ;;  %v14975_v49 = vld [vmem:[%s19501_s9 + $0x124] ss:$16 sps:$4 sm:$0xff]   ;;  %v14973_v33 = vld [vmem:[%s19501_s9 + $0x120] ss:$16 sps:$4 sm:$0xff]   ;;  %v14976_v59 = vld [vmem:[#allocation10 + $0x8] sm:$0xff]  }
 0xf16   :  { %v5401_v10 = vpop.f32.mrf.mxu0  ;;  %v14039_v11 = vpop.f32.mrf.mxu1  ;;  %v14977_v60 = vld [vmem:[#allocation10 + $0x40] sm:$0xff]  }
 0xf17   :  { %v14980_v5 = vld [vmem:[%s19501_s9 + $0x104] ss:$16 sps:$4 sm:$0xff]   ;;  %v14978_v10 = vld [vmem:[%s19501_s9 + $0x100] ss:$16 sps:$4 sm:$0xff]  }
 0xf18   :  { %v14981_v11 = vld [vmem:[#allocation10] sm:$0xff]  }
 0xf20   :  { %v16171_v14 = vpop.eup %16170 }
 0xf21   :  { %v16173_v15 = vpop.eup %16172  ;;  %v5446_v3 = vpack.c.bf16 %v16171_v14, %v16171_v14  ;;  %v14984_v14 = vld [vmem:[%s19501_s9 + $0x2e4] ss:$16 sps:$4 sm:$0xff]  }
 0xf22   :  { %v16175_v6 = vpop.eup %16174  ;;  %v5448_v2 = vpack.c.bf16 %v16173_v15, %v16173_v15  ;;  %v14987_v15 = vld [vmem:[%s19501_s9 + $0x2ec] ss:$16 sps:$4 sm:$0xff]  }
 0xf23   :  { %v5447_v63 = vpack.c.bf16 %v16175_v6, %v16175_v6 }
 0xf24   :  { %5823 = vmatmul.mubr.bf16.vlgmr.msra.gmra.mxu1 %v5448_v2 }
 0xf25   :  { %5781 = vmatprep.mubr.bf16.mxu0 %v5447_v63  ;;  %13835 = vmatpush3.bf16.msra.mxu1 %v14946_v58  ;;  %v5497_v58 = vld [vmem:[%s19505_s13] sm:$0x3] }
 0xf26   :  { %5782 = vmatmul.mubr.bf16.vlgmr.msra.gmra.mxu0 %v5446_v3  ;;  %13836 = vmatprep.subr.bf16.mxu1 %v14947_v24  ;;  %v5502_v6 = vrot.slane %v5497_v58, %v19543_v22  ;;  %v5506_v24 = vrot.slane %v5497_v58, %v19544_v41  ;;  %v15033_v58 = vld [vmem:[%s19501_s9 + $0xc8] ss:$16 sps:$4 sm:$0xff]  }
 0xf27   :  { %6590 = vmatpush1.bf16.msra.mxu0 %v14918_v48 }
 0xf28   :  { %6591 = vmatprep.subr.bf16.mxu0 %v14923_v28 }
 0xf29   :  { %13837 = vmatpush3.bf16.msra.mxu1 %v14951_v19 }
 0xf2a   :  { %13838 = vmatprep.subr.bf16.mxu1 %v14952_v39  ;;  %v14999_v39 = vld [vmem:[%s19501_s9 + $0x2ac] ss:$16 sps:$4 sm:$0xff]  }
 0xf2b   :  { %6592 = vmatpush1.bf16.msra.mxu0 %v14921_v34 }
 0xf2c   :  { %6593 = vmatprep.subr.bf16.mxu0 %v14926_v36 }
 0xf2d   :  { %13839 = vmatpush3.bf16.msra.mxu1 %v14956_v30  ;;  %v15002_v30 = vld [vmem:[%s19501_s9 + $0x284] ss:$16 sps:$4 sm:$0xff]  }
 0xf2e   :  { %13840 = vmatprep.subr.bf16.mxu1 %v14957_v31  ;;  %v15005_v31 = vld [vmem:[%s19501_s9 + $0x28c] ss:$16 sps:$4 sm:$0xff]  }
 0xf2f   :  { %6594 = vmatpush1.bf16.msra.mxu0 %v14924_v35 }
 0xf30   :  { %6595 = vmatprep.subr.bf16.mxu0 %v14929_v61 }
 0xf31   :  { %13841 = vmatpush3.bf16.msra.mxu1 %v14961_v25  ;;  %v15008_v25 = vld [vmem:[%s19501_s9 + $0x264] ss:$16 sps:$4 sm:$0xff]  }
 0xf32   :  { %13842 = vmatprep.subr.bf16.mxu1 %v14962_v54  ;;  %v15011_v54 = vld [vmem:[%s19501_s9 + $0x26c] ss:$16 sps:$4 sm:$0xff]  }
 0xf33   :  { %6596 = vmatpush1.bf16.msra.mxu0 %v14927_v52 }
 0xf34   :  { %6597 = vmatprep.subr.bf16.mxu0 %v14932_v50 }
 0xf35   :  { %13843 = vmatpush3.bf16.msra.mxu1 %v14966_v23  ;;  %v15014_v23 = vld [vmem:[%s19501_s9 + $0x244] ss:$16 sps:$4 sm:$0xff]  }
 0xf36   :  { %13844 = vmatprep.subr.bf16.mxu1 %v14967_v8  ;;  %v15017_v8 = vld [vmem:[%s19501_s9 + $0x24c] ss:$16 sps:$4 sm:$0xff]  }
 0xf37   :  { %6598 = vmatpush1.bf16.msra.mxu0 %v14930_v45 }
 0xf38   :  { %6599 = vmatprep.subr.bf16.mxu0 %v14935_v62 }
 0xf39   :  { %13845 = vmatpush3.bf16.msra.mxu1 %v14971_v46  ;;  %v15020_v46 = vld [vmem:[%s19501_s9 + $0x224] ss:$16 sps:$4 sm:$0xff]  }
 0xf3a   :  { %13846 = vmatprep.subr.bf16.mxu1 %v14972_v47  ;;  %v15023_v47 = vld [vmem:[%s19501_s9 + $0x22c] ss:$16 sps:$4 sm:$0xff]  }
 0xf3b   :  { %6600 = vmatpush1.bf16.msra.mxu0 %v14933_v12 }
 0xf3c   :  { %6601 = vmatprep.subr.bf16.mxu0 %v14938_v40  ;;  %v14982_v40 = vld [vmem:[%s19501_s9 + $0x2e0] ss:$16 sps:$4 sm:$0xff]  }
 0xf3d   :  { %13847 = vmatpush3.bf16.msra.mxu1 %v14976_v59  ;;  %v15026_v59 = vld [vmem:[%s19501_s9 + $0x204] ss:$16 sps:$4 sm:$0xff]  }
 0xf3e   :  { %13848 = vmatprep.subr.bf16.mxu1 %v14977_v60  ;;  %v15029_v60 = vld [vmem:[%s19501_s9 + $0x20c] ss:$16 sps:$4 sm:$0xff]  }
 0xf3f   :  { %6602 = vmatpush1.bf16.msra.mxu0 %v14936_v4  ;;  %v14985_v4 = vld [vmem:[%s19501_s9 + $0x2e8] ss:$16 sps:$4 sm:$0xff]  }
 0xf40   :  { %6603 = vmatprep.subr.bf16.mxu0 %v14941_v37 }
 0xf41   :  { %13849 = vmatpush3.bf16.msra.mxu1 %v14981_v11  ;;  %v15032_v11 = vld [vmem:[%s19501_s9 + $0xec] ss:$16 sps:$4 sm:$0xff]  }
 0xf42   :  { %6630 = vmatprep.subr.bf16.mxu1 %v14984_v14  ;;  %v15030_v14 = vld [vmem:[%s19501_s9 + $0xe8] ss:$16 sps:$4 sm:$0xff]  }
 0xf43   :  { %6604 = vmatpush1.bf16.msra.mxu0 %v14939_v18  ;;  %v14990_v18 = vld [vmem:[%s19501_s9 + $0x2c4] ss:$16 sps:$4 sm:$0xff]  }
 0xf44   :  { %6605 = vmatprep.subr.bf16.mxu0 %v14945_v9  ;;  %v14993_v9 = vld [vmem:[%s19501_s9 + $0x2cc] ss:$16 sps:$4 sm:$0xff]  }
 0xf47   :  { %6606 = vmatpush2.bf16.msra.mxu0 %v14943_v16  ;;  %v14988_v16 = vld [vmem:[%s19501_s9 + $0x2c0] ss:$16 sps:$4 sm:$0xff]  }
 0xf48   :  { %6607 = vmatprep.subr.bf16.mxu0 %v14950_v13  ;;  %v14991_v13 = vld [vmem:[%s19501_s9 + $0x2c8] ss:$16 sps:$4 sm:$0xff]  }
 0xf4b   :  { %6608 = vmatpush2.bf16.msra.mxu0 %v14948_v29  ;;  %v14996_v29 = vld [vmem:[%s19501_s9 + $0x2a4] ss:$16 sps:$4 sm:$0xff]  }
 0xf4c   :  { %6609 = vmatprep.subr.bf16.mxu0 %v14955_v42  ;;  %v14994_v42 = vld [vmem:[%s19501_s9 + $0x2a0] ss:$16 sps:$4 sm:$0xff]  }
 0xf4f   :  { %6610 = vmatpush2.bf16.msra.mxu0 %v14953_v38  ;;  %v14997_v38 = vld [vmem:[%s19501_s9 + $0x2a8] ss:$16 sps:$4 sm:$0xff]  }
 0xf50   :  { %6611 = vmatprep.subr.bf16.mxu0 %v14960_v44  ;;  %v15000_v44 = vld [vmem:[%s19501_s9 + $0x280] ss:$16 sps:$4 sm:$0xff]  }
 0xf53   :  { %6612 = vmatpush2.bf16.msra.mxu0 %v14958_v26  ;;  %v15003_v26 = vld [vmem:[%s19501_s9 + $0x288] ss:$16 sps:$4 sm:$0xff]  }
 0xf54   :  { %6613 = vmatprep.subr.bf16.mxu0 %v14965_v17  ;;  %v15006_v17 = vld [vmem:[%s19501_s9 + $0x260] ss:$16 sps:$4 sm:$0xff]  }
 0xf57   :  { %6614 = vmatpush2.bf16.msra.mxu0 %v14963_v27  ;;  %v15009_v27 = vld [vmem:[%s19501_s9 + $0x268] ss:$16 sps:$4 sm:$0xff]  }
 0xf58   :  { %6615 = vmatprep.subr.bf16.mxu0 %v14970_v1  ;;  %v15012_v1 = vld [vmem:[%s19501_s9 + $0x240] ss:$16 sps:$4 sm:$0xff]  }
 0xf5b   :  { %6616 = vmatpush2.bf16.msra.mxu0 %v14968_v0  ;;  %v15015_v0 = vld [vmem:[%s19501_s9 + $0x248] ss:$16 sps:$4 sm:$0xff]  }
 0xf5c   :  { %6617 = vmatprep.subr.bf16.mxu0 %v14975_v49  ;;  %v15018_v49 = vld [vmem:[%s19501_s9 + $0x220] ss:$16 sps:$4 sm:$0xff]  }
 0xf5f   :  { %6618 = vmatpush2.bf16.msra.mxu0 %v14973_v33  ;;  %v15021_v33 = vld [vmem:[%s19501_s9 + $0x228] ss:$16 sps:$4 sm:$0xff]  }
 0xf60   :  { %6619 = vmatprep.subr.bf16.mxu0 %v14980_v5  ;;  %v15024_v5 = vld [vmem:[%s19501_s9 + $0x200] ss:$16 sps:$4 sm:$0xff]  }
 0xf63   :  { %6620 = vmatpush2.bf16.msra.mxu0 %v14978_v10  ;;  %v15027_v10 = vld [vmem:[%s19501_s9 + $0x208] ss:$16 sps:$4 sm:$0xff]  }
 0xf64   :  { %6712 = vmatprep.subr.bf16.mxu0 %v14987_v15  ;;  %v15035_v15 = vld [vmem:[%s19501_s9 + $0xcc] ss:$16 sps:$4 sm:$0xff]  }
 0xfe4   :  { %v5824_v2 = vpop.f32.mrf.mxu1 }
 0xfe6   :  { %v5826_v63 = vpop.f32.mrf.mxu1  ;;  %v5783_v48 = vpop.f32.mrf.mxu0 }
 0xfe7   :  { %v5784_v3 = vadd.f32 %v5783_v48, %v5502_v6  ;;  %v15038_v6 = vld [vmem:[%s19501_s9 + $0xac] ss:$16 sps:$4 sm:$0xff]   ;;  %v15042_v48 = vld [vmem:[%s19501_s9 + $0x68] ss:$16 sps:$4 sm:$0xff]  }
 0xfe8   :  { %v5828_v28 = vpop.f32.mrf.mxu1  ;;  %v5785_v19 = vpop.f32.mrf.mxu0 }
 0xfe9   :  { %v5825_v34 = vadd.f32 %v5824_v2, %v5784_v3  ;;  %v5786_v36 = vadd.f32 %v5785_v19, %v5506_v24  ;;  %v15036_v2 = vld [vmem:[%s19501_s9 + $0xa8] ss:$16 sps:$4 sm:$0xff]   ;;  %v15047_v3 = vld [vmem:[%s19501_s9 + $0x4c] ss:$16 sps:$4 sm:$0xff]  }
 0xfea   :  { %v5829_v35 = vpop.f32.mrf.mxu1  ;;  %v5787_v61 = vpop.f32.mrf.mxu0  ;;  %v15039_v24 = vld [vmem:[%s19501_s9 + $0x88] ss:$16 sps:$4 sm:$0xff]   ;;  %v15050_v19 = vld [vmem:[%s19501_s9 + $0x2c] ss:$16 sps:$4 sm:$0xff]  }
 0xfeb   :  { %v5827_v52 = vadd.f32 %v5826_v63, %v5786_v36  ;;  %16176 = vtanh.f32 %v5825_v34  ;;  %v15044_v63 = vld [vmem:[%s19501_s9 + $0x6c] ss:$16 sps:$4 sm:$0xff]   ;;  %v15045_v28 = vld [vmem:[%s19501_s9 + $0x48] ss:$16 sps:$4 sm:$0xff]  }
 0xfec   :  { %v5788_v50 = vpop.f32.mrf.mxu0  ;;  %v15048_v34 = vld [vmem:[%s19501_s9 + $0x28] ss:$16 sps:$4 sm:$0xff]   ;;  %v15053_v36 = vld [vmem:[%s19501_s9 + $0xc] ss:$16 sps:$4 sm:$0xff]  }
 0xfed   :  { %16178 = vtanh.f32 %v5827_v52  ;;  %v15051_v35 = vld [vmem:[%s19501_s9 + $0x8] ss:$16 sps:$4 sm:$0xff]   ;;  %v15056_v61 = vld [vmem:[%s19501_s9 + $0x1ec] ss:$16 sps:$4 sm:$0xff]  }
 0xfee   :  { %v15054_v52 = vld [vmem:[%s19501_s9 + $0x1e8] ss:$16 sps:$4 sm:$0xff]   ;;  %v15059_v50 = vld [vmem:[%s19501_s9 + $0x1cc] ss:$16 sps:$4 sm:$0xff]  }
 0xff8   :  { %v16177_v45 = vpop.eup %16176 }
 0xff9   :  { %v18213_v37 = vpack.c.bf16 %v16177_v45, %v16177_v45  ;;  %v15057_v45 = vld [vmem:[%s19501_s9 + $0x1c8] ss:$16 sps:$4 sm:$0xff]  }
 0xffa   :  { %v16179_v62 = vpop.eup %16178 }
 0xffb   :  { %v18205_v12 = vpack.c.bf16 %v16179_v62, %v16179_v62  ;;  %v15062_v62 = vld [vmem:[%s19501_s9 + $0x1ac] ss:$16 sps:$4 sm:$0xff]  }
 0xffd   :  { %6002 = vmatprep.mubr.bf16.mxu1 %v18205_v12  ;;  %6621 = vmatprep.mubr.bf16.mxu0 %v18205_v12 }
 0xffe   :  { %6003 = vmatmul.mubr.bf16.vlgmr.msra.gmra.mxu1 %v18213_v37  ;;  %6622 = vmatmul.mubr.bf16.vlgmr.msra.gmra.mxu0 %v18213_v37 }
 0xfff   :  { %6631 = vmatpush1.bf16.msra.mxu1 %v14982_v40  ;;  %6713 = vmatpush1.bf16.msra.mxu0 %v14985_v4  ;;  %v15065_v40 = vld [vmem:[%s19501_s9 + $0x18c] ss:$16 sps:$4 sm:$0xff]   ;;  %v15063_v4 = vld [vmem:[%s19501_s9 + $0x188] ss:$16 sps:$4 sm:$0xff]  }
0x1000   :  { %6632 = vmatprep.subr.bf16.mxu1 %v14990_v18  ;;  %6714 = vmatprep.subr.bf16.mxu0 %v14993_v9  ;;  %v15068_v18 = vld [vmem:[%s19501_s9 + $0x16c] ss:$16 sps:$4 sm:$0xff]   ;;  %v15066_v9 = vld [vmem:[%s19501_s9 + $0x168] ss:$16 sps:$4 sm:$0xff]  }
0x1001   :  { %6662 = vmatprep.mubr.bf16.mxu1 %v19533_v32  ;;  %6744 = vmatprep.mubr.bf16.mxu0 %v19533_v32 }
0x1003   :  { %6633 = vmatpush1.bf16.msra.mxu1 %v14988_v16  ;;  %6715 = vmatpush1.bf16.msra.mxu0 %v14991_v13  ;;  %v15071_v16 = vld [vmem:[%s19501_s9 + $0x14c] ss:$16 sps:$4 sm:$0xff]   ;;  %v15069_v13 = vld [vmem:[%s19501_s9 + $0x148] ss:$16 sps:$4 sm:$0xff]  }
0x1004   :  { %6634 = vmatprep.subr.bf16.mxu1 %v14996_v29  ;;  %6716 = vmatprep.subr.bf16.mxu0 %v14999_v39  ;;  %v15074_v29 = vld [vmem:[%s19501_s9 + $0x12c] ss:$16 sps:$4 sm:$0xff]   ;;  %v15072_v39 = vld [vmem:[%s19501_s9 + $0x128] ss:$16 sps:$4 sm:$0xff]  }
0x1007   :  { %6635 = vmatpush1.bf16.msra.mxu1 %v14994_v42  ;;  %6717 = vmatpush1.bf16.msra.mxu0 %v14997_v38  ;;  %v15077_v42 = vld [vmem:[%s19501_s9 + $0x10c] ss:$16 sps:$4 sm:$0xff]   ;;  %v15075_v38 = vld [vmem:[%s19501_s9 + $0x108] ss:$16 sps:$4 sm:$0xff]  }
0x1008   :  { %6636 = vmatprep.subr.bf16.mxu1 %v15002_v30  ;;  %6718 = vmatprep.subr.bf16.mxu0 %v15005_v31  ;;  %v15080_v30 = vld [vmem:[#allocation7 + $0xac] ss:$12 sps:$4 sm:$0xff]   ;;  %v15078_v31 = vld [vmem:[#allocation7 + $0xa8] ss:$12 sps:$4 sm:$0xff]  }
0x100b   :  { %6637 = vmatpush1.bf16.msra.mxu1 %v15000_v44  ;;  %6719 = vmatpush1.bf16.msra.mxu0 %v15003_v26  ;;  %v15081_v44 = vld [vmem:[#allocation7 + $0xb0] ss:$12 sps:$4 sm:$0xff]   ;;  %v15084_v26 = vld [vmem:[#allocation7 + $0x94] ss:$12 sps:$4 sm:$0xff]  }
0x100c   :  { %6638 = vmatprep.subr.bf16.mxu1 %v15008_v25  ;;  %6720 = vmatprep.subr.bf16.mxu0 %v15011_v54  ;;  %v15082_v25 = vld [vmem:[#allocation7 + $0x90] ss:$12 sps:$4 sm:$0xff]   ;;  %v15085_v54 = vld [vmem:[#allocation7 + $0x98] ss:$12 sps:$4 sm:$0xff]  }
0x100f   :  { %6639 = vmatpush1.bf16.msra.mxu1 %v15006_v17  ;;  %6721 = vmatpush1.bf16.msra.mxu0 %v15009_v27  ;;  %v15088_v17 = vld [vmem:[#allocation7 + $0x7c] ss:$12 sps:$4 sm:$0xff]   ;;  %v15089_v27 = vld [vmem:[#allocation7 + $0x80] ss:$12 sps:$4 sm:$0xff]  }
0x1010   :  { %6640 = vmatprep.subr.bf16.mxu1 %v15014_v23  ;;  %6722 = vmatprep.subr.bf16.mxu0 %v15017_v8  ;;  %v15092_v23 = vld [vmem:[#allocation7 + $0x64] ss:$12 sps:$4 sm:$0xff]   ;;  %v15090_v8 = vld [vmem:[#allocation7 + $0x60] ss:$12 sps:$4 sm:$0xff]  }
0x1013   :  { %6641 = vmatpush1.bf16.msra.mxu1 %v15012_v1  ;;  %6723 = vmatpush1.bf16.msra.mxu0 %v15015_v0  ;;  %v15093_v1 = vld [vmem:[#allocation7 + $0x68] ss:$12 sps:$4 sm:$0xff]  }
0x1014   :  { %6642 = vmatprep.subr.bf16.mxu1 %v15020_v46  ;;  %6724 = vmatprep.subr.bf16.mxu0 %v15023_v47  ;;  %v15094_v0 = vld [vmem:[#allocation7 + $0x48] ss:$12 sps:$4 sm:$0xff]   ;;  %v15096_v46 = vld [vmem:[#allocation7 + $0x4c] ss:$12 sps:$4 sm:$0xff]   ;;  %v15097_v47 = vld [vmem:[#allocation7 + $0x50] ss:$12 sps:$4 sm:$0xff]  }
0x1017   :  { %6643 = vmatpush1.bf16.msra.mxu1 %v15018_v49  ;;  %6725 = vmatpush1.bf16.msra.mxu0 %v15021_v33  ;;  %v15100_v49 = vld [vmem:[#allocation7 + $0x34] ss:$12 sps:$4 sm:$0xff]   ;;  %v15098_v33 = vld [vmem:[#allocation7 + $0x30] ss:$12 sps:$4 sm:$0xff]  }
0x1018   :  { %6644 = vmatprep.subr.bf16.mxu1 %v15026_v59  ;;  %6726 = vmatprep.subr.bf16.mxu0 %v15029_v60  ;;  %v15101_v59 = vld [vmem:[#allocation7 + $0x38] ss:$12 sps:$4 sm:$0xff]   ;;  %v15104_v60 = vld [vmem:[#allocation7 + $0x1c] ss:$12 sps:$4 sm:$0xff]  }
0x101b   :  { %6645 = vmatpush1.bf16.msra.mxu1 %v15024_v5  ;;  %6727 = vmatpush1.bf16.msra.mxu0 %v15027_v10 }
0x101c   :  { %6671 = vmatprep.subr.bf16.mxu1 %v15032_v11  ;;  %6959 = vmatprep.subr.bf16.mxu0 %v15080_v30  ;;  %v15102_v11 = vld [vmem:[#allocation7 + $0x18] ss:$12 sps:$4 sm:$0xff]  }
0x101e   :  { %6663 = vmatmul.mubr.bf16.vlgmr.msra.gmra.mxu1 %v18087_v55  ;;  %6745 = vmatmul.mubr.bf16.vlgmr.msra.gmra.mxu0 %v18087_v55  ;;  %v15041_v55 = vld [vmem:[%s19501_s9 + $0x8c] ss:$16 sps:$4 sm:$0xff]  }
0x101f   :  { %6672 = vmatpush1.bf16.msra.mxu1 %v15030_v14  ;;  %6703 = vmatprep.mubr.bf16.mxu1 %v18205_v12  ;;  %v15060_v12 = vld [vmem:[%s19501_s9 + $0x1a8] ss:$16 sps:$4 sm:$0xff]   ;;  %v15105_v14 = vld [vmem:[#allocation7 + $0x20] ss:$12 sps:$4 sm:$0xff]  }
0x1020   :  { %6673 = vmatprep.subr.bf16.mxu1 %v15035_v15  ;;  %6991 = vmatprep.mubr.bf16.mxu0 %v19533_v32  ;;  %v15108_v15 = vld [vmem:[#allocation7 + $0x4] ss:$12 sps:$4 sm:$0xff]  }
0x1021   :  { %6960 = vmatpush1.bf16.msra.mxu0 %v15078_v31 }
0x1022   :  { %6961 = vmatprep.subr.bf16.mxu0 %v15084_v26 }
0x1023   :  { %6674 = vmatpush1.bf16.msra.mxu1 %v15033_v58  ;;  %v12989_v58 = vld [vmem:[%s19507_s15] ss:$0 sm:$0xff] }
0x1024   :  { %6675 = vmatprep.subr.bf16.mxu1 %v15038_v6 }
0x1025   :  { %6962 = vmatpush1.bf16.msra.mxu0 %v15082_v25 }
0x1026   :  { %6963 = vmatprep.subr.bf16.mxu0 %v15088_v17 }
0x1027   :  { %6676 = vmatpush1.bf16.msra.mxu1 %v15036_v2 }
0x1028   :  { %6677 = vmatprep.subr.bf16.mxu1 %v15041_v55 }
0x102b   :  { %6678 = vmatpush1.bf16.msra.mxu1 %v15039_v24 }
0x102c   :  { %6679 = vmatprep.subr.bf16.mxu1 %v15044_v63 }
0x102f   :  { %6680 = vmatpush1.bf16.msra.mxu1 %v15042_v48  ;;  %v15106_v48 = vld [vmem:[#allocation7] ss:$12 sps:$4 sm:$0xff]  }
0x1030   :  { %6681 = vmatprep.subr.bf16.mxu1 %v15047_v3  ;;  %v15109_v3 = vld [vmem:[#allocation7 + $0x8] ss:$12 sps:$4 sm:$0xff]  }
0x1033   :  { %6682 = vmatpush1.bf16.msra.mxu1 %v15045_v28 }
0x1034   :  { %6683 = vmatprep.subr.bf16.mxu1 %v15050_v19 }
0x1037   :  { %6684 = vmatpush1.bf16.msra.mxu1 %v15048_v34 }
0x1038   :  { %6685 = vmatprep.subr.bf16.mxu1 %v15053_v36 }
0x103b   :  { %6686 = vmatpush1.bf16.msra.mxu1 %v15051_v35  ;;  %v15112_v35 = vld [vmem:[#allocation8 + $0x74] ss:$8 sps:$4 sm:$0xff]  }
0x103c   :  { %6687 = vmatprep.subr.bf16.mxu1 %v15056_v61 }
0x103f   :  { %6688 = vmatpush2.bf16.msra.mxu1 %v15054_v52 }
0x1040   :  { %6689 = vmatprep.subr.bf16.mxu1 %v15059_v50 }
0x1043   :  { %6690 = vmatpush2.bf16.msra.mxu1 %v15057_v45 }
0x1044   :  { %6691 = vmatprep.subr.bf16.mxu1 %v15062_v62 }
0x1047   :  { %6692 = vmatpush2.bf16.msra.mxu1 %v15060_v12 }
0x1048   :  { %6693 = vmatprep.subr.bf16.mxu1 %v15065_v40 }
0x104b   :  { %6694 = vmatpush2.bf16.msra.mxu1 %v15063_v4 }
0x104c   :  { %6695 = vmatprep.subr.bf16.mxu1 %v15068_v18  ;;  %v15136_v18 = vld [vmem:[#allocation8 + $0x174] ss:$8 sps:$4 sm:$0xff]  }
0x104f   :  { %6696 = vmatpush2.bf16.msra.mxu1 %v15066_v9 }
0x1050   :  { %6697 = vmatprep.subr.bf16.mxu1 %v15071_v16 }
0x1053   :  { %6698 = vmatpush2.bf16.msra.mxu1 %v15069_v13 }
0x1054   :  { %6699 = vmatprep.subr.bf16.mxu1 %v15074_v29 }
0x1057   :  { %6700 = vmatpush2.bf16.msra.mxu1 %v15072_v39 }
0x1058   :  { %6701 = vmatprep.subr.bf16.mxu1 %v15077_v42 }
0x105b   :  { %6702 = vmatpush2.bf16.msra.mxu1 %v15075_v38 }
0x105c   :  { %14040 = vmatprep.subr.bf16.mxu1 %v16469_v20 }
0x105e   :  { %6704 = vmatmul.mubr.bf16.vlgmr.msra.gmra.mxu1 %v18213_v37  ;;  %v15086_v37 = vld [vmem:[#allocation7 + $0x78] ss:$12 sps:$4 sm:$0xff]  }
0x105f   :  { %14056 = vmatprep.mubr.msk.bf16.mxu1 %vm16470_vm1, %v16469_v20  ;;  %14041 = vmatpush3.bf16.msra.mxu1 %v15081_v44 }
0x1060   :  { %14042 = vmatprep.subr.bf16.mxu1 %v16469_v20  ;;  %6964 = vmatpush1.bf16.msra.mxu0 %v15086_v37 }
0x1061   :  { %6965 = vmatprep.subr.bf16.mxu0 %v15092_v23 }
0x1063   :  { %14043 = vmatpush3.bf16.msra.mxu1 %v15085_v54 }
0x1064   :  { %14044 = vmatprep.subr.bf16.mxu1 %v16469_v20  ;;  %6966 = vmatpush1.bf16.msra.mxu0 %v15090_v8 }
0x1065   :  { %6967 = vmatprep.subr.bf16.mxu0 %v15096_v46 }
0x1067   :  { %14045 = vmatpush3.bf16.msra.mxu1 %v15089_v27 }
0x1068   :  { %14046 = vmatprep.subr.bf16.mxu1 %v16469_v20  ;;  %6968 = vmatpush1.bf16.msra.mxu0 %v15094_v0 }
0x1069   :  { %6969 = vmatprep.subr.bf16.mxu0 %v15100_v49 }
0x106b   :  { %14047 = vmatpush3.bf16.msra.mxu1 %v15093_v1 }
0x106c   :  { %14048 = vmatprep.subr.bf16.mxu1 %v16469_v20  ;;  %6970 = vmatpush1.bf16.msra.mxu0 %v15098_v33 }
0x106d   :  { %6971 = vmatprep.subr.bf16.mxu0 %v15104_v60 }
0x106f   :  { %14049 = vmatpush3.bf16.msra.mxu1 %v15097_v47 }
0x1070   :  { %14050 = vmatprep.subr.bf16.mxu1 %v16469_v20  ;;  %6972 = vmatpush1.bf16.msra.mxu0 %v15102_v11 }
0x1071   :  { %6973 = vmatprep.subr.bf16.mxu0 %v15108_v15  ;;  %v15134_v15 = vld [vmem:[#allocation8 + $0x170] ss:$8 sps:$4 sm:$0xff]  }
0x1073   :  { %14051 = vmatpush3.bf16.msra.mxu1 %v15101_v59 }
0x1074   :  { %14052 = vmatprep.subr.bf16.mxu1 %v16469_v20  ;;  %6974 = vmatpush1.bf16.msra.mxu0 %v15106_v48  ;;  %v15116_v48 = vld [vmem:[#allocation8 + $0x50] ss:$8 sps:$4 sm:$0xff]  }
0x1075   :  { %7346 = vmatprep.subr.bf16.mxu0 %v15112_v35  ;;  %v15152_v35 = vld [vmem:[#allocation8 + $0x140] ss:$8 sps:$4 sm:$0xff]  }
0x1077   :  { %14053 = vmatpush3.bf16.msra.mxu1 %v15105_v14  ;;  %v15110_v14 = vld [vmem:[#allocation8 + $0x70] ss:$8 sps:$4 sm:$0xff]  }
0x1078   :  { %14054 = vmatprep.subr.bf16.mxu1 %v16469_v20 }
0x107b   :  { %14055 = vmatpush3.bf16.msra.mxu1 %v15109_v3  ;;  %v15146_v3 = vld [vmem:[#allocation8 + $0x150] ss:$8 sps:$4 sm:$0xff]  }
0x107c   :  { %7387 = vmatprep.subr.bf16.mxu1 %v15136_v18  ;;  %v15139_v18 = vld [vmem:[#allocation8 + $0xf4] ss:$8 sps:$4 sm:$0xff]  }
0x10be   :  { %v13850_v5 = vpop.f32.mrf.mxu1  ;;  %v6623_v10 = vpop.f32.mrf.mxu0 }
0x10c0   :  { %v13851_v6 = vpop.f32.mrf.mxu1  ;;  %v6625_v2 = vpop.f32.mrf.mxu0 }
0x10c1   :  { %v13852_v55 = vadd.f32 %v13851_v6, %v13850_v5  ;;  %v15115_v6 = vld [vmem:[#allocation8 + $0x64] ss:$8 sps:$4 sm:$0xff]  }
0x10c2   :  { %v13853_v24 = vpop.f32.mrf.mxu1  ;;  %v6627_v63 = vpop.f32.mrf.mxu0 }
0x10c3   :  { %v6005_v28 = vadd.f32 %v13852_v55, %v12989_v58  ;;  %v15140_v55 = vld [vmem:[#allocation8 + $0x160] ss:$8 sps:$4 sm:$0xff]   ;;  %v15118_v24 = vld [vmem:[#allocation8 + $0x54] ss:$8 sps:$4 sm:$0xff]  }
0x10c4   :  { %v13854_v19 = vpop.f32.mrf.mxu1  ;;  %v6628_v34 = vpop.f32.mrf.mxu0  ;;  %v15148_v63 = vld [vmem:[#allocation8 + $0x154] ss:$8 sps:$4 sm:$0xff]  }
0x10c5   :  { %v18420_v36 = vadd.f32 %v6005_v28, %v18073_v56  ;;  %v15121_v28 = vld [vmem:[#allocation8 + $0x44] ss:$8 sps:$4 sm:$0xff]   ;;  %v15119_v34 = vld [vmem:[#allocation8 + $0x40] ss:$8 sps:$4 sm:$0xff]  }
0x10c6   :  { %v15154_v19 = vld [vmem:[#allocation8 + $0x144] ss:$8 sps:$4 sm:$0xff]  }
0x10c7   :  { %13006 = vst [vmem:[%s19508_s16 + $0x10] sm:$0xff] %v18420_v36 }
0x10de   :  { %v6664_v61 = vpop.f32.mrf.mxu1  ;;  %v6746_v52 = vpop.f32.mrf.mxu0 }
0x10df   :  { %v6665_v9 = vadd.f32 %v6664_v61, %v6623_v10  ;;  %v15124_v61 = vld [vmem:[#allocation8 + $0x34] ss:$8 sps:$4 sm:$0xff]  }
0x10e0   :  { %v6666_v50 = vpop.f32.mrf.mxu1  ;;  %v6748_v45 = vpop.f32.mrf.mxu0 }
0x10e1   :  { %v6667_v56 = vadd.f32 %v6666_v50, %v6625_v2  ;;  %v6753_v13 = vadd.f32 %v6665_v9, %v17722_v53  ;;  %v15142_v2 = vld [vmem:[#allocation8 + $0x164] ss:$8 sps:$4 sm:$0xff]  }
0x10e2   :  { %v6668_v62 = vpop.f32.mrf.mxu1  ;;  %v6750_v12 = vpop.f32.mrf.mxu0  ;;  %v15127_v50 = vld [vmem:[#allocation8 + $0x24] ss:$8 sps:$4 sm:$0xff]  }
0x10e3   :  { %v6754_v16 = vadd.f32 %v6667_v56, %v17719_v21  ;;  %v13103_v39 = vmul.f32 -1.442695, %v6753_v13  ;;  %v15130_v62 = vld [vmem:[#allocation8 + $0x14] ss:$8 sps:$4 sm:$0xff]   ;;  %v15128_v12 = vld [vmem:[#allocation8 + $0x10] ss:$8 sps:$4 sm:$0xff]  }
0x10e4   :  { %v6669_v40 = vpop.f32.mrf.mxu1  ;;  %v6751_v4 = vpop.f32.mrf.mxu0  ;;  %v15137_v56 = vld [vmem:[#allocation8 + $0xf0] ss:$8 sps:$4 sm:$0xff]   ;;  %v15145_v9 = vld [vmem:[#allocation8 + $0xe4] ss:$8 sps:$4 sm:$0xff]   ;;  %v15151_v13 = vld [vmem:[#allocation8 + $0xd4] ss:$8 sps:$4 sm:$0xff]  }
0x10e5   :  { %v13104_v29 = vmul.f32 -1.442695, %v6754_v16  ;;  %v15133_v40 = vld [vmem:[#allocation8 + $0x4] ss:$8 sps:$4 sm:$0xff]   ;;  %v15131_v4 = vld [vmem:[#allocation8] ss:$8 sps:$4 sm:$0xff]  }
0x10e6   :  { %v15143_v16 = vld [vmem:[#allocation8 + $0xe0] ss:$8 sps:$4 sm:$0xff]  }
0x10e7   :  { %16180 = vpow2.f32 %v13104_v29  ;;  %v15149_v29 = vld [vmem:[#allocation8 + $0xd0] ss:$8 sps:$4 sm:$0xff]  }
0x10e8   :  { %16182 = vpow2.f32 %v13103_v39  ;;  %v15157_v39 = vld [vmem:[#allocation8 + $0xc4] ss:$8 sps:$4 sm:$0xff]  }
0x10f4   :  { %v16181_v42 = vpop.eup %16180 }
0x10f5   :  { %v16183_v38 = vpop.eup %16182  ;;  %v6766_v30 = vadd.f32 1.0, %v16181_v42  ;;  %v15155_v42 = vld [vmem:[#allocation8 + $0xc0] ss:$8 sps:$4 sm:$0xff]  }
0x10f6   :  { %v6760_v31 = vadd.f32 1.0, %v16183_v38  ;;  %v15160_v38 = vld [vmem:[#allocation8 + $0x134] ss:$8 sps:$4 sm:$0xff]  }
0x10f7   :  { %16184 = vrcp.f32 %v6766_v30  ;;  %v15158_v30 = vld [vmem:[#allocation8 + $0x130] ss:$8 sps:$4 sm:$0xff]  }
0x10f8   :  { %16186 = vrcp.f32 %v6760_v31  ;;  %v15163_v31 = vld [vmem:[#allocation8 + $0xb4] ss:$8 sps:$4 sm:$0xff]  }
0x1104   :  { %v16185_v1 = vpop.eup %16184 }
0x1105   :  { %v16187_v0 = vpop.eup %16186  ;;  %v6776_v47 = vmul.f32 %v16185_v1, %v18084_v57  ;;  %v15113_v57 = vld [vmem:[#allocation8 + $0x60] ss:$8 sps:$4 sm:$0xff]   ;;  %v15178_v1 = vld [vmem:[#allocation8 + $0x104] ss:$8 sps:$4 sm:$0xff]  }
0x111e   :  { %v6705_v44 = vpop.f32.mrf.mxu1 }
0x111f   :  { %v6747_v26 = vadd.f32 %v6746_v52, %v6705_v44  ;;  %v15122_v52 = vld [vmem:[#allocation8 + $0x30] ss:$8 sps:$4 sm:$0xff]  }
0x1120   :  { %v6707_v25 = vpop.f32.mrf.mxu1  ;;  %v15161_v44 = vld [vmem:[#allocation8 + $0xb0] ss:$8 sps:$4 sm:$0xff]  }
0x1121   :  { %v6755_v54 = vadd.f32 %v6747_v26, %v17729_v43  ;;  %v6749_v17 = vadd.f32 %v6748_v45, %v6707_v25  ;;  %v15125_v45 = vld [vmem:[#allocation8 + $0x20] ss:$8 sps:$4 sm:$0xff]   ;;  %v15166_v26 = vld [vmem:[#allocation8 + $0x124] ss:$8 sps:$4 sm:$0xff]  }
0x1122   :  { %v6709_v37 = vpop.f32.mrf.mxu1  ;;  %v15164_v25 = vld [vmem:[#allocation8 + $0x120] ss:$8 sps:$4 sm:$0xff]  }
0x1123   :  { %16188 = vtanh.f32 %v6755_v54  ;;  %v6756_v27 = vadd.f32 %v6749_v17, %v17732_v7  ;;  %v15169_v54 = vld [vmem:[#allocation8 + $0xa4] ss:$8 sps:$4 sm:$0xff]   ;;  %v15167_v17 = vld [vmem:[#allocation8 + $0xa0] ss:$8 sps:$4 sm:$0xff]   ;;  %v15172_v37 = vld [vmem:[#allocation8 + $0x114] ss:$8 sps:$4 sm:$0xff]  }
0x1124   :  { %v6710_v23 = vpop.f32.mrf.mxu1 }
0x1125   :  { %v13105_v8 = vmul.f32 -1.442695, %v6756_v27  ;;  %v15170_v27 = vld [vmem:[#allocation8 + $0x110] ss:$8 sps:$4 sm:$0xff]   ;;  %v15175_v23 = vld [vmem:[#allocation8 + $0x94] ss:$8 sps:$4 sm:$0xff]  }
0x1127   :  { %16190 = vpow2.f32 %v13105_v8  ;;  %v15173_v8 = vld [vmem:[#allocation8 + $0x90] ss:$8 sps:$4 sm:$0xff]  }
0x1130   :  { %v16189_v46 = vpop.eup %16188 }
0x1131   :  { %v6777_v49 = vmul.f32 %v16189_v46, %v16187_v0  ;;  %v15176_v0 = vld [vmem:[#allocation8 + $0x100] ss:$8 sps:$4 sm:$0xff]   ;;  %v15181_v46 = vld [vmem:[#allocation8 + $0x84] ss:$8 sps:$4 sm:$0xff]  }
0x1133   :  { %v18431_v33 = vadd.f32 %v6777_v49, %v6776_v47  ;;  %v15179_v47 = vld [vmem:[#allocation8 + $0x80] ss:$8 sps:$4 sm:$0xff]   ;;  %v15184_v49 = vld [vmem:[%s19501_s9 + $0xe4] ss:$16 sps:$4 sm:$0xff]  }
0x1134   :  { %v16191_v59 = vpop.eup %16190 }
0x1135   :  { %v6773_v60 = vadd.f32 1.0, %v16191_v59  ;;  %16192 = vtanh.f32 %v18431_v33  ;;  %v15206_v59 = vld [vmem:[#allocation10 + $0x78] sm:$0xff]  }
0x1137   :  { %16194 = vrcp.f32 %v6773_v60  ;;  %v6814_v60 = vld [vmem:[%s19503_s11] sm:$0x7] }
0x1142   :  { %v16193_v5 = vpop.eup %16192 }
0x1144   :  { %v16195_v10 = vpop.eup %16194 }
0x1145   :  { %v6780_v11 = vmul.f32 %v16195_v10, %v16193_v5  ;;  %v6819_v5 = vrot.slane %v6814_v60, %v19543_v22  ;;  %v6827_v10 = vrot.slane %v6814_v60, %v19546_v51 }
0x1147   :  { %v18434_v58 = vpack.c.bf16 %v6780_v11, %v6780_v11  ;;  %v6823_v11 = vrot.slane %v6814_v60, %v19544_v41  ;;  %v15229_v60 = vld [vmem:[%s19501_s9 + $0x164] ss:$16 sps:$4 sm:$0xff]  }
0x1149   :  { %6992 = vmatmul.mubr.bf16.vlgmr.msra.gmra.mxu0 %v18434_v58  ;;  %14057 = vmatmul.mubr.bf16.vlgmr.msra.gmra.mxu1 %v18434_v58 }
0x114a   :  { %7347 = vmatpush1.bf16.msra.mxu0 %v15110_v14  ;;  %7388 = vmatpush1.bf16.msra.mxu1 %v15134_v15 }
0x114b   :  { %7348 = vmatprep.subr.bf16.mxu0 %v15115_v6  ;;  %7389 = vmatprep.subr.bf16.mxu1 %v15142_v2 }
0x114c   :  { %7419 = vmatprep.mubr.bf16.mxu1 %v19533_v32 }
0x114e   :  { %7349 = vmatpush1.bf16.msra.mxu0 %v15113_v57  ;;  %7390 = vmatpush1.bf16.msra.mxu1 %v15140_v55 }
0x114f   :  { %7350 = vmatprep.subr.bf16.mxu0 %v15118_v24  ;;  %7391 = vmatprep.subr.bf16.mxu1 %v15148_v63 }
0x1152   :  { %7351 = vmatpush1.bf16.msra.mxu0 %v15116_v48  ;;  %7392 = vmatpush1.bf16.msra.mxu1 %v15146_v3 }
0x1153   :  { %7352 = vmatprep.subr.bf16.mxu0 %v15121_v28  ;;  %7393 = vmatprep.subr.bf16.mxu1 %v15154_v19 }
0x1156   :  { %7353 = vmatpush1.bf16.msra.mxu0 %v15119_v34  ;;  %7394 = vmatpush1.bf16.msra.mxu1 %v15152_v35  ;;  %v15210_v35 = vld [vmem:[#allocation10 + $0x38] sm:$0xff]  }
0x1157   :  { %7354 = vmatprep.subr.bf16.mxu0 %v15124_v61  ;;  %7395 = vmatprep.subr.bf16.mxu1 %v15160_v38  ;;  %v15197_v38 = vld [vmem:[%s19501_s9 + $0x40] ss:$16 sps:$4 sm:$0xff]  }
0x115a   :  { %7355 = vmatpush1.bf16.msra.mxu0 %v15122_v52  ;;  %7396 = vmatpush1.bf16.msra.mxu1 %v15158_v30  ;;  %v15202_v30 = vld [vmem:[%s19501_s9 + $0x24] ss:$16 sps:$4 sm:$0xff]  }
0x115b   :  { %7356 = vmatprep.subr.bf16.mxu0 %v15127_v50  ;;  %7397 = vmatprep.subr.bf16.mxu1 %v15166_v26  ;;  %v15211_v50 = vld [vmem:[#allocation10 + $0x70] sm:$0xff]  }
0x115c   :  { %v15203_v26 = vld [vmem:[%s19501_s9] ss:$16 sps:$4 sm:$0xff]  }
0x115e   :  { %7357 = vmatpush1.bf16.msra.mxu0 %v15125_v45  ;;  %7398 = vmatpush1.bf16.msra.mxu1 %v15164_v25  ;;  %v15209_v25 = vld [vmem:[%s19501_s9 + $0x1e4] ss:$16 sps:$4 sm:$0xff]  }
0x115f   :  { %7358 = vmatprep.subr.bf16.mxu0 %v15130_v62  ;;  %7399 = vmatprep.subr.bf16.mxu1 %v15172_v37  ;;  %v15182_v62 = vld [vmem:[%s19501_s9 + $0xe0] ss:$16 sps:$4 sm:$0xff]  }
0x1160   :  { %v15212_v37 = vld [vmem:[%s19501_s9 + $0x1c0] ss:$16 sps:$4 sm:$0xff]  }
0x1162   :  { %7359 = vmatpush1.bf16.msra.mxu0 %v15128_v12  ;;  %7400 = vmatpush1.bf16.msra.mxu1 %v15170_v27  ;;  %v15216_v27 = vld [vmem:[#allocation10 + $0x68] sm:$0xff]  }
0x1163   :  { %7360 = vmatprep.subr.bf16.mxu0 %v15133_v40  ;;  %7401 = vmatprep.subr.bf16.mxu1 %v15178_v1  ;;  %v15187_v40 = vld [vmem:[%s19501_s9 + $0xc4] ss:$16 sps:$4 sm:$0xff]   ;;  %v15220_v1 = vld [vmem:[#allocation10 + $0x28] sm:$0xff]  }
0x1166   :  { %7361 = vmatpush1.bf16.msra.mxu0 %v15131_v4  ;;  %7402 = vmatpush1.bf16.msra.mxu1 %v15176_v0  ;;  %v15215_v4 = vld [vmem:[#allocation10 + $0x30] sm:$0xff]   ;;  %v15221_v0 = vld [vmem:[#allocation10 + $0x60] sm:$0xff]  }
0x1167   :  { %7362 = vmatprep.subr.bf16.mxu0 %v15139_v18  ;;  %13865 = vmatprep.subr.bf16.mxu1 %v15206_v59  ;;  %v15185_v18 = vld [vmem:[%s19501_s9 + $0xc0] ss:$16 sps:$4 sm:$0xff]   ;;  %v15226_v59 = vld [vmem:[#allocation10 + $0x58] sm:$0xff]  }
0x116a   :  { %7363 = vmatpush2.bf16.msra.mxu0 %v15137_v56  ;;  %v15190_v56 = vld [vmem:[%s19501_s9 + $0xa4] ss:$16 sps:$4 sm:$0xff]  }
0x116b   :  { %7364 = vmatprep.subr.bf16.mxu0 %v15145_v9  ;;  %v15188_v9 = vld [vmem:[%s19501_s9 + $0xa0] ss:$16 sps:$4 sm:$0xff]  }
0x116e   :  { %7365 = vmatpush2.bf16.msra.mxu0 %v15143_v16  ;;  %v15193_v16 = vld [vmem:[%s19501_s9 + $0x84] ss:$16 sps:$4 sm:$0xff]  }
0x116f   :  { %7366 = vmatprep.subr.bf16.mxu0 %v15151_v13  ;;  %v15191_v13 = vld [vmem:[%s19501_s9 + $0x80] ss:$16 sps:$4 sm:$0xff]  }
0x1172   :  { %7367 = vmatpush2.bf16.msra.mxu0 %v15149_v29  ;;  %v15196_v29 = vld [vmem:[%s19501_s9 + $0x64] ss:$16 sps:$4 sm:$0xff]  }
0x1173   :  { %7368 = vmatprep.subr.bf16.mxu0 %v15157_v39  ;;  %v15194_v39 = vld [vmem:[%s19501_s9 + $0x60] ss:$16 sps:$4 sm:$0xff]  }
0x1176   :  { %7369 = vmatpush2.bf16.msra.mxu0 %v15155_v42  ;;  %v15199_v42 = vld [vmem:[%s19501_s9 + $0x44] ss:$16 sps:$4 sm:$0xff]  }
0x1177   :  { %7370 = vmatprep.subr.bf16.mxu0 %v15163_v31  ;;  %v15200_v31 = vld [vmem:[%s19501_s9 + $0x20] ss:$16 sps:$4 sm:$0xff]  }
0x117a   :  { %7371 = vmatpush2.bf16.msra.mxu0 %v15161_v44  ;;  %v15205_v44 = vld [vmem:[%s19501_s9 + $0x4] ss:$16 sps:$4 sm:$0xff]  }
0x117b   :  { %7372 = vmatprep.subr.bf16.mxu0 %v15169_v54  ;;  %v15207_v54 = vld [vmem:[%s19501_s9 + $0x1e0] ss:$16 sps:$4 sm:$0xff]  }
0x117e   :  { %7373 = vmatpush2.bf16.msra.mxu0 %v15167_v17  ;;  %v15214_v17 = vld [vmem:[%s19501_s9 + $0x1c4] ss:$16 sps:$4 sm:$0xff]  }
0x117f   :  { %7374 = vmatprep.subr.bf16.mxu0 %v15175_v23  ;;  %v15219_v23 = vld [vmem:[%s19501_s9 + $0x1a4] ss:$16 sps:$4 sm:$0xff]  }
0x1182   :  { %7375 = vmatpush2.bf16.msra.mxu0 %v15173_v8  ;;  %v15217_v8 = vld [vmem:[%s19501_s9 + $0x1a0] ss:$16 sps:$4 sm:$0xff]  }
0x1183   :  { %7376 = vmatprep.subr.bf16.mxu0 %v15181_v46  ;;  %v15224_v46 = vld [vmem:[%s19501_s9 + $0x184] ss:$16 sps:$4 sm:$0xff]  }
0x1186   :  { %7377 = vmatpush2.bf16.msra.mxu0 %v15179_v47  ;;  %v15222_v47 = vld [vmem:[%s19501_s9 + $0x180] ss:$16 sps:$4 sm:$0xff]  }
0x1187   :  { %8186 = vmatprep.subr.bf16.mxu0 %v15184_v49  ;;  %v15225_v49 = vld [vmem:[#allocation10 + $0x20] sm:$0xff]  }
0x1209   :  { %v6993_v14 = vpop.f32.mrf.mxu0  ;;  %v7034_v15 = vpop.f32.mrf.mxu1 }
0x120a   :  { %v6994_v6 = vadd.f32 %v6993_v14, %v6819_v5  ;;  %v7035_v2 = vadd.f32 %v7034_v15, %v6827_v10  ;;  %v15227_v5 = vld [vmem:[%s19501_s9 + $0x160] ss:$16 sps:$4 sm:$0xff]   ;;  %v15230_v10 = vld [vmem:[#allocation10 + $0x18] sm:$0xff]   ;;  %v15234_v14 = vld [vmem:[%s19501_s9 + $0x144] ss:$16 sps:$4 sm:$0xff]  }
0x120b   :  { %v6995_v57 = vpop.f32.mrf.mxu0  ;;  %v14058_v55 = vpop.f32.mrf.mxu1  ;;  %v15232_v15 = vld [vmem:[%s19501_s9 + $0x140] ss:$16 sps:$4 sm:$0xff]  }
0x120c   :  { %16196 = vtanh.f32 %v6994_v6  ;;  %v6996_v24 = vadd.f32 %v6995_v57, %v6823_v11  ;;  %v15231_v11 = vld [vmem:[#allocation10 + $0x50] sm:$0xff]  }
0x120d   :  { %16198 = vtanh.f32 %v7035_v2  ;;  %v6997_v63 = vpop.f32.mrf.mxu0  ;;  %v7037_v48 = vpop.f32.mrf.mxu1  ;;  %v15235_v6 = vld [vmem:[#allocation10 + $0x10] sm:$0xff]   ;;  %v15236_v2 = vld [vmem:[#allocation10 + $0x48] sm:$0xff]  }
0x120e   :  { %16200 = vtanh.f32 %v6996_v24  ;;  %v15239_v57 = vld [vmem:[%s19501_s9 + $0x124] ss:$16 sps:$4 sm:$0xff]   ;;  %v15237_v55 = vld [vmem:[%s19501_s9 + $0x120] ss:$16 sps:$4 sm:$0xff]   ;;  %v15240_v24 = vld [vmem:[#allocation10 + $0x8] sm:$0xff]  }
0x120f   :  { %v6998_v3 = vpop.f32.mrf.mxu0  ;;  %v14059_v28 = vpop.f32.mrf.mxu1  ;;  %v15241_v63 = vld [vmem:[#allocation10 + $0x40] sm:$0xff]  }
0x1210   :  { %v15244_v48 = vld [vmem:[%s19501_s9 + $0x104] ss:$16 sps:$4 sm:$0xff]   ;;  %v15242_v3 = vld [vmem:[%s19501_s9 + $0x100] ss:$16 sps:$4 sm:$0xff]  }
0x1211   :  { %v15245_v28 = vld [vmem:[#allocation10] sm:$0xff]  }
0x1219   :  { %v16197_v19 = vpop.eup %16196 }
0x121a   :  { %v16199_v34 = vpop.eup %16198  ;;  %v7043_v12 = vpack.c.bf16 %v16197_v19, %v16197_v19  ;;  %v15248_v19 = vld [vmem:[%s19501_s9 + $0x2e4] ss:$16 sps:$4 sm:$0xff]  }
0x121b   :  { %v16201_v61 = vpop.eup %16200  ;;  %v7045_v52 = vpack.c.bf16 %v16199_v34, %v16199_v34  ;;  %v15251_v34 = vld [vmem:[%s19501_s9 + $0x2ec] ss:$16 sps:$4 sm:$0xff]  }
0x121c   :  { %v7044_v45 = vpack.c.bf16 %v16201_v61, %v16201_v61 }
0x121d   :  { %7420 = vmatmul.mubr.bf16.vlgmr.msra.gmra.mxu1 %v7045_v52 }
0x121e   :  { %7378 = vmatprep.mubr.bf16.mxu0 %v7044_v45  ;;  %13866 = vmatpush3.bf16.msra.mxu1 %v15210_v35  ;;  %v7094_v35 = vld [vmem:[%s19505_s13] sm:$0x3] }
0x121f   :  { %7379 = vmatmul.mubr.bf16.vlgmr.msra.gmra.mxu0 %v7043_v12  ;;  %13867 = vmatprep.subr.bf16.mxu1 %v15211_v50  ;;  %v7099_v61 = vrot.slane %v7094_v35, %v19543_v22  ;;  %v7103_v50 = vrot.slane %v7094_v35, %v19544_v41  ;;  %v15297_v35 = vld [vmem:[%s19501_s9 + $0xc8] ss:$16 sps:$4 sm:$0xff]  }
0x1220   :  { %8187 = vmatpush1.bf16.msra.mxu0 %v15182_v62 }
0x1221   :  { %8188 = vmatprep.subr.bf16.mxu0 %v15187_v40 }
0x1222   :  { %13868 = vmatpush3.bf16.msra.mxu1 %v15215_v4 }
0x1223   :  { %13869 = vmatprep.subr.bf16.mxu1 %v15216_v27  ;;  %v15263_v27 = vld [vmem:[%s19501_s9 + $0x2ac] ss:$16 sps:$4 sm:$0xff]  }
0x1224   :  { %8189 = vmatpush1.bf16.msra.mxu0 %v15185_v18 }
0x1225   :  { %8190 = vmatprep.subr.bf16.mxu0 %v15190_v56 }
0x1226   :  { %13870 = vmatpush3.bf16.msra.mxu1 %v15220_v1  ;;  %v15266_v1 = vld [vmem:[%s19501_s9 + $0x284] ss:$16 sps:$4 sm:$0xff]  }
0x1227   :  { %13871 = vmatprep.subr.bf16.mxu1 %v15221_v0  ;;  %v15269_v0 = vld [vmem:[%s19501_s9 + $0x28c] ss:$16 sps:$4 sm:$0xff]  }
0x1228   :  { %8191 = vmatpush1.bf16.msra.mxu0 %v15188_v9 }
0x1229   :  { %8192 = vmatprep.subr.bf16.mxu0 %v15193_v16 }
0x122a   :  { %13872 = vmatpush3.bf16.msra.mxu1 %v15225_v49  ;;  %v15272_v49 = vld [vmem:[%s19501_s9 + $0x264] ss:$16 sps:$4 sm:$0xff]  }
0x122b   :  { %13873 = vmatprep.subr.bf16.mxu1 %v15226_v59  ;;  %v15275_v59 = vld [vmem:[%s19501_s9 + $0x26c] ss:$16 sps:$4 sm:$0xff]  }
0x122c   :  { %8193 = vmatpush1.bf16.msra.mxu0 %v15191_v13 }
0x122d   :  { %8194 = vmatprep.subr.bf16.mxu0 %v15196_v29 }
0x122e   :  { %13874 = vmatpush3.bf16.msra.mxu1 %v15230_v10  ;;  %v15278_v10 = vld [vmem:[%s19501_s9 + $0x244] ss:$16 sps:$4 sm:$0xff]  }
0x122f   :  { %13875 = vmatprep.subr.bf16.mxu1 %v15231_v11  ;;  %v15281_v11 = vld [vmem:[%s19501_s9 + $0x24c] ss:$16 sps:$4 sm:$0xff]  }
0x1230   :  { %8195 = vmatpush1.bf16.msra.mxu0 %v15194_v39 }
0x1231   :  { %8196 = vmatprep.subr.bf16.mxu0 %v15199_v42 }
0x1232   :  { %13876 = vmatpush3.bf16.msra.mxu1 %v15235_v6  ;;  %v15284_v6 = vld [vmem:[%s19501_s9 + $0x224] ss:$16 sps:$4 sm:$0xff]  }
0x1233   :  { %13877 = vmatprep.subr.bf16.mxu1 %v15236_v2  ;;  %v15287_v2 = vld [vmem:[%s19501_s9 + $0x22c] ss:$16 sps:$4 sm:$0xff]  }
0x1234   :  { %8197 = vmatpush1.bf16.msra.mxu0 %v15197_v38 }
0x1235   :  { %8198 = vmatprep.subr.bf16.mxu0 %v15202_v30  ;;  %v15246_v30 = vld [vmem:[%s19501_s9 + $0x2e0] ss:$16 sps:$4 sm:$0xff]  }
0x1236   :  { %13878 = vmatpush3.bf16.msra.mxu1 %v15240_v24  ;;  %v15290_v24 = vld [vmem:[%s19501_s9 + $0x204] ss:$16 sps:$4 sm:$0xff]  }
0x1237   :  { %13879 = vmatprep.subr.bf16.mxu1 %v15241_v63  ;;  %v15293_v63 = vld [vmem:[%s19501_s9 + $0x20c] ss:$16 sps:$4 sm:$0xff]  }
0x1238   :  { %8199 = vmatpush1.bf16.msra.mxu0 %v15200_v31  ;;  %v15249_v31 = vld [vmem:[%s19501_s9 + $0x2e8] ss:$16 sps:$4 sm:$0xff]  }
0x1239   :  { %8200 = vmatprep.subr.bf16.mxu0 %v15205_v44 }
0x123a   :  { %13880 = vmatpush3.bf16.msra.mxu1 %v15245_v28  ;;  %v15296_v28 = vld [vmem:[%s19501_s9 + $0xec] ss:$16 sps:$4 sm:$0xff]  }
0x123b   :  { %8227 = vmatprep.subr.bf16.mxu1 %v15248_v19  ;;  %v15294_v19 = vld [vmem:[%s19501_s9 + $0xe8] ss:$16 sps:$4 sm:$0xff]  }
0x123c   :  { %8201 = vmatpush1.bf16.msra.mxu0 %v15203_v26  ;;  %v15254_v26 = vld [vmem:[%s19501_s9 + $0x2c4] ss:$16 sps:$4 sm:$0xff]  }
0x123d   :  { %8202 = vmatprep.subr.bf16.mxu0 %v15209_v25  ;;  %v15257_v25 = vld [vmem:[%s19501_s9 + $0x2cc] ss:$16 sps:$4 sm:$0xff]  }
0x1240   :  { %8203 = vmatpush2.bf16.msra.mxu0 %v15207_v54  ;;  %v15252_v54 = vld [vmem:[%s19501_s9 + $0x2c0] ss:$16 sps:$4 sm:$0xff]  }
0x1241   :  { %8204 = vmatprep.subr.bf16.mxu0 %v15214_v17  ;;  %v15255_v17 = vld [vmem:[%s19501_s9 + $0x2c8] ss:$16 sps:$4 sm:$0xff]  }
0x1244   :  { %8205 = vmatpush2.bf16.msra.mxu0 %v15212_v37  ;;  %v15260_v37 = vld [vmem:[%s19501_s9 + $0x2a4] ss:$16 sps:$4 sm:$0xff]  }
0x1245   :  { %8206 = vmatprep.subr.bf16.mxu0 %v15219_v23  ;;  %v15258_v23 = vld [vmem:[%s19501_s9 + $0x2a0] ss:$16 sps:$4 sm:$0xff]  }
0x1248   :  { %8207 = vmatpush2.bf16.msra.mxu0 %v15217_v8  ;;  %v15261_v8 = vld [vmem:[%s19501_s9 + $0x2a8] ss:$16 sps:$4 sm:$0xff]  }
0x1249   :  { %8208 = vmatprep.subr.bf16.mxu0 %v15224_v46  ;;  %v15264_v46 = vld [vmem:[%s19501_s9 + $0x280] ss:$16 sps:$4 sm:$0xff]  }
0x124c   :  { %8209 = vmatpush2.bf16.msra.mxu0 %v15222_v47  ;;  %v15267_v47 = vld [vmem:[%s19501_s9 + $0x288] ss:$16 sps:$4 sm:$0xff]  }
0x124d   :  { %8210 = vmatprep.subr.bf16.mxu0 %v15229_v60  ;;  %v15270_v60 = vld [vmem:[%s19501_s9 + $0x260] ss:$16 sps:$4 sm:$0xff]  }
0x1250   :  { %8211 = vmatpush2.bf16.msra.mxu0 %v15227_v5  ;;  %v15273_v5 = vld [vmem:[%s19501_s9 + $0x268] ss:$16 sps:$4 sm:$0xff]  }
0x1251   :  { %8212 = vmatprep.subr.bf16.mxu0 %v15234_v14  ;;  %v15276_v14 = vld [vmem:[%s19501_s9 + $0x240] ss:$16 sps:$4 sm:$0xff]  }
0x1254   :  { %8213 = vmatpush2.bf16.msra.mxu0 %v15232_v15  ;;  %v15279_v15 = vld [vmem:[%s19501_s9 + $0x248] ss:$16 sps:$4 sm:$0xff]  }
0x1255   :  { %8214 = vmatprep.subr.bf16.mxu0 %v15239_v57  ;;  %v15282_v57 = vld [vmem:[%s19501_s9 + $0x220] ss:$16 sps:$4 sm:$0xff]  }
0x1258   :  { %8215 = vmatpush2.bf16.msra.mxu0 %v15237_v55  ;;  %v15285_v55 = vld [vmem:[%s19501_s9 + $0x228] ss:$16 sps:$4 sm:$0xff]  }
0x1259   :  { %8216 = vmatprep.subr.bf16.mxu0 %v15244_v48  ;;  %v15288_v48 = vld [vmem:[%s19501_s9 + $0x200] ss:$16 sps:$4 sm:$0xff]  }
0x125c   :  { %8217 = vmatpush2.bf16.msra.mxu0 %v15242_v3  ;;  %v15291_v3 = vld [vmem:[%s19501_s9 + $0x208] ss:$16 sps:$4 sm:$0xff]  }
0x125d   :  { %8309 = vmatprep.subr.bf16.mxu0 %v15251_v34  ;;  %v15299_v34 = vld [vmem:[%s19501_s9 + $0xcc] ss:$16 sps:$4 sm:$0xff]  }
0x12dd   :  { %v7421_v52 = vpop.f32.mrf.mxu1 }
0x12df   :  { %v7423_v45 = vpop.f32.mrf.mxu1  ;;  %v7380_v62 = vpop.f32.mrf.mxu0 }
0x12e0   :  { %v7381_v12 = vadd.f32 %v7380_v62, %v7099_v61  ;;  %v15302_v61 = vld [vmem:[%s19501_s9 + $0xac] ss:$16 sps:$4 sm:$0xff]   ;;  %v15306_v62 = vld [vmem:[%s19501_s9 + $0x68] ss:$16 sps:$4 sm:$0xff]  }
0x12e1   :  { %v7425_v40 = vpop.f32.mrf.mxu1  ;;  %v7382_v4 = vpop.f32.mrf.mxu0 }
0x12e2   :  { %v7422_v18 = vadd.f32 %v7421_v52, %v7381_v12  ;;  %v7383_v56 = vadd.f32 %v7382_v4, %v7103_v50  ;;  %v15300_v52 = vld [vmem:[%s19501_s9 + $0xa8] ss:$16 sps:$4 sm:$0xff]   ;;  %v15311_v12 = vld [vmem:[%s19501_s9 + $0x4c] ss:$16 sps:$4 sm:$0xff]  }
0x12e3   :  { %v7426_v9 = vpop.f32.mrf.mxu1  ;;  %v7384_v16 = vpop.f32.mrf.mxu0  ;;  %v15303_v50 = vld [vmem:[%s19501_s9 + $0x88] ss:$16 sps:$4 sm:$0xff]   ;;  %v15314_v4 = vld [vmem:[%s19501_s9 + $0x2c] ss:$16 sps:$4 sm:$0xff]  }
0x12e4   :  { %v7424_v13 = vadd.f32 %v7423_v45, %v7383_v56  ;;  %16202 = vtanh.f32 %v7422_v18  ;;  %v15308_v45 = vld [vmem:[%s19501_s9 + $0x6c] ss:$16 sps:$4 sm:$0xff]   ;;  %v15309_v40 = vld [vmem:[%s19501_s9 + $0x48] ss:$16 sps:$4 sm:$0xff]  }
0x12e5   :  { %v7385_v29 = vpop.f32.mrf.mxu0  ;;  %v15312_v18 = vld [vmem:[%s19501_s9 + $0x28] ss:$16 sps:$4 sm:$0xff]   ;;  %v15317_v56 = vld [vmem:[%s19501_s9 + $0xc] ss:$16 sps:$4 sm:$0xff]  }
0x12e6   :  { %16204 = vtanh.f32 %v7424_v13  ;;  %v15315_v9 = vld [vmem:[%s19501_s9 + $0x8] ss:$16 sps:$4 sm:$0xff]   ;;  %v15320_v16 = vld [vmem:[%s19501_s9 + $0x1ec] ss:$16 sps:$4 sm:$0xff]  }
0x12e7   :  { %v15318_v13 = vld [vmem:[%s19501_s9 + $0x1e8] ss:$16 sps:$4 sm:$0xff]   ;;  %v15323_v29 = vld [vmem:[%s19501_s9 + $0x1cc] ss:$16 sps:$4 sm:$0xff]  }
0x12f1   :  { %v16203_v39 = vpop.eup %16202 }
0x12f2   :  { %v18560_v44 = vpack.c.bf16 %v16203_v39, %v16203_v39  ;;  %v15321_v39 = vld [vmem:[%s19501_s9 + $0x1c8] ss:$16 sps:$4 sm:$0xff]  }
0x12f3   :  { %v16205_v42 = vpop.eup %16204 }
0x12f4   :  { %v18552_v38 = vpack.c.bf16 %v16205_v42, %v16205_v42  ;;  %v15326_v42 = vld [vmem:[%s19501_s9 + $0x1ac] ss:$16 sps:$4 sm:$0xff]  }
0x12f6   :  { %7599 = vmatprep.mubr.bf16.mxu1 %v18552_v38  ;;  %8218 = vmatprep.mubr.bf16.mxu0 %v18552_v38 }
0x12f7   :  { %7600 = vmatmul.mubr.bf16.vlgmr.msra.gmra.mxu1 %v18560_v44  ;;  %8219 = vmatmul.mubr.bf16.vlgmr.msra.gmra.mxu0 %v18560_v44 }
0x12f8   :  { %8228 = vmatpush1.bf16.msra.mxu1 %v15246_v30  ;;  %8310 = vmatpush1.bf16.msra.mxu0 %v15249_v31  ;;  %v15329_v30 = vld [vmem:[%s19501_s9 + $0x18c] ss:$16 sps:$4 sm:$0xff]   ;;  %v15327_v31 = vld [vmem:[%s19501_s9 + $0x188] ss:$16 sps:$4 sm:$0xff]  }
0x12f9   :  { %8229 = vmatprep.subr.bf16.mxu1 %v15254_v26  ;;  %8311 = vmatprep.subr.bf16.mxu0 %v15257_v25  ;;  %v15332_v26 = vld [vmem:[%s19501_s9 + $0x16c] ss:$16 sps:$4 sm:$0xff]   ;;  %v15330_v25 = vld [vmem:[%s19501_s9 + $0x168] ss:$16 sps:$4 sm:$0xff]  }
0x12fa   :  { %8259 = vmatprep.mubr.bf16.mxu1 %v19533_v32  ;;  %8341 = vmatprep.mubr.bf16.mxu0 %v19533_v32 }
0x12fc   :  { %8230 = vmatpush1.bf16.msra.mxu1 %v15252_v54  ;;  %8312 = vmatpush1.bf16.msra.mxu0 %v15255_v17  ;;  %v15335_v54 = vld [vmem:[%s19501_s9 + $0x14c] ss:$16 sps:$4 sm:$0xff]   ;;  %v15333_v17 = vld [vmem:[%s19501_s9 + $0x148] ss:$16 sps:$4 sm:$0xff]  }
0x12fd   :  { %8231 = vmatprep.subr.bf16.mxu1 %v15260_v37  ;;  %8313 = vmatprep.subr.bf16.mxu0 %v15263_v27  ;;  %v15338_v37 = vld [vmem:[%s19501_s9 + $0x12c] ss:$16 sps:$4 sm:$0xff]   ;;  %v15336_v27 = vld [vmem:[%s19501_s9 + $0x128] ss:$16 sps:$4 sm:$0xff]  }
0x1300   :  { %8232 = vmatpush1.bf16.msra.mxu1 %v15258_v23  ;;  %8314 = vmatpush1.bf16.msra.mxu0 %v15261_v8  ;;  %v15341_v23 = vld [vmem:[%s19501_s9 + $0x10c] ss:$16 sps:$4 sm:$0xff]   ;;  %v15339_v8 = vld [vmem:[%s19501_s9 + $0x108] ss:$16 sps:$4 sm:$0xff]  }
0x1301   :  { %8233 = vmatprep.subr.bf16.mxu1 %v15266_v1  ;;  %8315 = vmatprep.subr.bf16.mxu0 %v15269_v0  ;;  %v15344_v1 = vld [vmem:[#allocation7 + $0xac] ss:$12 sps:$4 sm:$0xff]   ;;  %v15342_v0 = vld [vmem:[#allocation7 + $0xa8] ss:$12 sps:$4 sm:$0xff]  }
0x1304   :  { %8234 = vmatpush1.bf16.msra.mxu1 %v15264_v46  ;;  %8316 = vmatpush1.bf16.msra.mxu0 %v15267_v47  ;;  %v15345_v46 = vld [vmem:[#allocation7 + $0xb0] ss:$12 sps:$4 sm:$0xff]   ;;  %v15348_v47 = vld [vmem:[#allocation7 + $0x94] ss:$12 sps:$4 sm:$0xff]  }
0x1305   :  { %8235 = vmatprep.subr.bf16.mxu1 %v15272_v49  ;;  %8317 = vmatprep.subr.bf16.mxu0 %v15275_v59  ;;  %v15346_v49 = vld [vmem:[#allocation7 + $0x90] ss:$12 sps:$4 sm:$0xff]   ;;  %v15349_v59 = vld [vmem:[#allocation7 + $0x98] ss:$12 sps:$4 sm:$0xff]  }
0x1308   :  { %8236 = vmatpush1.bf16.msra.mxu1 %v15270_v60  ;;  %8318 = vmatpush1.bf16.msra.mxu0 %v15273_v5  ;;  %v15352_v60 = vld [vmem:[#allocation7 + $0x7c] ss:$12 sps:$4 sm:$0xff]   ;;  %v15353_v5 = vld [vmem:[#allocation7 + $0x80] ss:$12 sps:$4 sm:$0xff]  }
0x1309   :  { %8237 = vmatprep.subr.bf16.mxu1 %v15278_v10  ;;  %8319 = vmatprep.subr.bf16.mxu0 %v15281_v11  ;;  %v15356_v10 = vld [vmem:[#allocation7 + $0x64] ss:$12 sps:$4 sm:$0xff]   ;;  %v15354_v11 = vld [vmem:[#allocation7 + $0x60] ss:$12 sps:$4 sm:$0xff]  }
0x130c   :  { %8238 = vmatpush1.bf16.msra.mxu1 %v15276_v14  ;;  %8320 = vmatpush1.bf16.msra.mxu0 %v15279_v15  ;;  %v15357_v14 = vld [vmem:[#allocation7 + $0x68] ss:$12 sps:$4 sm:$0xff]  }
0x130d   :  { %8239 = vmatprep.subr.bf16.mxu1 %v15284_v6  ;;  %8321 = vmatprep.subr.bf16.mxu0 %v15287_v2  ;;  %v15358_v15 = vld [vmem:[#allocation7 + $0x48] ss:$12 sps:$4 sm:$0xff]   ;;  %v15360_v6 = vld [vmem:[#allocation7 + $0x4c] ss:$12 sps:$4 sm:$0xff]   ;;  %v15361_v2 = vld [vmem:[#allocation7 + $0x50] ss:$12 sps:$4 sm:$0xff]  }
0x1310   :  { %8240 = vmatpush1.bf16.msra.mxu1 %v15282_v57  ;;  %8322 = vmatpush1.bf16.msra.mxu0 %v15285_v55  ;;  %v15364_v57 = vld [vmem:[#allocation7 + $0x34] ss:$12 sps:$4 sm:$0xff]   ;;  %v15362_v55 = vld [vmem:[#allocation7 + $0x30] ss:$12 sps:$4 sm:$0xff]  }
0x1311   :  { %8241 = vmatprep.subr.bf16.mxu1 %v15290_v24  ;;  %8323 = vmatprep.subr.bf16.mxu0 %v15293_v63  ;;  %v15365_v24 = vld [vmem:[#allocation7 + $0x38] ss:$12 sps:$4 sm:$0xff]   ;;  %v15368_v63 = vld [vmem:[#allocation7 + $0x1c] ss:$12 sps:$4 sm:$0xff]  }
0x1314   :  { %8242 = vmatpush1.bf16.msra.mxu1 %v15288_v48  ;;  %8324 = vmatpush1.bf16.msra.mxu0 %v15291_v3 }
0x1315   :  { %8268 = vmatprep.subr.bf16.mxu1 %v15296_v28  ;;  %8556 = vmatprep.subr.bf16.mxu0 %v15344_v1  ;;  %v15366_v28 = vld [vmem:[#allocation7 + $0x18] ss:$12 sps:$4 sm:$0xff]  }
0x1317   :  { %8260 = vmatmul.mubr.bf16.vlgmr.msra.gmra.mxu1 %v18434_v58  ;;  %8342 = vmatmul.mubr.bf16.vlgmr.msra.gmra.mxu0 %v18434_v58  ;;  %v15305_v58 = vld [vmem:[%s19501_s9 + $0x8c] ss:$16 sps:$4 sm:$0xff]  }
0x1318   :  { %8269 = vmatpush1.bf16.msra.mxu1 %v15294_v19  ;;  %8300 = vmatprep.mubr.bf16.mxu1 %v18552_v38  ;;  %v15324_v38 = vld [vmem:[%s19501_s9 + $0x1a8] ss:$16 sps:$4 sm:$0xff]   ;;  %v15369_v19 = vld [vmem:[#allocation7 + $0x20] ss:$12 sps:$4 sm:$0xff]  }
0x1319   :  { %8270 = vmatprep.subr.bf16.mxu1 %v15299_v34  ;;  %8588 = vmatprep.mubr.bf16.mxu0 %v19533_v32  ;;  %v15372_v34 = vld [vmem:[#allocation7 + $0x4] ss:$12 sps:$4 sm:$0xff]  }
0x131a   :  { %8557 = vmatpush1.bf16.msra.mxu0 %v15342_v0 }
0x131b   :  { %8558 = vmatprep.subr.bf16.mxu0 %v15348_v47 }
0x131c   :  { %8271 = vmatpush1.bf16.msra.mxu1 %v15297_v35  ;;  %v13178_v35 = vld [vmem:[%s19507_s15] ss:$0 sm:$0xff] }
0x131d   :  { %8272 = vmatprep.subr.bf16.mxu1 %v15302_v61 }
0x131e   :  { %8559 = vmatpush1.bf16.msra.mxu0 %v15346_v49 }
0x131f   :  { %8560 = vmatprep.subr.bf16.mxu0 %v15352_v60 }
0x1320   :  { %8273 = vmatpush1.bf16.msra.mxu1 %v15300_v52 }
0x1321   :  { %8274 = vmatprep.subr.bf16.mxu1 %v15305_v58 }
0x1324   :  { %8275 = vmatpush1.bf16.msra.mxu1 %v15303_v50 }
0x1325   :  { %8276 = vmatprep.subr.bf16.mxu1 %v15308_v45 }
0x1328   :  { %8277 = vmatpush1.bf16.msra.mxu1 %v15306_v62  ;;  %v15370_v62 = vld [vmem:[#allocation7] ss:$12 sps:$4 sm:$0xff]  }
0x1329   :  { %8278 = vmatprep.subr.bf16.mxu1 %v15311_v12  ;;  %v15373_v12 = vld [vmem:[#allocation7 + $0x8] ss:$12 sps:$4 sm:$0xff]  }
0x132c   :  { %8279 = vmatpush1.bf16.msra.mxu1 %v15309_v40 }
0x132d   :  { %8280 = vmatprep.subr.bf16.mxu1 %v15314_v4 }
0x1330   :  { %8281 = vmatpush1.bf16.msra.mxu1 %v15312_v18 }
0x1331   :  { %8282 = vmatprep.subr.bf16.mxu1 %v15317_v56 }
0x1334   :  { %8283 = vmatpush1.bf16.msra.mxu1 %v15315_v9  ;;  %v15376_v9 = vld [vmem:[#allocation8 + $0x74] ss:$8 sps:$4 sm:$0xff]  }
0x1335   :  { %8284 = vmatprep.subr.bf16.mxu1 %v15320_v16 }
0x1338   :  { %8285 = vmatpush2.bf16.msra.mxu1 %v15318_v13 }
0x1339   :  { %8286 = vmatprep.subr.bf16.mxu1 %v15323_v29 }
0x133c   :  { %8287 = vmatpush2.bf16.msra.mxu1 %v15321_v39 }
0x133d   :  { %8288 = vmatprep.subr.bf16.mxu1 %v15326_v42 }
0x1340   :  { %8289 = vmatpush2.bf16.msra.mxu1 %v15324_v38 }
0x1341   :  { %8290 = vmatprep.subr.bf16.mxu1 %v15329_v30 }
0x1344   :  { %8291 = vmatpush2.bf16.msra.mxu1 %v15327_v31 }
0x1345   :  { %8292 = vmatprep.subr.bf16.mxu1 %v15332_v26  ;;  %v15400_v26 = vld [vmem:[#allocation8 + $0x174] ss:$8 sps:$4 sm:$0xff]  }
0x1348   :  { %8293 = vmatpush2.bf16.msra.mxu1 %v15330_v25 }
0x1349   :  { %8294 = vmatprep.subr.bf16.mxu1 %v15335_v54 }
0x134c   :  { %8295 = vmatpush2.bf16.msra.mxu1 %v15333_v17 }
0x134d   :  { %8296 = vmatprep.subr.bf16.mxu1 %v15338_v37 }
0x1350   :  { %8297 = vmatpush2.bf16.msra.mxu1 %v15336_v27 }
0x1351   :  { %8298 = vmatprep.subr.bf16.mxu1 %v15341_v23 }
0x1354   :  { %8299 = vmatpush2.bf16.msra.mxu1 %v15339_v8 }
0x1355   :  { %14060 = vmatprep.subr.bf16.mxu1 %v16469_v20 }
0x1357   :  { %8301 = vmatmul.mubr.bf16.vlgmr.msra.gmra.mxu1 %v18560_v44  ;;  %v15350_v44 = vld [vmem:[#allocation7 + $0x78] ss:$12 sps:$4 sm:$0xff]  }
0x1358   :  { %14076 = vmatprep.mubr.msk.bf16.mxu1 %vm16470_vm1, %v16469_v20  ;;  %14061 = vmatpush3.bf16.msra.mxu1 %v15345_v46 }
0x1359   :  { %14062 = vmatprep.subr.bf16.mxu1 %v16469_v20  ;;  %8561 = vmatpush1.bf16.msra.mxu0 %v15350_v44 }
0x135a   :  { %8562 = vmatprep.subr.bf16.mxu0 %v15356_v10 }
0x135c   :  { %14063 = vmatpush3.bf16.msra.mxu1 %v15349_v59 }
0x135d   :  { %14064 = vmatprep.subr.bf16.mxu1 %v16469_v20  ;;  %8563 = vmatpush1.bf16.msra.mxu0 %v15354_v11 }
0x135e   :  { %8564 = vmatprep.subr.bf16.mxu0 %v15360_v6 }
0x1360   :  { %14065 = vmatpush3.bf16.msra.mxu1 %v15353_v5 }
0x1361   :  { %14066 = vmatprep.subr.bf16.mxu1 %v16469_v20  ;;  %8565 = vmatpush1.bf16.msra.mxu0 %v15358_v15 }
0x1362   :  { %8566 = vmatprep.subr.bf16.mxu0 %v15364_v57 }
0x1364   :  { %14067 = vmatpush3.bf16.msra.mxu1 %v15357_v14 }
0x1365   :  { %14068 = vmatprep.subr.bf16.mxu1 %v16469_v20  ;;  %8567 = vmatpush1.bf16.msra.mxu0 %v15362_v55 }
0x1366   :  { %8568 = vmatprep.subr.bf16.mxu0 %v15368_v63 }
0x1368   :  { %14069 = vmatpush3.bf16.msra.mxu1 %v15361_v2 }
0x1369   :  { %14070 = vmatprep.subr.bf16.mxu1 %v16469_v20  ;;  %8569 = vmatpush1.bf16.msra.mxu0 %v15366_v28 }
0x136a   :  { %8570 = vmatprep.subr.bf16.mxu0 %v15372_v34  ;;  %v15398_v34 = vld [vmem:[#allocation8 + $0x170] ss:$8 sps:$4 sm:$0xff]  }
0x136c   :  { %14071 = vmatpush3.bf16.msra.mxu1 %v15365_v24 }
0x136d   :  { %14072 = vmatprep.subr.bf16.mxu1 %v16469_v20  ;;  %8571 = vmatpush1.bf16.msra.mxu0 %v15370_v62  ;;  %v15380_v62 = vld [vmem:[#allocation8 + $0x50] ss:$8 sps:$4 sm:$0xff]  }
0x136e   :  { %8943 = vmatprep.subr.bf16.mxu0 %v15376_v9  ;;  %v15416_v9 = vld [vmem:[#allocation8 + $0x140] ss:$8 sps:$4 sm:$0xff]  }
0x1370   :  { %14073 = vmatpush3.bf16.msra.mxu1 %v15369_v19  ;;  %v15374_v19 = vld [vmem:[#allocation8 + $0x70] ss:$8 sps:$4 sm:$0xff]  }
0x1371   :  { %14074 = vmatprep.subr.bf16.mxu1 %v16469_v20 }
0x1374   :  { %14075 = vmatpush3.bf16.msra.mxu1 %v15373_v12  ;;  %v15410_v12 = vld [vmem:[#allocation8 + $0x150] ss:$8 sps:$4 sm:$0xff]  }
0x1375   :  { %8984 = vmatprep.subr.bf16.mxu1 %v15400_v26  ;;  %v15403_v26 = vld [vmem:[#allocation8 + $0xf4] ss:$8 sps:$4 sm:$0xff]  }
0x13b7   :  { %v13881_v48 = vpop.f32.mrf.mxu1  ;;  %v8220_v3 = vpop.f32.mrf.mxu0 }
0x13b9   :  { %v13882_v61 = vpop.f32.mrf.mxu1  ;;  %v8222_v52 = vpop.f32.mrf.mxu0 }
0x13ba   :  { %v13883_v58 = vadd.f32 %v13882_v61, %v13881_v48  ;;  %v15379_v61 = vld [vmem:[#allocation8 + $0x64] ss:$8 sps:$4 sm:$0xff]  }
0x13bb   :  { %v13884_v50 = vpop.f32.mrf.mxu1  ;;  %v8224_v45 = vpop.f32.mrf.mxu0 }
0x13bc   :  { %v7602_v40 = vadd.f32 %v13883_v58, %v13178_v35  ;;  %v15404_v58 = vld [vmem:[#allocation8 + $0x160] ss:$8 sps:$4 sm:$0xff]   ;;  %v15382_v50 = vld [vmem:[#allocation8 + $0x54] ss:$8 sps:$4 sm:$0xff]  }
0x13bd   :  { %v13885_v4 = vpop.f32.mrf.mxu1  ;;  %v8225_v18 = vpop.f32.mrf.mxu0  ;;  %v15412_v45 = vld [vmem:[#allocation8 + $0x154] ss:$8 sps:$4 sm:$0xff]  }
0x13be   :  { %v18767_v56 = vadd.f32 %v7602_v40, %v18420_v36  ;;  %v15385_v40 = vld [vmem:[#allocation8 + $0x44] ss:$8 sps:$4 sm:$0xff]   ;;  %v15383_v18 = vld [vmem:[#allocation8 + $0x40] ss:$8 sps:$4 sm:$0xff]  }
0x13bf   :  { %v15418_v4 = vld [vmem:[#allocation8 + $0x144] ss:$8 sps:$4 sm:$0xff]  }
0x13c0   :  { %13195 = vst [vmem:[%s19508_s16 + $0x18] sm:$0xff] %v18767_v56 }
0x13d7   :  { %v8261_v16 = vpop.f32.mrf.mxu1  ;;  %v8343_v13 = vpop.f32.mrf.mxu0 }
0x13d8   :  { %v8262_v25 = vadd.f32 %v8261_v16, %v8220_v3  ;;  %v15388_v16 = vld [vmem:[#allocation8 + $0x34] ss:$8 sps:$4 sm:$0xff]  }
0x13d9   :  { %v8263_v29 = vpop.f32.mrf.mxu1  ;;  %v8345_v39 = vpop.f32.mrf.mxu0 }
0x13da   :  { %v8264_v36 = vadd.f32 %v8263_v29, %v8222_v52  ;;  %v8350_v17 = vadd.f32 %v8262_v25, %v17722_v53  ;;  %v15406_v52 = vld [vmem:[#allocation8 + $0x164] ss:$8 sps:$4 sm:$0xff]  }
0x13db   :  { %v8265_v42 = vpop.f32.mrf.mxu1  ;;  %v8347_v38 = vpop.f32.mrf.mxu0  ;;  %v15391_v29 = vld [vmem:[#allocation8 + $0x24] ss:$8 sps:$4 sm:$0xff]  }
0x13dc   :  { %v8351_v54 = vadd.f32 %v8264_v36, %v17719_v21  ;;  %v13292_v27 = vmul.f32 -1.442695, %v8350_v17  ;;  %v15394_v42 = vld [vmem:[#allocation8 + $0x14] ss:$8 sps:$4 sm:$0xff]   ;;  %v15392_v38 = vld [vmem:[#allocation8 + $0x10] ss:$8 sps:$4 sm:$0xff]  }
0x13dd   :  { %v8266_v30 = vpop.f32.mrf.mxu1  ;;  %v8348_v31 = vpop.f32.mrf.mxu0  ;;  %v15401_v36 = vld [vmem:[#allocation8 + $0xf0] ss:$8 sps:$4 sm:$0xff]   ;;  %v15409_v25 = vld [vmem:[#allocation8 + $0xe4] ss:$8 sps:$4 sm:$0xff]   ;;  %v15415_v17 = vld [vmem:[#allocation8 + $0xd4] ss:$8 sps:$4 sm:$0xff]  }
0x13de   :  { %v13293_v37 = vmul.f32 -1.442695, %v8351_v54  ;;  %v15397_v30 = vld [vmem:[#allocation8 + $0x4] ss:$8 sps:$4 sm:$0xff]   ;;  %v15395_v31 = vld [vmem:[#allocation8] ss:$8 sps:$4 sm:$0xff]  }
0x13df   :  { %v15407_v54 = vld [vmem:[#allocation8 + $0xe0] ss:$8 sps:$4 sm:$0xff]  }
0x13e0   :  { %16206 = vpow2.f32 %v13293_v37  ;;  %v15413_v37 = vld [vmem:[#allocation8 + $0xd0] ss:$8 sps:$4 sm:$0xff]  }
0x13e1   :  { %16208 = vpow2.f32 %v13292_v27  ;;  %v15421_v27 = vld [vmem:[#allocation8 + $0xc4] ss:$8 sps:$4 sm:$0xff]  }
0x13ed   :  { %v16207_v23 = vpop.eup %16206 }
0x13ee   :  { %v16209_v8 = vpop.eup %16208  ;;  %v8363_v1 = vadd.f32 1.0, %v16207_v23  ;;  %v15419_v23 = vld [vmem:[#allocation8 + $0xc0] ss:$8 sps:$4 sm:$0xff]  }
0x13ef   :  { %v8357_v0 = vadd.f32 1.0, %v16209_v8  ;;  %v15424_v8 = vld [vmem:[#allocation8 + $0x134] ss:$8 sps:$4 sm:$0xff]  }
0x13f0   :  { %16210 = vrcp.f32 %v8363_v1  ;;  %v15422_v1 = vld [vmem:[#allocation8 + $0x130] ss:$8 sps:$4 sm:$0xff]  }
0x13f1   :  { %16212 = vrcp.f32 %v8357_v0  ;;  %v15427_v0 = vld [vmem:[#allocation8 + $0xb4] ss:$8 sps:$4 sm:$0xff]  }
0x13fd   :  { %v16211_v14 = vpop.eup %16210 }
0x13fe   :  { %v16213_v15 = vpop.eup %16212  ;;  %v8373_v2 = vmul.f32 %v16211_v14, %v18431_v33  ;;  %v15377_v33 = vld [vmem:[#allocation8 + $0x60] ss:$8 sps:$4 sm:$0xff]   ;;  %v15442_v14 = vld [vmem:[#allocation8 + $0x104] ss:$8 sps:$4 sm:$0xff]  }
0x1417   :  { %v8302_v46 = vpop.f32.mrf.mxu1 }
0x1418   :  { %v8344_v47 = vadd.f32 %v8343_v13, %v8302_v46  ;;  %v15386_v13 = vld [vmem:[#allocation8 + $0x30] ss:$8 sps:$4 sm:$0xff]  }
0x1419   :  { %v8304_v49 = vpop.f32.mrf.mxu1  ;;  %v15425_v46 = vld [vmem:[#allocation8 + $0xb0] ss:$8 sps:$4 sm:$0xff]  }
0x141a   :  { %v8352_v59 = vadd.f32 %v8344_v47, %v17729_v43  ;;  %v8346_v60 = vadd.f32 %v8345_v39, %v8304_v49  ;;  %v15389_v39 = vld [vmem:[#allocation8 + $0x20] ss:$8 sps:$4 sm:$0xff]   ;;  %v15430_v47 = vld [vmem:[#allocation8 + $0x124] ss:$8 sps:$4 sm:$0xff]  }
0x141b   :  { %v8306_v44 = vpop.f32.mrf.mxu1  ;;  %v15428_v49 = vld [vmem:[#allocation8 + $0x120] ss:$8 sps:$4 sm:$0xff]  }
0x141c   :  { %16214 = vtanh.f32 %v8352_v59  ;;  %v8353_v5 = vadd.f32 %v8346_v60, %v17732_v7  ;;  %v15433_v59 = vld [vmem:[#allocation8 + $0xa4] ss:$8 sps:$4 sm:$0xff]   ;;  %v15431_v60 = vld [vmem:[#allocation8 + $0xa0] ss:$8 sps:$4 sm:$0xff]   ;;  %v15436_v44 = vld [vmem:[#allocation8 + $0x114] ss:$8 sps:$4 sm:$0xff]  }
0x141d   :  { %v8307_v10 = vpop.f32.mrf.mxu1 }
0x141e   :  { %v13294_v11 = vmul.f32 -1.442695, %v8353_v5  ;;  %v15434_v5 = vld [vmem:[#allocation8 + $0x110] ss:$8 sps:$4 sm:$0xff]   ;;  %v15439_v10 = vld [vmem:[#allocation8 + $0x94] ss:$8 sps:$4 sm:$0xff]  }
0x1420   :  { %16216 = vpow2.f32 %v13294_v11  ;;  %v15437_v11 = vld [vmem:[#allocation8 + $0x90] ss:$8 sps:$4 sm:$0xff]  }
0x1429   :  { %v16215_v6 = vpop.eup %16214 }
0x142a   :  { %v8374_v57 = vmul.f32 %v16215_v6, %v16213_v15  ;;  %v15440_v15 = vld [vmem:[#allocation8 + $0x100] ss:$8 sps:$4 sm:$0xff]   ;;  %v15445_v6 = vld [vmem:[#allocation8 + $0x84] ss:$8 sps:$4 sm:$0xff]  }
0x142c   :  { %v18778_v55 = vadd.f32 %v8374_v57, %v8373_v2  ;;  %v15443_v2 = vld [vmem:[#allocation8 + $0x80] ss:$8 sps:$4 sm:$0xff]   ;;  %v15448_v57 = vld [vmem:[%s19501_s9 + $0xe4] ss:$16 sps:$4 sm:$0xff]  }
0x142d   :  { %v16217_v24 = vpop.eup %16216 }
0x142e   :  { %v8370_v63 = vadd.f32 1.0, %v16217_v24  ;;  %16218 = vtanh.f32 %v18778_v55  ;;  %v15470_v24 = vld [vmem:[#allocation10 + $0x78] sm:$0xff]  }
0x1430   :  { %16220 = vrcp.f32 %v8370_v63  ;;  %v8411_v63 = vld [vmem:[%s19503_s11] sm:$0x7] }
0x143b   :  { %v16219_v48 = vpop.eup %16218 }
0x143d   :  { %v16221_v3 = vpop.eup %16220 }
0x143e   :  { %v8377_v28 = vmul.f32 %v16221_v3, %v16219_v48  ;;  %v8416_v48 = vrot.slane %v8411_v63, %v19543_v22  ;;  %v8424_v3 = vrot.slane %v8411_v63, %v19546_v51 }
0x1440   :  { %v18781_v35 = vpack.c.bf16 %v8377_v28, %v8377_v28  ;;  %v8420_v28 = vrot.slane %v8411_v63, %v19544_v41  ;;  %v15493_v63 = vld [vmem:[%s19501_s9 + $0x164] ss:$16 sps:$4 sm:$0xff]  }
0x1442   :  { %8589 = vmatmul.mubr.bf16.vlgmr.msra.gmra.mxu0 %v18781_v35  ;;  %14077 = vmatmul.mubr.bf16.vlgmr.msra.gmra.mxu1 %v18781_v35 }
0x1443   :  { %8944 = vmatpush1.bf16.msra.mxu0 %v15374_v19  ;;  %8985 = vmatpush1.bf16.msra.mxu1 %v15398_v34 }
0x1444   :  { %8945 = vmatprep.subr.bf16.mxu0 %v15379_v61  ;;  %8986 = vmatprep.subr.bf16.mxu1 %v15406_v52 }
0x1445   :  { %9016 = vmatprep.mubr.bf16.mxu1 %v19533_v32 }
0x1447   :  { %8946 = vmatpush1.bf16.msra.mxu0 %v15377_v33  ;;  %8987 = vmatpush1.bf16.msra.mxu1 %v15404_v58 }
0x1448   :  { %8947 = vmatprep.subr.bf16.mxu0 %v15382_v50  ;;  %8988 = vmatprep.subr.bf16.mxu1 %v15412_v45 }
0x144b   :  { %8948 = vmatpush1.bf16.msra.mxu0 %v15380_v62  ;;  %8989 = vmatpush1.bf16.msra.mxu1 %v15410_v12 }
0x144c   :  { %8949 = vmatprep.subr.bf16.mxu0 %v15385_v40  ;;  %8990 = vmatprep.subr.bf16.mxu1 %v15418_v4 }
0x144f   :  { %8950 = vmatpush1.bf16.msra.mxu0 %v15383_v18  ;;  %8991 = vmatpush1.bf16.msra.mxu1 %v15416_v9  ;;  %v15474_v9 = vld [vmem:[#allocation10 + $0x38] sm:$0xff]  }
0x1450   :  { %8951 = vmatprep.subr.bf16.mxu0 %v15388_v16  ;;  %8992 = vmatprep.subr.bf16.mxu1 %v15424_v8  ;;  %v15461_v8 = vld [vmem:[%s19501_s9 + $0x40] ss:$16 sps:$4 sm:$0xff]  }
0x1453   :  { %8952 = vmatpush1.bf16.msra.mxu0 %v15386_v13  ;;  %8993 = vmatpush1.bf16.msra.mxu1 %v15422_v1  ;;  %v15466_v1 = vld [vmem:[%s19501_s9 + $0x24] ss:$16 sps:$4 sm:$0xff]  }
0x1454   :  { %8953 = vmatprep.subr.bf16.mxu0 %v15391_v29  ;;  %8994 = vmatprep.subr.bf16.mxu1 %v15430_v47  ;;  %v15475_v29 = vld [vmem:[#allocation10 + $0x70] sm:$0xff]  }
0x1455   :  { %v15467_v47 = vld [vmem:[%s19501_s9] ss:$16 sps:$4 sm:$0xff]  }
0x1457   :  { %8954 = vmatpush1.bf16.msra.mxu0 %v15389_v39  ;;  %8995 = vmatpush1.bf16.msra.mxu1 %v15428_v49  ;;  %v15473_v49 = vld [vmem:[%s19501_s9 + $0x1e4] ss:$16 sps:$4 sm:$0xff]  }
0x1458   :  { %8955 = vmatprep.subr.bf16.mxu0 %v15394_v42  ;;  %8996 = vmatprep.subr.bf16.mxu1 %v15436_v44  ;;  %v15446_v42 = vld [vmem:[%s19501_s9 + $0xe0] ss:$16 sps:$4 sm:$0xff]  }
0x1459   :  { %v15476_v44 = vld [vmem:[%s19501_s9 + $0x1c0] ss:$16 sps:$4 sm:$0xff]  }
0x145b   :  { %8956 = vmatpush1.bf16.msra.mxu0 %v15392_v38  ;;  %8997 = vmatpush1.bf16.msra.mxu1 %v15434_v5  ;;  %v15480_v5 = vld [vmem:[#allocation10 + $0x68] sm:$0xff]  }
0x145c   :  { %8957 = vmatprep.subr.bf16.mxu0 %v15397_v30  ;;  %8998 = vmatprep.subr.bf16.mxu1 %v15442_v14  ;;  %v15451_v30 = vld [vmem:[%s19501_s9 + $0xc4] ss:$16 sps:$4 sm:$0xff]   ;;  %v15484_v14 = vld [vmem:[#allocation10 + $0x28] sm:$0xff]  }
0x145f   :  { %8958 = vmatpush1.bf16.msra.mxu0 %v15395_v31  ;;  %8999 = vmatpush1.bf16.msra.mxu1 %v15440_v15  ;;  %v15479_v31 = vld [vmem:[#allocation10 + $0x30] sm:$0xff]   ;;  %v15485_v15 = vld [vmem:[#allocation10 + $0x60] sm:$0xff]  }
0x1460   :  { %8959 = vmatprep.subr.bf16.mxu0 %v15403_v26  ;;  %13896 = vmatprep.subr.bf16.mxu1 %v15470_v24  ;;  %v15449_v26 = vld [vmem:[%s19501_s9 + $0xc0] ss:$16 sps:$4 sm:$0xff]   ;;  %v15490_v24 = vld [vmem:[#allocation10 + $0x58] sm:$0xff]  }
0x1463   :  { %8960 = vmatpush2.bf16.msra.mxu0 %v15401_v36  ;;  %v15454_v36 = vld [vmem:[%s19501_s9 + $0xa4] ss:$16 sps:$4 sm:$0xff]  }
0x1464   :  { %8961 = vmatprep.subr.bf16.mxu0 %v15409_v25  ;;  %v15452_v25 = vld [vmem:[%s19501_s9 + $0xa0] ss:$16 sps:$4 sm:$0xff]  }
0x1467   :  { %8962 = vmatpush2.bf16.msra.mxu0 %v15407_v54  ;;  %v15457_v54 = vld [vmem:[%s19501_s9 + $0x84] ss:$16 sps:$4 sm:$0xff]  }
0x1468   :  { %8963 = vmatprep.subr.bf16.mxu0 %v15415_v17  ;;  %v15455_v17 = vld [vmem:[%s19501_s9 + $0x80] ss:$16 sps:$4 sm:$0xff]  }
0x146b   :  { %8964 = vmatpush2.bf16.msra.mxu0 %v15413_v37  ;;  %v15460_v37 = vld [vmem:[%s19501_s9 + $0x64] ss:$16 sps:$4 sm:$0xff]  }
0x146c   :  { %8965 = vmatprep.subr.bf16.mxu0 %v15421_v27  ;;  %v15458_v27 = vld [vmem:[%s19501_s9 + $0x60] ss:$16 sps:$4 sm:$0xff]  }
0x146f   :  { %8966 = vmatpush2.bf16.msra.mxu0 %v15419_v23  ;;  %v15463_v23 = vld [vmem:[%s19501_s9 + $0x44] ss:$16 sps:$4 sm:$0xff]  }
0x1470   :  { %8967 = vmatprep.subr.bf16.mxu0 %v15427_v0  ;;  %v15464_v0 = vld [vmem:[%s19501_s9 + $0x20] ss:$16 sps:$4 sm:$0xff]  }
0x1473   :  { %8968 = vmatpush2.bf16.msra.mxu0 %v15425_v46  ;;  %v15469_v46 = vld [vmem:[%s19501_s9 + $0x4] ss:$16 sps:$4 sm:$0xff]  }
0x1474   :  { %8969 = vmatprep.subr.bf16.mxu0 %v15433_v59  ;;  %v15471_v59 = vld [vmem:[%s19501_s9 + $0x1e0] ss:$16 sps:$4 sm:$0xff]  }
0x1477   :  { %8970 = vmatpush2.bf16.msra.mxu0 %v15431_v60  ;;  %v15478_v60 = vld [vmem:[%s19501_s9 + $0x1c4] ss:$16 sps:$4 sm:$0xff]  }
0x1478   :  { %8971 = vmatprep.subr.bf16.mxu0 %v15439_v10  ;;  %v15483_v10 = vld [vmem:[%s19501_s9 + $0x1a4] ss:$16 sps:$4 sm:$0xff]  }
0x147b   :  { %8972 = vmatpush2.bf16.msra.mxu0 %v15437_v11  ;;  %v15481_v11 = vld [vmem:[%s19501_s9 + $0x1a0] ss:$16 sps:$4 sm:$0xff]  }
0x147c   :  { %8973 = vmatprep.subr.bf16.mxu0 %v15445_v6  ;;  %v15488_v6 = vld [vmem:[%s19501_s9 + $0x184] ss:$16 sps:$4 sm:$0xff]  }
0x147f   :  { %8974 = vmatpush2.bf16.msra.mxu0 %v15443_v2  ;;  %v15486_v2 = vld [vmem:[%s19501_s9 + $0x180] ss:$16 sps:$4 sm:$0xff]  }
0x1480   :  { %9783 = vmatprep.subr.bf16.mxu0 %v15448_v57  ;;  %v15489_v57 = vld [vmem:[#allocation10 + $0x20] sm:$0xff]  }
0x1502   :  { %v8590_v19 = vpop.f32.mrf.mxu0  ;;  %v8631_v34 = vpop.f32.mrf.mxu1 }
0x1503   :  { %v8591_v61 = vadd.f32 %v8590_v19, %v8416_v48  ;;  %v8632_v52 = vadd.f32 %v8631_v34, %v8424_v3  ;;  %v15491_v48 = vld [vmem:[%s19501_s9 + $0x160] ss:$16 sps:$4 sm:$0xff]   ;;  %v15494_v3 = vld [vmem:[#allocation10 + $0x18] sm:$0xff]   ;;  %v15498_v19 = vld [vmem:[%s19501_s9 + $0x144] ss:$16 sps:$4 sm:$0xff]  }
0x1504   :  { %v8592_v33 = vpop.f32.mrf.mxu0  ;;  %v14078_v58 = vpop.f32.mrf.mxu1  ;;  %v15496_v34 = vld [vmem:[%s19501_s9 + $0x140] ss:$16 sps:$4 sm:$0xff]  }
0x1505   :  { %16222 = vtanh.f32 %v8591_v61  ;;  %v8593_v50 = vadd.f32 %v8592_v33, %v8420_v28  ;;  %v15495_v28 = vld [vmem:[#allocation10 + $0x50] sm:$0xff]  }
0x1506   :  { %16224 = vtanh.f32 %v8632_v52  ;;  %v8594_v45 = vpop.f32.mrf.mxu0  ;;  %v8634_v62 = vpop.f32.mrf.mxu1  ;;  %v15499_v61 = vld [vmem:[#allocation10 + $0x10] sm:$0xff]   ;;  %v15500_v52 = vld [vmem:[#allocation10 + $0x48] sm:$0xff]  }
0x1507   :  { %16226 = vtanh.f32 %v8593_v50  ;;  %v15503_v33 = vld [vmem:[%s19501_s9 + $0x124] ss:$16 sps:$4 sm:$0xff]   ;;  %v15501_v58 = vld [vmem:[%s19501_s9 + $0x120] ss:$16 sps:$4 sm:$0xff]   ;;  %v15504_v50 = vld [vmem:[#allocation10 + $0x8] sm:$0xff]  }
0x1508   :  { %v8595_v12 = vpop.f32.mrf.mxu0  ;;  %v14079_v40 = vpop.f32.mrf.mxu1  ;;  %v15505_v45 = vld [vmem:[#allocation10 + $0x40] sm:$0xff]  }
0x1509   :  { %v15508_v62 = vld [vmem:[%s19501_s9 + $0x104] ss:$16 sps:$4 sm:$0xff]   ;;  %v15506_v12 = vld [vmem:[%s19501_s9 + $0x100] ss:$16 sps:$4 sm:$0xff]  }
0x150a   :  { %v15509_v40 = vld [vmem:[#allocation10] sm:$0xff]  }
0x1512   :  { %v16223_v4 = vpop.eup %16222 }
0x1513   :  { %v16225_v18 = vpop.eup %16224  ;;  %v8640_v38 = vpack.c.bf16 %v16223_v4, %v16223_v4  ;;  %v15512_v4 = vld [vmem:[%s19501_s9 + $0x2e4] ss:$16 sps:$4 sm:$0xff]  }
0x1514   :  { %v16227_v16 = vpop.eup %16226  ;;  %v8642_v13 = vpack.c.bf16 %v16225_v18, %v16225_v18  ;;  %v15515_v18 = vld [vmem:[%s19501_s9 + $0x2ec] ss:$16 sps:$4 sm:$0xff]  }
0x1515   :  { %v8641_v39 = vpack.c.bf16 %v16227_v16, %v16227_v16 }
0x1516   :  { %9017 = vmatmul.mubr.bf16.vlgmr.msra.gmra.mxu1 %v8642_v13 }
0x1517   :  { %8975 = vmatprep.mubr.bf16.mxu0 %v8641_v39  ;;  %13897 = vmatpush3.bf16.msra.mxu1 %v15474_v9  ;;  %v8691_v9 = vld [vmem:[%s19505_s13] sm:$0x3] }
0x1518   :  { %8976 = vmatmul.mubr.bf16.vlgmr.msra.gmra.mxu0 %v8640_v38  ;;  %13898 = vmatprep.subr.bf16.mxu1 %v15475_v29  ;;  %v8696_v16 = vrot.slane %v8691_v9, %v19543_v22  ;;  %v8700_v29 = vrot.slane %v8691_v9, %v19544_v41  ;;  %v15561_v9 = vld [vmem:[%s19501_s9 + $0xc8] ss:$16 sps:$4 sm:$0xff]  }
0x1519   :  { %9784 = vmatpush1.bf16.msra.mxu0 %v15446_v42 }
0x151a   :  { %9785 = vmatprep.subr.bf16.mxu0 %v15451_v30 }
0x151b   :  { %13899 = vmatpush3.bf16.msra.mxu1 %v15479_v31 }
0x151c   :  { %13900 = vmatprep.subr.bf16.mxu1 %v15480_v5  ;;  %v15527_v5 = vld [vmem:[%s19501_s9 + $0x2ac] ss:$16 sps:$4 sm:$0xff]  }
0x151d   :  { %9786 = vmatpush1.bf16.msra.mxu0 %v15449_v26 }
0x151e   :  { %9787 = vmatprep.subr.bf16.mxu0 %v15454_v36 }
0x151f   :  { %13901 = vmatpush3.bf16.msra.mxu1 %v15484_v14  ;;  %v15530_v14 = vld [vmem:[%s19501_s9 + $0x284] ss:$16 sps:$4 sm:$0xff]  }
0x1520   :  { %13902 = vmatprep.subr.bf16.mxu1 %v15485_v15  ;;  %v15533_v15 = vld [vmem:[%s19501_s9 + $0x28c] ss:$16 sps:$4 sm:$0xff]  }
0x1521   :  { %9788 = vmatpush1.bf16.msra.mxu0 %v15452_v25 }
0x1522   :  { %9789 = vmatprep.subr.bf16.mxu0 %v15457_v54 }
0x1523   :  { %13903 = vmatpush3.bf16.msra.mxu1 %v15489_v57  ;;  %v15536_v57 = vld [vmem:[%s19501_s9 + $0x264] ss:$16 sps:$4 sm:$0xff]  }
0x1524   :  { %13904 = vmatprep.subr.bf16.mxu1 %v15490_v24  ;;  %v15539_v24 = vld [vmem:[%s19501_s9 + $0x26c] ss:$16 sps:$4 sm:$0xff]  }
0x1525   :  { %9790 = vmatpush1.bf16.msra.mxu0 %v15455_v17 }
0x1526   :  { %9791 = vmatprep.subr.bf16.mxu0 %v15460_v37 }
0x1527   :  { %13905 = vmatpush3.bf16.msra.mxu1 %v15494_v3  ;;  %v15542_v3 = vld [vmem:[%s19501_s9 + $0x244] ss:$16 sps:$4 sm:$0xff]  }
0x1528   :  { %13906 = vmatprep.subr.bf16.mxu1 %v15495_v28  ;;  %v15545_v28 = vld [vmem:[%s19501_s9 + $0x24c] ss:$16 sps:$4 sm:$0xff]  }
0x1529   :  { %9792 = vmatpush1.bf16.msra.mxu0 %v15458_v27 }
0x152a   :  { %9793 = vmatprep.subr.bf16.mxu0 %v15463_v23 }
0x152b   :  { %13907 = vmatpush3.bf16.msra.mxu1 %v15499_v61  ;;  %v15548_v61 = vld [vmem:[%s19501_s9 + $0x224] ss:$16 sps:$4 sm:$0xff]  }
0x152c   :  { %13908 = vmatprep.subr.bf16.mxu1 %v15500_v52  ;;  %v15551_v52 = vld [vmem:[%s19501_s9 + $0x22c] ss:$16 sps:$4 sm:$0xff]  }
0x152d   :  { %9794 = vmatpush1.bf16.msra.mxu0 %v15461_v8 }
0x152e   :  { %9795 = vmatprep.subr.bf16.mxu0 %v15466_v1  ;;  %v15510_v1 = vld [vmem:[%s19501_s9 + $0x2e0] ss:$16 sps:$4 sm:$0xff]  }
0x152f   :  { %13909 = vmatpush3.bf16.msra.mxu1 %v15504_v50  ;;  %v15554_v50 = vld [vmem:[%s19501_s9 + $0x204] ss:$16 sps:$4 sm:$0xff]  }
0x1530   :  { %13910 = vmatprep.subr.bf16.mxu1 %v15505_v45  ;;  %v15557_v45 = vld [vmem:[%s19501_s9 + $0x20c] ss:$16 sps:$4 sm:$0xff]  }
0x1531   :  { %9796 = vmatpush1.bf16.msra.mxu0 %v15464_v0  ;;  %v15513_v0 = vld [vmem:[%s19501_s9 + $0x2e8] ss:$16 sps:$4 sm:$0xff]  }
0x1532   :  { %9797 = vmatprep.subr.bf16.mxu0 %v15469_v46 }
0x1533   :  { %13911 = vmatpush3.bf16.msra.mxu1 %v15509_v40  ;;  %v15560_v40 = vld [vmem:[%s19501_s9 + $0xec] ss:$16 sps:$4 sm:$0xff]  }
0x1534   :  { %9824 = vmatprep.subr.bf16.mxu1 %v15512_v4  ;;  %v15558_v4 = vld [vmem:[%s19501_s9 + $0xe8] ss:$16 sps:$4 sm:$0xff]  }
0x1535   :  { %9798 = vmatpush1.bf16.msra.mxu0 %v15467_v47  ;;  %v15518_v47 = vld [vmem:[%s19501_s9 + $0x2c4] ss:$16 sps:$4 sm:$0xff]  }
0x1536   :  { %9799 = vmatprep.subr.bf16.mxu0 %v15473_v49  ;;  %v15521_v49 = vld [vmem:[%s19501_s9 + $0x2cc] ss:$16 sps:$4 sm:$0xff]  }
0x1539   :  { %9800 = vmatpush2.bf16.msra.mxu0 %v15471_v59  ;;  %v15516_v59 = vld [vmem:[%s19501_s9 + $0x2c0] ss:$16 sps:$4 sm:$0xff]  }
0x153a   :  { %9801 = vmatprep.subr.bf16.mxu0 %v15478_v60  ;;  %v15519_v60 = vld [vmem:[%s19501_s9 + $0x2c8] ss:$16 sps:$4 sm:$0xff]  }
0x153d   :  { %9802 = vmatpush2.bf16.msra.mxu0 %v15476_v44  ;;  %v15524_v44 = vld [vmem:[%s19501_s9 + $0x2a4] ss:$16 sps:$4 sm:$0xff]  }
0x153e   :  { %9803 = vmatprep.subr.bf16.mxu0 %v15483_v10  ;;  %v15522_v10 = vld [vmem:[%s19501_s9 + $0x2a0] ss:$16 sps:$4 sm:$0xff]  }
0x1541   :  { %9804 = vmatpush2.bf16.msra.mxu0 %v15481_v11  ;;  %v15525_v11 = vld [vmem:[%s19501_s9 + $0x2a8] ss:$16 sps:$4 sm:$0xff]  }
0x1542   :  { %9805 = vmatprep.subr.bf16.mxu0 %v15488_v6  ;;  %v15528_v6 = vld [vmem:[%s19501_s9 + $0x280] ss:$16 sps:$4 sm:$0xff]  }
0x1545   :  { %9806 = vmatpush2.bf16.msra.mxu0 %v15486_v2  ;;  %v15531_v2 = vld [vmem:[%s19501_s9 + $0x288] ss:$16 sps:$4 sm:$0xff]  }
0x1546   :  { %9807 = vmatprep.subr.bf16.mxu0 %v15493_v63  ;;  %v15534_v63 = vld [vmem:[%s19501_s9 + $0x260] ss:$16 sps:$4 sm:$0xff]  }
0x1549   :  { %9808 = vmatpush2.bf16.msra.mxu0 %v15491_v48  ;;  %v15537_v48 = vld [vmem:[%s19501_s9 + $0x268] ss:$16 sps:$4 sm:$0xff]  }
0x154a   :  { %9809 = vmatprep.subr.bf16.mxu0 %v15498_v19  ;;  %v15540_v19 = vld [vmem:[%s19501_s9 + $0x240] ss:$16 sps:$4 sm:$0xff]  }
0x154d   :  { %9810 = vmatpush2.bf16.msra.mxu0 %v15496_v34  ;;  %v15543_v34 = vld [vmem:[%s19501_s9 + $0x248] ss:$16 sps:$4 sm:$0xff]  }
0x154e   :  { %9811 = vmatprep.subr.bf16.mxu0 %v15503_v33  ;;  %v15546_v33 = vld [vmem:[%s19501_s9 + $0x220] ss:$16 sps:$4 sm:$0xff]  }
0x1551   :  { %9812 = vmatpush2.bf16.msra.mxu0 %v15501_v58  ;;  %v15549_v58 = vld [vmem:[%s19501_s9 + $0x228] ss:$16 sps:$4 sm:$0xff]  }
0x1552   :  { %9813 = vmatprep.subr.bf16.mxu0 %v15508_v62  ;;  %v15552_v62 = vld [vmem:[%s19501_s9 + $0x200] ss:$16 sps:$4 sm:$0xff]  }
0x1555   :  { %9814 = vmatpush2.bf16.msra.mxu0 %v15506_v12  ;;  %v15555_v12 = vld [vmem:[%s19501_s9 + $0x208] ss:$16 sps:$4 sm:$0xff]  }
0x1556   :  { %9906 = vmatprep.subr.bf16.mxu0 %v15515_v18  ;;  %v15563_v18 = vld [vmem:[%s19501_s9 + $0xcc] ss:$16 sps:$4 sm:$0xff]  }
0x15d6   :  { %v9018_v13 = vpop.f32.mrf.mxu1 }
0x15d8   :  { %v9020_v39 = vpop.f32.mrf.mxu1  ;;  %v8977_v42 = vpop.f32.mrf.mxu0 }
0x15d9   :  { %v8978_v38 = vadd.f32 %v8977_v42, %v8696_v16  ;;  %v15566_v16 = vld [vmem:[%s19501_s9 + $0xac] ss:$16 sps:$4 sm:$0xff]   ;;  %v15570_v42 = vld [vmem:[%s19501_s9 + $0x68] ss:$16 sps:$4 sm:$0xff]  }
0x15da   :  { %v9022_v30 = vpop.f32.mrf.mxu1  ;;  %v8979_v31 = vpop.f32.mrf.mxu0 }
0x15db   :  { %v9019_v26 = vadd.f32 %v9018_v13, %v8978_v38  ;;  %v8980_v36 = vadd.f32 %v8979_v31, %v8700_v29  ;;  %v15564_v13 = vld [vmem:[%s19501_s9 + $0xa8] ss:$16 sps:$4 sm:$0xff]   ;;  %v15575_v38 = vld [vmem:[%s19501_s9 + $0x4c] ss:$16 sps:$4 sm:$0xff]  }
0x15dc   :  { %v9023_v25 = vpop.f32.mrf.mxu1  ;;  %v8981_v54 = vpop.f32.mrf.mxu0  ;;  %v15567_v29 = vld [vmem:[%s19501_s9 + $0x88] ss:$16 sps:$4 sm:$0xff]   ;;  %v15578_v31 = vld [vmem:[%s19501_s9 + $0x2c] ss:$16 sps:$4 sm:$0xff]  }
0x15dd   :  { %v9021_v17 = vadd.f32 %v9020_v39, %v8980_v36  ;;  %16228 = vtanh.f32 %v9019_v26  ;;  %v15572_v39 = vld [vmem:[%s19501_s9 + $0x6c] ss:$16 sps:$4 sm:$0xff]   ;;  %v15573_v30 = vld [vmem:[%s19501_s9 + $0x48] ss:$16 sps:$4 sm:$0xff]  }
0x15de   :  { %v8982_v37 = vpop.f32.mrf.mxu0  ;;  %v15576_v26 = vld [vmem:[%s19501_s9 + $0x28] ss:$16 sps:$4 sm:$0xff]   ;;  %v15581_v36 = vld [vmem:[%s19501_s9 + $0xc] ss:$16 sps:$4 sm:$0xff]  }
0x15df   :  { %16230 = vtanh.f32 %v9021_v17  ;;  %v15579_v25 = vld [vmem:[%s19501_s9 + $0x8] ss:$16 sps:$4 sm:$0xff]   ;;  %v15584_v54 = vld [vmem:[%s19501_s9 + $0x1ec] ss:$16 sps:$4 sm:$0xff]  }
0x15e0   :  { %v15582_v17 = vld [vmem:[%s19501_s9 + $0x1e8] ss:$16 sps:$4 sm:$0xff]   ;;  %v15587_v37 = vld [vmem:[%s19501_s9 + $0x1cc] ss:$16 sps:$4 sm:$0xff]  }
0x15ea   :  { %v16229_v27 = vpop.eup %16228 }
0x15eb   :  { %v18907_v46 = vpack.c.bf16 %v16229_v27, %v16229_v27  ;;  %v15585_v27 = vld [vmem:[%s19501_s9 + $0x1c8] ss:$16 sps:$4 sm:$0xff]  }
0x15ec   :  { %v16231_v23 = vpop.eup %16230 }
0x15ed   :  { %v18899_v8 = vpack.c.bf16 %v16231_v23, %v16231_v23  ;;  %v15590_v23 = vld [vmem:[%s19501_s9 + $0x1ac] ss:$16 sps:$4 sm:$0xff]  }
0x15ef   :  { %9196 = vmatprep.mubr.bf16.mxu1 %v18899_v8  ;;  %9815 = vmatprep.mubr.bf16.mxu0 %v18899_v8 }
0x15f0   :  { %9197 = vmatmul.mubr.bf16.vlgmr.msra.gmra.mxu1 %v18907_v46  ;;  %9816 = vmatmul.mubr.bf16.vlgmr.msra.gmra.mxu0 %v18907_v46 }
0x15f1   :  { %9825 = vmatpush1.bf16.msra.mxu1 %v15510_v1  ;;  %9907 = vmatpush1.bf16.msra.mxu0 %v15513_v0  ;;  %v15593_v1 = vld [vmem:[%s19501_s9 + $0x18c] ss:$16 sps:$4 sm:$0xff]   ;;  %v15591_v0 = vld [vmem:[%s19501_s9 + $0x188] ss:$16 sps:$4 sm:$0xff]  }
0x15f2   :  { %9826 = vmatprep.subr.bf16.mxu1 %v15518_v47  ;;  %9908 = vmatprep.subr.bf16.mxu0 %v15521_v49  ;;  %v15596_v47 = vld [vmem:[%s19501_s9 + $0x16c] ss:$16 sps:$4 sm:$0xff]   ;;  %v15594_v49 = vld [vmem:[%s19501_s9 + $0x168] ss:$16 sps:$4 sm:$0xff]  }
0x15f3   :  { %9856 = vmatprep.mubr.bf16.mxu1 %v19533_v32  ;;  %9938 = vmatprep.mubr.bf16.mxu0 %v19533_v32 }
0x15f5   :  { %9827 = vmatpush1.bf16.msra.mxu1 %v15516_v59  ;;  %9909 = vmatpush1.bf16.msra.mxu0 %v15519_v60  ;;  %v15599_v59 = vld [vmem:[%s19501_s9 + $0x14c] ss:$16 sps:$4 sm:$0xff]   ;;  %v15597_v60 = vld [vmem:[%s19501_s9 + $0x148] ss:$16 sps:$4 sm:$0xff]  }
0x15f6   :  { %9828 = vmatprep.subr.bf16.mxu1 %v15524_v44  ;;  %9910 = vmatprep.subr.bf16.mxu0 %v15527_v5  ;;  %v15602_v44 = vld [vmem:[%s19501_s9 + $0x12c] ss:$16 sps:$4 sm:$0xff]   ;;  %v15600_v5 = vld [vmem:[%s19501_s9 + $0x128] ss:$16 sps:$4 sm:$0xff]  }
0x15f9   :  { %9829 = vmatpush1.bf16.msra.mxu1 %v15522_v10  ;;  %9911 = vmatpush1.bf16.msra.mxu0 %v15525_v11  ;;  %v15605_v10 = vld [vmem:[%s19501_s9 + $0x10c] ss:$16 sps:$4 sm:$0xff]   ;;  %v15603_v11 = vld [vmem:[%s19501_s9 + $0x108] ss:$16 sps:$4 sm:$0xff]  }
0x15fa   :  { %9830 = vmatprep.subr.bf16.mxu1 %v15530_v14  ;;  %9912 = vmatprep.subr.bf16.mxu0 %v15533_v15  ;;  %v15608_v14 = vld [vmem:[#allocation7 + $0xac] ss:$12 sps:$4 sm:$0xff]   ;;  %v15606_v15 = vld [vmem:[#allocation7 + $0xa8] ss:$12 sps:$4 sm:$0xff]  }
0x15fd   :  { %9831 = vmatpush1.bf16.msra.mxu1 %v15528_v6  ;;  %9913 = vmatpush1.bf16.msra.mxu0 %v15531_v2  ;;  %v15609_v6 = vld [vmem:[#allocation7 + $0xb0] ss:$12 sps:$4 sm:$0xff]   ;;  %v15612_v2 = vld [vmem:[#allocation7 + $0x94] ss:$12 sps:$4 sm:$0xff]  }
0x15fe   :  { %9832 = vmatprep.subr.bf16.mxu1 %v15536_v57  ;;  %9914 = vmatprep.subr.bf16.mxu0 %v15539_v24  ;;  %v15610_v57 = vld [vmem:[#allocation7 + $0x90] ss:$12 sps:$4 sm:$0xff]   ;;  %v15613_v24 = vld [vmem:[#allocation7 + $0x98] ss:$12 sps:$4 sm:$0xff]  }
0x1601   :  { %9833 = vmatpush1.bf16.msra.mxu1 %v15534_v63  ;;  %9915 = vmatpush1.bf16.msra.mxu0 %v15537_v48  ;;  %v15616_v63 = vld [vmem:[#allocation7 + $0x7c] ss:$12 sps:$4 sm:$0xff]   ;;  %v15617_v48 = vld [vmem:[#allocation7 + $0x80] ss:$12 sps:$4 sm:$0xff]  }
0x1602   :  { %9834 = vmatprep.subr.bf16.mxu1 %v15542_v3  ;;  %9916 = vmatprep.subr.bf16.mxu0 %v15545_v28  ;;  %v15620_v3 = vld [vmem:[#allocation7 + $0x64] ss:$12 sps:$4 sm:$0xff]   ;;  %v15618_v28 = vld [vmem:[#allocation7 + $0x60] ss:$12 sps:$4 sm:$0xff]  }
0x1605   :  { %9835 = vmatpush1.bf16.msra.mxu1 %v15540_v19  ;;  %9917 = vmatpush1.bf16.msra.mxu0 %v15543_v34  ;;  %v15621_v19 = vld [vmem:[#allocation7 + $0x68] ss:$12 sps:$4 sm:$0xff]  }
0x1606   :  { %9836 = vmatprep.subr.bf16.mxu1 %v15548_v61  ;;  %9918 = vmatprep.subr.bf16.mxu0 %v15551_v52  ;;  %v15622_v34 = vld [vmem:[#allocation7 + $0x48] ss:$12 sps:$4 sm:$0xff]   ;;  %v15624_v61 = vld [vmem:[#allocation7 + $0x4c] ss:$12 sps:$4 sm:$0xff]   ;;  %v15625_v52 = vld [vmem:[#allocation7 + $0x50] ss:$12 sps:$4 sm:$0xff]  }
0x1609   :  { %9837 = vmatpush1.bf16.msra.mxu1 %v15546_v33  ;;  %9919 = vmatpush1.bf16.msra.mxu0 %v15549_v58  ;;  %v15628_v33 = vld [vmem:[#allocation7 + $0x34] ss:$12 sps:$4 sm:$0xff]   ;;  %v15626_v58 = vld [vmem:[#allocation7 + $0x30] ss:$12 sps:$4 sm:$0xff]  }
0x160a   :  { %9838 = vmatprep.subr.bf16.mxu1 %v15554_v50  ;;  %9920 = vmatprep.subr.bf16.mxu0 %v15557_v45  ;;  %v15629_v50 = vld [vmem:[#allocation7 + $0x38] ss:$12 sps:$4 sm:$0xff]   ;;  %v15632_v45 = vld [vmem:[#allocation7 + $0x1c] ss:$12 sps:$4 sm:$0xff]  }
0x160d   :  { %9839 = vmatpush1.bf16.msra.mxu1 %v15552_v62  ;;  %9921 = vmatpush1.bf16.msra.mxu0 %v15555_v12 }
0x160e   :  { %9865 = vmatprep.subr.bf16.mxu1 %v15560_v40  ;;  %10153 = vmatprep.subr.bf16.mxu0 %v15608_v14  ;;  %v15630_v40 = vld [vmem:[#allocation7 + $0x18] ss:$12 sps:$4 sm:$0xff]  }
0x1610   :  { %9857 = vmatmul.mubr.bf16.vlgmr.msra.gmra.mxu1 %v18781_v35  ;;  %9939 = vmatmul.mubr.bf16.vlgmr.msra.gmra.mxu0 %v18781_v35  ;;  %v15569_v35 = vld [vmem:[%s19501_s9 + $0x8c] ss:$16 sps:$4 sm:$0xff]  }
0x1611   :  { %9866 = vmatpush1.bf16.msra.mxu1 %v15558_v4  ;;  %9897 = vmatprep.mubr.bf16.mxu1 %v18899_v8  ;;  %v15588_v8 = vld [vmem:[%s19501_s9 + $0x1a8] ss:$16 sps:$4 sm:$0xff]   ;;  %v15633_v4 = vld [vmem:[#allocation7 + $0x20] ss:$12 sps:$4 sm:$0xff]  }
0x1612   :  { %9867 = vmatprep.subr.bf16.mxu1 %v15563_v18  ;;  %10185 = vmatprep.mubr.bf16.mxu0 %v19533_v32  ;;  %v15636_v18 = vld [vmem:[#allocation7 + $0x4] ss:$12 sps:$4 sm:$0xff]  }
0x1613   :  { %10154 = vmatpush1.bf16.msra.mxu0 %v15606_v15 }
0x1614   :  { %10155 = vmatprep.subr.bf16.mxu0 %v15612_v2 }
0x1615   :  { %9868 = vmatpush1.bf16.msra.mxu1 %v15561_v9  ;;  %v13367_v9 = vld [vmem:[%s19507_s15] ss:$0 sm:$0xff] }
0x1616   :  { %9869 = vmatprep.subr.bf16.mxu1 %v15566_v16 }
0x1617   :  { %10156 = vmatpush1.bf16.msra.mxu0 %v15610_v57 }
0x1618   :  { %10157 = vmatprep.subr.bf16.mxu0 %v15616_v63 }
0x1619   :  { %9870 = vmatpush1.bf16.msra.mxu1 %v15564_v13 }
0x161a   :  { %9871 = vmatprep.subr.bf16.mxu1 %v15569_v35 }
0x161d   :  { %9872 = vmatpush1.bf16.msra.mxu1 %v15567_v29 }
0x161e   :  { %9873 = vmatprep.subr.bf16.mxu1 %v15572_v39 }
0x1621   :  { %9874 = vmatpush1.bf16.msra.mxu1 %v15570_v42  ;;  %v15634_v42 = vld [vmem:[#allocation7] ss:$12 sps:$4 sm:$0xff]  }
0x1622   :  { %9875 = vmatprep.subr.bf16.mxu1 %v15575_v38  ;;  %v15637_v38 = vld [vmem:[#allocation7 + $0x8] ss:$12 sps:$4 sm:$0xff]  }
0x1625   :  { %9876 = vmatpush1.bf16.msra.mxu1 %v15573_v30 }
0x1626   :  { %9877 = vmatprep.subr.bf16.mxu1 %v15578_v31 }
0x1629   :  { %9878 = vmatpush1.bf16.msra.mxu1 %v15576_v26 }
0x162a   :  { %9879 = vmatprep.subr.bf16.mxu1 %v15581_v36 }
0x162d   :  { %9880 = vmatpush1.bf16.msra.mxu1 %v15579_v25  ;;  %v15640_v25 = vld [vmem:[#allocation8 + $0x74] ss:$8 sps:$4 sm:$0xff]  }
0x162e   :  { %9881 = vmatprep.subr.bf16.mxu1 %v15584_v54 }
0x1631   :  { %9882 = vmatpush2.bf16.msra.mxu1 %v15582_v17 }
0x1632   :  { %9883 = vmatprep.subr.bf16.mxu1 %v15587_v37 }
0x1635   :  { %9884 = vmatpush2.bf16.msra.mxu1 %v15585_v27 }
0x1636   :  { %9885 = vmatprep.subr.bf16.mxu1 %v15590_v23 }
0x1639   :  { %9886 = vmatpush2.bf16.msra.mxu1 %v15588_v8 }
0x163a   :  { %9887 = vmatprep.subr.bf16.mxu1 %v15593_v1 }
0x163d   :  { %9888 = vmatpush2.bf16.msra.mxu1 %v15591_v0 }
0x163e   :  { %9889 = vmatprep.subr.bf16.mxu1 %v15596_v47  ;;  %v15664_v47 = vld [vmem:[#allocation8 + $0x174] ss:$8 sps:$4 sm:$0xff]  }
0x1641   :  { %9890 = vmatpush2.bf16.msra.mxu1 %v15594_v49 }
0x1642   :  { %9891 = vmatprep.subr.bf16.mxu1 %v15599_v59 }
0x1645   :  { %9892 = vmatpush2.bf16.msra.mxu1 %v15597_v60 }
0x1646   :  { %9893 = vmatprep.subr.bf16.mxu1 %v15602_v44 }
0x1649   :  { %9894 = vmatpush2.bf16.msra.mxu1 %v15600_v5 }
0x164a   :  { %9895 = vmatprep.subr.bf16.mxu1 %v15605_v10 }
0x164d   :  { %9896 = vmatpush2.bf16.msra.mxu1 %v15603_v11 }
0x164e   :  { %14080 = vmatprep.subr.bf16.mxu1 %v16469_v20 }
0x1650   :  { %9898 = vmatmul.mubr.bf16.vlgmr.msra.gmra.mxu1 %v18907_v46  ;;  %v15614_v46 = vld [vmem:[#allocation7 + $0x78] ss:$12 sps:$4 sm:$0xff]  }
0x1651   :  { %14096 = vmatprep.mubr.msk.bf16.mxu1 %vm16470_vm1, %v16469_v20  ;;  %14081 = vmatpush3.bf16.msra.mxu1 %v15609_v6 }
0x1652   :  { %14082 = vmatprep.subr.bf16.mxu1 %v16469_v20  ;;  %10158 = vmatpush1.bf16.msra.mxu0 %v15614_v46 }
0x1653   :  { %10159 = vmatprep.subr.bf16.mxu0 %v15620_v3 }
0x1655   :  { %14083 = vmatpush3.bf16.msra.mxu1 %v15613_v24 }
0x1656   :  { %14084 = vmatprep.subr.bf16.mxu1 %v16469_v20  ;;  %10160 = vmatpush1.bf16.msra.mxu0 %v15618_v28 }
0x1657   :  { %10161 = vmatprep.subr.bf16.mxu0 %v15624_v61 }
0x1659   :  { %14085 = vmatpush3.bf16.msra.mxu1 %v15617_v48 }
0x165a   :  { %14086 = vmatprep.subr.bf16.mxu1 %v16469_v20  ;;  %10162 = vmatpush1.bf16.msra.mxu0 %v15622_v34 }
0x165b   :  { %10163 = vmatprep.subr.bf16.mxu0 %v15628_v33 }
0x165d   :  { %14087 = vmatpush3.bf16.msra.mxu1 %v15621_v19 }
0x165e   :  { %14088 = vmatprep.subr.bf16.mxu1 %v16469_v20  ;;  %10164 = vmatpush1.bf16.msra.mxu0 %v15626_v58 }
0x165f   :  { %10165 = vmatprep.subr.bf16.mxu0 %v15632_v45 }
0x1661   :  { %14089 = vmatpush3.bf16.msra.mxu1 %v15625_v52 }
0x1662   :  { %14090 = vmatprep.subr.bf16.mxu1 %v16469_v20  ;;  %10166 = vmatpush1.bf16.msra.mxu0 %v15630_v40 }
0x1663   :  { %10167 = vmatprep.subr.bf16.mxu0 %v15636_v18  ;;  %v15662_v18 = vld [vmem:[#allocation8 + $0x170] ss:$8 sps:$4 sm:$0xff]  }
0x1665   :  { %14091 = vmatpush3.bf16.msra.mxu1 %v15629_v50 }
0x1666   :  { %14092 = vmatprep.subr.bf16.mxu1 %v16469_v20  ;;  %10168 = vmatpush1.bf16.msra.mxu0 %v15634_v42  ;;  %v15644_v42 = vld [vmem:[#allocation8 + $0x50] ss:$8 sps:$4 sm:$0xff]  }
0x1667   :  { %10540 = vmatprep.subr.bf16.mxu0 %v15640_v25  ;;  %v15680_v25 = vld [vmem:[#allocation8 + $0x140] ss:$8 sps:$4 sm:$0xff]  }
0x1669   :  { %14093 = vmatpush3.bf16.msra.mxu1 %v15633_v4  ;;  %v15638_v4 = vld [vmem:[#allocation8 + $0x70] ss:$8 sps:$4 sm:$0xff]  }
0x166a   :  { %14094 = vmatprep.subr.bf16.mxu1 %v16469_v20 }
0x166d   :  { %14095 = vmatpush3.bf16.msra.mxu1 %v15637_v38  ;;  %v15674_v38 = vld [vmem:[#allocation8 + $0x150] ss:$8 sps:$4 sm:$0xff]  }
0x166e   :  { %10581 = vmatprep.subr.bf16.mxu1 %v15664_v47  ;;  %v15667_v47 = vld [vmem:[#allocation8 + $0xf4] ss:$8 sps:$4 sm:$0xff]  }
0x16b0   :  { %v13912_v62 = vpop.f32.mrf.mxu1  ;;  %v9817_v12 = vpop.f32.mrf.mxu0 }
0x16b2   :  { %v13913_v16 = vpop.f32.mrf.mxu1  ;;  %v9819_v13 = vpop.f32.mrf.mxu0 }
0x16b3   :  { %v13914_v35 = vadd.f32 %v13913_v16, %v13912_v62  ;;  %v15643_v16 = vld [vmem:[#allocation8 + $0x64] ss:$8 sps:$4 sm:$0xff]  }
0x16b4   :  { %v13915_v29 = vpop.f32.mrf.mxu1  ;;  %v9821_v39 = vpop.f32.mrf.mxu0 }
0x16b5   :  { %v9199_v30 = vadd.f32 %v13914_v35, %v13367_v9  ;;  %v15668_v35 = vld [vmem:[#allocation8 + $0x160] ss:$8 sps:$4 sm:$0xff]   ;;  %v15646_v29 = vld [vmem:[#allocation8 + $0x54] ss:$8 sps:$4 sm:$0xff]  }
0x16b6   :  { %v13916_v31 = vpop.f32.mrf.mxu1  ;;  %v9822_v26 = vpop.f32.mrf.mxu0  ;;  %v15676_v39 = vld [vmem:[#allocation8 + $0x154] ss:$8 sps:$4 sm:$0xff]  }
0x16b7   :  { %v19114_v36 = vadd.f32 %v9199_v30, %v18767_v56  ;;  %v15649_v30 = vld [vmem:[#allocation8 + $0x44] ss:$8 sps:$4 sm:$0xff]   ;;  %v15647_v26 = vld [vmem:[#allocation8 + $0x40] ss:$8 sps:$4 sm:$0xff]  }
0x16b8   :  { %v15682_v31 = vld [vmem:[#allocation8 + $0x144] ss:$8 sps:$4 sm:$0xff]  }
0x16b9   :  { %13384 = vst [vmem:[%s19508_s16 + $0x20] sm:$0xff] %v19114_v36 }
0x16d0   :  { %v9858_v54 = vpop.f32.mrf.mxu1  ;;  %v9940_v17 = vpop.f32.mrf.mxu0 }
0x16d1   :  { %v9859_v49 = vadd.f32 %v9858_v54, %v9817_v12  ;;  %v15652_v54 = vld [vmem:[#allocation8 + $0x34] ss:$8 sps:$4 sm:$0xff]  }
0x16d2   :  { %v9860_v37 = vpop.f32.mrf.mxu1  ;;  %v9942_v27 = vpop.f32.mrf.mxu0 }
0x16d3   :  { %v9861_v56 = vadd.f32 %v9860_v37, %v9819_v13  ;;  %v9947_v60 = vadd.f32 %v9859_v49, %v17722_v53  ;;  %v15670_v13 = vld [vmem:[#allocation8 + $0x164] ss:$8 sps:$4 sm:$0xff]  }
0x16d4   :  { %v9862_v23 = vpop.f32.mrf.mxu1  ;;  %v9944_v8 = vpop.f32.mrf.mxu0  ;;  %v15655_v37 = vld [vmem:[#allocation8 + $0x24] ss:$8 sps:$4 sm:$0xff]  }
0x16d5   :  { %v9948_v59 = vadd.f32 %v9861_v56, %v17719_v21  ;;  %v13481_v5 = vmul.f32 -1.442695, %v9947_v60  ;;  %v15658_v23 = vld [vmem:[#allocation8 + $0x14] ss:$8 sps:$4 sm:$0xff]   ;;  %v15656_v8 = vld [vmem:[#allocation8 + $0x10] ss:$8 sps:$4 sm:$0xff]  }
0x16d6   :  { %v9863_v1 = vpop.f32.mrf.mxu1  ;;  %v9945_v0 = vpop.f32.mrf.mxu0  ;;  %v15665_v56 = vld [vmem:[#allocation8 + $0xf0] ss:$8 sps:$4 sm:$0xff]   ;;  %v15673_v49 = vld [vmem:[#allocation8 + $0xe4] ss:$8 sps:$4 sm:$0xff]   ;;  %v15679_v60 = vld [vmem:[#allocation8 + $0xd4] ss:$8 sps:$4 sm:$0xff]  }
0x16d7   :  { %v13482_v44 = vmul.f32 -1.442695, %v9948_v59  ;;  %v15661_v1 = vld [vmem:[#allocation8 + $0x4] ss:$8 sps:$4 sm:$0xff]   ;;  %v15659_v0 = vld [vmem:[#allocation8] ss:$8 sps:$4 sm:$0xff]  }
0x16d8   :  { %v15671_v59 = vld [vmem:[#allocation8 + $0xe0] ss:$8 sps:$4 sm:$0xff]  }
0x16d9   :  { %16232 = vpow2.f32 %v13482_v44  ;;  %v15677_v44 = vld [vmem:[#allocation8 + $0xd0] ss:$8 sps:$4 sm:$0xff]  }
0x16da   :  { %16234 = vpow2.f32 %v13481_v5  ;;  %v15685_v5 = vld [vmem:[#allocation8 + $0xc4] ss:$8 sps:$4 sm:$0xff]  }
0x16e6   :  { %v16233_v10 = vpop.eup %16232 }
0x16e7   :  { %v16235_v11 = vpop.eup %16234  ;;  %v9960_v14 = vadd.f32 1.0, %v16233_v10  ;;  %v15683_v10 = vld [vmem:[#allocation8 + $0xc0] ss:$8 sps:$4 sm:$0xff]  }
0x16e8   :  { %v9954_v15 = vadd.f32 1.0, %v16235_v11  ;;  %v15688_v11 = vld [vmem:[#allocation8 + $0x134] ss:$8 sps:$4 sm:$0xff]  }
0x16e9   :  { %16236 = vrcp.f32 %v9960_v14  ;;  %v15686_v14 = vld [vmem:[#allocation8 + $0x130] ss:$8 sps:$4 sm:$0xff]  }
0x16ea   :  { %16238 = vrcp.f32 %v9954_v15  ;;  %v15691_v15 = vld [vmem:[#allocation8 + $0xb4] ss:$8 sps:$4 sm:$0xff]  }
0x16f6   :  { %v16237_v19 = vpop.eup %16236 }
0x16f7   :  { %v16239_v34 = vpop.eup %16238  ;;  %v9970_v52 = vmul.f32 %v16237_v19, %v18778_v55  ;;  %v15641_v55 = vld [vmem:[#allocation8 + $0x60] ss:$8 sps:$4 sm:$0xff]   ;;  %v15706_v19 = vld [vmem:[#allocation8 + $0x104] ss:$8 sps:$4 sm:$0xff]  }
0x1710   :  { %v9899_v6 = vpop.f32.mrf.mxu1 }
0x1711   :  { %v9941_v2 = vadd.f32 %v9940_v17, %v9899_v6  ;;  %v15650_v17 = vld [vmem:[#allocation8 + $0x30] ss:$8 sps:$4 sm:$0xff]  }
0x1712   :  { %v9901_v57 = vpop.f32.mrf.mxu1  ;;  %v15689_v6 = vld [vmem:[#allocation8 + $0xb0] ss:$8 sps:$4 sm:$0xff]  }
0x1713   :  { %v9949_v24 = vadd.f32 %v9941_v2, %v17729_v43  ;;  %v9943_v63 = vadd.f32 %v9942_v27, %v9901_v57  ;;  %v15653_v27 = vld [vmem:[#allocation8 + $0x20] ss:$8 sps:$4 sm:$0xff]   ;;  %v15694_v2 = vld [vmem:[#allocation8 + $0x124] ss:$8 sps:$4 sm:$0xff]  }
0x1714   :  { %v9903_v46 = vpop.f32.mrf.mxu1  ;;  %v15692_v57 = vld [vmem:[#allocation8 + $0x120] ss:$8 sps:$4 sm:$0xff]  }
0x1715   :  { %16240 = vtanh.f32 %v9949_v24  ;;  %v9950_v48 = vadd.f32 %v9943_v63, %v17732_v7  ;;  %v15697_v24 = vld [vmem:[#allocation8 + $0xa4] ss:$8 sps:$4 sm:$0xff]   ;;  %v15695_v63 = vld [vmem:[#allocation8 + $0xa0] ss:$8 sps:$4 sm:$0xff]   ;;  %v15700_v46 = vld [vmem:[#allocation8 + $0x114] ss:$8 sps:$4 sm:$0xff]  }
0x1716   :  { %v9904_v3 = vpop.f32.mrf.mxu1 }
0x1717   :  { %v13483_v28 = vmul.f32 -1.442695, %v9950_v48  ;;  %v15698_v48 = vld [vmem:[#allocation8 + $0x110] ss:$8 sps:$4 sm:$0xff]   ;;  %v15703_v3 = vld [vmem:[#allocation8 + $0x94] ss:$8 sps:$4 sm:$0xff]  }
0x1719   :  { %16242 = vpow2.f32 %v13483_v28  ;;  %v15701_v28 = vld [vmem:[#allocation8 + $0x90] ss:$8 sps:$4 sm:$0xff]  }
0x1722   :  { %v16241_v61 = vpop.eup %16240 }
0x1723   :  { %v9971_v33 = vmul.f32 %v16241_v61, %v16239_v34  ;;  %v15704_v34 = vld [vmem:[#allocation8 + $0x100] ss:$8 sps:$4 sm:$0xff]   ;;  %v15709_v61 = vld [vmem:[#allocation8 + $0x84] ss:$8 sps:$4 sm:$0xff]  }
0x1725   :  { %v19125_v58 = vadd.f32 %v9971_v33, %v9970_v52  ;;  %v15707_v52 = vld [vmem:[#allocation8 + $0x80] ss:$8 sps:$4 sm:$0xff]   ;;  %v15712_v33 = vld [vmem:[%s19501_s9 + $0xe4] ss:$16 sps:$4 sm:$0xff]  }
0x1726   :  { %v16243_v50 = vpop.eup %16242 }
0x1727   :  { %v9967_v45 = vadd.f32 1.0, %v16243_v50  ;;  %16244 = vtanh.f32 %v19125_v58  ;;  %v15734_v50 = vld [vmem:[#allocation10 + $0x78] sm:$0xff]  }
0x1729   :  { %16246 = vrcp.f32 %v9967_v45  ;;  %v10008_v45 = vld [vmem:[%s19503_s11] sm:$0x7] }
0x1734   :  { %v16245_v62 = vpop.eup %16244 }
0x1736   :  { %v16247_v12 = vpop.eup %16246 }
0x1737   :  { %v9974_v40 = vmul.f32 %v16247_v12, %v16245_v62  ;;  %v10013_v62 = vrot.slane %v10008_v45, %v19543_v22  ;;  %v10021_v12 = vrot.slane %v10008_v45, %v19546_v51 }
0x1739   :  { %v19128_v9 = vpack.c.bf16 %v9974_v40, %v9974_v40  ;;  %v10017_v40 = vrot.slane %v10008_v45, %v19544_v41  ;;  %v15757_v45 = vld [vmem:[%s19501_s9 + $0x164] ss:$16 sps:$4 sm:$0xff]  }
0x173b   :  { %10186 = vmatmul.mubr.bf16.vlgmr.msra.gmra.mxu0 %v19128_v9  ;;  %14097 = vmatmul.mubr.bf16.vlgmr.msra.gmra.mxu1 %v19128_v9 }
0x173c   :  { %10541 = vmatpush1.bf16.msra.mxu0 %v15638_v4  ;;  %10582 = vmatpush1.bf16.msra.mxu1 %v15662_v18 }
0x173d   :  { %10542 = vmatprep.subr.bf16.mxu0 %v15643_v16  ;;  %10583 = vmatprep.subr.bf16.mxu1 %v15670_v13 }
0x173e   :  { %10613 = vmatprep.mubr.bf16.mxu1 %v19533_v32 }
0x1740   :  { %10543 = vmatpush1.bf16.msra.mxu0 %v15641_v55  ;;  %10584 = vmatpush1.bf16.msra.mxu1 %v15668_v35 }
0x1741   :  { %10544 = vmatprep.subr.bf16.mxu0 %v15646_v29  ;;  %10585 = vmatprep.subr.bf16.mxu1 %v15676_v39 }
0x1744   :  { %10545 = vmatpush1.bf16.msra.mxu0 %v15644_v42  ;;  %10586 = vmatpush1.bf16.msra.mxu1 %v15674_v38 }
0x1745   :  { %10546 = vmatprep.subr.bf16.mxu0 %v15649_v30  ;;  %10587 = vmatprep.subr.bf16.mxu1 %v15682_v31 }
0x1748   :  { %10547 = vmatpush1.bf16.msra.mxu0 %v15647_v26  ;;  %10588 = vmatpush1.bf16.msra.mxu1 %v15680_v25  ;;  %v15738_v25 = vld [vmem:[#allocation10 + $0x38] sm:$0xff]  }
0x1749   :  { %10548 = vmatprep.subr.bf16.mxu0 %v15652_v54  ;;  %10589 = vmatprep.subr.bf16.mxu1 %v15688_v11  ;;  %v15725_v11 = vld [vmem:[%s19501_s9 + $0x40] ss:$16 sps:$4 sm:$0xff]  }
0x174c   :  { %10549 = vmatpush1.bf16.msra.mxu0 %v15650_v17  ;;  %10590 = vmatpush1.bf16.msra.mxu1 %v15686_v14  ;;  %v15730_v14 = vld [vmem:[%s19501_s9 + $0x24] ss:$16 sps:$4 sm:$0xff]  }
0x174d   :  { %10550 = vmatprep.subr.bf16.mxu0 %v15655_v37  ;;  %10591 = vmatprep.subr.bf16.mxu1 %v15694_v2  ;;  %v15739_v37 = vld [vmem:[#allocation10 + $0x70] sm:$0xff]  }
0x174e   :  { %v15731_v2 = vld [vmem:[%s19501_s9] ss:$16 sps:$4 sm:$0xff]  }
0x1750   :  { %10551 = vmatpush1.bf16.msra.mxu0 %v15653_v27  ;;  %10592 = vmatpush1.bf16.msra.mxu1 %v15692_v57  ;;  %v15737_v57 = vld [vmem:[%s19501_s9 + $0x1e4] ss:$16 sps:$4 sm:$0xff]  }
0x1751   :  { %10552 = vmatprep.subr.bf16.mxu0 %v15658_v23  ;;  %10593 = vmatprep.subr.bf16.mxu1 %v15700_v46  ;;  %v15710_v23 = vld [vmem:[%s19501_s9 + $0xe0] ss:$16 sps:$4 sm:$0xff]  }
0x1752   :  { %v15740_v46 = vld [vmem:[%s19501_s9 + $0x1c0] ss:$16 sps:$4 sm:$0xff]  }
0x1754   :  { %10553 = vmatpush1.bf16.msra.mxu0 %v15656_v8  ;;  %10594 = vmatpush1.bf16.msra.mxu1 %v15698_v48  ;;  %v15744_v48 = vld [vmem:[#allocation10 + $0x68] sm:$0xff]  }
0x1755   :  { %10554 = vmatprep.subr.bf16.mxu0 %v15661_v1  ;;  %10595 = vmatprep.subr.bf16.mxu1 %v15706_v19  ;;  %v15715_v1 = vld [vmem:[%s19501_s9 + $0xc4] ss:$16 sps:$4 sm:$0xff]   ;;  %v15748_v19 = vld [vmem:[#allocation10 + $0x28] sm:$0xff]  }
0x1758   :  { %10555 = vmatpush1.bf16.msra.mxu0 %v15659_v0  ;;  %10596 = vmatpush1.bf16.msra.mxu1 %v15704_v34  ;;  %v15743_v0 = vld [vmem:[#allocation10 + $0x30] sm:$0xff]   ;;  %v15749_v34 = vld [vmem:[#allocation10 + $0x60] sm:$0xff]  }
0x1759   :  { %10556 = vmatprep.subr.bf16.mxu0 %v15667_v47  ;;  %13927 = vmatprep.subr.bf16.mxu1 %v15734_v50  ;;  %v15713_v47 = vld [vmem:[%s19501_s9 + $0xc0] ss:$16 sps:$4 sm:$0xff]   ;;  %v15754_v50 = vld [vmem:[#allocation10 + $0x58] sm:$0xff]  }
0x175c   :  { %10557 = vmatpush2.bf16.msra.mxu0 %v15665_v56  ;;  %v15718_v56 = vld [vmem:[%s19501_s9 + $0xa4] ss:$16 sps:$4 sm:$0xff]  }
0x175d   :  { %10558 = vmatprep.subr.bf16.mxu0 %v15673_v49  ;;  %v15716_v49 = vld [vmem:[%s19501_s9 + $0xa0] ss:$16 sps:$4 sm:$0xff]  }
0x1760   :  { %10559 = vmatpush2.bf16.msra.mxu0 %v15671_v59  ;;  %v15721_v59 = vld [vmem:[%s19501_s9 + $0x84] ss:$16 sps:$4 sm:$0xff]  }
0x1761   :  { %10560 = vmatprep.subr.bf16.mxu0 %v15679_v60  ;;  %v15719_v60 = vld [vmem:[%s19501_s9 + $0x80] ss:$16 sps:$4 sm:$0xff]  }
0x1764   :  { %10561 = vmatpush2.bf16.msra.mxu0 %v15677_v44  ;;  %v15724_v44 = vld [vmem:[%s19501_s9 + $0x64] ss:$16 sps:$4 sm:$0xff]  }
0x1765   :  { %10562 = vmatprep.subr.bf16.mxu0 %v15685_v5  ;;  %v15722_v5 = vld [vmem:[%s19501_s9 + $0x60] ss:$16 sps:$4 sm:$0xff]  }
0x1768   :  { %10563 = vmatpush2.bf16.msra.mxu0 %v15683_v10  ;;  %v15727_v10 = vld [vmem:[%s19501_s9 + $0x44] ss:$16 sps:$4 sm:$0xff]  }
0x1769   :  { %10564 = vmatprep.subr.bf16.mxu0 %v15691_v15  ;;  %v15728_v15 = vld [vmem:[%s19501_s9 + $0x20] ss:$16 sps:$4 sm:$0xff]  }
0x176c   :  { %10565 = vmatpush2.bf16.msra.mxu0 %v15689_v6  ;;  %v15733_v6 = vld [vmem:[%s19501_s9 + $0x4] ss:$16 sps:$4 sm:$0xff]  }
0x176d   :  { %10566 = vmatprep.subr.bf16.mxu0 %v15697_v24  ;;  %v15735_v24 = vld [vmem:[%s19501_s9 + $0x1e0] ss:$16 sps:$4 sm:$0xff]  }
0x1770   :  { %10567 = vmatpush2.bf16.msra.mxu0 %v15695_v63  ;;  %v15742_v63 = vld [vmem:[%s19501_s9 + $0x1c4] ss:$16 sps:$4 sm:$0xff]  }
0x1771   :  { %10568 = vmatprep.subr.bf16.mxu0 %v15703_v3  ;;  %v15747_v3 = vld [vmem:[%s19501_s9 + $0x1a4] ss:$16 sps:$4 sm:$0xff]  }
0x1774   :  { %10569 = vmatpush2.bf16.msra.mxu0 %v15701_v28  ;;  %v15745_v28 = vld [vmem:[%s19501_s9 + $0x1a0] ss:$16 sps:$4 sm:$0xff]  }
0x1775   :  { %10570 = vmatprep.subr.bf16.mxu0 %v15709_v61  ;;  %v15752_v61 = vld [vmem:[%s19501_s9 + $0x184] ss:$16 sps:$4 sm:$0xff]  }
0x1778   :  { %10571 = vmatpush2.bf16.msra.mxu0 %v15707_v52  ;;  %v15750_v52 = vld [vmem:[%s19501_s9 + $0x180] ss:$16 sps:$4 sm:$0xff]  }
0x1779   :  { %11380 = vmatprep.subr.bf16.mxu0 %v15712_v33  ;;  %v15753_v33 = vld [vmem:[#allocation10 + $0x20] sm:$0xff]  }
0x17fb   :  { %v10187_v4 = vpop.f32.mrf.mxu0  ;;  %v10228_v18 = vpop.f32.mrf.mxu1 }
0x17fc   :  { %v10188_v16 = vadd.f32 %v10187_v4, %v10013_v62  ;;  %v10229_v13 = vadd.f32 %v10228_v18, %v10021_v12  ;;  %v15755_v62 = vld [vmem:[%s19501_s9 + $0x160] ss:$16 sps:$4 sm:$0xff]   ;;  %v15758_v12 = vld [vmem:[#allocation10 + $0x18] sm:$0xff]   ;;  %v15762_v4 = vld [vmem:[%s19501_s9 + $0x144] ss:$16 sps:$4 sm:$0xff]  }
0x17fd   :  { %v10189_v55 = vpop.f32.mrf.mxu0  ;;  %v14098_v35 = vpop.f32.mrf.mxu1  ;;  %v15760_v18 = vld [vmem:[%s19501_s9 + $0x140] ss:$16 sps:$4 sm:$0xff]  }
0x17fe   :  { %16248 = vtanh.f32 %v10188_v16  ;;  %v10190_v29 = vadd.f32 %v10189_v55, %v10017_v40  ;;  %v15759_v40 = vld [vmem:[#allocation10 + $0x50] sm:$0xff]  }
0x17ff   :  { %16250 = vtanh.f32 %v10229_v13  ;;  %v10191_v39 = vpop.f32.mrf.mxu0  ;;  %v10231_v42 = vpop.f32.mrf.mxu1  ;;  %v15763_v16 = vld [vmem:[#allocation10 + $0x10] sm:$0xff]   ;;  %v15764_v13 = vld [vmem:[#allocation10 + $0x48] sm:$0xff]  }
0x1800   :  { %16252 = vtanh.f32 %v10190_v29  ;;  %v15767_v55 = vld [vmem:[%s19501_s9 + $0x124] ss:$16 sps:$4 sm:$0xff]   ;;  %v15765_v35 = vld [vmem:[%s19501_s9 + $0x120] ss:$16 sps:$4 sm:$0xff]   ;;  %v15768_v29 = vld [vmem:[#allocation10 + $0x8] sm:$0xff]  }
0x1801   :  { %v10192_v38 = vpop.f32.mrf.mxu0  ;;  %v14099_v30 = vpop.f32.mrf.mxu1  ;;  %v15769_v39 = vld [vmem:[#allocation10 + $0x40] sm:$0xff]  }
0x1802   :  { %v15772_v42 = vld [vmem:[%s19501_s9 + $0x104] ss:$16 sps:$4 sm:$0xff]   ;;  %v15770_v38 = vld [vmem:[%s19501_s9 + $0x100] ss:$16 sps:$4 sm:$0xff]  }
0x1803   :  { %v15773_v30 = vld [vmem:[#allocation10] sm:$0xff]  }
0x180b   :  { %v16249_v31 = vpop.eup %16248 }
0x180c   :  { %v16251_v26 = vpop.eup %16250  ;;  %v10237_v8 = vpack.c.bf16 %v16249_v31, %v16249_v31  ;;  %v15776_v31 = vld [vmem:[%s19501_s9 + $0x2e4] ss:$16 sps:$4 sm:$0xff]  }
0x180d   :  { %v16253_v54 = vpop.eup %16252  ;;  %v10239_v17 = vpack.c.bf16 %v16251_v26, %v16251_v26  ;;  %v15779_v26 = vld [vmem:[%s19501_s9 + $0x2ec] ss:$16 sps:$4 sm:$0xff]  }
0x180e   :  { %v10238_v27 = vpack.c.bf16 %v16253_v54, %v16253_v54 }
0x180f   :  { %10614 = vmatmul.mubr.bf16.vlgmr.msra.gmra.mxu1 %v10239_v17 }
0x1810   :  { %10572 = vmatprep.mubr.bf16.mxu0 %v10238_v27  ;;  %13928 = vmatpush3.bf16.msra.mxu1 %v15738_v25  ;;  %v10288_v25 = vld [vmem:[%s19505_s13] sm:$0x3] }
0x1811   :  { %10573 = vmatmul.mubr.bf16.vlgmr.msra.gmra.mxu0 %v10237_v8  ;;  %13929 = vmatprep.subr.bf16.mxu1 %v15739_v37  ;;  %v10293_v54 = vrot.slane %v10288_v25, %v19543_v22  ;;  %v10297_v37 = vrot.slane %v10288_v25, %v19544_v41  ;;  %v15825_v25 = vld [vmem:[%s19501_s9 + $0xc8] ss:$16 sps:$4 sm:$0xff]  }
0x1812   :  { %11381 = vmatpush1.bf16.msra.mxu0 %v15710_v23 }
0x1813   :  { %11382 = vmatprep.subr.bf16.mxu0 %v15715_v1 }
0x1814   :  { %13930 = vmatpush3.bf16.msra.mxu1 %v15743_v0 }
0x1815   :  { %13931 = vmatprep.subr.bf16.mxu1 %v15744_v48  ;;  %v15791_v48 = vld [vmem:[%s19501_s9 + $0x2ac] ss:$16 sps:$4 sm:$0xff]  }
0x1816   :  { %11383 = vmatpush1.bf16.msra.mxu0 %v15713_v47 }
0x1817   :  { %11384 = vmatprep.subr.bf16.mxu0 %v15718_v56 }
0x1818   :  { %13932 = vmatpush3.bf16.msra.mxu1 %v15748_v19  ;;  %v15794_v19 = vld [vmem:[%s19501_s9 + $0x284] ss:$16 sps:$4 sm:$0xff]  }
0x1819   :  { %13933 = vmatprep.subr.bf16.mxu1 %v15749_v34  ;;  %v15797_v34 = vld [vmem:[%s19501_s9 + $0x28c] ss:$16 sps:$4 sm:$0xff]  }
0x181a   :  { %11385 = vmatpush1.bf16.msra.mxu0 %v15716_v49 }
0x181b   :  { %11386 = vmatprep.subr.bf16.mxu0 %v15721_v59 }
0x181c   :  { %13934 = vmatpush3.bf16.msra.mxu1 %v15753_v33  ;;  %v15800_v33 = vld [vmem:[%s19501_s9 + $0x264] ss:$16 sps:$4 sm:$0xff]  }
0x181d   :  { %13935 = vmatprep.subr.bf16.mxu1 %v15754_v50  ;;  %v15803_v50 = vld [vmem:[%s19501_s9 + $0x26c] ss:$16 sps:$4 sm:$0xff]  }
0x181e   :  { %11387 = vmatpush1.bf16.msra.mxu0 %v15719_v60 }
0x181f   :  { %11388 = vmatprep.subr.bf16.mxu0 %v15724_v44 }
0x1820   :  { %13936 = vmatpush3.bf16.msra.mxu1 %v15758_v12  ;;  %v15806_v12 = vld [vmem:[%s19501_s9 + $0x244] ss:$16 sps:$4 sm:$0xff]  }
0x1821   :  { %13937 = vmatprep.subr.bf16.mxu1 %v15759_v40  ;;  %v15809_v40 = vld [vmem:[%s19501_s9 + $0x24c] ss:$16 sps:$4 sm:$0xff]  }
0x1822   :  { %11389 = vmatpush1.bf16.msra.mxu0 %v15722_v5 }
0x1823   :  { %11390 = vmatprep.subr.bf16.mxu0 %v15727_v10 }
0x1824   :  { %13938 = vmatpush3.bf16.msra.mxu1 %v15763_v16  ;;  %v15812_v16 = vld [vmem:[%s19501_s9 + $0x224] ss:$16 sps:$4 sm:$0xff]  }
0x1825   :  { %13939 = vmatprep.subr.bf16.mxu1 %v15764_v13  ;;  %v15815_v13 = vld [vmem:[%s19501_s9 + $0x22c] ss:$16 sps:$4 sm:$0xff]  }
0x1826   :  { %11391 = vmatpush1.bf16.msra.mxu0 %v15725_v11 }
0x1827   :  { %11392 = vmatprep.subr.bf16.mxu0 %v15730_v14  ;;  %v15774_v14 = vld [vmem:[%s19501_s9 + $0x2e0] ss:$16 sps:$4 sm:$0xff]  }
0x1828   :  { %13940 = vmatpush3.bf16.msra.mxu1 %v15768_v29  ;;  %v15818_v29 = vld [vmem:[%s19501_s9 + $0x204] ss:$16 sps:$4 sm:$0xff]  }
0x1829   :  { %13941 = vmatprep.subr.bf16.mxu1 %v15769_v39  ;;  %v15821_v39 = vld [vmem:[%s19501_s9 + $0x20c] ss:$16 sps:$4 sm:$0xff]  }
0x182a   :  { %11393 = vmatpush1.bf16.msra.mxu0 %v15728_v15  ;;  %v15777_v15 = vld [vmem:[%s19501_s9 + $0x2e8] ss:$16 sps:$4 sm:$0xff]  }
0x182b   :  { %11394 = vmatprep.subr.bf16.mxu0 %v15733_v6 }
0x182c   :  { %13942 = vmatpush3.bf16.msra.mxu1 %v15773_v30  ;;  %v15824_v30 = vld [vmem:[%s19501_s9 + $0xec] ss:$16 sps:$4 sm:$0xff]  }
0x182d   :  { %11421 = vmatprep.subr.bf16.mxu1 %v15776_v31  ;;  %v15822_v31 = vld [vmem:[%s19501_s9 + $0xe8] ss:$16 sps:$4 sm:$0xff]  }
0x182e   :  { %11395 = vmatpush1.bf16.msra.mxu0 %v15731_v2  ;;  %v15782_v2 = vld [vmem:[%s19501_s9 + $0x2c4] ss:$16 sps:$4 sm:$0xff]  }
0x182f   :  { %11396 = vmatprep.subr.bf16.mxu0 %v15737_v57  ;;  %v15785_v57 = vld [vmem:[%s19501_s9 + $0x2cc] ss:$16 sps:$4 sm:$0xff]  }
0x1832   :  { %11397 = vmatpush2.bf16.msra.mxu0 %v15735_v24  ;;  %v15780_v24 = vld [vmem:[%s19501_s9 + $0x2c0] ss:$16 sps:$4 sm:$0xff]  }
0x1833   :  { %11398 = vmatprep.subr.bf16.mxu0 %v15742_v63  ;;  %v15783_v63 = vld [vmem:[%s19501_s9 + $0x2c8] ss:$16 sps:$4 sm:$0xff]  }
0x1836   :  { %11399 = vmatpush2.bf16.msra.mxu0 %v15740_v46  ;;  %v15788_v46 = vld [vmem:[%s19501_s9 + $0x2a4] ss:$16 sps:$4 sm:$0xff]  }
0x1837   :  { %11400 = vmatprep.subr.bf16.mxu0 %v15747_v3  ;;  %v15786_v3 = vld [vmem:[%s19501_s9 + $0x2a0] ss:$16 sps:$4 sm:$0xff]  }
0x183a   :  { %11401 = vmatpush2.bf16.msra.mxu0 %v15745_v28  ;;  %v15789_v28 = vld [vmem:[%s19501_s9 + $0x2a8] ss:$16 sps:$4 sm:$0xff]  }
0x183b   :  { %11402 = vmatprep.subr.bf16.mxu0 %v15752_v61  ;;  %v15792_v61 = vld [vmem:[%s19501_s9 + $0x280] ss:$16 sps:$4 sm:$0xff]  }
0x183e   :  { %11403 = vmatpush2.bf16.msra.mxu0 %v15750_v52  ;;  %v15795_v52 = vld [vmem:[%s19501_s9 + $0x288] ss:$16 sps:$4 sm:$0xff]  }
0x183f   :  { %11404 = vmatprep.subr.bf16.mxu0 %v15757_v45  ;;  %v15798_v45 = vld [vmem:[%s19501_s9 + $0x260] ss:$16 sps:$4 sm:$0xff]  }
0x1842   :  { %11405 = vmatpush2.bf16.msra.mxu0 %v15755_v62  ;;  %v15801_v62 = vld [vmem:[%s19501_s9 + $0x268] ss:$16 sps:$4 sm:$0xff]  }
0x1843   :  { %11406 = vmatprep.subr.bf16.mxu0 %v15762_v4  ;;  %v15804_v4 = vld [vmem:[%s19501_s9 + $0x240] ss:$16 sps:$4 sm:$0xff]  }
0x1846   :  { %11407 = vmatpush2.bf16.msra.mxu0 %v15760_v18  ;;  %v15807_v18 = vld [vmem:[%s19501_s9 + $0x248] ss:$16 sps:$4 sm:$0xff]  }
0x1847   :  { %11408 = vmatprep.subr.bf16.mxu0 %v15767_v55  ;;  %v15810_v55 = vld [vmem:[%s19501_s9 + $0x220] ss:$16 sps:$4 sm:$0xff]  }
0x184a   :  { %11409 = vmatpush2.bf16.msra.mxu0 %v15765_v35  ;;  %v15813_v35 = vld [vmem:[%s19501_s9 + $0x228] ss:$16 sps:$4 sm:$0xff]  }
0x184b   :  { %11410 = vmatprep.subr.bf16.mxu0 %v15772_v42  ;;  %v15816_v42 = vld [vmem:[%s19501_s9 + $0x200] ss:$16 sps:$4 sm:$0xff]  }
0x184e   :  { %11411 = vmatpush2.bf16.msra.mxu0 %v15770_v38  ;;  %v15819_v38 = vld [vmem:[%s19501_s9 + $0x208] ss:$16 sps:$4 sm:$0xff]  }
0x184f   :  { %11503 = vmatprep.subr.bf16.mxu0 %v15779_v26  ;;  %v15827_v26 = vld [vmem:[%s19501_s9 + $0xcc] ss:$16 sps:$4 sm:$0xff]  }
0x18cf   :  { %v10615_v17 = vpop.f32.mrf.mxu1 }
0x18d1   :  { %v10617_v27 = vpop.f32.mrf.mxu1  ;;  %v10574_v23 = vpop.f32.mrf.mxu0 }
0x18d2   :  { %v10575_v8 = vadd.f32 %v10574_v23, %v10293_v54  ;;  %v15830_v54 = vld [vmem:[%s19501_s9 + $0xac] ss:$16 sps:$4 sm:$0xff]   ;;  %v15834_v23 = vld [vmem:[%s19501_s9 + $0x68] ss:$16 sps:$4 sm:$0xff]  }
0x18d3   :  { %v10619_v1 = vpop.f32.mrf.mxu1  ;;  %v10576_v0 = vpop.f32.mrf.mxu0 }
0x18d4   :  { %v10616_v47 = vadd.f32 %v10615_v17, %v10575_v8  ;;  %v10577_v56 = vadd.f32 %v10576_v0, %v10297_v37  ;;  %v15828_v17 = vld [vmem:[%s19501_s9 + $0xa8] ss:$16 sps:$4 sm:$0xff]   ;;  %v15839_v8 = vld [vmem:[%s19501_s9 + $0x4c] ss:$16 sps:$4 sm:$0xff]  }
0x18d5   :  { %v10620_v49 = vpop.f32.mrf.mxu1  ;;  %v10578_v59 = vpop.f32.mrf.mxu0  ;;  %v15831_v37 = vld [vmem:[%s19501_s9 + $0x88] ss:$16 sps:$4 sm:$0xff]   ;;  %v15842_v0 = vld [vmem:[%s19501_s9 + $0x2c] ss:$16 sps:$4 sm:$0xff]  }
0x18d6   :  { %v10618_v60 = vadd.f32 %v10617_v27, %v10577_v56  ;;  %16254 = vtanh.f32 %v10616_v47  ;;  %v15836_v27 = vld [vmem:[%s19501_s9 + $0x6c] ss:$16 sps:$4 sm:$0xff]   ;;  %v15837_v1 = vld [vmem:[%s19501_s9 + $0x48] ss:$16 sps:$4 sm:$0xff]  }
0x18d7   :  { %v10579_v44 = vpop.f32.mrf.mxu0  ;;  %v15840_v47 = vld [vmem:[%s19501_s9 + $0x28] ss:$16 sps:$4 sm:$0xff]   ;;  %v15845_v56 = vld [vmem:[%s19501_s9 + $0xc] ss:$16 sps:$4 sm:$0xff]  }
0x18d8   :  { %16256 = vtanh.f32 %v10618_v60  ;;  %v15843_v49 = vld [vmem:[%s19501_s9 + $0x8] ss:$16 sps:$4 sm:$0xff]   ;;  %v15848_v59 = vld [vmem:[%s19501_s9 + $0x1ec] ss:$16 sps:$4 sm:$0xff]  }
0x18d9   :  { %v15846_v60 = vld [vmem:[%s19501_s9 + $0x1e8] ss:$16 sps:$4 sm:$0xff]   ;;  %v15851_v44 = vld [vmem:[%s19501_s9 + $0x1cc] ss:$16 sps:$4 sm:$0xff]  }
0x18e3   :  { %v16255_v5 = vpop.eup %16254 }
0x18e4   :  { %v19254_v6 = vpack.c.bf16 %v16255_v5, %v16255_v5  ;;  %v15849_v5 = vld [vmem:[%s19501_s9 + $0x1c8] ss:$16 sps:$4 sm:$0xff]  }
0x18e5   :  { %v16257_v10 = vpop.eup %16256 }
0x18e6   :  { %v19246_v11 = vpack.c.bf16 %v16257_v10, %v16257_v10  ;;  %v15854_v10 = vld [vmem:[%s19501_s9 + $0x1ac] ss:$16 sps:$4 sm:$0xff]  }
0x18e8   :  { %10793 = vmatprep.mubr.bf16.mxu1 %v19246_v11  ;;  %11412 = vmatprep.mubr.bf16.mxu0 %v19246_v11 }
0x18e9   :  { %10794 = vmatmul.mubr.bf16.vlgmr.msra.gmra.mxu1 %v19254_v6  ;;  %11413 = vmatmul.mubr.bf16.vlgmr.msra.gmra.mxu0 %v19254_v6 }
0x18ea   :  { %11422 = vmatpush1.bf16.msra.mxu1 %v15774_v14  ;;  %11504 = vmatpush1.bf16.msra.mxu0 %v15777_v15  ;;  %v15857_v14 = vld [vmem:[%s19501_s9 + $0x18c] ss:$16 sps:$4 sm:$0xff]   ;;  %v15855_v15 = vld [vmem:[%s19501_s9 + $0x188] ss:$16 sps:$4 sm:$0xff]  }
0x18eb   :  { %11423 = vmatprep.subr.bf16.mxu1 %v15782_v2  ;;  %11505 = vmatprep.subr.bf16.mxu0 %v15785_v57  ;;  %v15860_v2 = vld [vmem:[%s19501_s9 + $0x16c] ss:$16 sps:$4 sm:$0xff]   ;;  %v15858_v57 = vld [vmem:[%s19501_s9 + $0x168] ss:$16 sps:$4 sm:$0xff]  }
0x18ec   :  { %11453 = vmatprep.mubr.bf16.mxu1 %v19533_v32  ;;  %11535 = vmatprep.mubr.bf16.mxu0 %v19533_v32 }
0x18ee   :  { %11424 = vmatpush1.bf16.msra.mxu1 %v15780_v24  ;;  %11506 = vmatpush1.bf16.msra.mxu0 %v15783_v63  ;;  %v15863_v24 = vld [vmem:[%s19501_s9 + $0x14c] ss:$16 sps:$4 sm:$0xff]   ;;  %v15861_v63 = vld [vmem:[%s19501_s9 + $0x148] ss:$16 sps:$4 sm:$0xff]  }
0x18ef   :  { %11425 = vmatprep.subr.bf16.mxu1 %v15788_v46  ;;  %11507 = vmatprep.subr.bf16.mxu0 %v15791_v48  ;;  %v15866_v46 = vld [vmem:[%s19501_s9 + $0x12c] ss:$16 sps:$4 sm:$0xff]   ;;  %v15864_v48 = vld [vmem:[%s19501_s9 + $0x128] ss:$16 sps:$4 sm:$0xff]  }
0x18f2   :  { %11426 = vmatpush1.bf16.msra.mxu1 %v15786_v3  ;;  %11508 = vmatpush1.bf16.msra.mxu0 %v15789_v28  ;;  %v15869_v3 = vld [vmem:[%s19501_s9 + $0x10c] ss:$16 sps:$4 sm:$0xff]   ;;  %v15867_v28 = vld [vmem:[%s19501_s9 + $0x108] ss:$16 sps:$4 sm:$0xff]  }
0x18f3   :  { %11427 = vmatprep.subr.bf16.mxu1 %v15794_v19  ;;  %11509 = vmatprep.subr.bf16.mxu0 %v15797_v34  ;;  %v15872_v19 = vld [vmem:[#allocation7 + $0xac] ss:$12 sps:$4 sm:$0xff]   ;;  %v15870_v34 = vld [vmem:[#allocation7 + $0xa8] ss:$12 sps:$4 sm:$0xff]  }
0x18f6   :  { %11428 = vmatpush1.bf16.msra.mxu1 %v15792_v61  ;;  %11510 = vmatpush1.bf16.msra.mxu0 %v15795_v52  ;;  %v15873_v61 = vld [vmem:[#allocation7 + $0xb0] ss:$12 sps:$4 sm:$0xff]   ;;  %v15876_v52 = vld [vmem:[#allocation7 + $0x94] ss:$12 sps:$4 sm:$0xff]  }
0x18f7   :  { %11429 = vmatprep.subr.bf16.mxu1 %v15800_v33  ;;  %11511 = vmatprep.subr.bf16.mxu0 %v15803_v50  ;;  %v15874_v33 = vld [vmem:[#allocation7 + $0x90] ss:$12 sps:$4 sm:$0xff]   ;;  %v15877_v50 = vld [vmem:[#allocation7 + $0x98] ss:$12 sps:$4 sm:$0xff]  }
0x18fa   :  { %11430 = vmatpush1.bf16.msra.mxu1 %v15798_v45  ;;  %11512 = vmatpush1.bf16.msra.mxu0 %v15801_v62  ;;  %v15880_v45 = vld [vmem:[#allocation7 + $0x7c] ss:$12 sps:$4 sm:$0xff]   ;;  %v15881_v62 = vld [vmem:[#allocation7 + $0x80] ss:$12 sps:$4 sm:$0xff]  }
0x18fb   :  { %11431 = vmatprep.subr.bf16.mxu1 %v15806_v12  ;;  %11513 = vmatprep.subr.bf16.mxu0 %v15809_v40  ;;  %v15884_v12 = vld [vmem:[#allocation7 + $0x64] ss:$12 sps:$4 sm:$0xff]   ;;  %v15882_v40 = vld [vmem:[#allocation7 + $0x60] ss:$12 sps:$4 sm:$0xff]  }
0x18fe   :  { %11432 = vmatpush1.bf16.msra.mxu1 %v15804_v4  ;;  %11514 = vmatpush1.bf16.msra.mxu0 %v15807_v18  ;;  %v15885_v4 = vld [vmem:[#allocation7 + $0x68] ss:$12 sps:$4 sm:$0xff]  }
0x18ff   :  { %11433 = vmatprep.subr.bf16.mxu1 %v15812_v16  ;;  %11515 = vmatprep.subr.bf16.mxu0 %v15815_v13  ;;  %v15886_v18 = vld [vmem:[#allocation7 + $0x48] ss:$12 sps:$4 sm:$0xff]   ;;  %v15888_v16 = vld [vmem:[#allocation7 + $0x4c] ss:$12 sps:$4 sm:$0xff]   ;;  %v15889_v13 = vld [vmem:[#allocation7 + $0x50] ss:$12 sps:$4 sm:$0xff]  }
0x1902   :  { %11434 = vmatpush1.bf16.msra.mxu1 %v15810_v55  ;;  %11516 = vmatpush1.bf16.msra.mxu0 %v15813_v35  ;;  %v15892_v55 = vld [vmem:[#allocation7 + $0x34] ss:$12 sps:$4 sm:$0xff]   ;;  %v15890_v35 = vld [vmem:[#allocation7 + $0x30] ss:$12 sps:$4 sm:$0xff]  }
0x1903   :  { %11435 = vmatprep.subr.bf16.mxu1 %v15818_v29  ;;  %11517 = vmatprep.subr.bf16.mxu0 %v15821_v39  ;;  %v15893_v29 = vld [vmem:[#allocation7 + $0x38] ss:$12 sps:$4 sm:$0xff]   ;;  %v15896_v39 = vld [vmem:[#allocation7 + $0x1c] ss:$12 sps:$4 sm:$0xff]  }
0x1906   :  { %11436 = vmatpush1.bf16.msra.mxu1 %v15816_v42  ;;  %11518 = vmatpush1.bf16.msra.mxu0 %v15819_v38 }
0x1907   :  { %11462 = vmatprep.subr.bf16.mxu1 %v15824_v30  ;;  %11750 = vmatprep.subr.bf16.mxu0 %v15872_v19  ;;  %v15894_v30 = vld [vmem:[#allocation7 + $0x18] ss:$12 sps:$4 sm:$0xff]  }
0x1909   :  { %11454 = vmatmul.mubr.bf16.vlgmr.msra.gmra.mxu1 %v19128_v9  ;;  %11536 = vmatmul.mubr.bf16.vlgmr.msra.gmra.mxu0 %v19128_v9  ;;  %v15833_v9 = vld [vmem:[%s19501_s9 + $0x8c] ss:$16 sps:$4 sm:$0xff]  }
0x190a   :  { %11463 = vmatpush1.bf16.msra.mxu1 %v15822_v31  ;;  %11494 = vmatprep.mubr.bf16.mxu1 %v19246_v11  ;;  %v15852_v11 = vld [vmem:[%s19501_s9 + $0x1a8] ss:$16 sps:$4 sm:$0xff]   ;;  %v15897_v31 = vld [vmem:[#allocation7 + $0x20] ss:$12 sps:$4 sm:$0xff]  }
0x190b   :  { %11464 = vmatprep.subr.bf16.mxu1 %v15827_v26  ;;  %11782 = vmatprep.mubr.bf16.mxu0 %v19533_v32  ;;  %v15900_v26 = vld [vmem:[#allocation7 + $0x4] ss:$12 sps:$4 sm:$0xff]  }
0x190c   :  { %11751 = vmatpush1.bf16.msra.mxu0 %v15870_v34 }
0x190d   :  { %11752 = vmatprep.subr.bf16.mxu0 %v15876_v52 }
0x190e   :  { %11465 = vmatpush1.bf16.msra.mxu1 %v15825_v25  ;;  %v19459_v25 = vld [vmem:[%s19507_s15] ss:$0 sm:$0xff] }
0x190f   :  { %11466 = vmatprep.subr.bf16.mxu1 %v15830_v54 }
0x1910   :  { %11753 = vmatpush1.bf16.msra.mxu0 %v15874_v33 }
0x1911   :  { %11754 = vmatprep.subr.bf16.mxu0 %v15880_v45 }
0x1912   :  { %11467 = vmatpush1.bf16.msra.mxu1 %v15828_v17 }
0x1913   :  { %11468 = vmatprep.subr.bf16.mxu1 %v15833_v9 }
0x1916   :  { %11469 = vmatpush1.bf16.msra.mxu1 %v15831_v37 }
0x1917   :  { %11470 = vmatprep.subr.bf16.mxu1 %v15836_v27 }
0x191a   :  { %11471 = vmatpush1.bf16.msra.mxu1 %v15834_v23  ;;  %v15898_v23 = vld [vmem:[#allocation7] ss:$12 sps:$4 sm:$0xff]  }
0x191b   :  { %11472 = vmatprep.subr.bf16.mxu1 %v15839_v8  ;;  %v15901_v8 = vld [vmem:[#allocation7 + $0x8] ss:$12 sps:$4 sm:$0xff]  }
0x191e   :  { %11473 = vmatpush1.bf16.msra.mxu1 %v15837_v1 }
0x191f   :  { %11474 = vmatprep.subr.bf16.mxu1 %v15842_v0 }
0x1922   :  { %11475 = vmatpush1.bf16.msra.mxu1 %v15840_v47 }
0x1923   :  { %11476 = vmatprep.subr.bf16.mxu1 %v15845_v56 }
0x1926   :  { %11477 = vmatpush1.bf16.msra.mxu1 %v15843_v49  ;;  %v15904_v49 = vld [vmem:[#allocation8 + $0x74] ss:$8 sps:$4 sm:$0xff]  }
0x1927   :  { %11478 = vmatprep.subr.bf16.mxu1 %v15848_v59 }
0x192a   :  { %11479 = vmatpush2.bf16.msra.mxu1 %v15846_v60 }
0x192b   :  { %11480 = vmatprep.subr.bf16.mxu1 %v15851_v44 }
0x192e   :  { %11481 = vmatpush2.bf16.msra.mxu1 %v15849_v5 }
0x192f   :  { %11482 = vmatprep.subr.bf16.mxu1 %v15854_v10 }
0x1932   :  { %11483 = vmatpush2.bf16.msra.mxu1 %v15852_v11 }
0x1933   :  { %11484 = vmatprep.subr.bf16.mxu1 %v15857_v14 }
0x1936   :  { %11485 = vmatpush2.bf16.msra.mxu1 %v15855_v15  ;;  %v15928_v15 = vld [vmem:[#allocation8 + $0x174] ss:$8 sps:$4 sm:$0xff]  }
0x1937   :  { %11486 = vmatprep.subr.bf16.mxu1 %v15860_v2 }
0x193a   :  { %11487 = vmatpush2.bf16.msra.mxu1 %v15858_v57 }
0x193b   :  { %11488 = vmatprep.subr.bf16.mxu1 %v15863_v24 }
0x193e   :  { %11489 = vmatpush2.bf16.msra.mxu1 %v15861_v63 }
0x193f   :  { %11490 = vmatprep.subr.bf16.mxu1 %v15866_v46 }
0x1942   :  { %11491 = vmatpush2.bf16.msra.mxu1 %v15864_v48 }
0x1943   :  { %11492 = vmatprep.subr.bf16.mxu1 %v15869_v3 }
0x1946   :  { %11493 = vmatpush2.bf16.msra.mxu1 %v15867_v28 }
0x1947   :  { %14100 = vmatprep.subr.bf16.mxu1 %v16469_v20 }
0x1949   :  { %11495 = vmatmul.mubr.bf16.vlgmr.msra.gmra.mxu1 %v19254_v6  ;;  %v15878_v6 = vld [vmem:[#allocation7 + $0x78] ss:$12 sps:$4 sm:$0xff]  }
0x194a   :  { %14116 = vmatprep.mubr.msk.bf16.mxu1 %vm16470_vm1, %v16469_v20  ;;  %14101 = vmatpush3.bf16.msra.mxu1 %v15873_v61 }
0x194b   :  { %14102 = vmatprep.subr.bf16.mxu1 %v16469_v20  ;;  %11755 = vmatpush1.bf16.msra.mxu0 %v15878_v6 }
0x194c   :  { %11756 = vmatprep.subr.bf16.mxu0 %v15884_v12 }
0x194e   :  { %14103 = vmatpush3.bf16.msra.mxu1 %v15877_v50 }
0x194f   :  { %14104 = vmatprep.subr.bf16.mxu1 %v16469_v20  ;;  %11757 = vmatpush1.bf16.msra.mxu0 %v15882_v40 }
0x1950   :  { %11758 = vmatprep.subr.bf16.mxu0 %v15888_v16 }
0x1952   :  { %14105 = vmatpush3.bf16.msra.mxu1 %v15881_v62 }
0x1953   :  { %14106 = vmatprep.subr.bf16.mxu1 %v16469_v20  ;;  %11759 = vmatpush1.bf16.msra.mxu0 %v15886_v18 }
0x1954   :  { %11760 = vmatprep.subr.bf16.mxu0 %v15892_v55 }
0x1956   :  { %14107 = vmatpush3.bf16.msra.mxu1 %v15885_v4 }
0x1957   :  { %14108 = vmatprep.subr.bf16.mxu1 %v16469_v20  ;;  %11761 = vmatpush1.bf16.msra.mxu0 %v15890_v35 }
0x1958   :  { %11762 = vmatprep.subr.bf16.mxu0 %v15896_v39  ;;  %v15902_v39 = vld [vmem:[#allocation8 + $0x70] ss:$8 sps:$4 sm:$0xff]  }
0x195a   :  { %14109 = vmatpush3.bf16.msra.mxu1 %v15889_v13 }
0x195b   :  { %14110 = vmatprep.subr.bf16.mxu1 %v16469_v20  ;;  %11763 = vmatpush1.bf16.msra.mxu0 %v15894_v30  ;;  %v15934_v30 = vld [vmem:[#allocation8 + $0x164] ss:$8 sps:$4 sm:$0xff]  }
0x195c   :  { %11764 = vmatprep.subr.bf16.mxu0 %v15900_v26  ;;  %v15910_v26 = vld [vmem:[#allocation8 + $0x54] ss:$8 sps:$4 sm:$0xff]  }
0x195e   :  { %14111 = vmatpush3.bf16.msra.mxu1 %v15893_v29 }
0x195f   :  { %14112 = vmatprep.subr.bf16.mxu1 %v16469_v20  ;;  %11765 = vmatpush1.bf16.msra.mxu0 %v15898_v23  ;;  %v15911_v23 = vld [vmem:[#allocation8 + $0x40] ss:$8 sps:$4 sm:$0xff]  }
0x1960   :  { %12137 = vmatprep.subr.bf16.mxu0 %v15904_v49  ;;  %v15922_v49 = vld [vmem:[#allocation8 + $0x14] ss:$8 sps:$4 sm:$0xff]  }
0x1962   :  { %14113 = vmatpush3.bf16.msra.mxu1 %v15897_v31  ;;  %v15905_v31 = vld [vmem:[#allocation8 + $0x60] ss:$8 sps:$4 sm:$0xff]  }
0x1963   :  { %14114 = vmatprep.subr.bf16.mxu1 %v16469_v20 }
0x1966   :  { %14115 = vmatpush3.bf16.msra.mxu1 %v15901_v8  ;;  %v15944_v8 = vld [vmem:[#allocation8 + $0x140] ss:$8 sps:$4 sm:$0xff]  }
0x1967   :  { %12178 = vmatprep.subr.bf16.mxu1 %v15928_v15  ;;  %v15941_v15 = vld [vmem:[#allocation8 + $0xd0] ss:$8 sps:$4 sm:$0xff]  }
0x19a9   :  { %v13943_v42 = vpop.f32.mrf.mxu1  ;;  %v11414_v38 = vpop.f32.mrf.mxu0 }
0x19ab   :  { %v13944_v54 = vpop.f32.mrf.mxu1  ;;  %v11416_v17 = vpop.f32.mrf.mxu0 }
0x19ac   :  { %v13945_v9 = vadd.f32 %v13944_v54, %v13943_v42  ;;  %v15926_v42 = vld [vmem:[#allocation8 + $0x170] ss:$8 sps:$4 sm:$0xff]   ;;  %v15940_v54 = vld [vmem:[#allocation8 + $0x154] ss:$8 sps:$4 sm:$0xff]  }
0x19ad   :  { %v13946_v37 = vpop.f32.mrf.mxu1  ;;  %v11418_v27 = vpop.f32.mrf.mxu0 }
0x19ae   :  { %v10796_v1 = vadd.f32 %v13945_v9, %v19459_v25  ;;  %v15938_v9 = vld [vmem:[#allocation8 + $0x150] ss:$8 sps:$4 sm:$0xff]   ;;  %v15913_v37 = vld [vmem:[#allocation8 + $0x44] ss:$8 sps:$4 sm:$0xff]  }
0x19af   :  { %v13947_v0 = vpop.f32.mrf.mxu1  ;;  %v11419_v47 = vpop.f32.mrf.mxu0  ;;  %v15946_v27 = vld [vmem:[#allocation8 + $0x144] ss:$8 sps:$4 sm:$0xff]  }
0x19b0   :  { %v19464_v56 = vadd.f32 %v10796_v1, %v19114_v36  ;;  %v15916_v1 = vld [vmem:[#allocation8 + $0x34] ss:$8 sps:$4 sm:$0xff]   ;;  %v15914_v0 = vld [vmem:[#allocation8 + $0x30] ss:$8 sps:$4 sm:$0xff]   ;;  %v15917_v47 = vld [vmem:[#allocation8 + $0x20] ss:$8 sps:$4 sm:$0xff]  }
0x19b2   :  { %13573 = vst [vmem:[%s19508_s16 + $0x28] sm:$0xff] %v19464_v56 }
0x19c9   :  { %v11455_v59 = vpop.f32.mrf.mxu1  ;;  %v11537_v60 = vpop.f32.mrf.mxu0 }
0x19ca   :  { %v11456_v2 = vadd.f32 %v11455_v59, %v11414_v38  ;;  %v15907_v38 = vld [vmem:[#allocation8 + $0x64] ss:$8 sps:$4 sm:$0xff]   ;;  %v15920_v59 = vld [vmem:[#allocation8 + $0x10] ss:$8 sps:$4 sm:$0xff]  }
0x19cb   :  { %v11457_v44 = vpop.f32.mrf.mxu1  ;;  %v11539_v5 = vpop.f32.mrf.mxu0 }
0x19cc   :  { %v11458_v36 = vadd.f32 %v11457_v44, %v11416_v17  ;;  %v11544_v24 = vadd.f32 %v11456_v2, %v17722_v53  ;;  %v15908_v17 = vld [vmem:[#allocation8 + $0x50] ss:$8 sps:$4 sm:$0xff]   ;;  %v15923_v44 = vld [vmem:[#allocation8] ss:$8 sps:$4 sm:$0xff]  }
0x19cd   :  { %v11459_v10 = vpop.f32.mrf.mxu1  ;;  %v11541_v20 = vpop.f32.mrf.mxu0  ;;  %v15947_v2 = vld [vmem:[#allocation8 + $0xc0] ss:$8 sps:$4 sm:$0xff]  }
0x19ce   :  { %v11545_v57 = vadd.f32 %v11458_v36, %v17719_v21  ;;  %v13670_v46 = vmul.f32 -1.442695, %v11544_v24  ;;  %v15929_v10 = vld [vmem:[#allocation8 + $0xf0] ss:$8 sps:$4 sm:$0xff]   ;;  %v15937_v20 = vld [vmem:[#allocation8 + $0xe4] ss:$8 sps:$4 sm:$0xff]  }
0x19cf   :  { %v11460_v11 = vpop.f32.mrf.mxu1  ;;  %v11542_v14 = vpop.f32.mrf.mxu0  ;;  %v15949_v36 = vld [vmem:[#allocation8 + $0xc4] ss:$8 sps:$4 sm:$0xff]   ;;  %v15950_v24 = vld [vmem:[#allocation8 + $0x130] ss:$8 sps:$4 sm:$0xff]  }
0x19d0   :  { %v13671_v63 = vmul.f32 -1.442695, %v11545_v57  ;;  %v15935_v11 = vld [vmem:[#allocation8 + $0xe0] ss:$8 sps:$4 sm:$0xff]   ;;  %v15943_v14 = vld [vmem:[#allocation8 + $0xd4] ss:$8 sps:$4 sm:$0xff]  }
0x19d1   :  { %v15952_v57 = vld [vmem:[#allocation8 + $0x134] ss:$8 sps:$4 sm:$0xff]  }
0x19d2   :  { %16258 = vpow2.f32 %v13671_v63  ;;  %v15955_v63 = vld [vmem:[#allocation8 + $0xb4] ss:$8 sps:$4 sm:$0xff]  }
0x19d3   :  { %16260 = vpow2.f32 %v13670_v46  ;;  %v15953_v46 = vld [vmem:[#allocation8 + $0xb0] ss:$8 sps:$4 sm:$0xff]  }
0x19df   :  { %v16259_v48 = vpop.eup %16258 }
0x19e0   :  { %v16261_v3 = vpop.eup %16260  ;;  %v11557_v28 = vadd.f32 1.0, %v16259_v48  ;;  %v15958_v48 = vld [vmem:[#allocation8 + $0x124] ss:$8 sps:$4 sm:$0xff]  }
0x19e1   :  { %v11551_v19 = vadd.f32 1.0, %v16261_v3  ;;  %v15956_v3 = vld [vmem:[#allocation8 + $0x120] ss:$8 sps:$4 sm:$0xff]  }
0x19e2   :  { %16262 = vrcp.f32 %v11557_v28  ;;  %v15961_v28 = vld [vmem:[#allocation8 + $0xa4] ss:$8 sps:$4 sm:$0xff]  }
0x19e3   :  { %16264 = vrcp.f32 %v11551_v19  ;;  %v15959_v19 = vld [vmem:[#allocation8 + $0xa0] ss:$8 sps:$4 sm:$0xff]  }
0x19ef   :  { %v16263_v62 = vpop.eup %16262 }
0x19f0   :  { %v16265_v12 = vpop.eup %16264  ;;  %v11567_v4 = vmul.f32 %v16263_v62, %v19125_v58  ;;  %v15932_v58 = vld [vmem:[#allocation8 + $0x160] ss:$8 sps:$4 sm:$0xff]  }
0x19f1   :  { %v11605_v62 = vld [vmem:[%s19503_s11] sm:$0x7] }
0x1a09   :  { %v11496_v34 = vpop.f32.mrf.mxu1 }
0x1a0a   :  { %v11538_v61 = vadd.f32 %v11537_v60, %v11496_v34  ;;  %v15925_v60 = vld [vmem:[#allocation8 + $0x4] ss:$8 sps:$4 sm:$0xff]   ;;  %v15964_v34 = vld [vmem:[#allocation8 + $0x114] ss:$8 sps:$4 sm:$0xff]  }
0x1a0b   :  { %v11498_v52 = vpop.f32.mrf.mxu1 }
0x1a0c   :  { %v11546_v33 = vadd.f32 %v11538_v61, %v17729_v43  ;;  %v11540_v50 = vadd.f32 %v11539_v5, %v11498_v52  ;;  %v15931_v5 = vld [vmem:[#allocation8 + $0xf4] ss:$8 sps:$4 sm:$0xff]   ;;  %v15962_v61 = vld [vmem:[#allocation8 + $0x110] ss:$8 sps:$4 sm:$0xff]  }
0x1a0d   :  { %v11500_v45 = vpop.f32.mrf.mxu1  ;;  %v15967_v52 = vld [vmem:[#allocation8 + $0x94] ss:$8 sps:$4 sm:$0xff]  }
0x1a0e   :  { %16266 = vtanh.f32 %v11546_v33  ;;  %v11547_v21 = vadd.f32 %v11540_v50, %v17732_v7  ;;  %v15965_v33 = vld [vmem:[#allocation8 + $0x90] ss:$8 sps:$4 sm:$0xff]   ;;  %v15970_v50 = vld [vmem:[#allocation8 + $0x104] ss:$8 sps:$4 sm:$0xff]   ;;  %v15968_v45 = vld [vmem:[#allocation8 + $0x100] ss:$8 sps:$4 sm:$0xff]  }
0x1a0f   :  { %v11501_v53 = vpop.f32.mrf.mxu1 }
0x1a10   :  { %v13672_v6 = vmul.f32 -1.442695, %v11547_v21  ;;  %v15973_v21 = vld [vmem:[#allocation8 + $0x84] ss:$8 sps:$4 sm:$0xff]   ;;  %v15971_v53 = vld [vmem:[#allocation8 + $0x80] ss:$8 sps:$4 sm:$0xff]  }
0x1a12   :  { %16268 = vpow2.f32 %v13672_v6  ;;  %v15974_v6 = vld [vmem:[#allocation10 + $0x78] sm:$0xff]  }
0x1a1b   :  { %v16267_v40 = vpop.eup %16266 }
0x1a1c   :  { %v11568_v18 = vmul.f32 %v16267_v40, %v16265_v12  ;;  %v11610_v12 = vrot.slane %v11605_v62, %v19543_v22  ;;  %v11618_v40 = vrot.slane %v11605_v62, %v19546_v51 }
0x1a1e   :  { %v11569_v16 = vadd.f32 %v11568_v18, %v11567_v4  ;;  %v11614_v4 = vrot.slane %v11605_v62, %v19544_v41 }
0x1a1f   :  { %v16269_v13 = vpop.eup %16268 }
0x1a20   :  { %v11564_v55 = vadd.f32 1.0, %v16269_v13  ;;  %16270 = vtanh.f32 %v11569_v16 }
0x1a22   :  { %16272 = vrcp.f32 %v11564_v55 }
0x1a2d   :  { %v16271_v43 = vpop.eup %16270 }
0x1a2f   :  { %v16273_v35 = vpop.eup %16272 }
0x1a30   :  { %v11571_v29 = vmul.f32 %v16273_v35, %v16271_v43 }
0x1a32   :  { %v11572_v7 = vpack.c.bf16 %v11571_v29, %v11571_v29 }
0x1a34   :  { %11783 = vmatmul.mubr.bf16.vlgmr.msra.gmra.mxu0 %v11572_v7  ;;  %14117 = vmatmul.mubr.bf16.vlgmr.msra.gmra.mxu1 %v11572_v7 }
0x1a35   :  { %12138 = vmatpush1.bf16.msra.mxu0 %v15902_v39  ;;  %12179 = vmatpush1.bf16.msra.mxu1 %v15926_v42 }
0x1a36   :  { %12139 = vmatprep.subr.bf16.mxu0 %v15907_v38  ;;  %12180 = vmatprep.subr.bf16.mxu1 %v15934_v30 }
0x1a37   :  { %12210 = vmatprep.mubr.bf16.mxu1 %v19533_v32  ;;  %v15919_v32 = vld [vmem:[#allocation8 + $0x24] ss:$8 sps:$4 sm:$0xff]  }
0x1a39   :  { %12140 = vmatpush1.bf16.msra.mxu0 %v15905_v31  ;;  %12181 = vmatpush1.bf16.msra.mxu1 %v15932_v58  ;;  %v15975_v58 = vld [vmem:[#allocation10 + $0x38] sm:$0xff]  }
0x1a3a   :  { %12141 = vmatprep.subr.bf16.mxu0 %v15910_v26  ;;  %12182 = vmatprep.subr.bf16.mxu1 %v15940_v54  ;;  %v15976_v54 = vld [vmem:[#allocation10 + $0x70] sm:$0xff]  }
0x1a3d   :  { %12142 = vmatpush1.bf16.msra.mxu0 %v15908_v17  ;;  %12183 = vmatpush1.bf16.msra.mxu1 %v15938_v9 }
0x1a3e   :  { %12143 = vmatprep.subr.bf16.mxu0 %v15913_v37  ;;  %12184 = vmatprep.subr.bf16.mxu1 %v15946_v27  ;;  %v15977_v37 = vld [vmem:[#allocation10 + $0x30] sm:$0xff]   ;;  %v15978_v27 = vld [vmem:[#allocation10 + $0x68] sm:$0xff]  }
0x1a41   :  { %12144 = vmatpush1.bf16.msra.mxu0 %v15911_v23  ;;  %12185 = vmatpush1.bf16.msra.mxu1 %v15944_v8  ;;  %v15979_v23 = vld [vmem:[#allocation10 + $0x28] sm:$0xff]   ;;  %v15980_v8 = vld [vmem:[#allocation10 + $0x60] sm:$0xff]  }
0x1a42   :  { %12145 = vmatprep.subr.bf16.mxu0 %v15916_v1  ;;  %12186 = vmatprep.subr.bf16.mxu1 %v15952_v57  ;;  %v15981_v1 = vld [vmem:[#allocation10 + $0x20] sm:$0xff]  }
0x1a45   :  { %12146 = vmatpush1.bf16.msra.mxu0 %v15914_v0  ;;  %12187 = vmatpush1.bf16.msra.mxu1 %v15950_v24  ;;  %v15982_v0 = vld [vmem:[#allocation10 + $0x58] sm:$0xff]  }
0x1a46   :  { %12147 = vmatprep.subr.bf16.mxu0 %v15919_v32  ;;  %12188 = vmatprep.subr.bf16.mxu1 %v15958_v48  ;;  %v15983_v32 = vld [vmem:[#allocation10 + $0x18] sm:$0xff]  }
0x1a49   :  { %12148 = vmatpush1.bf16.msra.mxu0 %v15917_v47  ;;  %12189 = vmatpush1.bf16.msra.mxu1 %v15956_v3  ;;  %v15984_v47 = vld [vmem:[#allocation10 + $0x50] sm:$0xff]  }
0x1a4a   :  { %12149 = vmatprep.subr.bf16.mxu0 %v15922_v49  ;;  %12190 = vmatprep.subr.bf16.mxu1 %v15964_v34  ;;  %v15985_v49 = vld [vmem:[#allocation10 + $0x10] sm:$0xff]  }
0x1a4d   :  { %12150 = vmatpush1.bf16.msra.mxu0 %v15920_v59  ;;  %12191 = vmatpush1.bf16.msra.mxu1 %v15962_v61  ;;  %v15986_v59 = vld [vmem:[#allocation10 + $0x48] sm:$0xff]  }
0x1a4e   :  { %12151 = vmatprep.subr.bf16.mxu0 %v15925_v60  ;;  %12192 = vmatprep.subr.bf16.mxu1 %v15970_v50  ;;  %v15987_v60 = vld [vmem:[#allocation10 + $0x8] sm:$0xff]  }
0x1a51   :  { %12152 = vmatpush1.bf16.msra.mxu0 %v15923_v44  ;;  %12193 = vmatpush1.bf16.msra.mxu1 %v15968_v45  ;;  %v15988_v44 = vld [vmem:[#allocation10 + $0x40] sm:$0xff]  }
0x1a52   :  { %12153 = vmatprep.subr.bf16.mxu0 %v15931_v5  ;;  %13958 = vmatprep.subr.bf16.mxu1 %v15974_v6  ;;  %v15989_v5 = vld [vmem:[#allocation10] sm:$0xff]  }
0x1a55   :  { %12154 = vmatpush2.bf16.msra.mxu0 %v15929_v10  ;;  %v11885_v10 = vld [vmem:[%s19505_s13] sm:$0x3] }
0x1a56   :  { %12155 = vmatprep.subr.bf16.mxu0 %v15937_v20  ;;  %v11890_v20 = vrot.slane %v11885_v10, %v19543_v22 }
0x1a59   :  { %12156 = vmatpush2.bf16.msra.mxu0 %v15935_v11 }
0x1a5a   :  { %12157 = vmatprep.subr.bf16.mxu0 %v15943_v14  ;;  %v11894_v14 = vrot.slane %v11885_v10, %v19544_v41 }
0x1a5d   :  { %12158 = vmatpush2.bf16.msra.mxu0 %v15941_v15 }
0x1a5e   :  { %12159 = vmatprep.subr.bf16.mxu0 %v15949_v36 }
0x1a61   :  { %12160 = vmatpush2.bf16.msra.mxu0 %v15947_v2 }
0x1a62   :  { %12161 = vmatprep.subr.bf16.mxu0 %v15955_v63 }
0x1a65   :  { %12162 = vmatpush2.bf16.msra.mxu0 %v15953_v46 }
0x1a66   :  { %12163 = vmatprep.subr.bf16.mxu0 %v15961_v28 }
0x1a69   :  { %12164 = vmatpush2.bf16.msra.mxu0 %v15959_v19 }
0x1a6a   :  { %12165 = vmatprep.subr.bf16.mxu0 %v15967_v52 }
0x1a6d   :  { %12166 = vmatpush2.bf16.msra.mxu0 %v15965_v33 }
0x1a6e   :  { %12167 = vmatprep.subr.bf16.mxu0 %v15973_v21 }
0x1a71   :  { %12168 = vmatpush2.bf16.msra.mxu0 %v15971_v53 }
0x1af4   :  { %v11784_v18 = vpop.f32.mrf.mxu0  ;;  %v11825_v16 = vpop.f32.mrf.mxu1 }
0x1af5   :  { %v11785_v13 = vadd.f32 %v11784_v18, %v11610_v12  ;;  %v11826_v55 = vadd.f32 %v11825_v16, %v11618_v40 }
0x1af6   :  { %v11786_v43 = vpop.f32.mrf.mxu0  ;;  %v14118_v35 = vpop.f32.mrf.mxu1 }
0x1af7   :  { %16274 = vtanh.f32 %v11785_v13  ;;  %v11787_v29 = vadd.f32 %v11786_v43, %v11614_v4 }
0x1af8   :  { %16276 = vtanh.f32 %v11826_v55  ;;  %v11788_v39 = vpop.f32.mrf.mxu0  ;;  %v11828_v42 = vpop.f32.mrf.mxu1 }
0x1af9   :  { %16278 = vtanh.f32 %v11787_v29 }
0x1afa   :  { %v11789_v7 = vpop.f32.mrf.mxu0  ;;  %v14119_v38 = vpop.f32.mrf.mxu1 }
0x1b04   :  { %v16275_v30 = vpop.eup %16274 }
0x1b05   :  { %v16277_v31 = vpop.eup %16276  ;;  %v11834_v9 = vpack.c.bf16 %v16275_v30, %v16275_v30 }
0x1b06   :  { %v16279_v51 = vpop.eup %16278  ;;  %v11836_v26 = vpack.c.bf16 %v16277_v31, %v16277_v31 }
0x1b07   :  { %v11835_v17 = vpack.c.bf16 %v16279_v51, %v16279_v51 }
0x1b08   :  { %12211 = vmatmul.mubr.bf16.vlgmr.msra.gmra.mxu1 %v11836_v26 }
0x1b09   :  { %12169 = vmatprep.mubr.bf16.mxu0 %v11835_v17  ;;  %13959 = vmatpush3.bf16.msra.mxu1 %v15975_v58 }
0x1b0a   :  { %12170 = vmatmul.mubr.bf16.vlgmr.msra.gmra.mxu0 %v11834_v9  ;;  %13960 = vmatprep.subr.bf16.mxu1 %v15976_v54 }
0x1b0d   :  { %13961 = vmatpush3.bf16.msra.mxu1 %v15977_v37 }
0x1b0e   :  { %13962 = vmatprep.subr.bf16.mxu1 %v15978_v27 }
0x1b11   :  { %13963 = vmatpush3.bf16.msra.mxu1 %v15979_v23 }
0x1b12   :  { %13964 = vmatprep.subr.bf16.mxu1 %v15980_v8 }
0x1b15   :  { %13965 = vmatpush3.bf16.msra.mxu1 %v15981_v1 }
0x1b16   :  { %13966 = vmatprep.subr.bf16.mxu1 %v15982_v0 }
0x1b19   :  { %13967 = vmatpush3.bf16.msra.mxu1 %v15983_v32 }
0x1b1a   :  { %13968 = vmatprep.subr.bf16.mxu1 %v15984_v47 }
0x1b1d   :  { %13969 = vmatpush3.bf16.msra.mxu1 %v15985_v49 }
0x1b1e   :  { %13970 = vmatprep.subr.bf16.mxu1 %v15986_v59 }
0x1b21   :  { %13971 = vmatpush3.bf16.msra.mxu1 %v15987_v60 }
0x1b22   :  { %13972 = vmatprep.subr.bf16.mxu1 %v15988_v44 }
0x1b25   :  { %13973 = vmatpush3.bf16.msra.mxu1 %v15989_v5 }
0x1bc8   :  { %v12212_v11 = vpop.f32.mrf.mxu1 }
0x1bca   :  { %v12214_v15 = vpop.f32.mrf.mxu1  ;;  %v12171_v36 = vpop.f32.mrf.mxu0 }
0x1bcb   :  { %v12172_v2 = vadd.f32 %v12171_v36, %v11890_v20 }
0x1bcc   :  { %v12216_v57 = vpop.f32.mrf.mxu1  ;;  %v12173_v24 = vpop.f32.mrf.mxu0 }
0x1bcd   :  { %v12213_v63 = vadd.f32 %v12212_v11, %v12172_v2  ;;  %v12174_v46 = vadd.f32 %v12173_v24, %v11894_v14 }
0x1bce   :  { %v12217_v48 = vpop.f32.mrf.mxu1  ;;  %v12175_v3 = vpop.f32.mrf.mxu0 }
0x1bcf   :  { %v12215_v28 = vadd.f32 %v12214_v15, %v12174_v46  ;;  %16280 = vtanh.f32 %v12213_v63 }
0x1bd0   :  { %v12176_v19 = vpop.f32.mrf.mxu0 }
0x1bd1   :  { %16282 = vtanh.f32 %v12215_v28 }
0x1bdc   :  { %v16281_v34 = vpop.eup %16280 }
0x1bdd   :  { %v12221_v22 = vpack.c.bf16 %v16281_v34, %v16281_v34 }
0x1bde   :  { %v16283_v61 = vpop.eup %16282 }
0x1bdf   :  { %v12222_v52 = vpack.c.bf16 %v16283_v61, %v16283_v61 }
0x1be1   :  { %12390 = vmatprep.mubr.bf16.mxu1 %v12222_v52 }
0x1be2   :  { %12391 = vmatmul.mubr.bf16.vlgmr.msra.gmra.mxu1 %v12221_v22 }
0x1ca2   :  { %v13974_v41 = vpop.f32.mrf.mxu1 }
0x1ca4   :  { %v13975_v33 = vpop.f32.mrf.mxu1 }
0x1ca5   :  { %v13976_v50 = vadd.f32 %v13975_v33, %v13974_v41 }
0x1ca6   :  { %v13977_v45 = vpop.f32.mrf.mxu1 }
0x1ca7   :  { %v12393_v21 = vadd.f32 %v13976_v50, %v19459_v25 }
0x1ca8   :  { %v13978_v53 = vpop.f32.mrf.mxu1 }
0x1ca9   :  { %v12398_v6 = vadd.f32 %v12393_v21, %v19464_v56 }
0x1cab   :  { %13762 = vst [vmem:[%s19508_s16 + $0x30] sm:$0xff] %v12398_v6 }
0x1cac   :  { %12405 = vsyncpa [#allocation4], 1 }
0x1cad   :  { %12406 = vsyncpa [#allocation6], 1 }
0x1cae   :  { %12407 = vsyncpa [#allocation9], 1 }

</bundles_post_ra>
